<compile_context>
chip_gen: v6e
topology: v6e:2x2x1
jax: 0.10.0
libtpu: 0.0.40
codegen_flags: <defaults>
</compile_context>

<pallas_src>
import functools

import jax
import jax.numpy as jnp
from jax.experimental import pallas as pl
from jax.experimental.pallas import tpu as pltpu


def _rdb_kernel(x_ref, wd_ref, bd_ref, wlff_ref, blff_ref, o_ref,
                feat_ref, acc_ref, *, H, W, Cin, growth, num_layers, Ctot):
    """Fused RDB forward for one batch element (NHWC internally).

    x_ref:    (1, H, W, Cin)            input tile
    wd_ref:   (num_layers*9, Ctot, g)   packed 3x3 weights, zero-extended in C
    bd_ref:   (num_layers, g)           dense-layer biases
    wlff_ref: (Ctot, Cin)               1x1 LFF weight
    blff_ref: (1, Cin)                  LFF bias
    o_ref:    (1, H, W, Cin)            output tile
    feat_ref: (H+2, W+2, Ctot) f32      VMEM scratch: padded, growing features
    acc_ref:  (H, W, g) f32             VMEM scratch: conv accumulator
    """
    # --- 1) zero the padded feature buffer and place x in its interior.
    # The zero ring provides the conv padding for every layer; the channels
    # that later layers will fill are also zero, which makes contracting over
    # the full Ctot with zero-extended weights exact.
    feat_ref[...] = jnp.zeros_like(feat_ref)
    feat_ref[1:H + 1, 1:W + 1, 0:Cin] = x_ref[0, :, :, :].astype(jnp.float32)

    # --- 2) dense layers: conv3x3 + bias + ReLU, appended along channels
    # (the torch.cat is just a write into the next channel slot of feat_ref).
    for l in range(num_layers):
        c_off = Cin + l * growth
        acc_ref[...] = jnp.zeros_like(acc_ref)
        for dx in range(3):
            # One sublane-shifted load per dx; dy shifts below slice the
            # major (untiled) dim of the loaded band and are free.
            band = feat_ref[:, dx:dx + W, :]                 # (H+2, W, Ctot)
            for dy in range(3):
                patch = band[dy:dy + H]                      # (H, W, Ctot)
                w_tap = wd_ref[l * 9 + dy * 3 + dx]          # (Ctot, g)
                acc_ref[...] += jax.lax.dot_general(
                    patch, w_tap,
                    dimension_numbers=(((2,), (0,)), ((), ())),
                    preferred_element_type=jnp.float32,
                )
        y = jnp.maximum(acc_ref[...] + bd_ref[l][None, None, :], 0.0)
        feat_ref[1:H + 1, 1:W + 1, c_off:c_off + growth] = y

    # --- 3) local feature fusion (1x1 conv over all Ctot channels, a single
    # K=Ctot matmul) + bias + residual add, written straight to the output.
    ftile = feat_ref[1:H + 1, 1:W + 1, :]                    # (H, W, Ctot)
    lff = jax.lax.dot_general(
        ftile, wlff_ref[...],
        dimension_numbers=(((2,), (0,)), ((), ())),
        preferred_element_type=jnp.float32,
    )
    lff = lff + blff_ref[0][None, None, :]
    out = x_ref[0, :, :, :].astype(jnp.float32) + lff
    o_ref[0, :, :, :] = out.astype(o_ref.dtype)


def rdb_forward(x_nchw, dense_ws, dense_bs, lff_w, lff_b):
    """Pallas equivalent of RDB.forward.

    x_nchw:    (N, Cin, H, W)
    dense_ws:  list of (growth, Cin + growth*i, 3, 3)  (PyTorch OIHW)
    dense_bs:  list of (growth,)
    lff_w:     (Cin, Cin + growth*L, 1, 1)
    lff_b:     (Cin,)
    returns    (N, Cin, H, W)
    """
    N, Cin, H, W = x_nchw.shape
    num_layers = len(dense_ws)
    growth = dense_ws[0].shape[0]
    Ctot = Cin + growth * num_layers

    # --- one-time weight packing (wrapper side, tiny tensors) -------------
    # OIHW (g, C_l, 3, 3) -> HWIO (3, 3, C_l, g) -> zero-extend C_l -> Ctot,
    # flatten the 9 taps:  (L*9, Ctot, g).
    packed = []
    for w_l in dense_ws:
        c_l = w_l.shape[1]
        w_hwio = jnp.transpose(w_l, (2, 3, 1, 0))                  # (3,3,C_l,g)
        w_hwio = jnp.pad(w_hwio, ((0, 0), (0, 0), (0, Ctot - c_l), (0, 0)))
        packed.append(w_hwio.reshape(9, Ctot, growth))
    wd = jnp.concatenate(packed, axis=0)                           # (L*9, Ctot, g)
    bd = jnp.stack(dense_bs, axis=0)                               # (L, g)
    wlff = jnp.transpose(lff_w[:, :, 0, 0], (1, 0))                # (Ctot, Cin)
    blff = lff_b.reshape(1, Cin)

    # Module boundary is NCHW (PyTorch contract); internally the kernel is
    # NHWC.  In a full NHWC pipeline these two transposes disappear.
    x_nhwc = jnp.transpose(x_nchw, (0, 2, 3, 1))                   # (N, H, W, Cin)

    kernel = functools.partial(
        _rdb_kernel, H=H, W=W, Cin=Cin, growth=growth,
        num_layers=num_layers, Ctot=Ctot)

    y_nhwc = pl.pallas_call(
        kernel,
        out_shape=jax.ShapeDtypeStruct((N, H, W, Cin), x_nchw.dtype),
        grid_spec=pltpu.PrefetchScalarGridSpec(
            num_scalar_prefetch=0,
            grid=(N,),
            in_specs=[
                pl.BlockSpec((1, H, W, Cin), lambda n: (n, 0, 0, 0)),
                pl.BlockSpec((num_layers * 9, Ctot, growth), lambda n: (0, 0, 0)),
                pl.BlockSpec((num_layers, growth), lambda n: (0, 0)),
                pl.BlockSpec((Ctot, Cin), lambda n: (0, 0)),
                pl.BlockSpec((1, Cin), lambda n: (0, 0)),
            ],
            out_specs=pl.BlockSpec((1, H, W, Cin), lambda n: (n, 0, 0, 0)),
            scratch_shapes=[
                pltpu.VMEM((H + 2, W + 2, Ctot), jnp.float32),   # padded features
                pltpu.VMEM((H, W, growth), jnp.float32),         # conv accumulator
            ],
        ),
        compiler_params=pltpu.CompilerParams(
            dimension_semantics=("parallel",),      # independent images -> both TCs on v7x
            vmem_limit_bytes=32 * 1024 * 1024,
        ),
    )(x_nhwc, wd, bd, wlff, blff)

    return jnp.transpose(y_nhwc, (0, 3, 1, 2))                     # (N, Cin, H, W)


def _reference_forward(x, dense_ws, dense_bs, lff_w, lff_b):
    """Pure-JAX reference (lax conv) mirroring the PyTorch RDB exactly."""
    feat = x
    for w, b in zip(dense_ws, dense_bs):
        y = jax.lax.conv_general_dilated(
            feat, w, window_strides=(1, 1), padding=((1, 1), (1, 1)),
            dimension_numbers=("NCHW", "OIHW", "NCHW"))
        y = jax.nn.relu(y + b[None, :, None, None])
        feat = jnp.concatenate([feat, y], axis=1)
    out = jax.lax.conv_general_dilated(
        feat, lff_w, window_strides=(1, 1), padding=((0, 0), (0, 0)),
        dimension_numbers=("NCHW", "OIHW", "NCHW"))
    out = out + lff_b[None, :, None, None]
    return x + out


if __name__ == "__main__":
    # Small shapes consistent with the module: RDB(in_channels=4, growth=8, layers=3).
    N, Cin, H, W = 2, 4, 16, 16
    growth, num_layers = 8, 3
    Ctot = Cin + growth * num_layers

    key = jax.random.PRNGKey(0)
    keys = jax.random.split(key, 2 * num_layers + 3)

    x = jax.random.normal(keys[0], (N, Cin, H, W), dtype=jnp.float32)

    # Deterministic parameter init (kaiming-uniform-like bounds; exact init
    # scheme is irrelevant for kernel semantics).
    dense_ws, dense_bs = [], []
    for i in range(num_layers):
        c_in_l = Cin + growth * i
        bound = 1.0 / float((c_in_l * 9) ** 0.5)
        dense_ws.append(jax.random.uniform(
            keys[1 + 2 * i], (growth, c_in_l, 3, 3), jnp.float32, -bound, bound))
        dense_bs.append(jax.random.uniform(
            keys[2 + 2 * i], (growth,), jnp.float32, -bound, bound))
    bound = 1.0 / float(Ctot ** 0.5)
    lff_w = jax.random.uniform(
        keys[2 * num_layers + 1], (Cin, Ctot, 1, 1), jnp.float32, -bound, bound)
    lff_b = jax.random.uniform(
        keys[2 * num_layers + 2], (Cin,), jnp.float32, -bound, bound)

    rdb = jax.jit(rdb_forward)
    out = jax.block_until_ready(rdb(x, dense_ws, dense_bs, lff_w, lff_b))
    ref = jax.block_until_ready(_reference_forward(x, dense_ws, dense_bs, lff_w, lff_b))

    assert out.shape == (N, Cin, H, W), out.shape
    max_err = float(jnp.max(jnp.abs(out - ref)))
    assert jnp.allclose(out, ref, atol=1e-4, rtol=1e-4), f"mismatch vs reference, max |err| = {max_err}"

    print("KERNEL_OK")
</pallas_src>

<mosaic_0001>
module attributes {stable_mosaic.version = 11 : i64} {
  func.func @_rdb_kernel(%arg0: i32, %arg1: memref<1x16x16x4xf32, #tpu.memory_space<vmem>>, %arg2: memref<27x28x8xf32, #tpu.memory_space<vmem>>, %arg3: memref<3x8xf32, #tpu.memory_space<vmem>>, %arg4: memref<28x4xf32, #tpu.memory_space<vmem>>, %arg5: memref<1x4xf32, #tpu.memory_space<vmem>>, %arg6: memref<1x16x16x4xf32, #tpu.memory_space<vmem>>, %arg7: memref<18x18x28xf32, #tpu.memory_space<vmem>>, %arg8: memref<16x16x8xf32, #tpu.memory_space<vmem>>) attributes {dimension_semantics = [#tpu.dimension_semantics<parallel>], iteration_bounds = array<i64: 2>, scalar_prefetch = 0 : i64, scratch_operands = 2 : i64, tpu.core_type = #tpu.core_type<tc>, window_params = [{transform_indices = @transform_0, window_bounds = array<i64: 1, 16, 16, 4>}, {pipeline_mode = #tpu.pipeline_mode<synchronous>, transform_indices = @transform_1, window_bounds = array<i64: 27, 28, 8>}, {pipeline_mode = #tpu.pipeline_mode<synchronous>, transform_indices = @transform_2, window_bounds = array<i64: 3, 8>}, {pipeline_mode = #tpu.pipeline_mode<synchronous>, transform_indices = @transform_3, window_bounds = array<i64: 28, 4>}, {pipeline_mode = #tpu.pipeline_mode<synchronous>, transform_indices = @transform_4, window_bounds = array<i64: 1, 4>}, {transform_indices = @transform_5, window_bounds = array<i64: 1, 16, 16, 4>}]} {
    %cst = arith.constant 0.000000e+00 : f32
    %0 = vector.broadcast %cst : f32 to vector<18x18x28xf32>
    %c0 = arith.constant 0 : index
    %c0_0 = arith.constant 0 : index
    %c0_1 = arith.constant 0 : index
    %1 = vector.load %arg7[%c0, %c0_0, %c0_1] : memref<18x18x28xf32, #tpu.memory_space<vmem>>, vector<18x18x28xf32>
    tpu.vector_store %arg7[%c0, %c0_0, %c0_1], %0 {strides = array<i32>} : memref<18x18x28xf32, #tpu.memory_space<vmem>>, vector<18x18x28xf32>,
    %c0_2 = arith.constant 0 : index
    %c0_3 = arith.constant 0 : index
    %c0_4 = arith.constant 0 : index
    %c0_5 = arith.constant 0 : index
    %2 = vector.load %arg1[%c0_2, %c0_3, %c0_4, %c0_5] : memref<1x16x16x4xf32, #tpu.memory_space<vmem>>, vector<1x16x16x4xf32>
    %3 = vector.shape_cast %2 : vector<1x16x16x4xf32> to vector<16x16x4xf32>
    %c1 = arith.constant 1 : index
    %c1_6 = arith.constant 1 : index
    %c0_7 = arith.constant 0 : index
    %4 = vector.load %arg7[%c1, %c1_6, %c0_7] : memref<18x18x28xf32, #tpu.memory_space<vmem>>, vector<16x16x4xf32>
    tpu.vector_store %arg7[%c1, %c1_6, %c0_7], %3 {strides = array<i32>} : memref<18x18x28xf32, #tpu.memory_space<vmem>>, vector<16x16x4xf32>,
    %cst_8 = arith.constant 0.000000e+00 : f32
    %5 = vector.broadcast %cst_8 : f32 to vector<16x16x8xf32>
    %c0_9 = arith.constant 0 : index
    %c0_10 = arith.constant 0 : index
    %c0_11 = arith.constant 0 : index
    %6 = vector.load %arg8[%c0_9, %c0_10, %c0_11] : memref<16x16x8xf32, #tpu.memory_space<vmem>>, vector<16x16x8xf32>
    tpu.vector_store %arg8[%c0_9, %c0_10, %c0_11], %5 {strides = array<i32>} : memref<16x16x8xf32, #tpu.memory_space<vmem>>, vector<16x16x8xf32>,
    %c0_12 = arith.constant 0 : index
    %c0_13 = arith.constant 0 : index
    %c0_14 = arith.constant 0 : index
    %7 = vector.load %arg7[%c0_12, %c0_13, %c0_14] : memref<18x18x28xf32, #tpu.memory_space<vmem>>, vector<18x16x28xf32>
    %8 = vector.extract_strided_slice %7 {offsets = [0, 0, 0], sizes = [16, 16, 28], strides = [1, 1, 1]} : vector<18x16x28xf32> to vector<16x16x28xf32>
    %c0_15 = arith.constant 0 : index
    %c0_16 = arith.constant 0 : index
    %c0_17 = arith.constant 0 : index
    %9 = vector.load %arg2[%c0_15, %c0_16, %c0_17] : memref<27x28x8xf32, #tpu.memory_space<vmem>>, vector<1x28x8xf32>
    %10 = vector.shape_cast %9 : vector<1x28x8xf32> to vector<28x8xf32>
    %c0_18 = arith.constant 0 : index
    %c0_19 = arith.constant 0 : index
    %c0_20 = arith.constant 0 : index
    %11 = vector.load %arg8[%c0_18, %c0_19, %c0_20] : memref<16x16x8xf32, #tpu.memory_space<vmem>>, vector<16x16x8xf32>
    %cst_21 = arith.constant dense<0.000000e+00> : vector<16x16x8xf32>
    %12 = tpu.matmul %8, %10, %cst_21 {dimension_numbers = #tpu.dot_dimension_numbers<[2], [0], [0, 1], [1], [0, 0, 0, 1, 1, 1], [], []>} : vector<16x16x28xf32>, vector<28x8xf32>, vector<16x16x8xf32> -> vector<16x16x8xf32>
    %13 = arith.addf %11, %12 : vector<16x16x8xf32>
    %c0_22 = arith.constant 0 : index
    %c0_23 = arith.constant 0 : index
    %c0_24 = arith.constant 0 : index
    %14 = vector.load %arg8[%c0_22, %c0_23, %c0_24] : memref<16x16x8xf32, #tpu.memory_space<vmem>>, vector<16x16x8xf32>
    tpu.vector_store %arg8[%c0_22, %c0_23, %c0_24], %13 {strides = array<i32>} : memref<16x16x8xf32, #tpu.memory_space<vmem>>, vector<16x16x8xf32>,
    %15 = vector.extract_strided_slice %7 {offsets = [1, 0, 0], sizes = [16, 16, 28], strides = [1, 1, 1]} : vector<18x16x28xf32> to vector<16x16x28xf32>
    %c3 = arith.constant 3 : index
    %c0_25 = arith.constant 0 : index
    %c0_26 = arith.constant 0 : index
    %16 = vector.load %arg2[%c3, %c0_25, %c0_26] : memref<27x28x8xf32, #tpu.memory_space<vmem>>, vector<1x28x8xf32>
    %17 = vector.shape_cast %16 : vector<1x28x8xf32> to vector<28x8xf32>
    %c0_27 = arith.constant 0 : index
    %c0_28 = arith.constant 0 : index
    %c0_29 = arith.constant 0 : index
    %18 = vector.load %arg8[%c0_27, %c0_28, %c0_29] : memref<16x16x8xf32, #tpu.memory_space<vmem>>, vector<16x16x8xf32>
    %cst_30 = arith.constant dense<0.000000e+00> : vector<16x16x8xf32>
    %19 = tpu.matmul %15, %17, %cst_30 {dimension_numbers = #tpu.dot_dimension_numbers<[2], [0], [0, 1], [1], [0, 0, 0, 1, 1, 1], [], []>} : vector<16x16x28xf32>, vector<28x8xf32>, vector<16x16x8xf32> -> vector<16x16x8xf32>
    %20 = arith.addf %18, %19 : vector<16x16x8xf32>
    %c0_31 = arith.constant 0 : index
    %c0_32 = arith.constant 0 : index
    %c0_33 = arith.constant 0 : index
    %21 = vector.load %arg8[%c0_31, %c0_32, %c0_33] : memref<16x16x8xf32, #tpu.memory_space<vmem>>, vector<16x16x8xf32>
    tpu.vector_store %arg8[%c0_31, %c0_32, %c0_33], %20 {strides = array<i32>} : memref<16x16x8xf32, #tpu.memory_space<vmem>>, vector<16x16x8xf32>,
    %22 = vector.extract_strided_slice %7 {offsets = [2, 0, 0], sizes = [16, 16, 28], strides = [1, 1, 1]} : vector<18x16x28xf32> to vector<16x16x28xf32>
    %c6 = arith.constant 6 : index
    %c0_34 = arith.constant 0 : index
    %c0_35 = arith.constant 0 : index
    %23 = vector.load %arg2[%c6, %c0_34, %c0_35] : memref<27x28x8xf32, #tpu.memory_space<vmem>>, vector<1x28x8xf32>
    %24 = vector.shape_cast %23 : vector<1x28x8xf32> to vector<28x8xf32>
    %c0_36 = arith.constant 0 : index
    %c0_37 = arith.constant 0 : index
    %c0_38 = arith.constant 0 : index
    %25 = vector.load %arg8[%c0_36, %c0_37, %c0_38] : memref<16x16x8xf32, #tpu.memory_space<vmem>>, vector<16x16x8xf32>
    %cst_39 = arith.constant dense<0.000000e+00> : vector<16x16x8xf32>
    %26 = tpu.matmul %22, %24, %cst_39 {dimension_numbers = #tpu.dot_dimension_numbers<[2], [0], [0, 1], [1], [0, 0, 0, 1, 1, 1], [], []>} : vector<16x16x28xf32>, vector<28x8xf32>, vector<16x16x8xf32> -> vector<16x16x8xf32>
    %27 = arith.addf %25, %26 : vector<16x16x8xf32>
    %c0_40 = arith.constant 0 : index
    %c0_41 = arith.constant 0 : index
    %c0_42 = arith.constant 0 : index
    %28 = vector.load %arg8[%c0_40, %c0_41, %c0_42] : memref<16x16x8xf32, #tpu.memory_space<vmem>>, vector<16x16x8xf32>
    tpu.vector_store %arg8[%c0_40, %c0_41, %c0_42], %27 {strides = array<i32>} : memref<16x16x8xf32, #tpu.memory_space<vmem>>, vector<16x16x8xf32>,
    %c0_43 = arith.constant 0 : index
    %c1_44 = arith.constant 1 : index
    %c0_45 = arith.constant 0 : index
    %29 = vector.load %arg7[%c0_43, %c1_44, %c0_45] : memref<18x18x28xf32, #tpu.memory_space<vmem>>, vector<18x16x28xf32>
    %30 = vector.extract_strided_slice %29 {offsets = [0, 0, 0], sizes = [16, 16, 28], strides = [1, 1, 1]} : vector<18x16x28xf32> to vector<16x16x28xf32>
    %c1_46 = arith.constant 1 : index
    %c0_47 = arith.constant 0 : index
    %c0_48 = arith.constant 0 : index
    %31 = vector.load %arg2[%c1_46, %c0_47, %c0_48] : memref<27x28x8xf32, #tpu.memory_space<vmem>>, vector<1x28x8xf32>
    %32 = vector.shape_cast %31 : vector<1x28x8xf32> to vector<28x8xf32>
    %c0_49 = arith.constant 0 : index
    %c0_50 = arith.constant 0 : index
    %c0_51 = arith.constant 0 : index
    %33 = vector.load %arg8[%c0_49, %c0_50, %c0_51] : memref<16x16x8xf32, #tpu.memory_space<vmem>>, vector<16x16x8xf32>
    %cst_52 = arith.constant dense<0.000000e+00> : vector<16x16x8xf32>
    %34 = tpu.matmul %30, %32, %cst_52 {dimension_numbers = #tpu.dot_dimension_numbers<[2], [0], [0, 1], [1], [0, 0, 0, 1, 1, 1], [], []>} : vector<16x16x28xf32>, vector<28x8xf32>, vector<16x16x8xf32> -> vector<16x16x8xf32>
    %35 = arith.addf %33, %34 : vector<16x16x8xf32>
    %c0_53 = arith.constant 0 : index
    %c0_54 = arith.constant 0 : index
    %c0_55 = arith.constant 0 : index
    %36 = vector.load %arg8[%c0_53, %c0_54, %c0_55] : memref<16x16x8xf32, #tpu.memory_space<vmem>>, vector<16x16x8xf32>
    tpu.vector_store %arg8[%c0_53, %c0_54, %c0_55], %35 {strides = array<i32>} : memref<16x16x8xf32, #tpu.memory_space<vmem>>, vector<16x16x8xf32>,
    %37 = vector.extract_strided_slice %29 {offsets = [1, 0, 0], sizes = [16, 16, 28], strides = [1, 1, 1]} : vector<18x16x28xf32> to vector<16x16x28xf32>
    %c4 = arith.constant 4 : index
    %c0_56 = arith.constant 0 : index
    %c0_57 = arith.constant 0 : index
    %38 = vector.load %arg2[%c4, %c0_56, %c0_57] : memref<27x28x8xf32, #tpu.memory_space<vmem>>, vector<1x28x8xf32>
    %39 = vector.shape_cast %38 : vector<1x28x8xf32> to vector<28x8xf32>
    %c0_58 = arith.constant 0 : index
    %c0_59 = arith.constant 0 : index
    %c0_60 = arith.constant 0 : index
    %40 = vector.load %arg8[%c0_58, %c0_59, %c0_60] : memref<16x16x8xf32, #tpu.memory_space<vmem>>, vector<16x16x8xf32>
    %cst_61 = arith.constant dense<0.000000e+00> : vector<16x16x8xf32>
    %41 = tpu.matmul %37, %39, %cst_61 {dimension_numbers = #tpu.dot_dimension_numbers<[2], [0], [0, 1], [1], [0, 0, 0, 1, 1, 1], [], []>} : vector<16x16x28xf32>, vector<28x8xf32>, vector<16x16x8xf32> -> vector<16x16x8xf32>
    %42 = arith.addf %40, %41 : vector<16x16x8xf32>
    %c0_62 = arith.constant 0 : index
    %c0_63 = arith.constant 0 : index
    %c0_64 = arith.constant 0 : index
    %43 = vector.load %arg8[%c0_62, %c0_63, %c0_64] : memref<16x16x8xf32, #tpu.memory_space<vmem>>, vector<16x16x8xf32>
    tpu.vector_store %arg8[%c0_62, %c0_63, %c0_64], %42 {strides = array<i32>} : memref<16x16x8xf32, #tpu.memory_space<vmem>>, vector<16x16x8xf32>,
    %44 = vector.extract_strided_slice %29 {offsets = [2, 0, 0], sizes = [16, 16, 28], strides = [1, 1, 1]} : vector<18x16x28xf32> to vector<16x16x28xf32>
    %c7 = arith.constant 7 : index
    %c0_65 = arith.constant 0 : index
    %c0_66 = arith.constant 0 : index
    %45 = vector.load %arg2[%c7, %c0_65, %c0_66] : memref<27x28x8xf32, #tpu.memory_space<vmem>>, vector<1x28x8xf32>
    %46 = vector.shape_cast %45 : vector<1x28x8xf32> to vector<28x8xf32>
    %c0_67 = arith.constant 0 : index
    %c0_68 = arith.constant 0 : index
    %c0_69 = arith.constant 0 : index
    %47 = vector.load %arg8[%c0_67, %c0_68, %c0_69] : memref<16x16x8xf32, #tpu.memory_space<vmem>>, vector<16x16x8xf32>
    %cst_70 = arith.constant dense<0.000000e+00> : vector<16x16x8xf32>
    %48 = tpu.matmul %44, %46, %cst_70 {dimension_numbers = #tpu.dot_dimension_numbers<[2], [0], [0, 1], [1], [0, 0, 0, 1, 1, 1], [], []>} : vector<16x16x28xf32>, vector<28x8xf32>, vector<16x16x8xf32> -> vector<16x16x8xf32>
    %49 = arith.addf %47, %48 : vector<16x16x8xf32>
    %c0_71 = arith.constant 0 : index
    %c0_72 = arith.constant 0 : index
    %c0_73 = arith.constant 0 : index
    %50 = vector.load %arg8[%c0_71, %c0_72, %c0_73] : memref<16x16x8xf32, #tpu.memory_space<vmem>>, vector<16x16x8xf32>
    tpu.vector_store %arg8[%c0_71, %c0_72, %c0_73], %49 {strides = array<i32>} : memref<16x16x8xf32, #tpu.memory_space<vmem>>, vector<16x16x8xf32>,
    %c0_74 = arith.constant 0 : index
    %c2 = arith.constant 2 : index
    %c0_75 = arith.constant 0 : index
    %51 = vector.load %arg7[%c0_74, %c2, %c0_75] : memref<18x18x28xf32, #tpu.memory_space<vmem>>, vector<18x16x28xf32>
    %52 = vector.extract_strided_slice %51 {offsets = [0, 0, 0], sizes = [16, 16, 28], strides = [1, 1, 1]} : vector<18x16x28xf32> to vector<16x16x28xf32>
    %c2_76 = arith.constant 2 : index
    %c0_77 = arith.constant 0 : index
    %c0_78 = arith.constant 0 : index
    %53 = vector.load %arg2[%c2_76, %c0_77, %c0_78] : memref<27x28x8xf32, #tpu.memory_space<vmem>>, vector<1x28x8xf32>
    %54 = vector.shape_cast %53 : vector<1x28x8xf32> to vector<28x8xf32>
    %c0_79 = arith.constant 0 : index
    %c0_80 = arith.constant 0 : index
    %c0_81 = arith.constant 0 : index
    %55 = vector.load %arg8[%c0_79, %c0_80, %c0_81] : memref<16x16x8xf32, #tpu.memory_space<vmem>>, vector<16x16x8xf32>
    %cst_82 = arith.constant dense<0.000000e+00> : vector<16x16x8xf32>
    %56 = tpu.matmul %52, %54, %cst_82 {dimension_numbers = #tpu.dot_dimension_numbers<[2], [0], [0, 1], [1], [0, 0, 0, 1, 1, 1], [], []>} : vector<16x16x28xf32>, vector<28x8xf32>, vector<16x16x8xf32> -> vector<16x16x8xf32>
    %57 = arith.addf %55, %56 : vector<16x16x8xf32>
    %c0_83 = arith.constant 0 : index
    %c0_84 = arith.constant 0 : index
    %c0_85 = arith.constant 0 : index
    %58 = vector.load %arg8[%c0_83, %c0_84, %c0_85] : memref<16x16x8xf32, #tpu.memory_space<vmem>>, vector<16x16x8xf32>
    tpu.vector_store %arg8[%c0_83, %c0_84, %c0_85], %57 {strides = array<i32>} : memref<16x16x8xf32, #tpu.memory_space<vmem>>, vector<16x16x8xf32>,
    %59 = vector.extract_strided_slice %51 {offsets = [1, 0, 0], sizes = [16, 16, 28], strides = [1, 1, 1]} : vector<18x16x28xf32> to vector<16x16x28xf32>
    %c5 = arith.constant 5 : index
    %c0_86 = arith.constant 0 : index
    %c0_87 = arith.constant 0 : index
    %60 = vector.load %arg2[%c5, %c0_86, %c0_87] : memref<27x28x8xf32, #tpu.memory_space<vmem>>, vector<1x28x8xf32>
    %61 = vector.shape_cast %60 : vector<1x28x8xf32> to vector<28x8xf32>
    %c0_88 = arith.constant 0 : index
    %c0_89 = arith.constant 0 : index
    %c0_90 = arith.constant 0 : index
    %62 = vector.load %arg8[%c0_88, %c0_89, %c0_90] : memref<16x16x8xf32, #tpu.memory_space<vmem>>, vector<16x16x8xf32>
    %cst_91 = arith.constant dense<0.000000e+00> : vector<16x16x8xf32>
    %63 = tpu.matmul %59, %61, %cst_91 {dimension_numbers = #tpu.dot_dimension_numbers<[2], [0], [0, 1], [1], [0, 0, 0, 1, 1, 1], [], []>} : vector<16x16x28xf32>, vector<28x8xf32>, vector<16x16x8xf32> -> vector<16x16x8xf32>
    %64 = arith.addf %62, %63 : vector<16x16x8xf32>
    %c0_92 = arith.constant 0 : index
    %c0_93 = arith.constant 0 : index
    %c0_94 = arith.constant 0 : index
    %65 = vector.load %arg8[%c0_92, %c0_93, %c0_94] : memref<16x16x8xf32, #tpu.memory_space<vmem>>, vector<16x16x8xf32>
    tpu.vector_store %arg8[%c0_92, %c0_93, %c0_94], %64 {strides = array<i32>} : memref<16x16x8xf32, #tpu.memory_space<vmem>>, vector<16x16x8xf32>,
    %66 = vector.extract_strided_slice %51 {offsets = [2, 0, 0], sizes = [16, 16, 28], strides = [1, 1, 1]} : vector<18x16x28xf32> to vector<16x16x28xf32>
    %c8 = arith.constant 8 : index
    %c0_95 = arith.constant 0 : index
    %c0_96 = arith.constant 0 : index
    %67 = vector.load %arg2[%c8, %c0_95, %c0_96] : memref<27x28x8xf32, #tpu.memory_space<vmem>>, vector<1x28x8xf32>
    %68 = vector.shape_cast %67 : vector<1x28x8xf32> to vector<28x8xf32>
    %c0_97 = arith.constant 0 : index
    %c0_98 = arith.constant 0 : index
    %c0_99 = arith.constant 0 : index
    %69 = vector.load %arg8[%c0_97, %c0_98, %c0_99] : memref<16x16x8xf32, #tpu.memory_space<vmem>>, vector<16x16x8xf32>
    %cst_100 = arith.constant dense<0.000000e+00> : vector<16x16x8xf32>
    %70 = tpu.matmul %66, %68, %cst_100 {dimension_numbers = #tpu.dot_dimension_numbers<[2], [0], [0, 1], [1], [0, 0, 0, 1, 1, 1], [], []>} : vector<16x16x28xf32>, vector<28x8xf32>, vector<16x16x8xf32> -> vector<16x16x8xf32>
    %71 = arith.addf %69, %70 : vector<16x16x8xf32>
    %c0_101 = arith.constant 0 : index
    %c0_102 = arith.constant 0 : index
    %c0_103 = arith.constant 0 : index
    %72 = vector.load %arg8[%c0_101, %c0_102, %c0_103] : memref<16x16x8xf32, #tpu.memory_space<vmem>>, vector<16x16x8xf32>
    tpu.vector_store %arg8[%c0_101, %c0_102, %c0_103], %71 {strides = array<i32>} : memref<16x16x8xf32, #tpu.memory_space<vmem>>, vector<16x16x8xf32>,
    %c0_104 = arith.constant 0 : index
    %c0_105 = arith.constant 0 : index
    %c0_106 = arith.constant 0 : index
    %73 = vector.load %arg8[%c0_104, %c0_105, %c0_106] : memref<16x16x8xf32, #tpu.memory_space<vmem>>, vector<16x16x8xf32>
    %c0_107 = arith.constant 0 : index
    %c0_108 = arith.constant 0 : index
    %74 = vector.load %arg3[%c0_107, %c0_108] : memref<3x8xf32, #tpu.memory_space<vmem>>, vector<1x8xf32>
    %75 = vector.shape_cast %74 : vector<1x8xf32> to vector<8xf32>
    %76 = vector.shape_cast %75 : vector<8xf32> to vector<1x1x8xf32>
    %77 = vector.broadcast %76 : vector<1x1x8xf32> to vector<16x16x8xf32>
    %78 = arith.addf %73, %77 : vector<16x16x8xf32>
    %cst_109 = arith.constant 0.000000e+00 : f32
    %79 = vector.broadcast %cst_109 : f32 to vector<16x16x8xf32>
    %80 = arith.maximumf %78, %79 : vector<16x16x8xf32>
    %c1_110 = arith.constant 1 : index
    %c1_111 = arith.constant 1 : index
    %c4_112 = arith.constant 4 : index
    %81 = vector.load %arg7[%c1_110, %c1_111, %c4_112] : memref<18x18x28xf32, #tpu.memory_space<vmem>>, vector<16x16x8xf32>
    tpu.vector_store %arg7[%c1_110, %c1_111, %c4_112], %80 {strides = array<i32>} : memref<18x18x28xf32, #tpu.memory_space<vmem>>, vector<16x16x8xf32>,
    %cst_113 = arith.constant 0.000000e+00 : f32
    %82 = vector.broadcast %cst_113 : f32 to vector<16x16x8xf32>
    %c0_114 = arith.constant 0 : index
    %c0_115 = arith.constant 0 : index
    %c0_116 = arith.constant 0 : index
    %83 = vector.load %arg8[%c0_114, %c0_115, %c0_116] : memref<16x16x8xf32, #tpu.memory_space<vmem>>, vector<16x16x8xf32>
    tpu.vector_store %arg8[%c0_114, %c0_115, %c0_116], %82 {strides = array<i32>} : memref<16x16x8xf32, #tpu.memory_space<vmem>>, vector<16x16x8xf32>,
    %c0_117 = arith.constant 0 : index
    %c0_118 = arith.constant 0 : index
    %c0_119 = arith.constant 0 : index
    %84 = vector.load %arg7[%c0_117, %c0_118, %c0_119] : memref<18x18x28xf32, #tpu.memory_space<vmem>>, vector<18x16x28xf32>
    %85 = vector.extract_strided_slice %84 {offsets = [0, 0, 0], sizes = [16, 16, 28], strides = [1, 1, 1]} : vector<18x16x28xf32> to vector<16x16x28xf32>
    %c9 = arith.constant 9 : index
    %c0_120 = arith.constant 0 : index
    %c0_121 = arith.constant 0 : index
    %86 = vector.load %arg2[%c9, %c0_120, %c0_121] : memref<27x28x8xf32, #tpu.memory_space<vmem>>, vector<1x28x8xf32>
    %87 = vector.shape_cast %86 : vector<1x28x8xf32> to vector<28x8xf32>
    %c0_122 = arith.constant 0 : index
    %c0_123 = arith.constant 0 : index
    %c0_124 = arith.constant 0 : index
    %88 = vector.load %arg8[%c0_122, %c0_123, %c0_124] : memref<16x16x8xf32, #tpu.memory_space<vmem>>, vector<16x16x8xf32>
    %cst_125 = arith.constant dense<0.000000e+00> : vector<16x16x8xf32>
    %89 = tpu.matmul %85, %87, %cst_125 {dimension_numbers = #tpu.dot_dimension_numbers<[2], [0], [0, 1], [1], [0, 0, 0, 1, 1, 1], [], []>} : vector<16x16x28xf32>, vector<28x8xf32>, vector<16x16x8xf32> -> vector<16x16x8xf32>
    %90 = arith.addf %88, %89 : vector<16x16x8xf32>
    %c0_126 = arith.constant 0 : index
    %c0_127 = arith.constant 0 : index
    %c0_128 = arith.constant 0 : index
    %91 = vector.load %arg8[%c0_126, %c0_127, %c0_128] : memref<16x16x8xf32, #tpu.memory_space<vmem>>, vector<16x16x8xf32>
    tpu.vector_store %arg8[%c0_126, %c0_127, %c0_128], %90 {strides = array<i32>} : memref<16x16x8xf32, #tpu.memory_space<vmem>>, vector<16x16x8xf32>,
    %92 = vector.extract_strided_slice %84 {offsets = [1, 0, 0], sizes = [16, 16, 28], strides = [1, 1, 1]} : vector<18x16x28xf32> to vector<16x16x28xf32>
    %c12 = arith.constant 12 : index
    %c0_129 = arith.constant 0 : index
    %c0_130 = arith.constant 0 : index
    %93 = vector.load %arg2[%c12, %c0_129, %c0_130] : memref<27x28x8xf32, #tpu.memory_space<vmem>>, vector<1x28x8xf32>
    %94 = vector.shape_cast %93 : vector<1x28x8xf32> to vector<28x8xf32>
    %c0_131 = arith.constant 0 : index
    %c0_132 = arith.constant 0 : index
    %c0_133 = arith.constant 0 : index
    %95 = vector.load %arg8[%c0_131, %c0_132, %c0_133] : memref<16x16x8xf32, #tpu.memory_space<vmem>>, vector<16x16x8xf32>
    %cst_134 = arith.constant dense<0.000000e+00> : vector<16x16x8xf32>
    %96 = tpu.matmul %92, %94, %cst_134 {dimension_numbers = #tpu.dot_dimension_numbers<[2], [0], [0, 1], [1], [0, 0, 0, 1, 1, 1], [], []>} : vector<16x16x28xf32>, vector<28x8xf32>, vector<16x16x8xf32> -> vector<16x16x8xf32>
    %97 = arith.addf %95, %96 : vector<16x16x8xf32>
    %c0_135 = arith.constant 0 : index
    %c0_136 = arith.constant 0 : index
    %c0_137 = arith.constant 0 : index
    %98 = vector.load %arg8[%c0_135, %c0_136, %c0_137] : memref<16x16x8xf32, #tpu.memory_space<vmem>>, vector<16x16x8xf32>
    tpu.vector_store %arg8[%c0_135, %c0_136, %c0_137], %97 {strides = array<i32>} : memref<16x16x8xf32, #tpu.memory_space<vmem>>, vector<16x16x8xf32>,
    %99 = vector.extract_strided_slice %84 {offsets = [2, 0, 0], sizes = [16, 16, 28], strides = [1, 1, 1]} : vector<18x16x28xf32> to vector<16x16x28xf32>
    %c15 = arith.constant 15 : index
    %c0_138 = arith.constant 0 : index
    %c0_139 = arith.constant 0 : index
    %100 = vector.load %arg2[%c15, %c0_138, %c0_139] : memref<27x28x8xf32, #tpu.memory_space<vmem>>, vector<1x28x8xf32>
    %101 = vector.shape_cast %100 : vector<1x28x8xf32> to vector<28x8xf32>
    %c0_140 = arith.constant 0 : index
    %c0_141 = arith.constant 0 : index
    %c0_142 = arith.constant 0 : index
    %102 = vector.load %arg8[%c0_140, %c0_141, %c0_142] : memref<16x16x8xf32, #tpu.memory_space<vmem>>, vector<16x16x8xf32>
    %cst_143 = arith.constant dense<0.000000e+00> : vector<16x16x8xf32>
    %103 = tpu.matmul %99, %101, %cst_143 {dimension_numbers = #tpu.dot_dimension_numbers<[2], [0], [0, 1], [1], [0, 0, 0, 1, 1, 1], [], []>} : vector<16x16x28xf32>, vector<28x8xf32>, vector<16x16x8xf32> -> vector<16x16x8xf32>
    %104 = arith.addf %102, %103 : vector<16x16x8xf32>
    %c0_144 = arith.constant 0 : index
    %c0_145 = arith.constant 0 : index
    %c0_146 = arith.constant 0 : index
    %105 = vector.load %arg8[%c0_144, %c0_145, %c0_146] : memref<16x16x8xf32, #tpu.memory_space<vmem>>, vector<16x16x8xf32>
    tpu.vector_store %arg8[%c0_144, %c0_145, %c0_146], %104 {strides = array<i32>} : memref<16x16x8xf32, #tpu.memory_space<vmem>>, vector<16x16x8xf32>,
    %c0_147 = arith.constant 0 : index
    %c1_148 = arith.constant 1 : index
    %c0_149 = arith.constant 0 : index
    %106 = vector.load %arg7[%c0_147, %c1_148, %c0_149] : memref<18x18x28xf32, #tpu.memory_space<vmem>>, vector<18x16x28xf32>
    %107 = vector.extract_strided_slice %106 {offsets = [0, 0, 0], sizes = [16, 16, 28], strides = [1, 1, 1]} : vector<18x16x28xf32> to vector<16x16x28xf32>
    %c10 = arith.constant 10 : index
    %c0_150 = arith.constant 0 : index
    %c0_151 = arith.constant 0 : index
    %108 = vector.load %arg2[%c10, %c0_150, %c0_151] : memref<27x28x8xf32, #tpu.memory_space<vmem>>, vector<1x28x8xf32>
    %109 = vector.shape_cast %108 : vector<1x28x8xf32> to vector<28x8xf32>
    %c0_152 = arith.constant 0 : index
    %c0_153 = arith.constant 0 : index
    %c0_154 = arith.constant 0 : index
    %110 = vector.load %arg8[%c0_152, %c0_153, %c0_154] : memref<16x16x8xf32, #tpu.memory_space<vmem>>, vector<16x16x8xf32>
    %cst_155 = arith.constant dense<0.000000e+00> : vector<16x16x8xf32>
    %111 = tpu.matmul %107, %109, %cst_155 {dimension_numbers = #tpu.dot_dimension_numbers<[2], [0], [0, 1], [1], [0, 0, 0, 1, 1, 1], [], []>} : vector<16x16x28xf32>, vector<28x8xf32>, vector<16x16x8xf32> -> vector<16x16x8xf32>
    %112 = arith.addf %110, %111 : vector<16x16x8xf32>
    %c0_156 = arith.constant 0 : index
    %c0_157 = arith.constant 0 : index
    %c0_158 = arith.constant 0 : index
    %113 = vector.load %arg8[%c0_156, %c0_157, %c0_158] : memref<16x16x8xf32, #tpu.memory_space<vmem>>, vector<16x16x8xf32>
    tpu.vector_store %arg8[%c0_156, %c0_157, %c0_158], %112 {strides = array<i32>} : memref<16x16x8xf32, #tpu.memory_space<vmem>>, vector<16x16x8xf32>,
    %114 = vector.extract_strided_slice %106 {offsets = [1, 0, 0], sizes = [16, 16, 28], strides = [1, 1, 1]} : vector<18x16x28xf32> to vector<16x16x28xf32>
    %c13 = arith.constant 13 : index
    %c0_159 = arith.constant 0 : index
    %c0_160 = arith.constant 0 : index
    %115 = vector.load %arg2[%c13, %c0_159, %c0_160] : memref<27x28x8xf32, #tpu.memory_space<vmem>>, vector<1x28x8xf32>
    %116 = vector.shape_cast %115 : vector<1x28x8xf32> to vector<28x8xf32>
    %c0_161 = arith.constant 0 : index
    %c0_162 = arith.constant 0 : index
    %c0_163 = arith.constant 0 : index
    %117 = vector.load %arg8[%c0_161, %c0_162, %c0_163] : memref<16x16x8xf32, #tpu.memory_space<vmem>>, vector<16x16x8xf32>
    %cst_164 = arith.constant dense<0.000000e+00> : vector<16x16x8xf32>
    %118 = tpu.matmul %114, %116, %cst_164 {dimension_numbers = #tpu.dot_dimension_numbers<[2], [0], [0, 1], [1], [0, 0, 0, 1, 1, 1], [], []>} : vector<16x16x28xf32>, vector<28x8xf32>, vector<16x16x8xf32> -> vector<16x16x8xf32>
    %119 = arith.addf %117, %118 : vector<16x16x8xf32>
    %c0_165 = arith.constant 0 : index
    %c0_166 = arith.constant 0 : index
    %c0_167 = arith.constant 0 : index
    %120 = vector.load %arg8[%c0_165, %c0_166, %c0_167] : memref<16x16x8xf32, #tpu.memory_space<vmem>>, vector<16x16x8xf32>
    tpu.vector_store %arg8[%c0_165, %c0_166, %c0_167], %119 {strides = array<i32>} : memref<16x16x8xf32, #tpu.memory_space<vmem>>, vector<16x16x8xf32>,
    %121 = vector.extract_strided_slice %106 {offsets = [2, 0, 0], sizes = [16, 16, 28], strides = [1, 1, 1]} : vector<18x16x28xf32> to vector<16x16x28xf32>
    %c16 = arith.constant 16 : index
    %c0_168 = arith.constant 0 : index
    %c0_169 = arith.constant 0 : index
    %122 = vector.load %arg2[%c16, %c0_168, %c0_169] : memref<27x28x8xf32, #tpu.memory_space<vmem>>, vector<1x28x8xf32>
    %123 = vector.shape_cast %122 : vector<1x28x8xf32> to vector<28x8xf32>
    %c0_170 = arith.constant 0 : index
    %c0_171 = arith.constant 0 : index
    %c0_172 = arith.constant 0 : index
    %124 = vector.load %arg8[%c0_170, %c0_171, %c0_172] : memref<16x16x8xf32, #tpu.memory_space<vmem>>, vector<16x16x8xf32>
    %cst_173 = arith.constant dense<0.000000e+00> : vector<16x16x8xf32>
    %125 = tpu.matmul %121, %123, %cst_173 {dimension_numbers = #tpu.dot_dimension_numbers<[2], [0], [0, 1], [1], [0, 0, 0, 1, 1, 1], [], []>} : vector<16x16x28xf32>, vector<28x8xf32>, vector<16x16x8xf32> -> vector<16x16x8xf32>
    %126 = arith.addf %124, %125 : vector<16x16x8xf32>
    %c0_174 = arith.constant 0 : index
    %c0_175 = arith.constant 0 : index
    %c0_176 = arith.constant 0 : index
    %127 = vector.load %arg8[%c0_174, %c0_175, %c0_176] : memref<16x16x8xf32, #tpu.memory_space<vmem>>, vector<16x16x8xf32>
    tpu.vector_store %arg8[%c0_174, %c0_175, %c0_176], %126 {strides = array<i32>} : memref<16x16x8xf32, #tpu.memory_space<vmem>>, vector<16x16x8xf32>,
    %c0_177 = arith.constant 0 : index
    %c2_178 = arith.constant 2 : index
    %c0_179 = arith.constant 0 : index
    %128 = vector.load %arg7[%c0_177, %c2_178, %c0_179] : memref<18x18x28xf32, #tpu.memory_space<vmem>>, vector<18x16x28xf32>
    %129 = vector.extract_strided_slice %128 {offsets = [0, 0, 0], sizes = [16, 16, 28], strides = [1, 1, 1]} : vector<18x16x28xf32> to vector<16x16x28xf32>
    %c11 = arith.constant 11 : index
    %c0_180 = arith.constant 0 : index
    %c0_181 = arith.constant 0 : index
    %130 = vector.load %arg2[%c11, %c0_180, %c0_181] : memref<27x28x8xf32, #tpu.memory_space<vmem>>, vector<1x28x8xf32>
    %131 = vector.shape_cast %130 : vector<1x28x8xf32> to vector<28x8xf32>
    %c0_182 = arith.constant 0 : index
    %c0_183 = arith.constant 0 : index
    %c0_184 = arith.constant 0 : index
    %132 = vector.load %arg8[%c0_182, %c0_183, %c0_184] : memref<16x16x8xf32, #tpu.memory_space<vmem>>, vector<16x16x8xf32>
    %cst_185 = arith.constant dense<0.000000e+00> : vector<16x16x8xf32>
    %133 = tpu.matmul %129, %131, %cst_185 {dimension_numbers = #tpu.dot_dimension_numbers<[2], [0], [0, 1], [1], [0, 0, 0, 1, 1, 1], [], []>} : vector<16x16x28xf32>, vector<28x8xf32>, vector<16x16x8xf32> -> vector<16x16x8xf32>
    %134 = arith.addf %132, %133 : vector<16x16x8xf32>
    %c0_186 = arith.constant 0 : index
    %c0_187 = arith.constant 0 : index
    %c0_188 = arith.constant 0 : index
    %135 = vector.load %arg8[%c0_186, %c0_187, %c0_188] : memref<16x16x8xf32, #tpu.memory_space<vmem>>, vector<16x16x8xf32>
    tpu.vector_store %arg8[%c0_186, %c0_187, %c0_188], %134 {strides = array<i32>} : memref<16x16x8xf32, #tpu.memory_space<vmem>>, vector<16x16x8xf32>,
    %136 = vector.extract_strided_slice %128 {offsets = [1, 0, 0], sizes = [16, 16, 28], strides = [1, 1, 1]} : vector<18x16x28xf32> to vector<16x16x28xf32>
    %c14 = arith.constant 14 : index
    %c0_189 = arith.constant 0 : index
    %c0_190 = arith.constant 0 : index
    %137 = vector.load %arg2[%c14, %c0_189, %c0_190] : memref<27x28x8xf32, #tpu.memory_space<vmem>>, vector<1x28x8xf32>
    %138 = vector.shape_cast %137 : vector<1x28x8xf32> to vector<28x8xf32>
    %c0_191 = arith.constant 0 : index
    %c0_192 = arith.constant 0 : index
    %c0_193 = arith.constant 0 : index
    %139 = vector.load %arg8[%c0_191, %c0_192, %c0_193] : memref<16x16x8xf32, #tpu.memory_space<vmem>>, vector<16x16x8xf32>
    %cst_194 = arith.constant dense<0.000000e+00> : vector<16x16x8xf32>
    %140 = tpu.matmul %136, %138, %cst_194 {dimension_numbers = #tpu.dot_dimension_numbers<[2], [0], [0, 1], [1], [0, 0, 0, 1, 1, 1], [], []>} : vector<16x16x28xf32>, vector<28x8xf32>, vector<16x16x8xf32> -> vector<16x16x8xf32>
    %141 = arith.addf %139, %140 : vector<16x16x8xf32>
    %c0_195 = arith.constant 0 : index
    %c0_196 = arith.constant 0 : index
    %c0_197 = arith.constant 0 : index
    %142 = vector.load %arg8[%c0_195, %c0_196, %c0_197] : memref<16x16x8xf32, #tpu.memory_space<vmem>>, vector<16x16x8xf32>
    tpu.vector_store %arg8[%c0_195, %c0_196, %c0_197], %141 {strides = array<i32>} : memref<16x16x8xf32, #tpu.memory_space<vmem>>, vector<16x16x8xf32>,
    %143 = vector.extract_strided_slice %128 {offsets = [2, 0, 0], sizes = [16, 16, 28], strides = [1, 1, 1]} : vector<18x16x28xf32> to vector<16x16x28xf32>
    %c17 = arith.constant 17 : index
    %c0_198 = arith.constant 0 : index
    %c0_199 = arith.constant 0 : index
    %144 = vector.load %arg2[%c17, %c0_198, %c0_199] : memref<27x28x8xf32, #tpu.memory_space<vmem>>, vector<1x28x8xf32>
    %145 = vector.shape_cast %144 : vector<1x28x8xf32> to vector<28x8xf32>
    %c0_200 = arith.constant 0 : index
    %c0_201 = arith.constant 0 : index
    %c0_202 = arith.constant 0 : index
    %146 = vector.load %arg8[%c0_200, %c0_201, %c0_202] : memref<16x16x8xf32, #tpu.memory_space<vmem>>, vector<16x16x8xf32>
    %cst_203 = arith.constant dense<0.000000e+00> : vector<16x16x8xf32>
    %147 = tpu.matmul %143, %145, %cst_203 {dimension_numbers = #tpu.dot_dimension_numbers<[2], [0], [0, 1], [1], [0, 0, 0, 1, 1, 1], [], []>} : vector<16x16x28xf32>, vector<28x8xf32>, vector<16x16x8xf32> -> vector<16x16x8xf32>
    %148 = arith.addf %146, %147 : vector<16x16x8xf32>
    %c0_204 = arith.constant 0 : index
    %c0_205 = arith.constant 0 : index
    %c0_206 = arith.constant 0 : index
    %149 = vector.load %arg8[%c0_204, %c0_205, %c0_206] : memref<16x16x8xf32, #tpu.memory_space<vmem>>, vector<16x16x8xf32>
    tpu.vector_store %arg8[%c0_204, %c0_205, %c0_206], %148 {strides = array<i32>} : memref<16x16x8xf32, #tpu.memory_space<vmem>>, vector<16x16x8xf32>,
    %c0_207 = arith.constant 0 : index
    %c0_208 = arith.constant 0 : index
    %c0_209 = arith.constant 0 : index
    %150 = vector.load %arg8[%c0_207, %c0_208, %c0_209] : memref<16x16x8xf32, #tpu.memory_space<vmem>>, vector<16x16x8xf32>
    %c1_210 = arith.constant 1 : index
    %c0_211 = arith.constant 0 : index
    %151 = vector.load %arg3[%c1_210, %c0_211] : memref<3x8xf32, #tpu.memory_space<vmem>>, vector<1x8xf32>
    %152 = vector.shape_cast %151 : vector<1x8xf32> to vector<8xf32>
    %153 = vector.shape_cast %152 : vector<8xf32> to vector<1x1x8xf32>
    %154 = vector.broadcast %153 : vector<1x1x8xf32> to vector<16x16x8xf32>
    %155 = arith.addf %150, %154 : vector<16x16x8xf32>
    %cst_212 = arith.constant 0.000000e+00 : f32
    %156 = vector.broadcast %cst_212 : f32 to vector<16x16x8xf32>
    %157 = arith.maximumf %155, %156 : vector<16x16x8xf32>
    %c1_213 = arith.constant 1 : index
    %c1_214 = arith.constant 1 : index
    %c12_215 = arith.constant 12 : index
    %158 = vector.load %arg7[%c1_213, %c1_214, %c12_215] : memref<18x18x28xf32, #tpu.memory_space<vmem>>, vector<16x16x8xf32>
    tpu.vector_store %arg7[%c1_213, %c1_214, %c12_215], %157 {strides = array<i32>} : memref<18x18x28xf32, #tpu.memory_space<vmem>>, vector<16x16x8xf32>,
    %cst_216 = arith.constant 0.000000e+00 : f32
    %159 = vector.broadcast %cst_216 : f32 to vector<16x16x8xf32>
    %c0_217 = arith.constant 0 : index
    %c0_218 = arith.constant 0 : index
    %c0_219 = arith.constant 0 : index
    %160 = vector.load %arg8[%c0_217, %c0_218, %c0_219] : memref<16x16x8xf32, #tpu.memory_space<vmem>>, vector<16x16x8xf32>
    tpu.vector_store %arg8[%c0_217, %c0_218, %c0_219], %159 {strides = array<i32>} : memref<16x16x8xf32, #tpu.memory_space<vmem>>, vector<16x16x8xf32>,
    %c0_220 = arith.constant 0 : index
    %c0_221 = arith.constant 0 : index
    %c0_222 = arith.constant 0 : index
    %161 = vector.load %arg7[%c0_220, %c0_221, %c0_222] : memref<18x18x28xf32, #tpu.memory_space<vmem>>, vector<18x16x28xf32>
    %162 = vector.extract_strided_slice %161 {offsets = [0, 0, 0], sizes = [16, 16, 28], strides = [1, 1, 1]} : vector<18x16x28xf32> to vector<16x16x28xf32>
    %c18 = arith.constant 18 : index
    %c0_223 = arith.constant 0 : index
    %c0_224 = arith.constant 0 : index
    %163 = vector.load %arg2[%c18, %c0_223, %c0_224] : memref<27x28x8xf32, #tpu.memory_space<vmem>>, vector<1x28x8xf32>
    %164 = vector.shape_cast %163 : vector<1x28x8xf32> to vector<28x8xf32>
    %c0_225 = arith.constant 0 : index
    %c0_226 = arith.constant 0 : index
    %c0_227 = arith.constant 0 : index
    %165 = vector.load %arg8[%c0_225, %c0_226, %c0_227] : memref<16x16x8xf32, #tpu.memory_space<vmem>>, vector<16x16x8xf32>
    %cst_228 = arith.constant dense<0.000000e+00> : vector<16x16x8xf32>
    %166 = tpu.matmul %162, %164, %cst_228 {dimension_numbers = #tpu.dot_dimension_numbers<[2], [0], [0, 1], [1], [0, 0, 0, 1, 1, 1], [], []>} : vector<16x16x28xf32>, vector<28x8xf32>, vector<16x16x8xf32> -> vector<16x16x8xf32>
    %167 = arith.addf %165, %166 : vector<16x16x8xf32>
    %c0_229 = arith.constant 0 : index
    %c0_230 = arith.constant 0 : index
    %c0_231 = arith.constant 0 : index
    %168 = vector.load %arg8[%c0_229, %c0_230, %c0_231] : memref<16x16x8xf32, #tpu.memory_space<vmem>>, vector<16x16x8xf32>
    tpu.vector_store %arg8[%c0_229, %c0_230, %c0_231], %167 {strides = array<i32>} : memref<16x16x8xf32, #tpu.memory_space<vmem>>, vector<16x16x8xf32>,
    %169 = vector.extract_strided_slice %161 {offsets = [1, 0, 0], sizes = [16, 16, 28], strides = [1, 1, 1]} : vector<18x16x28xf32> to vector<16x16x28xf32>
    %c21 = arith.constant 21 : index
    %c0_232 = arith.constant 0 : index
    %c0_233 = arith.constant 0 : index
    %170 = vector.load %arg2[%c21, %c0_232, %c0_233] : memref<27x28x8xf32, #tpu.memory_space<vmem>>, vector<1x28x8xf32>
    %171 = vector.shape_cast %170 : vector<1x28x8xf32> to vector<28x8xf32>
    %c0_234 = arith.constant 0 : index
    %c0_235 = arith.constant 0 : index
    %c0_236 = arith.constant 0 : index
    %172 = vector.load %arg8[%c0_234, %c0_235, %c0_236] : memref<16x16x8xf32, #tpu.memory_space<vmem>>, vector<16x16x8xf32>
    %cst_237 = arith.constant dense<0.000000e+00> : vector<16x16x8xf32>
    %173 = tpu.matmul %169, %171, %cst_237 {dimension_numbers = #tpu.dot_dimension_numbers<[2], [0], [0, 1], [1], [0, 0, 0, 1, 1, 1], [], []>} : vector<16x16x28xf32>, vector<28x8xf32>, vector<16x16x8xf32> -> vector<16x16x8xf32>
    %174 = arith.addf %172, %173 : vector<16x16x8xf32>
    %c0_238 = arith.constant 0 : index
    %c0_239 = arith.constant 0 : index
    %c0_240 = arith.constant 0 : index
    %175 = vector.load %arg8[%c0_238, %c0_239, %c0_240] : memref<16x16x8xf32, #tpu.memory_space<vmem>>, vector<16x16x8xf32>
    tpu.vector_store %arg8[%c0_238, %c0_239, %c0_240], %174 {strides = array<i32>} : memref<16x16x8xf32, #tpu.memory_space<vmem>>, vector<16x16x8xf32>,
    %176 = vector.extract_strided_slice %161 {offsets = [2, 0, 0], sizes = [16, 16, 28], strides = [1, 1, 1]} : vector<18x16x28xf32> to vector<16x16x28xf32>
    %c24 = arith.constant 24 : index
    %c0_241 = arith.constant 0 : index
    %c0_242 = arith.constant 0 : index
    %177 = vector.load %arg2[%c24, %c0_241, %c0_242] : memref<27x28x8xf32, #tpu.memory_space<vmem>>, vector<1x28x8xf32>
    %178 = vector.shape_cast %177 : vector<1x28x8xf32> to vector<28x8xf32>
    %c0_243 = arith.constant 0 : index
    %c0_244 = arith.constant 0 : index
    %c0_245 = arith.constant 0 : index
    %179 = vector.load %arg8[%c0_243, %c0_244, %c0_245] : memref<16x16x8xf32, #tpu.memory_space<vmem>>, vector<16x16x8xf32>
    %cst_246 = arith.constant dense<0.000000e+00> : vector<16x16x8xf32>
    %180 = tpu.matmul %176, %178, %cst_246 {dimension_numbers = #tpu.dot_dimension_numbers<[2], [0], [0, 1], [1], [0, 0, 0, 1, 1, 1], [], []>} : vector<16x16x28xf32>, vector<28x8xf32>, vector<16x16x8xf32> -> vector<16x16x8xf32>
    %181 = arith.addf %179, %180 : vector<16x16x8xf32>
    %c0_247 = arith.constant 0 : index
    %c0_248 = arith.constant 0 : index
    %c0_249 = arith.constant 0 : index
    %182 = vector.load %arg8[%c0_247, %c0_248, %c0_249] : memref<16x16x8xf32, #tpu.memory_space<vmem>>, vector<16x16x8xf32>
    tpu.vector_store %arg8[%c0_247, %c0_248, %c0_249], %181 {strides = array<i32>} : memref<16x16x8xf32, #tpu.memory_space<vmem>>, vector<16x16x8xf32>,
    %c0_250 = arith.constant 0 : index
    %c1_251 = arith.constant 1 : index
    %c0_252 = arith.constant 0 : index
    %183 = vector.load %arg7[%c0_250, %c1_251, %c0_252] : memref<18x18x28xf32, #tpu.memory_space<vmem>>, vector<18x16x28xf32>
    %184 = vector.extract_strided_slice %183 {offsets = [0, 0, 0], sizes = [16, 16, 28], strides = [1, 1, 1]} : vector<18x16x28xf32> to vector<16x16x28xf32>
    %c19 = arith.constant 19 : index
    %c0_253 = arith.constant 0 : index
    %c0_254 = arith.constant 0 : index
    %185 = vector.load %arg2[%c19, %c0_253, %c0_254] : memref<27x28x8xf32, #tpu.memory_space<vmem>>, vector<1x28x8xf32>
    %186 = vector.shape_cast %185 : vector<1x28x8xf32> to vector<28x8xf32>
    %c0_255 = arith.constant 0 : index
    %c0_256 = arith.constant 0 : index
    %c0_257 = arith.constant 0 : index
    %187 = vector.load %arg8[%c0_255, %c0_256, %c0_257] : memref<16x16x8xf32, #tpu.memory_space<vmem>>, vector<16x16x8xf32>
    %cst_258 = arith.constant dense<0.000000e+00> : vector<16x16x8xf32>
    %188 = tpu.matmul %184, %186, %cst_258 {dimension_numbers = #tpu.dot_dimension_numbers<[2], [0], [0, 1], [1], [0, 0, 0, 1, 1, 1], [], []>} : vector<16x16x28xf32>, vector<28x8xf32>, vector<16x16x8xf32> -> vector<16x16x8xf32>
    %189 = arith.addf %187, %188 : vector<16x16x8xf32>
    %c0_259 = arith.constant 0 : index
    %c0_260 = arith.constant 0 : index
    %c0_261 = arith.constant 0 : index
    %190 = vector.load %arg8[%c0_259, %c0_260, %c0_261] : memref<16x16x8xf32, #tpu.memory_space<vmem>>, vector<16x16x8xf32>
    tpu.vector_store %arg8[%c0_259, %c0_260, %c0_261], %189 {strides = array<i32>} : memref<16x16x8xf32, #tpu.memory_space<vmem>>, vector<16x16x8xf32>,
    %191 = vector.extract_strided_slice %183 {offsets = [1, 0, 0], sizes = [16, 16, 28], strides = [1, 1, 1]} : vector<18x16x28xf32> to vector<16x16x28xf32>
    %c22 = arith.constant 22 : index
    %c0_262 = arith.constant 0 : index
    %c0_263 = arith.constant 0 : index
    %192 = vector.load %arg2[%c22, %c0_262, %c0_263] : memref<27x28x8xf32, #tpu.memory_space<vmem>>, vector<1x28x8xf32>
    %193 = vector.shape_cast %192 : vector<1x28x8xf32> to vector<28x8xf32>
    %c0_264 = arith.constant 0 : index
    %c0_265 = arith.constant 0 : index
    %c0_266 = arith.constant 0 : index
    %194 = vector.load %arg8[%c0_264, %c0_265, %c0_266] : memref<16x16x8xf32, #tpu.memory_space<vmem>>, vector<16x16x8xf32>
    %cst_267 = arith.constant dense<0.000000e+00> : vector<16x16x8xf32>
    %195 = tpu.matmul %191, %193, %cst_267 {dimension_numbers = #tpu.dot_dimension_numbers<[2], [0], [0, 1], [1], [0, 0, 0, 1, 1, 1], [], []>} : vector<16x16x28xf32>, vector<28x8xf32>, vector<16x16x8xf32> -> vector<16x16x8xf32>
    %196 = arith.addf %194, %195 : vector<16x16x8xf32>
    %c0_268 = arith.constant 0 : index
    %c0_269 = arith.constant 0 : index
    %c0_270 = arith.constant 0 : index
    %197 = vector.load %arg8[%c0_268, %c0_269, %c0_270] : memref<16x16x8xf32, #tpu.memory_space<vmem>>, vector<16x16x8xf32>
    tpu.vector_store %arg8[%c0_268, %c0_269, %c0_270], %196 {strides = array<i32>} : memref<16x16x8xf32, #tpu.memory_space<vmem>>, vector<16x16x8xf32>,
    %198 = vector.extract_strided_slice %183 {offsets = [2, 0, 0], sizes = [16, 16, 28], strides = [1, 1, 1]} : vector<18x16x28xf32> to vector<16x16x28xf32>
    %c25 = arith.constant 25 : index
    %c0_271 = arith.constant 0 : index
    %c0_272 = arith.constant 0 : index
    %199 = vector.load %arg2[%c25, %c0_271, %c0_272] : memref<27x28x8xf32, #tpu.memory_space<vmem>>, vector<1x28x8xf32>
    %200 = vector.shape_cast %199 : vector<1x28x8xf32> to vector<28x8xf32>
    %c0_273 = arith.constant 0 : index
    %c0_274 = arith.constant 0 : index
    %c0_275 = arith.constant 0 : index
    %201 = vector.load %arg8[%c0_273, %c0_274, %c0_275] : memref<16x16x8xf32, #tpu.memory_space<vmem>>, vector<16x16x8xf32>
    %cst_276 = arith.constant dense<0.000000e+00> : vector<16x16x8xf32>
    %202 = tpu.matmul %198, %200, %cst_276 {dimension_numbers = #tpu.dot_dimension_numbers<[2], [0], [0, 1], [1], [0, 0, 0, 1, 1, 1], [], []>} : vector<16x16x28xf32>, vector<28x8xf32>, vector<16x16x8xf32> -> vector<16x16x8xf32>
    %203 = arith.addf %201, %202 : vector<16x16x8xf32>
    %c0_277 = arith.constant 0 : index
    %c0_278 = arith.constant 0 : index
    %c0_279 = arith.constant 0 : index
    %204 = vector.load %arg8[%c0_277, %c0_278, %c0_279] : memref<16x16x8xf32, #tpu.memory_space<vmem>>, vector<16x16x8xf32>
    tpu.vector_store %arg8[%c0_277, %c0_278, %c0_279], %203 {strides = array<i32>} : memref<16x16x8xf32, #tpu.memory_space<vmem>>, vector<16x16x8xf32>,
    %c0_280 = arith.constant 0 : index
    %c2_281 = arith.constant 2 : index
    %c0_282 = arith.constant 0 : index
    %205 = vector.load %arg7[%c0_280, %c2_281, %c0_282] : memref<18x18x28xf32, #tpu.memory_space<vmem>>, vector<18x16x28xf32>
    %206 = vector.extract_strided_slice %205 {offsets = [0, 0, 0], sizes = [16, 16, 28], strides = [1, 1, 1]} : vector<18x16x28xf32> to vector<16x16x28xf32>
    %c20 = arith.constant 20 : index
    %c0_283 = arith.constant 0 : index
    %c0_284 = arith.constant 0 : index
    %207 = vector.load %arg2[%c20, %c0_283, %c0_284] : memref<27x28x8xf32, #tpu.memory_space<vmem>>, vector<1x28x8xf32>
    %208 = vector.shape_cast %207 : vector<1x28x8xf32> to vector<28x8xf32>
    %c0_285 = arith.constant 0 : index
    %c0_286 = arith.constant 0 : index
    %c0_287 = arith.constant 0 : index
    %209 = vector.load %arg8[%c0_285, %c0_286, %c0_287] : memref<16x16x8xf32, #tpu.memory_space<vmem>>, vector<16x16x8xf32>
    %cst_288 = arith.constant dense<0.000000e+00> : vector<16x16x8xf32>
    %210 = tpu.matmul %206, %208, %cst_288 {dimension_numbers = #tpu.dot_dimension_numbers<[2], [0], [0, 1], [1], [0, 0, 0, 1, 1, 1], [], []>} : vector<16x16x28xf32>, vector<28x8xf32>, vector<16x16x8xf32> -> vector<16x16x8xf32>
    %211 = arith.addf %209, %210 : vector<16x16x8xf32>
    %c0_289 = arith.constant 0 : index
    %c0_290 = arith.constant 0 : index
    %c0_291 = arith.constant 0 : index
    %212 = vector.load %arg8[%c0_289, %c0_290, %c0_291] : memref<16x16x8xf32, #tpu.memory_space<vmem>>, vector<16x16x8xf32>
    tpu.vector_store %arg8[%c0_289, %c0_290, %c0_291], %211 {strides = array<i32>} : memref<16x16x8xf32, #tpu.memory_space<vmem>>, vector<16x16x8xf32>,
    %213 = vector.extract_strided_slice %205 {offsets = [1, 0, 0], sizes = [16, 16, 28], strides = [1, 1, 1]} : vector<18x16x28xf32> to vector<16x16x28xf32>
    %c23 = arith.constant 23 : index
    %c0_292 = arith.constant 0 : index
    %c0_293 = arith.constant 0 : index
    %214 = vector.load %arg2[%c23, %c0_292, %c0_293] : memref<27x28x8xf32, #tpu.memory_space<vmem>>, vector<1x28x8xf32>
    %215 = vector.shape_cast %214 : vector<1x28x8xf32> to vector<28x8xf32>
    %c0_294 = arith.constant 0 : index
    %c0_295 = arith.constant 0 : index
    %c0_296 = arith.constant 0 : index
    %216 = vector.load %arg8[%c0_294, %c0_295, %c0_296] : memref<16x16x8xf32, #tpu.memory_space<vmem>>, vector<16x16x8xf32>
    %cst_297 = arith.constant dense<0.000000e+00> : vector<16x16x8xf32>
    %217 = tpu.matmul %213, %215, %cst_297 {dimension_numbers = #tpu.dot_dimension_numbers<[2], [0], [0, 1], [1], [0, 0, 0, 1, 1, 1], [], []>} : vector<16x16x28xf32>, vector<28x8xf32>, vector<16x16x8xf32> -> vector<16x16x8xf32>
    %218 = arith.addf %216, %217 : vector<16x16x8xf32>
    %c0_298 = arith.constant 0 : index
    %c0_299 = arith.constant 0 : index
    %c0_300 = arith.constant 0 : index
    %219 = vector.load %arg8[%c0_298, %c0_299, %c0_300] : memref<16x16x8xf32, #tpu.memory_space<vmem>>, vector<16x16x8xf32>
    tpu.vector_store %arg8[%c0_298, %c0_299, %c0_300], %218 {strides = array<i32>} : memref<16x16x8xf32, #tpu.memory_space<vmem>>, vector<16x16x8xf32>,
    %220 = vector.extract_strided_slice %205 {offsets = [2, 0, 0], sizes = [16, 16, 28], strides = [1, 1, 1]} : vector<18x16x28xf32> to vector<16x16x28xf32>
    %c26 = arith.constant 26 : index
    %c0_301 = arith.constant 0 : index
    %c0_302 = arith.constant 0 : index
    %221 = vector.load %arg2[%c26, %c0_301, %c0_302] : memref<27x28x8xf32, #tpu.memory_space<vmem>>, vector<1x28x8xf32>
    %222 = vector.shape_cast %221 : vector<1x28x8xf32> to vector<28x8xf32>
    %c0_303 = arith.constant 0 : index
    %c0_304 = arith.constant 0 : index
    %c0_305 = arith.constant 0 : index
    %223 = vector.load %arg8[%c0_303, %c0_304, %c0_305] : memref<16x16x8xf32, #tpu.memory_space<vmem>>, vector<16x16x8xf32>
    %cst_306 = arith.constant dense<0.000000e+00> : vector<16x16x8xf32>
    %224 = tpu.matmul %220, %222, %cst_306 {dimension_numbers = #tpu.dot_dimension_numbers<[2], [0], [0, 1], [1], [0, 0, 0, 1, 1, 1], [], []>} : vector<16x16x28xf32>, vector<28x8xf32>, vector<16x16x8xf32> -> vector<16x16x8xf32>
    %225 = arith.addf %223, %224 : vector<16x16x8xf32>
    %c0_307 = arith.constant 0 : index
    %c0_308 = arith.constant 0 : index
    %c0_309 = arith.constant 0 : index
    %226 = vector.load %arg8[%c0_307, %c0_308, %c0_309] : memref<16x16x8xf32, #tpu.memory_space<vmem>>, vector<16x16x8xf32>
    tpu.vector_store %arg8[%c0_307, %c0_308, %c0_309], %225 {strides = array<i32>} : memref<16x16x8xf32, #tpu.memory_space<vmem>>, vector<16x16x8xf32>,
    %c0_310 = arith.constant 0 : index
    %c0_311 = arith.constant 0 : index
    %c0_312 = arith.constant 0 : index
    %227 = vector.load %arg8[%c0_310, %c0_311, %c0_312] : memref<16x16x8xf32, #tpu.memory_space<vmem>>, vector<16x16x8xf32>
    %c2_313 = arith.constant 2 : index
    %c0_314 = arith.constant 0 : index
    %228 = vector.load %arg3[%c2_313, %c0_314] : memref<3x8xf32, #tpu.memory_space<vmem>>, vector<1x8xf32>
    %229 = vector.shape_cast %228 : vector<1x8xf32> to vector<8xf32>
    %230 = vector.shape_cast %229 : vector<8xf32> to vector<1x1x8xf32>
    %231 = vector.broadcast %230 : vector<1x1x8xf32> to vector<16x16x8xf32>
    %232 = arith.addf %227, %231 : vector<16x16x8xf32>
    %cst_315 = arith.constant 0.000000e+00 : f32
    %233 = vector.broadcast %cst_315 : f32 to vector<16x16x8xf32>
    %234 = arith.maximumf %232, %233 : vector<16x16x8xf32>
    %c1_316 = arith.constant 1 : index
    %c1_317 = arith.constant 1 : index
    %c20_318 = arith.constant 20 : index
    %235 = vector.load %arg7[%c1_316, %c1_317, %c20_318] : memref<18x18x28xf32, #tpu.memory_space<vmem>>, vector<16x16x8xf32>
    tpu.vector_store %arg7[%c1_316, %c1_317, %c20_318], %234 {strides = array<i32>} : memref<18x18x28xf32, #tpu.memory_space<vmem>>, vector<16x16x8xf32>,
    %c1_319 = arith.constant 1 : index
    %c1_320 = arith.constant 1 : index
    %c0_321 = arith.constant 0 : index
    %236 = vector.load %arg7[%c1_319, %c1_320, %c0_321] : memref<18x18x28xf32, #tpu.memory_space<vmem>>, vector<16x16x28xf32>
    %c0_322 = arith.constant 0 : index
    %c0_323 = arith.constant 0 : index
    %237 = vector.load %arg4[%c0_322, %c0_323] : memref<28x4xf32, #tpu.memory_space<vmem>>, vector<28x4xf32>
    %cst_324 = arith.constant dense<0.000000e+00> : vector<16x16x4xf32>
    %238 = tpu.matmul %236, %237, %cst_324 {dimension_numbers = #tpu.dot_dimension_numbers<[2], [0], [0, 1], [1], [0, 0, 0, 1, 1, 1], [], []>} : vector<16x16x28xf32>, vector<28x4xf32>, vector<16x16x4xf32> -> vector<16x16x4xf32>
    %c0_325 = arith.constant 0 : index
    %c0_326 = arith.constant 0 : index
    %239 = vector.load %arg5[%c0_325, %c0_326] : memref<1x4xf32, #tpu.memory_space<vmem>>, vector<1x4xf32>
    %240 = vector.shape_cast %239 : vector<1x4xf32> to vector<4xf32>
    %241 = vector.shape_cast %240 : vector<4xf32> to vector<1x1x4xf32>
    %242 = vector.broadcast %241 : vector<1x1x4xf32> to vector<16x16x4xf32>
    %243 = arith.addf %238, %242 : vector<16x16x4xf32>
    %c0_327 = arith.constant 0 : index
    %c0_328 = arith.constant 0 : index
    %c0_329 = arith.constant 0 : index
    %c0_330 = arith.constant 0 : index
    %244 = vector.load %arg1[%c0_327, %c0_328, %c0_329, %c0_330] : memref<1x16x16x4xf32, #tpu.memory_space<vmem>>, vector<1x16x16x4xf32>
    %245 = vector.shape_cast %244 : vector<1x16x16x4xf32> to vector<16x16x4xf32>
    %246 = arith.addf %245, %243 : vector<16x16x4xf32>
    %c0_331 = arith.constant 0 : index
    %c0_332 = arith.constant 0 : index
    %c0_333 = arith.constant 0 : index
    %c0_334 = arith.constant 0 : index
    %247 = vector.load %arg6[%c0_331, %c0_332, %c0_333, %c0_334] : memref<1x16x16x4xf32, #tpu.memory_space<vmem>>, vector<1x16x16x4xf32>
    %248 = vector.shape_cast %247 : vector<1x16x16x4xf32> to vector<16x16x4xf32>
    %249 = vector.shape_cast %246 : vector<16x16x4xf32> to vector<1x16x16x4xf32>
    tpu.vector_store %arg6[%c0_331, %c0_332, %c0_333, %c0_334], %249 {strides = array<i32>} : memref<1x16x16x4xf32, #tpu.memory_space<vmem>>, vector<1x16x16x4xf32>,
    return
  }
  func.func @transform_0(%arg0: i32) -> (i32, i32, i32, i32) {
    %c0_i32 = arith.constant 0 : i32
    %c0_i32_0 = arith.constant 0 : i32
    %c0_i32_1 = arith.constant 0 : i32
    %c0_i32_2 = arith.constant 0 : i32
    return %arg0, %c0_i32, %c0_i32_0, %c0_i32_1 : i32, i32, i32, i32
  }
  func.func @transform_1(%arg0: i32) -> (i32, i32, i32) {
    %c0_i32 = arith.constant 0 : i32
    %c0_i32_0 = arith.constant 0 : i32
    %c0_i32_1 = arith.constant 0 : i32
    %c0_i32_2 = arith.constant 0 : i32
    return %c0_i32, %c0_i32_0, %c0_i32_1 : i32, i32, i32
  }
  func.func @transform_2(%arg0: i32) -> (i32, i32) {
    %c0_i32 = arith.constant 0 : i32
    %c0_i32_0 = arith.constant 0 : i32
    %c0_i32_1 = arith.constant 0 : i32
    return %c0_i32, %c0_i32_0 : i32, i32
  }
  func.func @transform_3(%arg0: i32) -> (i32, i32) {
    %c0_i32 = arith.constant 0 : i32
    %c0_i32_0 = arith.constant 0 : i32
    %c0_i32_1 = arith.constant 0 : i32
    return %c0_i32, %c0_i32_0 : i32, i32
  }
  func.func @transform_4(%arg0: i32) -> (i32, i32) {
    %c0_i32 = arith.constant 0 : i32
    %c0_i32_0 = arith.constant 0 : i32
    %c0_i32_1 = arith.constant 0 : i32
    return %c0_i32, %c0_i32_0 : i32, i32
  }
  func.func @transform_5(%arg0: i32) -> (i32, i32, i32, i32) {
    %c0_i32 = arith.constant 0 : i32
    %c0_i32_0 = arith.constant 0 : i32
    %c0_i32_1 = arith.constant 0 : i32
    %c0_i32_2 = arith.constant 0 : i32
    return %arg0, %c0_i32, %c0_i32_0, %c0_i32_1 : i32, i32, i32, i32
  }
}

</mosaic_0001>

<bundles_post_ra>
// kernel: rdb_forward.1
= control target key start
LH: loop header
LB: loop body
LE: loop exit
PB: predicated region body
PF: predicated region fallthrough
CT: control target
= control target key end

     0   :  { %s15602_s18 = smov 0   ;;  %s19996_s0 = inlined_call_operand.vmem [shape: f32[2,16,16,4], index: 0, kind: input, shape index: {}]   ;;  %s19997_s1 = inlined_call_operand.vmem [shape: f32[27,28,8], index: 1, kind: input, shape index: {}]   ;;  %s19998_s2 = inlined_call_operand.vmem [shape: f32[3,8], index: 2, kind: input, shape index: {}]   ;;  %s19999_s3 = inlined_call_operand.vmem [shape: f32[28,4], index: 3, kind: input, shape index: {}]   ;;  %s20000_s4 = inlined_call_operand.vmem [shape: f32[1,4], index: 4, kind: input, shape index: {}]   ;;  %s20001_s5 = inlined_call_operand.vmem [shape: f32[2,16,16,4], index: 5, kind: output, shape index: {}]  }
   0x1 LB: > { %s11927_s19 = sadd.s32 4294967295, %s15566_s18   ;;  %p11931_p0 = scmp.ge.s32.totalorder %s15566_s18, 1  ;;  %s15566_s18 = sphi %s15602_s18, %s15_s18  }
   0x2   : > { %p187_p1 = scmp.lt.s32.totalorder %s15566_s18, 3 }
   0x4   : > { %p188_p2 = pnand %p11931_p0, %p187_p1 }
   0x5   : > { %p15706_p3 = scmp.lt.s32.totalorder (!%p188_p2), %s11927_s19, 1  ;;  %s15569_s6 = smov (!%p188_p2), 4  }
   0x6   : > { %191 = sbr.rel (%p188_p2) target bundleno = 2067 (0x813), region = 40  ;;  %s15570_s22 = smov (!%p188_p2), 12  }
   0x7   : > { %s15571_s24 = smov (!%p188_p2), 20  }
   0xb   : > { %v419_v0 = vld [vmem:[%s19997_s1 + $0x18] sm:$0xf]  ;;  %vm548_vm0 = vcmask 1043456   ;;  %v15616_v1 = vld [vmem:[%s19997_s1 + $0x10] sm:$0xff]  ;;  %vm225_vm1 = vcmask 228352   ;;  %v15626_v3 = vld [vmem:[%s19997_s1 + $0x8] sm:$0xff] }
   0xc   : > { %13980 = vmatprep.subr.msk.mxu0 %vm548_vm0, %v419_v0  ;;  %v11972_v2 = vld [vmem:[%s19997_s1 + $0x78] sm:$0xf]  ;;  %v15568_v4 = vmov 0.0   ;;  %v11971_v5 = vld [vmem:[%s19997_s1 + $0x70] sm:$0xff]  ;;  %vm228_vm2 = vcmask 222208   ;;  %v11970_v6 = vld [vmem:[%s19997_s1 + $0x68] sm:$0xff] }
   0xd   : > { %13981 = vmatpush3.msk.msra.mxu0 %vm548_vm0, %v419_v0  ;;  %226 = vst.msk [vmem:[#allocation2] sm:$0xff] %vm225_vm1, %v15568_v4  ;;  %227 = vst.msk [vmem:[#allocation2 + $0x8] sm:$0xff] %vm225_vm1, %v15568_v4  ;;  %14036 = vmatprep.subr.msk.mxu1 %vm548_vm0, %v11972_v2  ;;  %v416_v7 = vld [vmem:[%s19997_s1] sm:$0xff]  ;;  %s20004_s19 = smov (!%p15706_p3, %s11927_s19), 1  ;;  %v12009_v9 = vld [vmem:[%s19997_s1 + $0xd8] sm:$0xf] }
   0xe   : > { %230 = vst.msk [vmem:[#allocation2 + $0x18] sm:$0xff] %vm225_vm1, %v15568_v4  ;;  %231 = vst.msk [vmem:[#allocation2 + $0x20] sm:$0xff] %vm225_vm1, %v15568_v4  ;;  %13982 = vmatprep.subr.mxu0 %v15616_v1  ;;  %14037 = vmatpush3.msk.msra.mxu1 %vm548_vm0, %v11972_v2  ;;  %v11969_v8 = vld [vmem:[%s19997_s1 + $0x60] sm:$0xff]  ;;  %s12970_s14 = sshll.u32 %s20004_s19, 8  ;;  %vm314_vm3 = vcmask 31744   ;;  %v12008_v14 = vld [vmem:[%s19997_s1 + $0xd0] sm:$0xff] }
   0xf   : > { %233 = vst.msk [vmem:[#allocation2 + $0x30] sm:$0xff] %vm225_vm1, %v15568_v4  ;;  %234 = vst.msk [vmem:[#allocation2 + $0x38] sm:$0xff] %vm225_vm1, %v15568_v4  ;;  %13983 = vmatpush3.msra.mxu0 %v15616_v1  ;;  %14038 = vmatprep.subr.mxu1 %v11971_v5  ;;  %s15775_s17 = scalar_lea.vmem %s19996_s0, %s12970_s14  ;;  %v15780_v10 = vld [vmem:[%s19997_s1 + $0x38] sm:$0xf]  ;;  %v12007_v21 = vld [vmem:[%s19997_s1 + $0xc8] sm:$0xff]  ;;  %vm347_vm4 = vcmask 64512   ;;  %s19865_s29 = scalar_lea.vmem %s20001_s5, %s12970_s14 }
  0x10   : > { %236 = vst.msk [vmem:[#allocation2 + $0x48] sm:$0xff] %vm225_vm1, %v15568_v4  ;;  %237 = vst.msk [vmem:[#allocation2 + $0x50] sm:$0xff] %vm225_vm1, %v15568_v4  ;;  %13984 = vmatprep.subr.mxu0 %v15626_v3  ;;  %14039 = vmatpush3.msra.mxu1 %v11971_v5  ;;  %v281_v11 = vld [vmem:[%s15775_s17] sm:$0xff]  ;;  %v282_v12 = vld [vmem:[%s15775_s17 + $0x8] sm:$0xff]  ;;  %vm4002_vm5 = vcmask 97312   ;;  %vm7689_vm6 = vcmask 162912  }
  0x11   : > { %239 = vst.msk [vmem:[#allocation2 + $0x60] sm:$0xff] %vm225_vm1, %v15568_v4  ;;  %240 = vst.msk [vmem:[#allocation2 + $0x68] sm:$0xff] %vm225_vm1, %v15568_v4  ;;  %13985 = vmatpush3.msra.mxu0 %v15626_v3  ;;  %14040 = vmatprep.subr.mxu1 %v11970_v6  ;;  %v283_v13 = vld [vmem:[%s15775_s17 + $0x10] sm:$0xff]  ;;  %v284_v17 = vld [vmem:[%s15775_s17 + $0x18] sm:$0xff]  ;;  %vm11376_vm7 = vcmask 228512  }
  0x12   : > { %242 = vst.msk [vmem:[#allocation2 + $0x78] sm:$0xff] %vm225_vm1, %v15568_v4  ;;  %243 = vst.msk [vmem:[#allocation2 + $0x80] sm:$0xff] %vm225_vm1, %v15568_v4  ;;  %13986 = vmatprep.subr.mxu0 %v416_v7  ;;  %14041 = vmatpush3.msra.mxu1 %v11970_v6  ;;  %v285_v18 = vld [vmem:[%s15775_s17 + $0x20] sm:$0xff]  ;;  %v286_v19 = vld [vmem:[%s15775_s17 + $0x28] sm:$0xff] }
  0x13   : > { %245 = vst.msk [vmem:[#allocation2 + $0x90] sm:$0xff] %vm225_vm1, %v15568_v4  ;;  %246 = vst.msk [vmem:[#allocation2 + $0x98] sm:$0xff] %vm225_vm1, %v15568_v4  ;;  %13987 = vmatpush3.msra.mxu0 %v416_v7  ;;  %14042 = vmatprep.subr.mxu1 %v11969_v8  ;;  %v287_v20 = vld [vmem:[%s15775_s17 + $0x30] sm:$0xff]  ;;  %v288_v22 = vld [vmem:[%s15775_s17 + $0x38] sm:$0xff] }
  0x14   : > { %248 = vst.msk [vmem:[#allocation2 + $0xa8] sm:$0xff] %vm225_vm1, %v15568_v4  ;;  %249 = vst.msk [vmem:[#allocation2 + $0xb0] sm:$0xff] %vm225_vm1, %v15568_v4  ;;  %v380_v15 = vld [vmem:[#allocation2] sm:$0xff]  ;;  %v381_v16 = vld [vmem:[#allocation2 + $0x8] sm:$0xff]  ;;  %14092 = vmatprep.subr.msk.mxu0 %vm548_vm0, %v12009_v9  ;;  %14043 = vmatpush3.msra.mxu1 %v11969_v8 }
  0x15   : > { %251 = vst.msk [vmem:[#allocation2 + $0xc0] sm:$0xff] %vm225_vm1, %v15568_v4  ;;  %252 = vst.msk [vmem:[#allocation2 + $0xc8] sm:$0xff] %vm225_vm1, %v15568_v4  ;;  %13988 = vmatprep.mubr.msk.f32.mxu0 %vm225_vm1, %v380_v15  ;;  %14148 = vmatprep.subr.msk.mxu1 %vm548_vm0, %v15780_v10  ;;  %v289_v23 = vld [vmem:[%s15775_s17 + $0x40] sm:$0xff]  ;;  %v290_v24 = vld [vmem:[%s15775_s17 + $0x48] sm:$0xff] }
  0x16   : > { %254 = vst.msk [vmem:[#allocation2 + $0xd8] sm:$0xff] %vm225_vm1, %v15568_v4  ;;  %255 = vst.msk [vmem:[#allocation2 + $0xe0] sm:$0xff] %vm225_vm1, %v15568_v4  ;;  %13989 = vmatmul.mubr.msk.f32.vlgmr.msra.gmra.mxu0 %vm225_vm1, %v381_v16  ;;  %v291_v25 = vld [vmem:[%s15775_s17 + $0x50] sm:$0xff]  ;;  %v292_v26 = vld [vmem:[%s15775_s17 + $0x58] sm:$0xff] }
  0x17   : > { %257 = vst.msk [vmem:[#allocation2 + $0xf0] sm:$0xff] %vm225_vm1, %v15568_v4  ;;  %258 = vst.msk [vmem:[#allocation2 + $0xf8] sm:$0xff] %vm225_vm1, %v15568_v4  ;;  %14093 = vmatpush3.msk.msra.mxu0 %vm548_vm0, %v12009_v9  ;;  %v293_v27 = vld [vmem:[%s15775_s17 + $0x60] sm:$0xff]  ;;  %v294_v28 = vld [vmem:[%s15775_s17 + $0x68] sm:$0xff] }
  0x18   : > { %260 = vst.msk [vmem:[#allocation2 + $0x108] sm:$0xff] %vm225_vm1, %v15568_v4  ;;  %261 = vst.msk [vmem:[#allocation2 + $0x110] sm:$0xff] %vm225_vm1, %v15568_v4  ;;  %14094 = vmatprep.subr.mxu0 %v12008_v14  ;;  %v295_v29 = vld [vmem:[%s15775_s17 + $0x70] sm:$0xff]  ;;  %v296_v30 = vld [vmem:[%s15775_s17 + $0x78] sm:$0xff] }
  0x19   : > { %263 = vst.msk [vmem:[#allocation2 + $0x120] sm:$0xff] %vm225_vm1, %v15568_v4  ;;  %264 = vst.msk [vmem:[#allocation2 + $0x128] sm:$0xff] %vm225_vm1, %v15568_v4  ;;  %14095 = vmatpush3.msra.mxu0 %v12008_v14  ;;  %v297_v31 = vld [vmem:[%s15775_s17 + $0x80] sm:$0xff]  ;;  %v298_v32 = vld [vmem:[%s15775_s17 + $0x88] sm:$0xff] }
  0x1a   : > { %266 = vst.msk [vmem:[#allocation2 + $0x138] sm:$0xff] %vm225_vm1, %v15568_v4  ;;  %267 = vst.msk [vmem:[#allocation2 + $0x140] sm:$0xff] %vm225_vm1, %v15568_v4  ;;  %v299_v33 = vld [vmem:[%s15775_s17 + $0x90] sm:$0xff]  ;;  %14096 = vmatprep.subr.mxu0 %v12007_v21  ;;  %v300_v34 = vld [vmem:[%s15775_s17 + $0x98] sm:$0xff] }
  0x1b   : > { %269 = vst.msk [vmem:[#allocation2 + $0x150] sm:$0xff] %vm225_vm1, %v15568_v4  ;;  %270 = vst.msk [vmem:[#allocation2 + $0x158] sm:$0xff] %vm225_vm1, %v15568_v4  ;;  %v301_v35 = vld [vmem:[%s15775_s17 + $0xa0] sm:$0xff]  ;;  %v302_v36 = vld [vmem:[%s15775_s17 + $0xa8] sm:$0xff]  ;;  %14097 = vmatpush3.msra.mxu0 %v12007_v21 }
  0x1c   : > { %272 = vst.msk [vmem:[#allocation2 + $0x168] sm:$0xff] %vm225_vm1, %v15568_v4  ;;  %273 = vst.msk [vmem:[#allocation2 + $0x170] sm:$0xff] %vm225_vm1, %v15568_v4  ;;  %v303_v40 = vld [vmem:[%s15775_s17 + $0xb0] sm:$0xff]  ;;  %v304_v41 = vld [vmem:[%s15775_s17 + $0xb8] sm:$0xff] }
  0x1d   : > { %275 = vst.msk [vmem:[#allocation2 + $0x180] sm:$0xff] %vm225_vm1, %v15568_v4  ;;  %276 = vst.msk [vmem:[#allocation2 + $0x188] sm:$0xff] %vm225_vm1, %v15568_v4  ;;  %v12006_v42 = vld [vmem:[%s19997_s1 + $0xc0] sm:$0xff]  ;;  %v12045_v43 = vld [vmem:[%s19997_s1 + $0x30] sm:$0xff] }
  0x1e   : > { %278 = vst.msk [vmem:[#allocation2 + $0x198] sm:$0xff] %vm225_vm1, %v15568_v4  ;;  %279 = vst.msk [vmem:[#allocation2 + $0x1a0] sm:$0xff] %vm225_vm1, %v15568_v4  ;;  %14098 = vmatprep.subr.mxu0 %v12006_v42  ;;  %v15867_v46 = vld [vmem:[%s19997_s1 + $0x98] sm:$0xf]  ;;  %v12044_v47 = vld [vmem:[%s19997_s1 + $0x28] sm:$0xff] }
  0x1f   : > { %232 = vst.msk [vmem:[#allocation2 + $0x28] sm:$0x3] %vm228_vm2, %v15568_v4  ;;  %229 = vst.msk [vmem:[#allocation2 + $0x10] sm:$0x3] %vm228_vm2, %v15568_v4  ;;  %14099 = vmatpush3.msra.mxu0 %v12006_v42  ;;  %v305_v50 = vld [vmem:[%s15775_s17 + $0xc0] sm:$0xff]  ;;  %v306_v51 = vld [vmem:[%s15775_s17 + $0xc8] sm:$0xff] }
  0x20   : > { %235 = vst.msk [vmem:[#allocation2 + $0x40] sm:$0x3] %vm228_vm2, %v15568_v4  ;;  %238 = vst.msk [vmem:[#allocation2 + $0x58] sm:$0x3] %vm228_vm2, %v15568_v4  ;;  %v307_v52 = vld [vmem:[%s15775_s17 + $0xd0] sm:$0xff]  ;;  %14204 = vmatprep.subr.msk.mxu0 %vm548_vm0, %v15867_v46  ;;  %v308_v53 = vld [vmem:[%s15775_s17 + $0xd8] sm:$0xff] }
  0x21   : > { %241 = vst.msk [vmem:[#allocation2 + $0x70] sm:$0x3] %vm228_vm2, %v15568_v4  ;;  %244 = vst.msk [vmem:[#allocation2 + $0x88] sm:$0x3] %vm228_vm2, %v15568_v4  ;;  %v12043_v54 = vld [vmem:[%s19997_s1 + $0x20] sm:$0xff]  ;;  %v310_v56 = vld [vmem:[%s15775_s17 + $0xe8] sm:$0xff] }
  0x22   : > { %247 = vst.msk [vmem:[#allocation2 + $0xa0] sm:$0x3] %vm228_vm2, %v15568_v4  ;;  %250 = vst.msk [vmem:[#allocation2 + $0xb8] sm:$0x3] %vm228_vm2, %v15568_v4  ;;  %v309_v55 = vld [vmem:[%s15775_s17 + $0xe0] sm:$0xff]  ;;  %v311_v57 = vld [vmem:[%s15775_s17 + $0xf0] sm:$0xff] }
  0x23   : > { %253 = vst.msk [vmem:[#allocation2 + $0xd0] sm:$0x3] %vm228_vm2, %v15568_v4  ;;  %256 = vst.msk [vmem:[#allocation2 + $0xe8] sm:$0x3] %vm228_vm2, %v15568_v4  ;;  %v312_v59 = vld [vmem:[%s15775_s17 + $0xf8] sm:$0xff] }
  0x24   : > { %259 = vst.msk [vmem:[#allocation2 + $0x100] sm:$0x3] %vm228_vm2, %v15568_v4  ;;  %262 = vst.msk [vmem:[#allocation2 + $0x118] sm:$0x3] %vm228_vm2, %v15568_v4  ;;  %v15924_v61 = vld [vmem:[%s19997_s1 + $0xf8] sm:$0xf] }
  0x25   : > { %265 = vst.msk [vmem:[#allocation2 + $0x130] sm:$0x3] %vm228_vm2, %v15568_v4  ;;  %268 = vst.msk [vmem:[#allocation2 + $0x148] sm:$0x3] %vm228_vm2, %v15568_v4 }
  0x26   : > { %271 = vst.msk [vmem:[#allocation2 + $0x160] sm:$0x3] %vm228_vm2, %v15568_v4  ;;  %274 = vst.msk [vmem:[#allocation2 + $0x178] sm:$0x3] %vm228_vm2, %v15568_v4 }
  0x27   : > { %277 = vst.msk [vmem:[#allocation2 + $0x190] sm:$0x3] %vm228_vm2, %v15568_v4  ;;  %280 = vst.msk [vmem:[#allocation2 + $0x1a8] sm:$0x3] %vm228_vm2, %v15568_v4 }
  0x28   : > { %315 = vst.msk [vmem:[#allocation2 + $0x19] sm:$0xff] %vm314_vm3, %v281_v11  ;;  %316 = vst.msk [vmem:[#allocation2 + $0x21] sm:$0xff] %vm314_vm3, %v282_v12 }
  0x29   : > { %317 = vst.msk [vmem:[#allocation2 + $0x31] sm:$0xff] %vm314_vm3, %v283_v13  ;;  %318 = vst.msk [vmem:[#allocation2 + $0x39] sm:$0xff] %vm314_vm3, %v284_v17 }
  0x2a   : > { %319 = vst.msk [vmem:[#allocation2 + $0x49] sm:$0xff] %vm314_vm3, %v285_v18  ;;  %320 = vst.msk [vmem:[#allocation2 + $0x51] sm:$0xff] %vm314_vm3, %v286_v19 }
  0x2b   : > { %321 = vst.msk [vmem:[#allocation2 + $0x61] sm:$0xff] %vm314_vm3, %v287_v20  ;;  %322 = vst.msk [vmem:[#allocation2 + $0x69] sm:$0xff] %vm314_vm3, %v288_v22  ;;  %v1511_v22 = vld [vmem:[#allocation2 + $0x1] sm:$0xff] }
  0x2c   : > { %323 = vst.msk [vmem:[#allocation2 + $0x79] sm:$0xff] %vm314_vm3, %v289_v23  ;;  %324 = vst.msk [vmem:[#allocation2 + $0x81] sm:$0xff] %vm314_vm3, %v290_v24  ;;  %v12082_v23 = vld [vmem:[%s19997_s1 + $0x90] sm:$0xff] }
  0x2d   : > { %325 = vst.msk [vmem:[#allocation2 + $0x91] sm:$0xff] %vm314_vm3, %v291_v25  ;;  %326 = vst.msk [vmem:[#allocation2 + $0x99] sm:$0xff] %vm314_vm3, %v292_v26  ;;  %v1512_v24 = vld [vmem:[#allocation2 + $0x9] sm:$0xff] }
  0x2e   : > { %327 = vst.msk [vmem:[#allocation2 + $0xa9] sm:$0xff] %vm314_vm3, %v293_v27  ;;  %328 = vst.msk [vmem:[#allocation2 + $0xb1] sm:$0xff] %vm314_vm3, %v294_v28  ;;  %v12081_v26 = vld [vmem:[%s19997_s1 + $0x88] sm:$0xff]  ;;  %v12119_v27 = vld [vmem:[%s19997_s1 + $0xf0] sm:$0xff] }
  0x2f   : > { %329 = vst.msk [vmem:[#allocation2 + $0xc1] sm:$0xff] %vm314_vm3, %v295_v29  ;;  %330 = vst.msk [vmem:[#allocation2 + $0xc9] sm:$0xff] %vm314_vm3, %v296_v30  ;;  %v382_v37 = vld [vmem:[#allocation2 + $0x18] sm:$0xff]  ;;  %v383_v38 = vld [vmem:[#allocation2 + $0x20] sm:$0xff] }
  0x30   : > { %331 = vst.msk [vmem:[#allocation2 + $0xd9] sm:$0xff] %vm314_vm3, %v297_v31  ;;  %332 = vst.msk [vmem:[#allocation2 + $0xe1] sm:$0xff] %vm314_vm3, %v298_v32  ;;  %v15835_v39 = vld [vmem:[#allocation2 + $0x30] sm:$0xff]  ;;  %13991 = vmatprep.mubr.msk.f32.mxu0 %vm225_vm1, %v382_v37  ;;  %14044 = vmatprep.mubr.msk.f32.mxu1 %vm225_vm1, %v382_v37  ;;  %v15856_v44 = vld [vmem:[#allocation2 + $0x38] sm:$0xff] }
  0x31   : > { %333 = vst.msk [vmem:[#allocation2 + $0xf1] sm:$0xff] %vm314_vm3, %v299_v33  ;;  %334 = vst.msk [vmem:[#allocation2 + $0xf9] sm:$0xff] %vm314_vm3, %v300_v34  ;;  %13992 = vmatmul.mubr.msk.f32.gmra.mxu0 %vm225_vm1, %v383_v38  ;;  %14045 = vmatmul.mubr.msk.f32.vlgmr.msra.gmra.mxu1 %vm225_vm1, %v383_v38  ;;  %v15860_v45 = vld [vmem:[#allocation2 + $0x48] sm:$0xff]  ;;  %v15878_v48 = vld [vmem:[#allocation2 + $0x50] sm:$0xff] }
  0x32   : > { %335 = vst.msk [vmem:[#allocation2 + $0x109] sm:$0xff] %vm314_vm3, %v301_v35  ;;  %336 = vst.msk [vmem:[#allocation2 + $0x111] sm:$0xff] %vm314_vm3, %v302_v36  ;;  %13994 = vmatprep.mubr.msk.f32.mxu0 %vm225_vm1, %v15835_v39  ;;  %14047 = vmatprep.mubr.msk.f32.mxu1 %vm225_vm1, %v15835_v39  ;;  %v15880_v49 = vld [vmem:[#allocation2 + $0x60] sm:$0xff]  ;;  %v15906_v58 = vld [vmem:[#allocation2 + $0x68] sm:$0xff] }
  0x33   : > { %337 = vst.msk [vmem:[#allocation2 + $0x121] sm:$0xff] %vm314_vm3, %v303_v40  ;;  %338 = vst.msk [vmem:[#allocation2 + $0x129] sm:$0xff] %vm314_vm3, %v304_v41  ;;  %14149 = vmatpush3.msk.msra.mxu1 %vm548_vm0, %v15780_v10  ;;  %v15914_v60 = vld [vmem:[#allocation2 + $0x78] sm:$0xff]  ;;  %v15928_v62 = vld [vmem:[#allocation2 + $0x80] sm:$0xff] }
  0x34   : > { %14150 = vmatprep.subr.mxu1 %v12045_v43  ;;  %339 = vst.msk [vmem:[#allocation2 + $0x139] sm:$0xff] %vm314_vm3, %v305_v50  ;;  %340 = vst.msk [vmem:[#allocation2 + $0x141] sm:$0xff] %vm314_vm3, %v306_v51  ;;  %v15932_v63 = vld [vmem:[#allocation2 + $0x90] sm:$0xff]  ;;  %v15942_v0 = vld [vmem:[#allocation2 + $0x98] sm:$0xff] }
  0x35   : > { %13995 = vmatmul.mubr.msk.f32.gmra.mxu0 %vm225_vm1, %v15856_v44  ;;  %14048 = vmatmul.mubr.msk.f32.gmra.mxu1 %vm225_vm1, %v15856_v44  ;;  %341 = vst.msk [vmem:[#allocation2 + $0x151] sm:$0xff] %vm314_vm3, %v307_v52  ;;  %342 = vst.msk [vmem:[#allocation2 + $0x159] sm:$0xff] %vm314_vm3, %v308_v53  ;;  %v15946_v1 = vld [vmem:[#allocation2 + $0xa8] sm:$0xff]  ;;  %v15954_v2 = vld [vmem:[#allocation2 + $0xb0] sm:$0xff] }
  0x36   : > { %13997 = vmatprep.mubr.msk.f32.mxu0 %vm225_vm1, %v15860_v45  ;;  %14050 = vmatprep.mubr.msk.f32.mxu1 %vm225_vm1, %v15860_v45  ;;  %343 = vst.msk [vmem:[#allocation2 + $0x169] sm:$0xff] %vm314_vm3, %v309_v55  ;;  %344 = vst.msk [vmem:[#allocation2 + $0x171] sm:$0xff] %vm314_vm3, %v310_v56  ;;  %v15958_v3 = vld [vmem:[#allocation2 + $0xc0] sm:$0xff]  ;;  %v15966_v5 = vld [vmem:[#allocation2 + $0xc8] sm:$0xff] }
  0x37   : > { %14151 = vmatpush3.msra.mxu1 %v12045_v43  ;;  %345 = vst.msk [vmem:[#allocation2 + $0x181] sm:$0xff] %vm314_vm3, %v311_v57  ;;  %346 = vst.msk [vmem:[#allocation2 + $0x189] sm:$0xff] %vm314_vm3, %v312_v59  ;;  %v15970_v6 = vld [vmem:[#allocation2 + $0xd8] sm:$0xff]  ;;  %v15978_v7 = vld [vmem:[#allocation2 + $0xe0] sm:$0xff] }
  0x38   : > { %14152 = vmatprep.subr.mxu1 %v12044_v47  ;;  %v15982_v8 = vld [vmem:[#allocation2 + $0xf0] sm:$0xff]  ;;  %v15990_v9 = vld [vmem:[#allocation2 + $0xf8] sm:$0xff]  ;;  %349 = vst.msk [vmem:[#allocation3 + $0x8] sm:$0xff] %vm347_vm4, %v15568_v4  ;;  %348 = vst.msk [vmem:[#allocation3] sm:$0xff] %vm347_vm4, %v15568_v4 }
  0x39   : > { %13998 = vmatmul.mubr.msk.f32.gmra.mxu0 %vm225_vm1, %v15878_v48  ;;  %14051 = vmatmul.mubr.msk.f32.gmra.mxu1 %vm225_vm1, %v15878_v48  ;;  %v15994_v10 = vld [vmem:[#allocation2 + $0x108] sm:$0xff]  ;;  %v16002_v11 = vld [vmem:[#allocation2 + $0x110] sm:$0xff]  ;;  %350 = vst.msk [vmem:[#allocation3 + $0x10] sm:$0xff] %vm347_vm4, %v15568_v4  ;;  %351 = vst.msk [vmem:[#allocation3 + $0x18] sm:$0xff] %vm347_vm4, %v15568_v4 }
  0x3a   : > { %14000 = vmatprep.mubr.msk.f32.mxu0 %vm225_vm1, %v15880_v49  ;;  %14053 = vmatprep.mubr.msk.f32.mxu1 %vm225_vm1, %v15880_v49  ;;  %v16006_v12 = vld [vmem:[#allocation2 + $0x120] sm:$0xff]  ;;  %v16014_v13 = vld [vmem:[#allocation2 + $0x128] sm:$0xff]  ;;  %352 = vst.msk [vmem:[#allocation3 + $0x20] sm:$0xff] %vm347_vm4, %v15568_v4  ;;  %353 = vst.msk [vmem:[#allocation3 + $0x28] sm:$0xff] %vm347_vm4, %v15568_v4 }
  0x3b   : > { %14153 = vmatpush3.msra.mxu1 %v12044_v47  ;;  %v16018_v14 = vld [vmem:[#allocation2 + $0x138] sm:$0xff]  ;;  %v16026_v15 = vld [vmem:[#allocation2 + $0x140] sm:$0xff]  ;;  %354 = vst.msk [vmem:[#allocation3 + $0x30] sm:$0xff] %vm347_vm4, %v15568_v4  ;;  %355 = vst.msk [vmem:[#allocation3 + $0x38] sm:$0xff] %vm347_vm4, %v15568_v4 }
  0x3c   : > { %14154 = vmatprep.subr.mxu1 %v12043_v54  ;;  %v16030_v16 = vld [vmem:[#allocation2 + $0x150] sm:$0xff]  ;;  %v16038_v17 = vld [vmem:[#allocation2 + $0x158] sm:$0xff]  ;;  %356 = vst.msk [vmem:[#allocation3 + $0x40] sm:$0xff] %vm347_vm4, %v15568_v4  ;;  %357 = vst.msk [vmem:[#allocation3 + $0x48] sm:$0xff] %vm347_vm4, %v15568_v4 }
  0x3d   : > { %14001 = vmatmul.mubr.msk.f32.gmra.mxu0 %vm225_vm1, %v15906_v58  ;;  %14054 = vmatmul.mubr.msk.f32.gmra.mxu1 %vm225_vm1, %v15906_v58  ;;  %v16042_v18 = vld [vmem:[#allocation2 + $0x168] sm:$0xff]  ;;  %v16050_v19 = vld [vmem:[#allocation2 + $0x170] sm:$0xff]  ;;  %358 = vst.msk [vmem:[#allocation3 + $0x50] sm:$0xff] %vm347_vm4, %v15568_v4  ;;  %359 = vst.msk [vmem:[#allocation3 + $0x58] sm:$0xff] %vm347_vm4, %v15568_v4 }
  0x3e   : > { %14003 = vmatprep.mubr.msk.f32.mxu0 %vm225_vm1, %v15914_v60  ;;  %14056 = vmatprep.mubr.msk.f32.mxu1 %vm225_vm1, %v15914_v60  ;;  %360 = vst.msk [vmem:[#allocation3 + $0x60] sm:$0xff] %vm347_vm4, %v15568_v4  ;;  %361 = vst.msk [vmem:[#allocation3 + $0x68] sm:$0xff] %vm347_vm4, %v15568_v4  ;;  %v16118_v20 = vld [vmem:[#allocation2 + $0x180] sm:$0xff]  ;;  %v16128_v21 = vld [vmem:[#allocation2 + $0x188] sm:$0xff] }
  0x3f   : > { %14155 = vmatpush3.msra.mxu1 %v12043_v54  ;;  %362 = vst.msk [vmem:[#allocation3 + $0x70] sm:$0xff] %vm347_vm4, %v15568_v4  ;;  %363 = vst.msk [vmem:[#allocation3 + $0x78] sm:$0xff] %vm347_vm4, %v15568_v4  ;;  %v16142_v25 = vld [vmem:[#allocation2 + $0x19] sm:$0xff]  ;;  %v16157_v28 = vld [vmem:[#allocation2 + $0x21] sm:$0xff] }
  0x40   : > { %14260 = vmatprep.subr.msk.mxu1 %vm548_vm0, %v15924_v61  ;;  %364 = vst.msk [vmem:[#allocation3 + $0x80] sm:$0xff] %vm347_vm4, %v15568_v4  ;;  %365 = vst.msk [vmem:[#allocation3 + $0x88] sm:$0xff] %vm347_vm4, %v15568_v4  ;;  %v16159_v29 = vld [vmem:[#allocation2 + $0x31] sm:$0xff]  ;;  %v12080_v30 = vld [vmem:[%s19997_s1 + $0x80] sm:$0xff] }
  0x41   : > { %14004 = vmatmul.mubr.msk.f32.gmra.mxu0 %vm225_vm1, %v15928_v62  ;;  %14057 = vmatmul.mubr.msk.f32.gmra.mxu1 %vm225_vm1, %v15928_v62  ;;  %366 = vst.msk [vmem:[#allocation3 + $0x90] sm:$0xff] %vm347_vm4, %v15568_v4  ;;  %367 = vst.msk [vmem:[#allocation3 + $0x98] sm:$0xff] %vm347_vm4, %v15568_v4  ;;  %v12118_v31 = vld [vmem:[%s19997_s1 + $0xe8] sm:$0xff]  ;;  %v16177_v32 = vld [vmem:[#allocation2 + $0x39] sm:$0xff] }
  0x42   : > { %14006 = vmatprep.mubr.msk.f32.mxu0 %vm225_vm1, %v15932_v63  ;;  %14059 = vmatprep.mubr.msk.f32.mxu1 %vm225_vm1, %v15932_v63  ;;  %368 = vst.msk [vmem:[#allocation3 + $0xa0] sm:$0xff] %vm347_vm4, %v15568_v4  ;;  %369 = vst.msk [vmem:[#allocation3 + $0xa8] sm:$0xff] %vm347_vm4, %v15568_v4  ;;  %v16179_v33 = vld [vmem:[#allocation2 + $0x49] sm:$0xff]  ;;  %v16184_v34 = vld [vmem:[%s19997_s1 + $0x58] sm:$0xf] }
  0x43   : > { %370 = vst.msk [vmem:[#allocation3 + $0xb0] sm:$0xff] %vm347_vm4, %v15568_v4  ;;  %371 = vst.msk [vmem:[#allocation3 + $0xb8] sm:$0xff] %vm347_vm4, %v15568_v4  ;;  %v12117_v35 = vld [vmem:[%s19997_s1 + $0xe0] sm:$0xff]  ;;  %v16197_v36 = vld [vmem:[#allocation2 + $0x51] sm:$0xff] }
  0x44   : > { %372 = vst.msk [vmem:[#allocation3 + $0xc0] sm:$0xff] %vm347_vm4, %v15568_v4  ;;  %373 = vst.msk [vmem:[#allocation3 + $0xc8] sm:$0xff] %vm347_vm4, %v15568_v4  ;;  %v16199_v37 = vld [vmem:[#allocation2 + $0x61] sm:$0xff]  ;;  %v16210_v38 = vld [vmem:[%s19997_s1 + $0xb8] sm:$0xf] }
  0x45   : > { %14007 = vmatmul.mubr.msk.f32.gmra.mxu0 %vm225_vm1, %v15942_v0  ;;  %14060 = vmatmul.mubr.msk.f32.gmra.mxu1 %vm225_vm1, %v15942_v0  ;;  %374 = vst.msk [vmem:[#allocation3 + $0xd0] sm:$0xff] %vm347_vm4, %v15568_v4  ;;  %375 = vst.msk [vmem:[#allocation3 + $0xd8] sm:$0xff] %vm347_vm4, %v15568_v4  ;;  %v16218_v40 = vld [vmem:[#allocation2 + $0x79] sm:$0xff]  ;;  %v16230_v41 = vld [vmem:[#allocation2 + $0x81] sm:$0xff] }
  0x46   : > { %14009 = vmatprep.mubr.msk.f32.mxu0 %vm225_vm1, %v15946_v1  ;;  %14062 = vmatprep.mubr.msk.f32.mxu1 %vm225_vm1, %v15946_v1  ;;  %376 = vst.msk [vmem:[#allocation3 + $0xe0] sm:$0xff] %vm347_vm4, %v15568_v4  ;;  %377 = vst.msk [vmem:[#allocation3 + $0xe8] sm:$0xff] %vm347_vm4, %v15568_v4  ;;  %v16232_v42 = vld [vmem:[#allocation2 + $0x91] sm:$0xff]  ;;  %v16242_v43 = vld [vmem:[#allocation2 + $0x99] sm:$0xff] }
  0x47   : > { %378 = vst.msk [vmem:[#allocation3 + $0xf0] sm:$0xff] %vm347_vm4, %v15568_v4  ;;  %379 = vst.msk [vmem:[#allocation3 + $0xf8] sm:$0xff] %vm347_vm4, %v15568_v4  ;;  %v16266_v47 = vld [vmem:[#allocation2 + $0xc9] sm:$0xff]  ;;  %v16280_v50 = vld [vmem:[#allocation2 + $0xf1] sm:$0xff] }
  0x48   : > { %v16290_v51 = vld [vmem:[#allocation2 + $0xf9] sm:$0xff]  ;;  %v16292_v52 = vld [vmem:[#allocation2 + $0x109] sm:$0xff]  ;;  %v16302_v53 = vld [vmem:[#allocation2 + $0x111] sm:$0xff] }
  0x49   : > { %14010 = vmatmul.mubr.msk.f32.gmra.mxu0 %vm225_vm1, %v15954_v2  ;;  %14063 = vmatmul.mubr.msk.f32.gmra.mxu1 %vm225_vm1, %v15954_v2  ;;  %v16304_v54 = vld [vmem:[#allocation2 + $0x121] sm:$0xff]  ;;  %v16314_v55 = vld [vmem:[#allocation2 + $0x129] sm:$0xff]  ;;  %v16316_v56 = vld [vmem:[#allocation2 + $0x139] sm:$0xff] }
  0x4a   : > { %14012 = vmatprep.mubr.msk.f32.mxu0 %vm225_vm1, %v15958_v3  ;;  %14065 = vmatprep.mubr.msk.f32.mxu1 %vm225_vm1, %v15958_v3  ;;  %v16326_v57 = vld [vmem:[#allocation2 + $0x141] sm:$0xff]  ;;  %v16328_v59 = vld [vmem:[#allocation2 + $0x151] sm:$0xff] }
  0x4d   : > { %14013 = vmatmul.mubr.msk.f32.gmra.mxu0 %vm225_vm1, %v15966_v5  ;;  %14066 = vmatmul.mubr.msk.f32.gmra.mxu1 %vm225_vm1, %v15966_v5 }
  0x4e   : > { %14015 = vmatprep.mubr.msk.f32.mxu0 %vm225_vm1, %v15970_v6  ;;  %14068 = vmatprep.mubr.msk.f32.mxu1 %vm225_vm1, %v15970_v6 }
  0x51   : > { %14016 = vmatmul.mubr.msk.f32.gmra.mxu0 %vm225_vm1, %v15978_v7  ;;  %14069 = vmatmul.mubr.msk.f32.gmra.mxu1 %vm225_vm1, %v15978_v7 }
  0x52   : > { %14018 = vmatprep.mubr.msk.f32.mxu0 %vm225_vm1, %v15982_v8  ;;  %14071 = vmatprep.mubr.msk.f32.mxu1 %vm225_vm1, %v15982_v8 }
  0x55   : > { %14019 = vmatmul.mubr.msk.f32.gmra.mxu0 %vm225_vm1, %v15990_v9  ;;  %14072 = vmatmul.mubr.msk.f32.gmra.mxu1 %vm225_vm1, %v15990_v9 }
  0x56   : > { %14021 = vmatprep.mubr.msk.f32.mxu0 %vm225_vm1, %v15994_v10  ;;  %14074 = vmatprep.mubr.msk.f32.mxu1 %vm225_vm1, %v15994_v10 }
  0x59   : > { %14022 = vmatmul.mubr.msk.f32.gmra.mxu0 %vm225_vm1, %v16002_v11  ;;  %14075 = vmatmul.mubr.msk.f32.gmra.mxu1 %vm225_vm1, %v16002_v11 }
  0x5a   : > { %14024 = vmatprep.mubr.msk.f32.mxu0 %vm225_vm1, %v16006_v12  ;;  %14077 = vmatprep.mubr.msk.f32.mxu1 %vm225_vm1, %v16006_v12 }
  0x5d   : > { %14025 = vmatmul.mubr.msk.f32.gmra.mxu0 %vm225_vm1, %v16014_v13  ;;  %14078 = vmatmul.mubr.msk.f32.gmra.mxu1 %vm225_vm1, %v16014_v13 }
  0x5e   : > { %14027 = vmatprep.mubr.msk.f32.mxu0 %vm225_vm1, %v16018_v14  ;;  %14080 = vmatprep.mubr.msk.f32.mxu1 %vm225_vm1, %v16018_v14 }
  0x61   : > { %14028 = vmatmul.mubr.msk.f32.gmra.mxu0 %vm225_vm1, %v16026_v15  ;;  %14081 = vmatmul.mubr.msk.f32.gmra.mxu1 %vm225_vm1, %v16026_v15 }
  0x62   : > { %14030 = vmatprep.mubr.msk.f32.mxu0 %vm225_vm1, %v16030_v16  ;;  %14083 = vmatprep.mubr.msk.f32.mxu1 %vm225_vm1, %v16030_v16 }
  0x65   : > { %14031 = vmatmul.mubr.msk.f32.gmra.mxu0 %vm225_vm1, %v16038_v17  ;;  %14084 = vmatmul.mubr.msk.f32.gmra.mxu1 %vm225_vm1, %v16038_v17 }
  0x66   : > { %14033 = vmatprep.mubr.msk.f32.mxu0 %vm225_vm1, %v16042_v18  ;;  %14086 = vmatprep.mubr.msk.f32.mxu1 %vm225_vm1, %v16042_v18 }
  0x69   : > { %14034 = vmatmul.mubr.msk.f32.gmra.mxu0 %vm225_vm1, %v16050_v19  ;;  %14087 = vmatmul.mubr.msk.f32.gmra.mxu1 %vm225_vm1, %v16050_v19 }
  0x6a   : > { %14100 = vmatprep.mubr.msk.f32.mxu0 %vm225_vm1, %v15835_v39  ;;  %14089 = vmatprep.mubr.msk.f32.mxu1 %vm225_vm1, %v16118_v20  ;;  %v16216_v39 = vld [vmem:[#allocation2 + $0x69] sm:$0xff] }
  0x6d   : > { %14101 = vmatmul.mubr.msk.f32.vlgmr.msra.gmra.mxu0 %vm225_vm1, %v15856_v44  ;;  %14090 = vmatmul.mubr.msk.f32.gmra.mxu1 %vm225_vm1, %v16128_v21  ;;  %v16244_v44 = vld [vmem:[#allocation2 + $0xa9] sm:$0xff] }
  0x6e   : > { %14205 = vmatpush3.msk.msra.mxu0 %vm548_vm0, %v15867_v46  ;;  %14103 = vmatprep.mubr.msk.f32.mxu0 %vm225_vm1, %v15860_v45  ;;  %v16254_v45 = vld [vmem:[#allocation2 + $0xb1] sm:$0xff]  ;;  %v16256_v46 = vld [vmem:[#allocation2 + $0xc1] sm:$0xff] }
  0x6f   : > { %14156 = vmatprep.mubr.msk.f32.mxu1 %vm225_vm1, %v1511_v22  ;;  %14206 = vmatprep.subr.mxu0 %v12082_v23  ;;  %v2645_v22 = vld [vmem:[#allocation2 + $0x22] sm:$0xff] }
  0x70   : > { %14207 = vmatpush3.msra.mxu0 %v12082_v23  ;;  %v423_v23 = vld [vmem:[#allocation3 + $0x18] sm:$0xff] }
  0x71   : > { %14104 = vmatmul.mubr.msk.f32.gmra.mxu0 %vm225_vm1, %v15878_v48  ;;  %14157 = vmatmul.mubr.msk.f32.vlgmr.msra.gmra.mxu1 %vm225_vm1, %v1512_v24  ;;  %v16268_v48 = vld [vmem:[#allocation2 + $0xd9] sm:$0xff] }
  0x72   : > { %14106 = vmatprep.mubr.msk.f32.mxu0 %vm225_vm1, %v15880_v49  ;;  %14159 = vmatprep.mubr.msk.f32.mxu1 %vm225_vm1, %v16142_v25  ;;  %v16278_v49 = vld [vmem:[#allocation2 + $0xe1] sm:$0xff]  ;;  %v16511_v24 = vld [vmem:[#allocation2 + $0x32] sm:$0xff] }
  0x73   : > { %14208 = vmatprep.subr.mxu0 %v12081_v26  ;;  %14261 = vmatpush3.msk.msra.mxu1 %vm548_vm0, %v15924_v61  ;;  %v16337_v61 = vld [vmem:[#allocation2 + $0x159] sm:$0xff] }
  0x74   : > { %14209 = vmatpush3.msra.mxu0 %v12081_v26  ;;  %14262 = vmatprep.subr.mxu1 %v12119_v27 }
  0x75   : > { %14107 = vmatmul.mubr.msk.f32.gmra.mxu0 %vm225_vm1, %v15906_v58  ;;  %14160 = vmatmul.mubr.msk.f32.gmra.mxu1 %vm225_vm1, %v16157_v28  ;;  %v414_v58 = vld [vmem:[#allocation2 + $0x198] sm:$0xff] }
  0x76   : > { %14109 = vmatprep.mubr.msk.f32.mxu0 %vm225_vm1, %v15914_v60  ;;  %14162 = vmatprep.mubr.msk.f32.mxu1 %vm225_vm1, %v16159_v29  ;;  %v415_v60 = vld [vmem:[#allocation2 + $0x1a0] sm:$0xff] }
  0x77   : > { %14210 = vmatprep.subr.mxu0 %v12080_v30  ;;  %14263 = vmatpush3.msra.mxu1 %v12119_v27  ;;  %v422_v27 = vld [vmem:[#allocation3 + $0x10] sm:$0xff] }
  0x78   : > { %14211 = vmatpush3.msra.mxu0 %v12080_v30  ;;  %14264 = vmatprep.subr.mxu1 %v12118_v31  ;;  %v16521_v30 = vld [vmem:[#allocation2 + $0x3a] sm:$0xff] }
  0x79   : > { %14110 = vmatmul.mubr.msk.f32.gmra.mxu0 %vm225_vm1, %v15928_v62  ;;  %14163 = vmatmul.mubr.msk.f32.gmra.mxu1 %vm225_vm1, %v16177_v32  ;;  %v16339_v62 = vld [vmem:[#allocation2 + $0x169] sm:$0xff] }
  0x7a   : > { %14112 = vmatprep.mubr.msk.f32.mxu0 %vm225_vm1, %v15932_v63  ;;  %14165 = vmatprep.mubr.msk.f32.mxu1 %vm225_vm1, %v16179_v33  ;;  %v16348_v63 = vld [vmem:[#allocation2 + $0x171] sm:$0xff] }
  0x7b   : > { %14316 = vmatprep.subr.msk.mxu0 %vm548_vm0, %v16184_v34  ;;  %14265 = vmatpush3.msra.mxu1 %v12118_v31 }
  0x7c   : > { %14266 = vmatprep.subr.mxu1 %v12117_v35 }
  0x7d   : > { %14113 = vmatmul.mubr.msk.f32.gmra.mxu0 %vm225_vm1, %v15942_v0  ;;  %14166 = vmatmul.mubr.msk.f32.gmra.mxu1 %vm225_vm1, %v16197_v36  ;;  %v12156_v0 = vld [vmem:[%s19997_s1 + $0x50] sm:$0xff] }
  0x7e   : > { %14115 = vmatprep.mubr.msk.f32.mxu0 %vm225_vm1, %v15946_v1  ;;  %14168 = vmatprep.mubr.msk.f32.mxu1 %vm225_vm1, %v16199_v37  ;;  %v12155_v1 = vld [vmem:[%s19997_s1 + $0x48] sm:$0xff] }
  0x7f   : > { %14267 = vmatpush3.msra.mxu1 %v12117_v35 }
  0x80   : > { %14372 = vmatprep.subr.msk.mxu1 %vm548_vm0, %v16210_v38 }
  0x81   : > { %14116 = vmatmul.mubr.msk.f32.gmra.mxu0 %vm225_vm1, %v15954_v2  ;;  %14169 = vmatmul.mubr.msk.f32.gmra.mxu1 %vm225_vm1, %v16216_v39  ;;  %v12193_v2 = vld [vmem:[%s19997_s1 + $0xb0] sm:$0xff] }
  0x82   : > { %14118 = vmatprep.mubr.msk.f32.mxu0 %vm225_vm1, %v15958_v3  ;;  %14171 = vmatprep.mubr.msk.f32.mxu1 %vm225_vm1, %v16218_v40  ;;  %v12154_v3 = vld [vmem:[%s19997_s1 + $0x40] sm:$0xff] }
  0x85   : > { %14119 = vmatmul.mubr.msk.f32.gmra.mxu0 %vm225_vm1, %v15966_v5  ;;  %14172 = vmatmul.mubr.msk.f32.gmra.mxu1 %vm225_vm1, %v16230_v41  ;;  %v12192_v5 = vld [vmem:[%s19997_s1 + $0xa8] sm:$0xff] }
  0x86   : > { %14121 = vmatprep.mubr.msk.f32.mxu0 %vm225_vm1, %v15970_v6  ;;  %14174 = vmatprep.mubr.msk.f32.mxu1 %vm225_vm1, %v16232_v42  ;;  %v16396_v6 = vld [vmem:[%s19997_s1 + $0x118] sm:$0xf] }
  0x89   : > { %14122 = vmatmul.mubr.msk.f32.gmra.mxu0 %vm225_vm1, %v15978_v7  ;;  %14175 = vmatmul.mubr.msk.f32.gmra.mxu1 %vm225_vm1, %v16242_v43  ;;  %v12191_v7 = vld [vmem:[%s19997_s1 + $0xa0] sm:$0xff] }
  0x8a   : > { %14124 = vmatprep.mubr.msk.f32.mxu0 %vm225_vm1, %v15982_v8  ;;  %14177 = vmatprep.mubr.msk.f32.mxu1 %vm225_vm1, %v16244_v44  ;;  %v1543_v8 = vld [vmem:[#allocation2 + $0x181] sm:$0xff] }
  0x8d   : > { %14125 = vmatmul.mubr.msk.f32.gmra.mxu0 %vm225_vm1, %v15990_v9  ;;  %14178 = vmatmul.mubr.msk.f32.gmra.mxu1 %vm225_vm1, %v16254_v45  ;;  %v1544_v9 = vld [vmem:[#allocation2 + $0x189] sm:$0xff] }
  0x8e   : > { %14127 = vmatprep.mubr.msk.f32.mxu0 %vm225_vm1, %v15994_v10  ;;  %14180 = vmatprep.mubr.msk.f32.mxu1 %vm225_vm1, %v16256_v46  ;;  %v2642_v10 = vld [vmem:[#allocation2 + $0x2] sm:$0xff] }
  0x91   : > { %14128 = vmatmul.mubr.msk.f32.gmra.mxu0 %vm225_vm1, %v16002_v11  ;;  %14181 = vmatmul.mubr.msk.f32.gmra.mxu1 %vm225_vm1, %v16266_v47  ;;  %v1545_v11 = vld [vmem:[#allocation2 + $0x199] sm:$0xff] }
  0x92   : > { %14130 = vmatprep.mubr.msk.f32.mxu0 %vm225_vm1, %v16006_v12  ;;  %14183 = vmatprep.mubr.msk.f32.mxu1 %vm225_vm1, %v16268_v48  ;;  %v421_v12 = vld [vmem:[#allocation3 + $0x8] sm:$0xff] }
  0x95   : > { %14131 = vmatmul.mubr.msk.f32.gmra.mxu0 %vm225_vm1, %v16014_v13  ;;  %14184 = vmatmul.mubr.msk.f32.gmra.mxu1 %vm225_vm1, %v16278_v49 }
  0x96   : > { %14133 = vmatprep.mubr.msk.f32.mxu0 %vm225_vm1, %v16018_v14  ;;  %14186 = vmatprep.mubr.msk.f32.mxu1 %vm225_vm1, %v16280_v50  ;;  %v420_v14 = vld [vmem:[#allocation3] sm:$0xff] }
  0x99   : > { %14134 = vmatmul.mubr.msk.f32.gmra.mxu0 %vm225_vm1, %v16026_v15  ;;  %14187 = vmatmul.mubr.msk.f32.gmra.mxu1 %vm225_vm1, %v16290_v51  ;;  %v2643_v15 = vld [vmem:[#allocation2 + $0xa] sm:$0xff] }
  0x9a   : > { %14136 = vmatprep.mubr.msk.f32.mxu0 %vm225_vm1, %v16030_v16  ;;  %14189 = vmatprep.mubr.msk.f32.mxu1 %vm225_vm1, %v16292_v52  ;;  %v1546_v16 = vld [vmem:[#allocation2 + $0x1a1] sm:$0xff] }
  0x9d   : > { %14137 = vmatmul.mubr.msk.f32.gmra.mxu0 %vm225_vm1, %v16038_v17  ;;  %14190 = vmatmul.mubr.msk.f32.gmra.mxu1 %vm225_vm1, %v16302_v53 }
  0x9e   : > { %14139 = vmatprep.mubr.msk.f32.mxu0 %vm225_vm1, %v16042_v18  ;;  %14192 = vmatprep.mubr.msk.f32.mxu1 %vm225_vm1, %v16304_v54  ;;  %v2644_v18 = vld [vmem:[#allocation2 + $0x1a] sm:$0xff] }
  0xa1   : > { %14140 = vmatmul.mubr.msk.f32.gmra.mxu0 %vm225_vm1, %v16050_v19  ;;  %14193 = vmatmul.mubr.msk.f32.gmra.mxu1 %vm225_vm1, %v16314_v55 }
  0xa2   : > { %14142 = vmatprep.mubr.msk.f32.mxu0 %vm225_vm1, %v16118_v20  ;;  %14195 = vmatprep.mubr.msk.f32.mxu1 %vm225_vm1, %v16316_v56  ;;  %v12230_v20 = vld [vmem:[%s19997_s1 + $0x110] sm:$0xff] }
  0xa5   : > { %14143 = vmatmul.mubr.msk.f32.gmra.mxu0 %vm225_vm1, %v16128_v21  ;;  %14196 = vmatmul.mubr.msk.f32.gmra.mxu1 %vm225_vm1, %v16326_v57 }
  0xa6   : > { %14145 = vmatprep.mubr.msk.f32.mxu0 %vm225_vm1, %v414_v58  ;;  %14198 = vmatprep.mubr.msk.f32.mxu1 %vm225_vm1, %v16328_v59  ;;  %v429_v58 = vld [vmem:[#allocation3 + $0x48] sm:$0xff] }
  0xa9   : > { %14146 = vmatmul.mubr.msk.f32.gmra.mxu0 %vm225_vm1, %v415_v60  ;;  %14199 = vmatmul.mubr.msk.f32.gmra.mxu1 %vm225_vm1, %v16337_v61 }
  0xaa   : > { %14212 = vmatprep.mubr.msk.f32.mxu0 %vm225_vm1, %v16142_v25  ;;  %14201 = vmatprep.mubr.msk.f32.mxu1 %vm225_vm1, %v16339_v62  ;;  %v12229_v25 = vld [vmem:[%s19997_s1 + $0x108] sm:$0xff] }
  0xad   : > { %14213 = vmatmul.mubr.msk.f32.vlgmr.msra.gmra.mxu0 %vm225_vm1, %v16157_v28  ;;  %14202 = vmatmul.mubr.msk.f32.gmra.mxu1 %vm225_vm1, %v16348_v63 }
  0xae   : > { %14317 = vmatpush3.msk.msra.mxu0 %vm548_vm0, %v16184_v34  ;;  %14215 = vmatprep.mubr.msk.f32.mxu0 %vm225_vm1, %v16159_v29  ;;  %v16525_v34 = vld [vmem:[#allocation2 + $0x4a] sm:$0xff] }
  0xaf   : > { %14268 = vmatprep.mubr.msk.f32.mxu1 %vm225_vm1, %v16159_v29  ;;  %14318 = vmatprep.subr.mxu0 %v12156_v0 }
  0xb0   : > { %14319 = vmatpush3.msra.mxu0 %v12156_v0 }
  0xb1   : > { %14216 = vmatmul.mubr.msk.f32.gmra.mxu0 %vm225_vm1, %v16177_v32  ;;  %14269 = vmatmul.mubr.msk.f32.vlgmr.msra.gmra.mxu1 %vm225_vm1, %v16177_v32  ;;  %v425_v32 = vld [vmem:[#allocation3 + $0x28] sm:$0xff] }
  0xb2   : > { %14218 = vmatprep.mubr.msk.f32.mxu0 %vm225_vm1, %v16179_v33  ;;  %14271 = vmatprep.mubr.msk.f32.mxu1 %vm225_vm1, %v16179_v33 }
  0xb3   : > { %14320 = vmatprep.subr.mxu0 %v12155_v1  ;;  %14373 = vmatpush3.msk.msra.mxu1 %vm548_vm0, %v16210_v38 }
  0xb4   : > { %14321 = vmatpush3.msra.mxu0 %v12155_v1  ;;  %14374 = vmatprep.subr.mxu1 %v12193_v2  ;;  %v428_v1 = vld [vmem:[#allocation3 + $0x40] sm:$0xff] }
  0xb5   : > { %14219 = vmatmul.mubr.msk.f32.gmra.mxu0 %vm225_vm1, %v16197_v36  ;;  %14272 = vmatmul.mubr.msk.f32.gmra.mxu1 %vm225_vm1, %v16197_v36 }
  0xb6   : > { %14221 = vmatprep.mubr.msk.f32.mxu0 %vm225_vm1, %v16199_v37  ;;  %14274 = vmatprep.mubr.msk.f32.mxu1 %vm225_vm1, %v16199_v37  ;;  %v12228_v37 = vld [vmem:[%s19997_s1 + $0x100] sm:$0xff] }
  0xb7   : > { %14322 = vmatprep.subr.mxu0 %v12154_v3  ;;  %14375 = vmatpush3.msra.mxu1 %v12193_v2 }
  0xb8   : > { %14323 = vmatpush3.msra.mxu0 %v12154_v3  ;;  %14376 = vmatprep.subr.mxu1 %v12192_v5 }
  0xb9   : > { %14222 = vmatmul.mubr.msk.f32.gmra.mxu0 %vm225_vm1, %v16216_v39  ;;  %14275 = vmatmul.mubr.msk.f32.gmra.mxu1 %vm225_vm1, %v16216_v39 }
  0xba   : > { %14224 = vmatprep.mubr.msk.f32.mxu0 %vm225_vm1, %v16218_v40  ;;  %14277 = vmatprep.mubr.msk.f32.mxu1 %vm225_vm1, %v16218_v40  ;;  %v424_v40 = vld [vmem:[#allocation3 + $0x20] sm:$0xff] }
  0xbb   : > { %14428 = vmatprep.subr.msk.mxu0 %vm548_vm0, %v16396_v6  ;;  %14377 = vmatpush3.msra.mxu1 %v12192_v5 }
  0xbc   : > { %14378 = vmatprep.subr.mxu1 %v12191_v7 }
  0xbd   : > { %14225 = vmatmul.mubr.msk.f32.gmra.mxu0 %vm225_vm1, %v16230_v41  ;;  %14278 = vmatmul.mubr.msk.f32.gmra.mxu1 %vm225_vm1, %v16230_v41 }
  0xbe   : > { %14227 = vmatprep.mubr.msk.f32.mxu0 %vm225_vm1, %v16232_v42  ;;  %14280 = vmatprep.mubr.msk.f32.mxu1 %vm225_vm1, %v16232_v42 }
  0xbf   : > { %14379 = vmatpush3.msra.mxu1 %v12191_v7 }
  0xc1   : > { %14228 = vmatmul.mubr.msk.f32.gmra.mxu0 %vm225_vm1, %v16242_v43  ;;  %14281 = vmatmul.mubr.msk.f32.gmra.mxu1 %vm225_vm1, %v16242_v43 }
  0xc2   : > { %14230 = vmatprep.mubr.msk.f32.mxu0 %vm225_vm1, %v16244_v44  ;;  %14283 = vmatprep.mubr.msk.f32.mxu1 %vm225_vm1, %v16244_v44  ;;  %v16538_v44 = vld [vmem:[#allocation2 + $0x52] sm:$0xff] }
  0xc5   : > { %14231 = vmatmul.mubr.msk.f32.gmra.mxu0 %vm225_vm1, %v16254_v45  ;;  %14284 = vmatmul.mubr.msk.f32.gmra.mxu1 %vm225_vm1, %v16254_v45 }
  0xc6   : > { %14233 = vmatprep.mubr.msk.f32.mxu0 %vm225_vm1, %v16256_v46  ;;  %14286 = vmatprep.mubr.msk.f32.mxu1 %vm225_vm1, %v16256_v46 }
  0xc9   : > { %14234 = vmatmul.mubr.msk.f32.gmra.mxu0 %vm225_vm1, %v16266_v47  ;;  %14287 = vmatmul.mubr.msk.f32.gmra.mxu1 %vm225_vm1, %v16266_v47  ;;  %v427_v47 = vld [vmem:[#allocation3 + $0x38] sm:$0xff] }
  0xca   : > { %14236 = vmatprep.mubr.msk.f32.mxu0 %vm225_vm1, %v16268_v48  ;;  %14289 = vmatprep.mubr.msk.f32.mxu1 %vm225_vm1, %v16268_v48  ;;  %v16543_v48 = vld [vmem:[#allocation2 + $0x62] sm:$0xff] }
  0xcd   : > { %14237 = vmatmul.mubr.msk.f32.gmra.mxu0 %vm225_vm1, %v16278_v49  ;;  %14290 = vmatmul.mubr.msk.f32.gmra.mxu1 %vm225_vm1, %v16278_v49 }
  0xce   : > { %14239 = vmatprep.mubr.msk.f32.mxu0 %vm225_vm1, %v16280_v50  ;;  %14292 = vmatprep.mubr.msk.f32.mxu1 %vm225_vm1, %v16280_v50 }
  0xd1   : > { %14240 = vmatmul.mubr.msk.f32.gmra.mxu0 %vm225_vm1, %v16290_v51  ;;  %14293 = vmatmul.mubr.msk.f32.gmra.mxu1 %vm225_vm1, %v16290_v51 }
  0xd2   : > { %14242 = vmatprep.mubr.msk.f32.mxu0 %vm225_vm1, %v16292_v52  ;;  %14295 = vmatprep.mubr.msk.f32.mxu1 %vm225_vm1, %v16292_v52  ;;  %v426_v52 = vld [vmem:[#allocation3 + $0x30] sm:$0xff] }
  0xd5   : > { %14243 = vmatmul.mubr.msk.f32.gmra.mxu0 %vm225_vm1, %v16302_v53  ;;  %14296 = vmatmul.mubr.msk.f32.gmra.mxu1 %vm225_vm1, %v16302_v53 }
  0xd6   : > { %14245 = vmatprep.mubr.msk.f32.mxu0 %vm225_vm1, %v16304_v54  ;;  %14298 = vmatprep.mubr.msk.f32.mxu1 %vm225_vm1, %v16304_v54  ;;  %v13990_v13 = vpop.f32.mrf.mxu0 }
  0xd7   : > { %v778_v17 = vadd.f32 %v13990_v13, %v421_v12 }
  0xd8   : > { %v618_v19 = vpop.f32.mrf.mxu0 }
  0xd9   : > { %14246 = vmatmul.mubr.msk.f32.gmra.mxu0 %vm225_vm1, %v16314_v55  ;;  %14299 = vmatmul.mubr.msk.f32.gmra.mxu1 %vm225_vm1, %v16314_v55  ;;  %810 = vst.msk [vmem:[#allocation3 + $0x8] sm:$0xff] %vm347_vm4, %v778_v17  ;;  %v777_v21 = vadd.f32 %v618_v19, %v420_v14  ;;  %v16554_v55 = vld [vmem:[#allocation2 + $0x6a] sm:$0xff] }
  0xda   : > { %14248 = vmatprep.mubr.msk.f32.mxu0 %vm225_vm1, %v16316_v56  ;;  %14301 = vmatprep.mubr.msk.f32.mxu1 %vm225_vm1, %v16316_v56 }
  0xdb   : > { %809 = vst.msk [vmem:[#allocation3] sm:$0xff] %vm347_vm4, %v777_v21 }
  0xdd   : > { %14249 = vmatmul.mubr.msk.f32.gmra.mxu0 %vm225_vm1, %v16326_v57  ;;  %14302 = vmatmul.mubr.msk.f32.gmra.mxu1 %vm225_vm1, %v16326_v57 }
  0xde   : > { %14251 = vmatprep.mubr.msk.f32.mxu0 %vm225_vm1, %v16328_v59  ;;  %14304 = vmatprep.mubr.msk.f32.mxu1 %vm225_vm1, %v16328_v59  ;;  %v16558_v59 = vld [vmem:[#allocation2 + $0x7a] sm:$0xff] }
  0xe0   : > { %v847_v36 = vld [vmem:[#allocation3 + $0x8] sm:$0xff] }
  0xe1   : > { %14252 = vmatmul.mubr.msk.f32.gmra.mxu0 %vm225_vm1, %v16337_v61  ;;  %14305 = vmatmul.mubr.msk.f32.gmra.mxu1 %vm225_vm1, %v16337_v61 }
  0xe2   : > { %14254 = vmatprep.mubr.msk.f32.mxu0 %vm225_vm1, %v16339_v62  ;;  %14307 = vmatprep.mubr.msk.f32.mxu1 %vm225_vm1, %v16339_v62  ;;  %v846_v43 = vld [vmem:[#allocation3] sm:$0xff] }
  0xe5   : > { %14255 = vmatmul.mubr.msk.f32.gmra.mxu0 %vm225_vm1, %v16348_v63  ;;  %14308 = vmatmul.mubr.msk.f32.gmra.mxu1 %vm225_vm1, %v16348_v63 }
  0xe6   : > { %14257 = vmatprep.mubr.msk.f32.mxu0 %vm225_vm1, %v1543_v8  ;;  %14310 = vmatprep.mubr.msk.f32.mxu1 %vm225_vm1, %v1543_v8 }
  0xe9   : > { %14258 = vmatmul.mubr.msk.f32.gmra.mxu0 %vm225_vm1, %v1544_v9  ;;  %14311 = vmatmul.mubr.msk.f32.gmra.mxu1 %vm225_vm1, %v1544_v9  ;;  %v431_v9 = vld [vmem:[#allocation3 + $0x58] sm:$0xff] }
  0xea   : > { %14324 = vmatprep.mubr.msk.f32.mxu0 %vm225_vm1, %v2642_v10  ;;  %14313 = vmatprep.mubr.msk.f32.mxu1 %vm225_vm1, %v1545_v11  ;;  %v16573_v10 = vld [vmem:[#allocation2 + $0x92] sm:$0xff] }
  0xed   : > { %14325 = vmatmul.mubr.msk.f32.vlgmr.msra.gmra.mxu0 %vm225_vm1, %v2643_v15  ;;  %14314 = vmatmul.mubr.msk.f32.gmra.mxu1 %vm225_vm1, %v1546_v16  ;;  %v430_v16 = vld [vmem:[#allocation3 + $0x50] sm:$0xff] }
  0xee   : > { %14429 = vmatpush3.msk.msra.mxu0 %vm548_vm0, %v16396_v6  ;;  %14327 = vmatprep.mubr.msk.f32.mxu0 %vm225_vm1, %v2644_v18  ;;  %v16569_v6 = vld [vmem:[#allocation2 + $0x82] sm:$0xff] }
  0xef   : > { %14380 = vmatprep.mubr.msk.f32.mxu1 %vm225_vm1, %v2644_v18  ;;  %14430 = vmatprep.subr.mxu0 %v12230_v20 }
  0xf0   : > { %14431 = vmatpush3.msra.mxu0 %v12230_v20  ;;  %v16585_v20 = vld [vmem:[#allocation2 + $0x9a] sm:$0xff] }
  0xf1   : > { %v13993_v26 = vpop.f32.mrf.mxu0  ;;  %14328 = vmatmul.mubr.msk.f32.gmra.mxu0 %vm225_vm1, %v2645_v22  ;;  %v14046_v28 = vpop.f32.mrf.mxu1  ;;  %14381 = vmatmul.mubr.msk.f32.vlgmr.msra.gmra.mxu1 %vm225_vm1, %v2645_v22 }
  0xf2   : > { %v780_v29 = vadd.f32 %v13993_v26, %v423_v23  ;;  %14330 = vmatprep.mubr.msk.f32.mxu0 %vm225_vm1, %v16511_v24  ;;  %14383 = vmatprep.mubr.msk.f32.mxu1 %vm225_vm1, %v16511_v24  ;;  %v1113_v39 = vadd.f32 %v14046_v28, %v847_v36  ;;  %v433_v23 = vld [vmem:[#allocation3 + $0x68] sm:$0xff] }
  0xf3   : > { %v628_v31 = vpop.f32.mrf.mxu0  ;;  %v953_v33 = vpop.f32.mrf.mxu1  ;;  %14432 = vmatprep.subr.mxu0 %v12229_v25 }
  0xf4   : > { %812 = vst.msk [vmem:[#allocation3 + $0x18] sm:$0xff] %vm347_vm4, %v780_v29  ;;  %v779_v35 = vadd.f32 %v628_v31, %v422_v27  ;;  %14433 = vmatpush3.msra.mxu0 %v12229_v25  ;;  %1145 = vst.msk [vmem:[#allocation3 + $0x8] sm:$0xff] %vm347_vm4, %v1113_v39  ;;  %v1112_v46 = vadd.f32 %v953_v33, %v846_v43  ;;  %v16589_v25 = vld [vmem:[#allocation2 + $0xaa] sm:$0xff] }
  0xf5   : > { %v13996_v38 = vpop.f32.mrf.mxu0  ;;  %14331 = vmatmul.mubr.msk.f32.gmra.mxu0 %vm225_vm1, %v16521_v30  ;;  %v14049_v41 = vpop.f32.mrf.mxu1  ;;  %14384 = vmatmul.mubr.msk.f32.gmra.mxu1 %vm225_vm1, %v16521_v30 }
  0xf6   : > { %811 = vst.msk [vmem:[#allocation3 + $0x10] sm:$0xff] %vm347_vm4, %v779_v35  ;;  %v782_v42 = vadd.f32 %v13996_v38, %v425_v32  ;;  %14333 = vmatprep.mubr.msk.f32.mxu0 %vm225_vm1, %v16525_v34  ;;  %14386 = vmatprep.mubr.msk.f32.mxu1 %vm225_vm1, %v16525_v34  ;;  %1144 = vst.msk [vmem:[#allocation3] sm:$0xff] %vm347_vm4, %v1112_v46  ;;  %v432_v32 = vld [vmem:[#allocation3 + $0x60] sm:$0xff] }
  0xf7   : > { %v638_v45 = vpop.f32.mrf.mxu0  ;;  %v963_v49 = vpop.f32.mrf.mxu1  ;;  %14434 = vmatprep.subr.mxu0 %v12228_v37 }
  0xf8   : > { %814 = vst.msk [vmem:[#allocation3 + $0x28] sm:$0xff] %vm347_vm4, %v782_v42  ;;  %v781_v50 = vadd.f32 %v638_v45, %v424_v40  ;;  %14435 = vmatpush3.msra.mxu0 %v12228_v37  ;;  %v16601_v37 = vld [vmem:[#allocation2 + $0xb2] sm:$0xff]  ;;  %v435_v40 = vld [vmem:[#allocation3 + $0x78] sm:$0xff] }
  0xf9   : > { %v13999_v51 = vpop.f32.mrf.mxu0  ;;  %14334 = vmatmul.mubr.msk.f32.gmra.mxu0 %vm225_vm1, %v16538_v44  ;;  %v14052_v53 = vpop.f32.mrf.mxu1  ;;  %14387 = vmatmul.mubr.msk.f32.gmra.mxu1 %vm225_vm1, %v16538_v44 }
  0xfa   : > { %813 = vst.msk [vmem:[#allocation3 + $0x20] sm:$0xff] %vm347_vm4, %v781_v50  ;;  %v784_v54 = vadd.f32 %v13999_v51, %v427_v47  ;;  %14336 = vmatprep.mubr.msk.f32.mxu0 %vm225_vm1, %v16543_v48  ;;  %14389 = vmatprep.mubr.msk.f32.mxu1 %vm225_vm1, %v16543_v48 }
  0xfb   : > { %v648_v56 = vpop.f32.mrf.mxu0  ;;  %v849_v57 = vld [vmem:[#allocation3 + $0x18] sm:$0xff]  ;;  %v973_v60 = vpop.f32.mrf.mxu1 }
  0xfc   : > { %816 = vst.msk [vmem:[#allocation3 + $0x38] sm:$0xff] %vm347_vm4, %v784_v54  ;;  %v783_v61 = vadd.f32 %v648_v56, %v426_v52  ;;  %v1115_v62 = vadd.f32 %v14049_v41, %v849_v57  ;;  %v16605_v41 = vld [vmem:[#allocation2 + $0xc2] sm:$0xff]  ;;  %v437_v57 = vld [vmem:[#allocation3 + $0x88] sm:$0xff] }
  0xfd   : > { %v14002_v63 = vpop.f32.mrf.mxu0  ;;  %v848_v0 = vld [vmem:[#allocation3 + $0x10] sm:$0xff]  ;;  %14337 = vmatmul.mubr.msk.f32.gmra.mxu0 %vm225_vm1, %v16554_v55  ;;  %v14055_v2 = vpop.f32.mrf.mxu1  ;;  %14390 = vmatmul.mubr.msk.f32.gmra.mxu1 %vm225_vm1, %v16554_v55 }
  0xfe   : > { %815 = vst.msk [vmem:[#allocation3 + $0x30] sm:$0xff] %vm347_vm4, %v783_v61  ;;  %1147 = vst.msk [vmem:[#allocation3 + $0x18] sm:$0xff] %vm347_vm4, %v1115_v62  ;;  %v786_v3 = vadd.f32 %v14002_v63, %v429_v58  ;;  %v1114_v5 = vadd.f32 %v963_v49, %v848_v0  ;;  %14339 = vmatprep.mubr.msk.f32.mxu0 %vm225_vm1, %v16558_v59  ;;  %14392 = vmatprep.mubr.msk.f32.mxu1 %vm225_vm1, %v16558_v59  ;;  %v434_v49 = vld [vmem:[#allocation3 + $0x70] sm:$0xff] }
  0xff   : > { %v658_v7 = vpop.f32.mrf.mxu0  ;;  %v851_v8 = vld [vmem:[#allocation3 + $0x28] sm:$0xff]  ;;  %v983_v11 = vpop.f32.mrf.mxu1 }
 0x100   : > { %818 = vst.msk [vmem:[#allocation3 + $0x48] sm:$0xff] %vm347_vm4, %v786_v3  ;;  %1146 = vst.msk [vmem:[#allocation3 + $0x10] sm:$0xff] %vm347_vm4, %v1114_v5  ;;  %v785_v12 = vadd.f32 %v658_v7, %v428_v1  ;;  %v1117_v13 = vadd.f32 %v14052_v53, %v851_v8  ;;  %v16617_v53 = vld [vmem:[#allocation2 + $0xca] sm:$0xff]  ;;  %v16621_v58 = vld [vmem:[#allocation2 + $0xda] sm:$0xff] }
 0x101   : > { %v14005_v14 = vpop.f32.mrf.mxu0  ;;  %v850_v15 = vld [vmem:[#allocation3 + $0x20] sm:$0xff]  ;;  %14340 = vmatmul.mubr.msk.f32.gmra.mxu0 %vm225_vm1, %v16569_v6  ;;  %v14058_v17 = vpop.f32.mrf.mxu1  ;;  %14393 = vmatmul.mubr.msk.f32.gmra.mxu1 %vm225_vm1, %v16569_v6  ;;  %v16633_v7 = vld [vmem:[#allocation2 + $0xe2] sm:$0xff] }
 0x102   : > { %817 = vst.msk [vmem:[#allocation3 + $0x40] sm:$0xff] %vm347_vm4, %v785_v12  ;;  %1149 = vst.msk [vmem:[#allocation3 + $0x28] sm:$0xff] %vm347_vm4, %v1117_v13  ;;  %v788_v18 = vadd.f32 %v14005_v14, %v431_v9  ;;  %v1116_v19 = vadd.f32 %v973_v60, %v850_v15  ;;  %14342 = vmatprep.mubr.msk.f32.mxu0 %vm225_vm1, %v16573_v10  ;;  %14395 = vmatprep.mubr.msk.f32.mxu1 %vm225_vm1, %v16573_v10  ;;  %v436_v1 = vld [vmem:[#allocation3 + $0x80] sm:$0xff] }
 0x103   : > { %v668_v21 = vpop.f32.mrf.mxu0  ;;  %v853_v22 = vld [vmem:[#allocation3 + $0x38] sm:$0xff]  ;;  %v993_v26 = vpop.f32.mrf.mxu1  ;;  %v16637_v12 = vld [vmem:[#allocation2 + $0xf2] sm:$0xff] }
 0x104   : > { %820 = vst.msk [vmem:[#allocation3 + $0x58] sm:$0xff] %vm347_vm4, %v788_v18  ;;  %1148 = vst.msk [vmem:[#allocation3 + $0x20] sm:$0xff] %vm347_vm4, %v1116_v19  ;;  %v787_v27 = vadd.f32 %v668_v21, %v430_v16  ;;  %v1119_v28 = vadd.f32 %v14055_v2, %v853_v22  ;;  %v438_v18 = vld [vmem:[#allocation3 + $0x90] sm:$0xff] }
 0x105   : > { %v14008_v29 = vpop.f32.mrf.mxu0  ;;  %v852_v31 = vld [vmem:[#allocation3 + $0x30] sm:$0xff]  ;;  %14343 = vmatmul.mubr.msk.f32.gmra.mxu0 %vm225_vm1, %v16585_v20  ;;  %v14061_v33 = vpop.f32.mrf.mxu1  ;;  %14396 = vmatmul.mubr.msk.f32.gmra.mxu1 %vm225_vm1, %v16585_v20 }
 0x106   : > { %819 = vst.msk [vmem:[#allocation3 + $0x50] sm:$0xff] %vm347_vm4, %v787_v27  ;;  %1151 = vst.msk [vmem:[#allocation3 + $0x38] sm:$0xff] %vm347_vm4, %v1119_v28  ;;  %v790_v35 = vadd.f32 %v14008_v29, %v433_v23  ;;  %v1118_v36 = vadd.f32 %v983_v11, %v852_v31  ;;  %14345 = vmatprep.mubr.msk.f32.mxu0 %vm225_vm1, %v16589_v25  ;;  %14398 = vmatprep.mubr.msk.f32.mxu1 %vm225_vm1, %v16589_v25  ;;  %v439_v11 = vld [vmem:[#allocation3 + $0x98] sm:$0xff]  ;;  %v16649_v23 = vld [vmem:[#allocation2 + $0xfa] sm:$0xff] }
 0x107   : > { %v678_v38 = vpop.f32.mrf.mxu0  ;;  %v855_v39 = vld [vmem:[#allocation3 + $0x48] sm:$0xff]  ;;  %v1003_v42 = vpop.f32.mrf.mxu1  ;;  %v16653_v29 = vld [vmem:[#allocation2 + $0x10a] sm:$0xff] }
 0x108   : > { %822 = vst.msk [vmem:[#allocation3 + $0x68] sm:$0xff] %vm347_vm4, %v790_v35  ;;  %1150 = vst.msk [vmem:[#allocation3 + $0x30] sm:$0xff] %vm347_vm4, %v1118_v36  ;;  %v789_v43 = vadd.f32 %v678_v38, %v432_v32  ;;  %v1121_v45 = vadd.f32 %v14058_v17, %v855_v39  ;;  %v441_v28 = vld [vmem:[#allocation3 + $0xa8] sm:$0xff]  ;;  %v440_v38 = vld [vmem:[#allocation3 + $0xa0] sm:$0xff] }
 0x109   : > { %v14011_v46 = vpop.f32.mrf.mxu0  ;;  %v854_v47 = vld [vmem:[#allocation3 + $0x40] sm:$0xff]  ;;  %14346 = vmatmul.mubr.msk.f32.gmra.mxu0 %vm225_vm1, %v16601_v37  ;;  %v14064_v50 = vpop.f32.mrf.mxu1  ;;  %14399 = vmatmul.mubr.msk.f32.gmra.mxu1 %vm225_vm1, %v16601_v37 }
 0x10a   : > { %821 = vst.msk [vmem:[#allocation3 + $0x60] sm:$0xff] %vm347_vm4, %v789_v43  ;;  %1153 = vst.msk [vmem:[#allocation3 + $0x48] sm:$0xff] %vm347_vm4, %v1121_v45  ;;  %v792_v51 = vadd.f32 %v14011_v46, %v435_v40  ;;  %v1120_v52 = vadd.f32 %v993_v26, %v854_v47  ;;  %14348 = vmatprep.mubr.msk.f32.mxu0 %vm225_vm1, %v16605_v41  ;;  %14401 = vmatprep.mubr.msk.f32.mxu1 %vm225_vm1, %v16605_v41  ;;  %v16665_v43 = vld [vmem:[#allocation2 + $0x112] sm:$0xff]  ;;  %v443_v47 = vld [vmem:[#allocation3 + $0xb8] sm:$0xff] }
 0x10b   : > { %v688_v54 = vpop.f32.mrf.mxu0  ;;  %v857_v56 = vld [vmem:[#allocation3 + $0x58] sm:$0xff]  ;;  %v1013_v60 = vpop.f32.mrf.mxu1 }
 0x10c   : > { %824 = vst.msk [vmem:[#allocation3 + $0x78] sm:$0xff] %vm347_vm4, %v792_v51  ;;  %1152 = vst.msk [vmem:[#allocation3 + $0x40] sm:$0xff] %vm347_vm4, %v1120_v52  ;;  %v791_v61 = vadd.f32 %v688_v54, %v434_v49  ;;  %v1123_v62 = vadd.f32 %v14061_v33, %v857_v56  ;;  %v16669_v49 = vld [vmem:[#allocation2 + $0x122] sm:$0xff] }
 0x10d   : > { %v14014_v63 = vpop.f32.mrf.mxu0  ;;  %v856_v0 = vld [vmem:[#allocation3 + $0x50] sm:$0xff]  ;;  %14349 = vmatmul.mubr.msk.f32.gmra.mxu0 %vm225_vm1, %v16617_v53  ;;  %v14067_v2 = vpop.f32.mrf.mxu1  ;;  %14402 = vmatmul.mubr.msk.f32.gmra.mxu1 %vm225_vm1, %v16617_v53 }
 0x10e   : > { %823 = vst.msk [vmem:[#allocation3 + $0x70] sm:$0xff] %vm347_vm4, %v791_v61  ;;  %1155 = vst.msk [vmem:[#allocation3 + $0x58] sm:$0xff] %vm347_vm4, %v1123_v62  ;;  %v794_v3 = vadd.f32 %v14014_v63, %v437_v57  ;;  %v1122_v5 = vadd.f32 %v1003_v42, %v856_v0  ;;  %14351 = vmatprep.mubr.msk.f32.mxu0 %vm225_vm1, %v16621_v58  ;;  %14404 = vmatprep.mubr.msk.f32.mxu1 %vm225_vm1, %v16621_v58  ;;  %v442_v57 = vld [vmem:[#allocation3 + $0xb0] sm:$0xff]  ;;  %v16681_v63 = vld [vmem:[#allocation2 + $0x12a] sm:$0xff] }
 0x10f   : > { %v698_v8 = vpop.f32.mrf.mxu0  ;;  %v859_v9 = vld [vmem:[#allocation3 + $0x68] sm:$0xff]  ;;  %v1023_v13 = vpop.f32.mrf.mxu1 }
 0x110   : > { %826 = vst.msk [vmem:[#allocation3 + $0x88] sm:$0xff] %vm347_vm4, %v794_v3  ;;  %1154 = vst.msk [vmem:[#allocation3 + $0x50] sm:$0xff] %vm347_vm4, %v1122_v5  ;;  %v793_v14 = vadd.f32 %v698_v8, %v436_v1  ;;  %v1125_v15 = vadd.f32 %v14064_v50, %v859_v9  ;;  %v16685_v3 = vld [vmem:[#allocation2 + $0x13a] sm:$0xff] }
 0x111   : > { %v14017_v16 = vpop.f32.mrf.mxu0  ;;  %v858_v17 = vld [vmem:[#allocation3 + $0x60] sm:$0xff]  ;;  %14352 = vmatmul.mubr.msk.f32.gmra.mxu0 %vm225_vm1, %v16633_v7  ;;  %v14070_v19 = vpop.f32.mrf.mxu1  ;;  %14405 = vmatmul.mubr.msk.f32.gmra.mxu1 %vm225_vm1, %v16633_v7 }
 0x112   : > { %825 = vst.msk [vmem:[#allocation3 + $0x80] sm:$0xff] %vm347_vm4, %v793_v14  ;;  %1157 = vst.msk [vmem:[#allocation3 + $0x68] sm:$0xff] %vm347_vm4, %v1125_v15  ;;  %v796_v21 = vadd.f32 %v14017_v16, %v439_v11  ;;  %v1124_v22 = vadd.f32 %v1013_v60, %v858_v17  ;;  %14354 = vmatprep.mubr.msk.f32.mxu0 %vm225_vm1, %v16637_v12  ;;  %14407 = vmatprep.mubr.msk.f32.mxu1 %vm225_vm1, %v16637_v12  ;;  %v444_v14 = vld [vmem:[#allocation3 + $0xc0] sm:$0xff] }
 0x113   : > { %v708_v26 = vpop.f32.mrf.mxu0  ;;  %v861_v27 = vld [vmem:[#allocation3 + $0x78] sm:$0xff]  ;;  %v1033_v31 = vpop.f32.mrf.mxu1 }
 0x114   : > { %828 = vst.msk [vmem:[#allocation3 + $0x98] sm:$0xff] %vm347_vm4, %v796_v21  ;;  %1156 = vst.msk [vmem:[#allocation3 + $0x60] sm:$0xff] %vm347_vm4, %v1124_v22  ;;  %v795_v32 = vadd.f32 %v708_v26, %v438_v18  ;;  %v1127_v33 = vadd.f32 %v14067_v2, %v861_v27  ;;  %v445_v2 = vld [vmem:[#allocation3 + $0xc8] sm:$0xff]  ;;  %v16697_v18 = vld [vmem:[#allocation2 + $0x142] sm:$0xff] }
 0x115   : > { %v14020_v35 = vpop.f32.mrf.mxu0  ;;  %v860_v36 = vld [vmem:[#allocation3 + $0x70] sm:$0xff]  ;;  %14355 = vmatmul.mubr.msk.f32.gmra.mxu0 %vm225_vm1, %v16649_v23  ;;  %v14073_v39 = vpop.f32.mrf.mxu1  ;;  %14408 = vmatmul.mubr.msk.f32.gmra.mxu1 %vm225_vm1, %v16649_v23  ;;  %v447_v22 = vld [vmem:[#allocation3 + $0xd8] sm:$0xff]  ;;  %v16701_v26 = vld [vmem:[#allocation2 + $0x152] sm:$0xff] }
 0x116   : > { %827 = vst.msk [vmem:[#allocation3 + $0x90] sm:$0xff] %vm347_vm4, %v795_v32  ;;  %1159 = vst.msk [vmem:[#allocation3 + $0x78] sm:$0xff] %vm347_vm4, %v1127_v33  ;;  %v798_v40 = vadd.f32 %v14020_v35, %v441_v28  ;;  %v1126_v42 = vadd.f32 %v1023_v13, %v860_v36  ;;  %14357 = vmatprep.mubr.msk.f32.mxu0 %vm225_vm1, %v16653_v29  ;;  %14410 = vmatprep.mubr.msk.f32.mxu1 %vm225_vm1, %v16653_v29  ;;  %v446_v35 = vld [vmem:[#allocation3 + $0xd0] sm:$0xff] }
 0x117   : > { %v718_v45 = vpop.f32.mrf.mxu0  ;;  %v863_v46 = vld [vmem:[#allocation3 + $0x88] sm:$0xff]  ;;  %v1043_v50 = vpop.f32.mrf.mxu1 }
 0x118   : > { %830 = vst.msk [vmem:[#allocation3 + $0xa8] sm:$0xff] %vm347_vm4, %v798_v40  ;;  %1158 = vst.msk [vmem:[#allocation3 + $0x70] sm:$0xff] %vm347_vm4, %v1126_v42  ;;  %v797_v51 = vadd.f32 %v718_v45, %v440_v38  ;;  %v1129_v52 = vadd.f32 %v14070_v19, %v863_v46  ;;  %v16713_v40 = vld [vmem:[#allocation2 + $0x15a] sm:$0xff] }
 0x119   : > { %v14023_v54 = vpop.f32.mrf.mxu0  ;;  %v862_v56 = vld [vmem:[#allocation3 + $0x80] sm:$0xff]  ;;  %14358 = vmatmul.mubr.msk.f32.gmra.mxu0 %vm225_vm1, %v16665_v43  ;;  %v14076_v60 = vpop.f32.mrf.mxu1  ;;  %14411 = vmatmul.mubr.msk.f32.gmra.mxu1 %vm225_vm1, %v16665_v43  ;;  %v449_v46 = vld [vmem:[#allocation3 + $0xe8] sm:$0xff] }
 0x11a   : > { %829 = vst.msk [vmem:[#allocation3 + $0xa0] sm:$0xff] %vm347_vm4, %v797_v51  ;;  %1161 = vst.msk [vmem:[#allocation3 + $0x88] sm:$0xff] %vm347_vm4, %v1129_v52  ;;  %v800_v61 = vadd.f32 %v14023_v54, %v443_v47  ;;  %v1128_v62 = vadd.f32 %v1033_v31, %v862_v56  ;;  %14360 = vmatprep.mubr.msk.f32.mxu0 %vm225_vm1, %v16669_v49  ;;  %14413 = vmatprep.mubr.msk.f32.mxu1 %vm225_vm1, %v16669_v49  ;;  %v16717_v47 = vld [vmem:[#allocation2 + $0x16a] sm:$0xff] }
 0x11b   : > { %v728_v0 = vpop.f32.mrf.mxu0  ;;  %v865_v1 = vld [vmem:[#allocation3 + $0x98] sm:$0xff]  ;;  %v1053_v5 = vpop.f32.mrf.mxu1 }
 0x11c   : > { %832 = vst.msk [vmem:[#allocation3 + $0xb8] sm:$0xff] %vm347_vm4, %v800_v61  ;;  %1160 = vst.msk [vmem:[#allocation3 + $0x80] sm:$0xff] %vm347_vm4, %v1128_v62  ;;  %v799_v8 = vadd.f32 %v728_v0, %v442_v57  ;;  %v1131_v9 = vadd.f32 %v14073_v39, %v865_v1  ;;  %v448_v57 = vld [vmem:[#allocation3 + $0xe0] sm:$0xff] }
 0x11d   : > { %v14026_v11 = vpop.f32.mrf.mxu0  ;;  %v864_v13 = vld [vmem:[#allocation3 + $0x90] sm:$0xff]  ;;  %14361 = vmatmul.mubr.msk.f32.gmra.mxu0 %vm225_vm1, %v16681_v63  ;;  %v14079_v15 = vpop.f32.mrf.mxu1  ;;  %14414 = vmatmul.mubr.msk.f32.gmra.mxu1 %vm225_vm1, %v16681_v63  ;;  %v16729_v0 = vld [vmem:[#allocation2 + $0x172] sm:$0xff] }
 0x11e   : > { %831 = vst.msk [vmem:[#allocation3 + $0xb0] sm:$0xff] %vm347_vm4, %v799_v8  ;;  %1163 = vst.msk [vmem:[#allocation3 + $0x98] sm:$0xff] %vm347_vm4, %v1131_v9  ;;  %v802_v16 = vadd.f32 %v14026_v11, %v445_v2  ;;  %v1130_v17 = vadd.f32 %v1043_v50, %v864_v13  ;;  %14363 = vmatprep.mubr.msk.f32.mxu0 %vm225_vm1, %v16685_v3  ;;  %14416 = vmatprep.mubr.msk.f32.mxu1 %vm225_vm1, %v16685_v3  ;;  %v16733_v9 = vld [vmem:[#allocation2 + $0x182] sm:$0xff] }
 0x11f   : > { %v738_v19 = vpop.f32.mrf.mxu0  ;;  %v867_v21 = vld [vmem:[#allocation3 + $0xa8] sm:$0xff]  ;;  %v1063_v27 = vpop.f32.mrf.mxu1 }
 0x120   : > { %834 = vst.msk [vmem:[#allocation3 + $0xc8] sm:$0xff] %vm347_vm4, %v802_v16  ;;  %1162 = vst.msk [vmem:[#allocation3 + $0x90] sm:$0xff] %vm347_vm4, %v1130_v17  ;;  %v801_v28 = vadd.f32 %v738_v19, %v444_v14  ;;  %v1133_v31 = vadd.f32 %v14076_v60, %v867_v21  ;;  %v450_v16 = vld [vmem:[#allocation3 + $0xf0] sm:$0xff] }
 0x121   : > { %v14029_v32 = vpop.f32.mrf.mxu0  ;;  %v866_v33 = vld [vmem:[#allocation3 + $0xa0] sm:$0xff]  ;;  %14364 = vmatmul.mubr.msk.f32.gmra.mxu0 %vm225_vm1, %v16697_v18  ;;  %v14082_v36 = vpop.f32.mrf.mxu1  ;;  %14417 = vmatmul.mubr.msk.f32.gmra.mxu1 %vm225_vm1, %v16697_v18 }
 0x122   : > { %833 = vst.msk [vmem:[#allocation3 + $0xc0] sm:$0xff] %vm347_vm4, %v801_v28  ;;  %1165 = vst.msk [vmem:[#allocation3 + $0xa8] sm:$0xff] %vm347_vm4, %v1133_v31  ;;  %v804_v38 = vadd.f32 %v14029_v32, %v447_v22  ;;  %v1132_v39 = vadd.f32 %v1053_v5, %v866_v33  ;;  %14366 = vmatprep.mubr.msk.f32.mxu0 %vm225_vm1, %v16701_v26  ;;  %14419 = vmatprep.mubr.msk.f32.mxu1 %vm225_vm1, %v16701_v26  ;;  %v451_v5 = vld [vmem:[#allocation3 + $0xf8] sm:$0xff] }
 0x123   : > { %v748_v42 = vpop.f32.mrf.mxu0  ;;  %v869_v45 = vld [vmem:[#allocation3 + $0xb8] sm:$0xff]  ;;  %v1073_v50 = vpop.f32.mrf.mxu1 }
 0x124   : > { %836 = vst.msk [vmem:[#allocation3 + $0xd8] sm:$0xff] %vm347_vm4, %v804_v38  ;;  %1164 = vst.msk [vmem:[#allocation3 + $0xa0] sm:$0xff] %vm347_vm4, %v1132_v39  ;;  %v803_v51 = vadd.f32 %v748_v42, %v446_v35  ;;  %v1135_v52 = vadd.f32 %v14079_v15, %v869_v45  ;;  %v16747_v22 = vld [vmem:[#allocation2 + $0x18a] sm:$0xff] }
 0x125   : > { %v14032_v54 = vpop.f32.mrf.mxu0  ;;  %v868_v56 = vld [vmem:[#allocation3 + $0xb0] sm:$0xff]  ;;  %14367 = vmatmul.mubr.msk.f32.gmra.mxu0 %vm225_vm1, %v16713_v40  ;;  %v14085_v60 = vpop.f32.mrf.mxu1  ;;  %14420 = vmatmul.mubr.msk.f32.gmra.mxu1 %vm225_vm1, %v16713_v40 }
 0x126   : > { %835 = vst.msk [vmem:[#allocation3 + $0xd0] sm:$0xff] %vm347_vm4, %v803_v51  ;;  %1167 = vst.msk [vmem:[#allocation3 + $0xb8] sm:$0xff] %vm347_vm4, %v1135_v52  ;;  %v806_v61 = vadd.f32 %v14032_v54, %v449_v46  ;;  %v1134_v62 = vadd.f32 %v1063_v27, %v868_v56  ;;  %14369 = vmatprep.mubr.msk.f32.mxu0 %vm225_vm1, %v16717_v47  ;;  %14422 = vmatprep.mubr.msk.f32.mxu1 %vm225_vm1, %v16717_v47  ;;  %v1181_v46 = vld [vmem:[#allocation3] sm:$0xff]  ;;  %v1184_v56 = vld [vmem:[#allocation3 + $0x18] sm:$0xff] }
 0x127   : > { %v758_v1 = vpop.f32.mrf.mxu0  ;;  %v871_v2 = vld [vmem:[#allocation3 + $0xc8] sm:$0xff]  ;;  %v1083_v8 = vpop.f32.mrf.mxu1 }
 0x128   : > { %838 = vst.msk [vmem:[#allocation3 + $0xe8] sm:$0xff] %vm347_vm4, %v806_v61  ;;  %1166 = vst.msk [vmem:[#allocation3 + $0xb0] sm:$0xff] %vm347_vm4, %v1134_v62  ;;  %v805_v11 = vadd.f32 %v758_v1, %v448_v57  ;;  %v1137_v13 = vadd.f32 %v14082_v36, %v871_v2  ;;  %v1182_v36 = vld [vmem:[#allocation3 + $0x8] sm:$0xff]  ;;  %v1183_v1 = vld [vmem:[#allocation3 + $0x10] sm:$0xff] }
 0x129   : > { %v14035_v14 = vpop.f32.mrf.mxu0  ;;  %v870_v15 = vld [vmem:[#allocation3 + $0xc0] sm:$0xff]  ;;  %14370 = vmatmul.mubr.msk.f32.gmra.mxu0 %vm225_vm1, %v16729_v0  ;;  %v14088_v17 = vpop.f32.mrf.mxu1  ;;  %14423 = vmatmul.mubr.msk.f32.gmra.mxu1 %vm225_vm1, %v16729_v0 }
 0x12a   : > { %837 = vst.msk [vmem:[#allocation3 + $0xe0] sm:$0xff] %vm347_vm4, %v805_v11  ;;  %1169 = vst.msk [vmem:[#allocation3 + $0xc8] sm:$0xff] %vm347_vm4, %v1137_v13  ;;  %v808_v19 = vadd.f32 %v14035_v14, %v451_v5  ;;  %v1136_v21 = vadd.f32 %v1073_v50, %v870_v15  ;;  %14436 = vmatprep.mubr.msk.f32.mxu0 %vm225_vm1, %v16511_v24  ;;  %14425 = vmatprep.mubr.msk.f32.mxu1 %vm225_vm1, %v16733_v9  ;;  %v1186_v13 = vld [vmem:[#allocation3 + $0x28] sm:$0xff] }
 0x12b   : > { %v768_v27 = vpop.f32.mrf.mxu0  ;;  %v873_v28 = vld [vmem:[#allocation3 + $0xd8] sm:$0xff]  ;;  %v1093_v31 = vpop.f32.mrf.mxu1 }
 0x12c   : > { %840 = vst.msk [vmem:[#allocation3 + $0xf8] sm:$0xff] %vm347_vm4, %v808_v19  ;;  %1168 = vst.msk [vmem:[#allocation3 + $0xc0] sm:$0xff] %vm347_vm4, %v1136_v21  ;;  %v807_v32 = vadd.f32 %v768_v27, %v450_v16  ;;  %v1139_v33 = vadd.f32 %v14085_v60, %v873_v28 }
 0x12d   : > { %v872_v35 = vld [vmem:[#allocation3 + $0xd0] sm:$0xff]  ;;  %v14102_v38 = vpop.f32.mrf.mxu0  ;;  %14437 = vmatmul.mubr.msk.f32.vlgmr.msra.gmra.mxu0 %vm225_vm1, %v16521_v30  ;;  %v14091_v24 = vpop.f32.mrf.mxu1  ;;  %14426 = vmatmul.mubr.msk.f32.gmra.mxu1 %vm225_vm1, %v16747_v22 }
 0x12e   : > { %839 = vst.msk [vmem:[#allocation3 + $0xf0] sm:$0xff] %vm347_vm4, %v807_v32  ;;  %1171 = vst.msk [vmem:[#allocation3 + $0xd8] sm:$0xff] %vm347_vm4, %v1139_v33  ;;  %v1138_v39 = vadd.f32 %v1083_v8, %v872_v35  ;;  %v1448_v42 = vadd.f32 %v14102_v38, %v1182_v36  ;;  %14439 = vmatprep.mubr.msk.f32.mxu0 %vm225_vm1, %v16525_v34  ;;  %v1187_v38 = vld [vmem:[#allocation3 + $0x30] sm:$0xff] }
 0x12f   : > { %v875_v45 = vld [vmem:[#allocation3 + $0xe8] sm:$0xff]  ;;  %v1288_v50 = vpop.f32.mrf.mxu0  ;;  %v1103_v51 = vpop.f32.mrf.mxu1 }
 0x130   : > { %1170 = vst.msk [vmem:[#allocation3 + $0xd0] sm:$0xff] %vm347_vm4, %v1138_v39  ;;  %1480 = vst.msk [vmem:[#allocation3 + $0x8] sm:$0xff] %vm347_vm4, %v1448_v42  ;;  %v1141_v30 = vadd.f32 %v14088_v17, %v875_v45  ;;  %v1447_v52 = vadd.f32 %v1288_v50, %v1181_v46  ;;  %v1185_v17 = vld [vmem:[#allocation3 + $0x20] sm:$0xff]  ;;  %v1190_v46 = vld [vmem:[#allocation3 + $0x48] sm:$0xff] }
 0x131   : > { %v874_v54 = vld [vmem:[#allocation3 + $0xe0] sm:$0xff]  ;;  %v14105_v57 = vpop.f32.mrf.mxu0  ;;  %14440 = vmatmul.mubr.msk.f32.gmra.mxu0 %vm225_vm1, %v16538_v44  ;;  %v14158_v60 = vpop.f32.mrf.mxu1 }
 0x132   : > { %1173 = vst.msk [vmem:[#allocation3 + $0xe8] sm:$0xff] %vm347_vm4, %v1141_v30  ;;  %1479 = vst.msk [vmem:[#allocation3] sm:$0xff] %vm347_vm4, %v1447_v52  ;;  %v1140_v34 = vadd.f32 %v1093_v31, %v874_v54  ;;  %v1450_v61 = vadd.f32 %v14105_v57, %v1184_v56  ;;  %14442 = vmatprep.mubr.msk.f32.mxu0 %vm225_vm1, %v16543_v48  ;;  %v1188_v31 = vld [vmem:[#allocation3 + $0x38] sm:$0xff]  ;;  %v1189_v54 = vld [vmem:[#allocation3 + $0x40] sm:$0xff] }
 0x133   : > { %v877_v62 = vld [vmem:[#allocation3 + $0xf8] sm:$0xff]  ;;  %v1298_v2 = vpop.f32.mrf.mxu0  ;;  %v1749_v5 = vpop.f32.mrf.mxu1 }
 0x134   : > { %1172 = vst.msk [vmem:[#allocation3 + $0xe0] sm:$0xff] %vm347_vm4, %v1140_v34  ;;  %1482 = vst.msk [vmem:[#allocation3 + $0x18] sm:$0xff] %vm347_vm4, %v1450_v61  ;;  %v1143_v8 = vadd.f32 %v14091_v24, %v877_v62  ;;  %v1449_v44 = vadd.f32 %v1298_v2, %v1183_v1  ;;  %v1192_v61 = vld [vmem:[#allocation3 + $0x58] sm:$0xff] }
 0x135   : > { %v876_v11 = vld [vmem:[#allocation3 + $0xf0] sm:$0xff]  ;;  %v14108_v14 = vpop.f32.mrf.mxu0  ;;  %14443 = vmatmul.mubr.msk.f32.gmra.mxu0 %vm225_vm1, %v16554_v55  ;;  %v14161_v15 = vpop.f32.mrf.mxu1 }
 0x136   : > { %1175 = vst.msk [vmem:[#allocation3 + $0xf8] sm:$0xff] %vm347_vm4, %v1143_v8  ;;  %1481 = vst.msk [vmem:[#allocation3 + $0x10] sm:$0xff] %vm347_vm4, %v1449_v44  ;;  %v1142_v48 = vadd.f32 %v1103_v51, %v876_v11  ;;  %v1452_v16 = vadd.f32 %v14108_v14, %v1186_v13  ;;  %14445 = vmatprep.mubr.msk.f32.mxu0 %vm225_vm1, %v16558_v59  ;;  %v1191_v8 = vld [vmem:[#allocation3 + $0x50] sm:$0xff] }
 0x137   : > { %v1308_v19 = vpop.f32.mrf.mxu0  ;;  %v1553_v21 = vld [vmem:[#allocation3 + $0x8] sm:$0xff]  ;;  %v1759_v27 = vpop.f32.mrf.mxu1 }
 0x138   : > { %1174 = vst.msk [vmem:[#allocation3 + $0xf0] sm:$0xff] %vm347_vm4, %v1142_v48  ;;  %1484 = vst.msk [vmem:[#allocation3 + $0x28] sm:$0xff] %vm347_vm4, %v1452_v16  ;;  %v1451_v28 = vadd.f32 %v1308_v19, %v1185_v17  ;;  %v1909_v55 = vadd.f32 %v14158_v60, %v1553_v21  ;;  %v1193_v21 = vld [vmem:[#allocation3 + $0x60] sm:$0xff] }
 0x139   : > { %v14111_v32 = vpop.f32.mrf.mxu0  ;;  %v1552_v33 = vld [vmem:[#allocation3] sm:$0xff]  ;;  %14446 = vmatmul.mubr.msk.f32.gmra.mxu0 %vm225_vm1, %v16569_v6  ;;  %v14164_v35 = vpop.f32.mrf.mxu1 }
 0x13a   : > { %1483 = vst.msk [vmem:[#allocation3 + $0x20] sm:$0xff] %vm347_vm4, %v1451_v28  ;;  %1941 = vst.msk [vmem:[#allocation3 + $0x8] sm:$0xff] %vm347_vm4, %v1909_v55  ;;  %v1454_v59 = vadd.f32 %v14111_v32, %v1188_v31  ;;  %v1908_v36 = vadd.f32 %v1749_v5, %v1552_v33  ;;  %14448 = vmatprep.mubr.msk.f32.mxu0 %vm225_vm1, %v16573_v10  ;;  %v1196_v32 = vld [vmem:[#allocation3 + $0x78] sm:$0xff] }
 0x13b   : > { %v1318_v24 = vpop.f32.mrf.mxu0  ;;  %v1555_v39 = vld [vmem:[#allocation3 + $0x18] sm:$0xff]  ;;  %v1769_v42 = vpop.f32.mrf.mxu1 }
 0x13c   : > { %1486 = vst.msk [vmem:[#allocation3 + $0x38] sm:$0xff] %vm347_vm4, %v1454_v59  ;;  %1940 = vst.msk [vmem:[#allocation3] sm:$0xff] %vm347_vm4, %v1908_v36  ;;  %v1453_v45 = vadd.f32 %v1318_v24, %v1187_v38  ;;  %v1911_v6 = vadd.f32 %v14161_v15, %v1555_v39  ;;  %v1194_v15 = vld [vmem:[#allocation3 + $0x68] sm:$0xff]  ;;  %v1195_v38 = vld [vmem:[#allocation3 + $0x70] sm:$0xff] }
 0x13d   : > { %v14114_v50 = vpop.f32.mrf.mxu0  ;;  %v1554_v51 = vld [vmem:[#allocation3 + $0x10] sm:$0xff]  ;;  %14449 = vmatmul.mubr.msk.f32.gmra.mxu0 %vm225_vm1, %v16585_v20  ;;  %v14167_v30 = vpop.f32.mrf.mxu1 }
 0x13e   : > { %1485 = vst.msk [vmem:[#allocation3 + $0x30] sm:$0xff] %vm347_vm4, %v1453_v45  ;;  %1943 = vst.msk [vmem:[#allocation3 + $0x18] sm:$0xff] %vm347_vm4, %v1911_v6  ;;  %v1456_v10 = vadd.f32 %v14114_v50, %v1190_v46  ;;  %v1910_v52 = vadd.f32 %v1759_v27, %v1554_v51  ;;  %14451 = vmatprep.mubr.msk.f32.mxu0 %vm225_vm1, %v16589_v25  ;;  %v1198_v6 = vld [vmem:[#allocation3 + $0x88] sm:$0xff] }
 0x13f   : > { %v1328_v56 = vpop.f32.mrf.mxu0  ;;  %v1557_v57 = vld [vmem:[#allocation3 + $0x28] sm:$0xff]  ;;  %v1779_v60 = vpop.f32.mrf.mxu1 }
 0x140   : > { %1488 = vst.msk [vmem:[#allocation3 + $0x48] sm:$0xff] %vm347_vm4, %v1456_v10  ;;  %1942 = vst.msk [vmem:[#allocation3 + $0x10] sm:$0xff] %vm347_vm4, %v1910_v52  ;;  %v1455_v34 = vadd.f32 %v1328_v56, %v1189_v54  ;;  %v1913_v20 = vadd.f32 %v14164_v35, %v1557_v57  ;;  %v1197_v10 = vld [vmem:[#allocation3 + $0x80] sm:$0xff] }
 0x141   : > { %v14117_v62 = vpop.f32.mrf.mxu0  ;;  %v1556_v1 = vld [vmem:[#allocation3 + $0x20] sm:$0xff]  ;;  %14452 = vmatmul.mubr.msk.f32.gmra.mxu0 %vm225_vm1, %v16601_v37  ;;  %v14170_v2 = vpop.f32.mrf.mxu1 }
 0x142   : > { %1487 = vst.msk [vmem:[#allocation3 + $0x40] sm:$0xff] %vm347_vm4, %v1455_v34  ;;  %1945 = vst.msk [vmem:[#allocation3 + $0x28] sm:$0xff] %vm347_vm4, %v1913_v20  ;;  %v1458_v25 = vadd.f32 %v14117_v62, %v1192_v61  ;;  %v1912_v5 = vadd.f32 %v1769_v42, %v1556_v1  ;;  %14454 = vmatprep.mubr.msk.f32.mxu0 %vm225_vm1, %v16605_v41  ;;  %v1199_v1 = vld [vmem:[#allocation3 + $0x90] sm:$0xff] }
 0x143   : > { %v1338_v44 = vpop.f32.mrf.mxu0  ;;  %v1559_v11 = vld [vmem:[#allocation3 + $0x38] sm:$0xff]  ;;  %v1789_v13 = vpop.f32.mrf.mxu1 }
 0x144   : > { %1490 = vst.msk [vmem:[#allocation3 + $0x58] sm:$0xff] %vm347_vm4, %v1458_v25  ;;  %1944 = vst.msk [vmem:[#allocation3 + $0x20] sm:$0xff] %vm347_vm4, %v1912_v5  ;;  %v1457_v14 = vadd.f32 %v1338_v44, %v1191_v8  ;;  %v1915_v37 = vadd.f32 %v14167_v30, %v1559_v11  ;;  %v1202_v44 = vld [vmem:[#allocation3 + $0xa8] sm:$0xff] }
 0x145   : > { %v14120_v48 = vpop.f32.mrf.mxu0  ;;  %v1558_v16 = vld [vmem:[#allocation3 + $0x30] sm:$0xff]  ;;  %14455 = vmatmul.mubr.msk.f32.gmra.mxu0 %vm225_vm1, %v16617_v53  ;;  %v14173_v17 = vpop.f32.mrf.mxu1 }
 0x146   : > { %1489 = vst.msk [vmem:[#allocation3 + $0x50] sm:$0xff] %vm347_vm4, %v1457_v14  ;;  %1947 = vst.msk [vmem:[#allocation3 + $0x38] sm:$0xff] %vm347_vm4, %v1915_v37  ;;  %v1460_v41 = vadd.f32 %v14120_v48, %v1194_v15  ;;  %v1914_v19 = vadd.f32 %v1779_v60, %v1558_v16  ;;  %14457 = vmatprep.mubr.msk.f32.mxu0 %vm225_vm1, %v16621_v58  ;;  %v1200_v60 = vld [vmem:[#allocation3 + $0x98] sm:$0xff]  ;;  %v1201_v15 = vld [vmem:[#allocation3 + $0xa0] sm:$0xff] }
 0x147   : > { %v1348_v27 = vpop.f32.mrf.mxu0  ;;  %v1561_v28 = vld [vmem:[#allocation3 + $0x48] sm:$0xff]  ;;  %v1799_v55 = vpop.f32.mrf.mxu1 }
 0x148   : > { %1492 = vst.msk [vmem:[#allocation3 + $0x68] sm:$0xff] %vm347_vm4, %v1460_v41  ;;  %1946 = vst.msk [vmem:[#allocation3 + $0x30] sm:$0xff] %vm347_vm4, %v1914_v19  ;;  %v1459_v31 = vadd.f32 %v1348_v27, %v1193_v21  ;;  %v1917_v53 = vadd.f32 %v14170_v2, %v1561_v28  ;;  %v1204_v19 = vld [vmem:[#allocation3 + $0xb8] sm:$0xff] }
 0x149   : > { %v14123_v33 = vpop.f32.mrf.mxu0  ;;  %v1560_v35 = vld [vmem:[#allocation3 + $0x40] sm:$0xff]  ;;  %14458 = vmatmul.mubr.msk.f32.gmra.mxu0 %vm225_vm1, %v16633_v7  ;;  %v14176_v59 = vpop.f32.mrf.mxu1 }
 0x14a   : > { %1491 = vst.msk [vmem:[#allocation3 + $0x60] sm:$0xff] %vm347_vm4, %v1459_v31  ;;  %1949 = vst.msk [vmem:[#allocation3 + $0x48] sm:$0xff] %vm347_vm4, %v1917_v53  ;;  %v1462_v58 = vadd.f32 %v14123_v33, %v1196_v32  ;;  %v1916_v36 = vadd.f32 %v1789_v13, %v1560_v35  ;;  %14460 = vmatprep.mubr.msk.f32.mxu0 %vm225_vm1, %v16637_v12  ;;  %v1203_v31 = vld [vmem:[#allocation3 + $0xb0] sm:$0xff] }
 0x14b   : > { %v1358_v24 = vpop.f32.mrf.mxu0  ;;  %v1563_v39 = vld [vmem:[#allocation3 + $0x58] sm:$0xff]  ;;  %v1809_v42 = vpop.f32.mrf.mxu1 }
 0x14c   : > { %1494 = vst.msk [vmem:[#allocation3 + $0x78] sm:$0xff] %vm347_vm4, %v1462_v58  ;;  %1948 = vst.msk [vmem:[#allocation3 + $0x40] sm:$0xff] %vm347_vm4, %v1916_v36  ;;  %v1461_v45 = vadd.f32 %v1358_v24, %v1195_v38  ;;  %v1919_v7 = vadd.f32 %v14173_v17, %v1563_v39  ;;  %v1205_v39 = vld [vmem:[#allocation3 + $0xc0] sm:$0xff] }
 0x14d   : > { %v14126_v46 = vpop.f32.mrf.mxu0  ;;  %v1562_v50 = vld [vmem:[#allocation3 + $0x50] sm:$0xff]  ;;  %14461 = vmatmul.mubr.msk.f32.gmra.mxu0 %vm225_vm1, %v16649_v23  ;;  %v14179_v51 = vpop.f32.mrf.mxu1 }
 0x14e   : > { %1493 = vst.msk [vmem:[#allocation3 + $0x70] sm:$0xff] %vm347_vm4, %v1461_v45  ;;  %1951 = vst.msk [vmem:[#allocation3 + $0x58] sm:$0xff] %vm347_vm4, %v1919_v7  ;;  %v1464_v12 = vadd.f32 %v14126_v46, %v1198_v6  ;;  %v1918_v30 = vadd.f32 %v1799_v55, %v1562_v50  ;;  %14463 = vmatprep.mubr.msk.f32.mxu0 %vm225_vm1, %v16653_v29  ;;  %v1208_v46 = vld [vmem:[#allocation3 + $0xd8] sm:$0xff] }
 0x14f   : > { %v1368_v52 = vpop.f32.mrf.mxu0  ;;  %v1565_v54 = vld [vmem:[#allocation3 + $0x68] sm:$0xff]  ;;  %v1819_v56 = vpop.f32.mrf.mxu1 }
 0x150   : > { %1496 = vst.msk [vmem:[#allocation3 + $0x88] sm:$0xff] %vm347_vm4, %v1464_v12  ;;  %1950 = vst.msk [vmem:[#allocation3 + $0x50] sm:$0xff] %vm347_vm4, %v1918_v30  ;;  %v1463_v57 = vadd.f32 %v1368_v52, %v1197_v10  ;;  %v1921_v23 = vadd.f32 %v14176_v59, %v1565_v54  ;;  %v1206_v59 = vld [vmem:[#allocation3 + $0xc8] sm:$0xff]  ;;  %v1207_v10 = vld [vmem:[#allocation3 + $0xd0] sm:$0xff] }
 0x151   : > { %v14129_v34 = vpop.f32.mrf.mxu0  ;;  %v1564_v20 = vld [vmem:[#allocation3 + $0x60] sm:$0xff]  ;;  %14464 = vmatmul.mubr.msk.f32.gmra.mxu0 %vm225_vm1, %v16665_v43  ;;  %v14182_v61 = vpop.f32.mrf.mxu1 }
 0x152   : > { %1495 = vst.msk [vmem:[#allocation3 + $0x80] sm:$0xff] %vm347_vm4, %v1463_v57  ;;  %1953 = vst.msk [vmem:[#allocation3 + $0x68] sm:$0xff] %vm347_vm4, %v1921_v23  ;;  %v1466_v29 = vadd.f32 %v14129_v34, %v1200_v60  ;;  %v1920_v62 = vadd.f32 %v1809_v42, %v1564_v20  ;;  %14466 = vmatprep.mubr.msk.f32.mxu0 %vm225_vm1, %v16669_v49  ;;  %v1210_v60 = vld [vmem:[#allocation3 + $0xe8] sm:$0xff] }
 0x153   : > { %v1378_v2 = vpop.f32.mrf.mxu0  ;;  %v1567_v25 = vld [vmem:[#allocation3 + $0x78] sm:$0xff]  ;;  %v1829_v5 = vpop.f32.mrf.mxu1 }
 0x154   : > { %1498 = vst.msk [vmem:[#allocation3 + $0x98] sm:$0xff] %vm347_vm4, %v1466_v29  ;;  %1952 = vst.msk [vmem:[#allocation3 + $0x60] sm:$0xff] %vm347_vm4, %v1920_v62  ;;  %v1465_v8 = vadd.f32 %v1378_v2, %v1199_v1  ;;  %v1923_v43 = vadd.f32 %v14179_v51, %v1567_v25  ;;  %v2677_v62 = vld [vmem:[#allocation2 + $0x1a2] sm:$0xff]  ;;  %v1209_v1 = vld [vmem:[#allocation3 + $0xe0] sm:$0xff] }
 0x155   : > { %v14132_v11 = vpop.f32.mrf.mxu0  ;;  %v1566_v13 = vld [vmem:[#allocation3 + $0x70] sm:$0xff]  ;;  %14467 = vmatmul.mubr.msk.f32.gmra.mxu0 %vm225_vm1, %v16681_v63  ;;  %v14185_v14 = vpop.f32.mrf.mxu1 }
 0x156   : > { %1497 = vst.msk [vmem:[#allocation3 + $0x90] sm:$0xff] %vm347_vm4, %v1465_v8  ;;  %1955 = vst.msk [vmem:[#allocation3 + $0x78] sm:$0xff] %vm347_vm4, %v1923_v43  ;;  %v1468_v49 = vadd.f32 %v14132_v11, %v1202_v44  ;;  %v1922_v37 = vadd.f32 %v1819_v56, %v1566_v13  ;;  %14469 = vmatprep.mubr.msk.f32.mxu0 %vm225_vm1, %v16685_v3  ;;  %v2676_v56 = vld [vmem:[#allocation2 + $0x19a] sm:$0xff]  ;;  %v1212_v43 = vld [vmem:[#allocation3 + $0xf8] sm:$0xff] }
 0x157   : > { %v1388_v48 = vpop.f32.mrf.mxu0  ;;  %v1569_v16 = vld [vmem:[#allocation3 + $0x88] sm:$0xff]  ;;  %v1839_v17 = vpop.f32.mrf.mxu1 }
 0x158   : > { %1500 = vst.msk [vmem:[#allocation3 + $0xa8] sm:$0xff] %vm347_vm4, %v1468_v49  ;;  %1954 = vst.msk [vmem:[#allocation3 + $0x70] sm:$0xff] %vm347_vm4, %v1922_v37  ;;  %v1467_v41 = vadd.f32 %v1388_v48, %v1201_v15  ;;  %v1925_v63 = vadd.f32 %v14182_v61, %v1569_v16  ;;  %v1211_v37 = vld [vmem:[#allocation3 + $0xf0] sm:$0xff] }
 0x159   : > { %v14135_v21 = vpop.f32.mrf.mxu0  ;;  %v1568_v27 = vld [vmem:[#allocation3 + $0x80] sm:$0xff]  ;;  %14470 = vmatmul.mubr.msk.f32.gmra.mxu0 %vm225_vm1, %v16697_v18  ;;  %v14188_v28 = vpop.f32.mrf.mxu1 }
 0x15a   : > { %1499 = vst.msk [vmem:[#allocation3 + $0xa0] sm:$0xff] %vm347_vm4, %v1467_v41  ;;  %1957 = vst.msk [vmem:[#allocation3 + $0x88] sm:$0xff] %vm347_vm4, %v1925_v63  ;;  %v1470_v3 = vadd.f32 %v14135_v21, %v1204_v19  ;;  %v1924_v55 = vadd.f32 %v1829_v5, %v1568_v27  ;;  %14472 = vmatprep.mubr.msk.f32.mxu0 %vm225_vm1, %v16701_v26  ;;  %v1978_v19 = vld [vmem:[#allocation3 + $0x8] sm:$0xff] }
 0x15b   : > { %v1398_v53 = vpop.f32.mrf.mxu0  ;;  %v1571_v32 = vld [vmem:[#allocation3 + $0x98] sm:$0xff]  ;;  %v1849_v33 = vpop.f32.mrf.mxu1 }
 0x15c   : > { %1502 = vst.msk [vmem:[#allocation3 + $0xb8] sm:$0xff] %vm347_vm4, %v1470_v3  ;;  %1956 = vst.msk [vmem:[#allocation3 + $0x80] sm:$0xff] %vm347_vm4, %v1924_v55  ;;  %v1469_v35 = vadd.f32 %v1398_v53, %v1203_v31  ;;  %v1927_v18 = vadd.f32 %v14185_v14, %v1571_v32  ;;  %v1977_v31 = vld [vmem:[#allocation3] sm:$0xff] }
 0x15d   : > { %v14138_v58 = vpop.f32.mrf.mxu0  ;;  %v1570_v36 = vld [vmem:[#allocation3 + $0x90] sm:$0xff]  ;;  %14473 = vmatmul.mubr.msk.f32.gmra.mxu0 %vm225_vm1, %v16713_v40  ;;  %v14191_v38 = vpop.f32.mrf.mxu1 }
 0x15e   : > { %1501 = vst.msk [vmem:[#allocation3 + $0xb0] sm:$0xff] %vm347_vm4, %v1469_v35  ;;  %1959 = vst.msk [vmem:[#allocation3 + $0x98] sm:$0xff] %vm347_vm4, %v1927_v18  ;;  %v1472_v26 = vadd.f32 %v14138_v58, %v1206_v59  ;;  %v1926_v24 = vadd.f32 %v1839_v17, %v1570_v36  ;;  %14475 = vmatprep.mubr.msk.f32.mxu0 %vm225_vm1, %v16717_v47  ;;  %v1980_v59 = vld [vmem:[#allocation3 + $0x18] sm:$0xff] }
 0x15f   : > { %v1408_v42 = vpop.f32.mrf.mxu0  ;;  %v1573_v45 = vld [vmem:[#allocation3 + $0xa8] sm:$0xff]  ;;  %v1859_v7 = vpop.f32.mrf.mxu1 }
 0x160   : > { %1504 = vst.msk [vmem:[#allocation3 + $0xc8] sm:$0xff] %vm347_vm4, %v1472_v26  ;;  %1958 = vst.msk [vmem:[#allocation3 + $0x90] sm:$0xff] %vm347_vm4, %v1926_v24  ;;  %v1471_v6 = vadd.f32 %v1408_v42, %v1205_v39  ;;  %v1929_v40 = vadd.f32 %v14188_v28, %v1573_v45  ;;  %v1979_v39 = vld [vmem:[#allocation3 + $0x10] sm:$0xff] }
 0x161   : > { %v14141_v50 = vpop.f32.mrf.mxu0  ;;  %v1572_v51 = vld [vmem:[#allocation3 + $0xa0] sm:$0xff]  ;;  %14476 = vmatmul.mubr.msk.f32.gmra.mxu0 %vm225_vm1, %v16729_v0  ;;  %v14194_v12 = vpop.f32.mrf.mxu1 }
 0x162   : > { %1503 = vst.msk [vmem:[#allocation3 + $0xc0] sm:$0xff] %vm347_vm4, %v1471_v6  ;;  %1961 = vst.msk [vmem:[#allocation3 + $0xa8] sm:$0xff] %vm347_vm4, %v1929_v40  ;;  %v1474_v47 = vadd.f32 %v14141_v50, %v1208_v46  ;;  %v1928_v30 = vadd.f32 %v1849_v33, %v1572_v51  ;;  %14478 = vmatprep.mubr.msk.f32.mxu0 %vm225_vm1, %v16733_v9  ;;  %v1982_v46 = vld [vmem:[#allocation3 + $0x28] sm:$0xff] }
 0x163   : > { %v1418_v52 = vpop.f32.mrf.mxu0  ;;  %v1575_v54 = vld [vmem:[#allocation3 + $0xb8] sm:$0xff]  ;;  %v1869_v57 = vpop.f32.mrf.mxu1 }
 0x164   : > { %1506 = vst.msk [vmem:[#allocation3 + $0xd8] sm:$0xff] %vm347_vm4, %v1474_v47  ;;  %1960 = vst.msk [vmem:[#allocation3 + $0xa0] sm:$0xff] %vm347_vm4, %v1928_v30  ;;  %v1473_v0 = vadd.f32 %v1418_v52, %v1207_v10  ;;  %v1931_v23 = vadd.f32 %v14191_v38, %v1575_v54  ;;  %v1981_v30 = vld [vmem:[#allocation3 + $0x20] sm:$0xff] }
 0x165   : > { %v14144_v34 = vpop.f32.mrf.mxu0  ;;  %v1574_v20 = vld [vmem:[#allocation3 + $0xb0] sm:$0xff]  ;;  %14479 = vmatmul.mubr.msk.f32.gmra.mxu0 %vm225_vm1, %v16747_v22  ;;  %v14197_v61 = vpop.f32.mrf.mxu1 }
 0x166   : > { %1505 = vst.msk [vmem:[#allocation3 + $0xd0] sm:$0xff] %vm347_vm4, %v1473_v0  ;;  %1963 = vst.msk [vmem:[#allocation3 + $0xb8] sm:$0xff] %vm347_vm4, %v1931_v23  ;;  %v1476_v9 = vadd.f32 %v14144_v34, %v1210_v60  ;;  %v1930_v29 = vadd.f32 %v1859_v7, %v1574_v20  ;;  %14481 = vmatprep.mubr.msk.f32.mxu0 %vm225_vm1, %v2676_v56  ;;  %v1984_v0 = vld [vmem:[#allocation3 + $0x38] sm:$0xff] }
 0x167   : > { %v1428_v2 = vpop.f32.mrf.mxu0  ;;  %v1577_v25 = vld [vmem:[#allocation3 + $0xc8] sm:$0xff]  ;;  %v1879_v5 = vpop.f32.mrf.mxu1 }
 0x168   : > { %1508 = vst.msk [vmem:[#allocation3 + $0xe8] sm:$0xff] %vm347_vm4, %v1476_v9  ;;  %1962 = vst.msk [vmem:[#allocation3 + $0xb0] sm:$0xff] %vm347_vm4, %v1930_v29  ;;  %v1475_v8 = vadd.f32 %v1428_v2, %v1209_v1  ;;  %v1933_v22 = vadd.f32 %v14194_v12, %v1577_v25  ;;  %v1983_v9 = vld [vmem:[#allocation3 + $0x30] sm:$0xff] }
 0x169   : > { %v14147_v44 = vpop.f32.mrf.mxu0  ;;  %v1576_v11 = vld [vmem:[#allocation3 + $0xc0] sm:$0xff]  ;;  %14482 = vmatmul.mubr.msk.f32.gmra.mxu0 %vm225_vm1, %v2677_v62  ;;  %v14200_v13 = vpop.f32.mrf.mxu1 }
 0x16a   : > { %1507 = vst.msk [vmem:[#allocation3 + $0xe0] sm:$0xff] %vm347_vm4, %v1475_v8  ;;  %1965 = vst.msk [vmem:[#allocation3 + $0xc8] sm:$0xff] %vm347_vm4, %v1933_v22  ;;  %v1478_v14 = vadd.f32 %v14147_v44, %v1212_v43  ;;  %v1932_v49 = vadd.f32 %v1869_v57, %v1576_v11 }
 0x16b   : > { %v1438_v15 = vpop.f32.mrf.mxu0  ;;  %v1579_v48 = vld [vmem:[#allocation3 + $0xd8] sm:$0xff]  ;;  %v1889_v16 = vpop.f32.mrf.mxu1 }
 0x16c   : > { %1510 = vst.msk [vmem:[#allocation3 + $0xf8] sm:$0xff] %vm347_vm4, %v1478_v14  ;;  %1964 = vst.msk [vmem:[#allocation3 + $0xc0] sm:$0xff] %vm347_vm4, %v1932_v49  ;;  %v1477_v17 = vadd.f32 %v1438_v15, %v1211_v37  ;;  %v1935_v41 = vadd.f32 %v14197_v61, %v1579_v48 }
 0x16d   : > { %v1578_v63 = vld [vmem:[#allocation3 + $0xd0] sm:$0xff]  ;;  %v14214_v21 = vpop.f32.mrf.mxu0  ;;  %v14203_v27 = vpop.f32.mrf.mxu1 }
 0x16e   : > { %1509 = vst.msk [vmem:[#allocation3 + $0xf0] sm:$0xff] %vm347_vm4, %v1477_v17  ;;  %1967 = vst.msk [vmem:[#allocation3 + $0xd8] sm:$0xff] %vm347_vm4, %v1935_v41  ;;  %v1934_v28 = vadd.f32 %v1879_v5, %v1578_v63  ;;  %v2244_v3 = vadd.f32 %v14214_v21, %v1978_v19  ;;  %v1986_v5 = vld [vmem:[#allocation3 + $0x48] sm:$0xff] }
 0x16f   : > { %v1581_v55 = vld [vmem:[#allocation3 + $0xe8] sm:$0xff]  ;;  %v2084_v53 = vpop.f32.mrf.mxu0  ;;  %v1899_v32 = vpop.f32.mrf.mxu1 }
 0x170   : > { %1966 = vst.msk [vmem:[#allocation3 + $0xd0] sm:$0xff] %vm347_vm4, %v1934_v28  ;;  %2276 = vst.msk [vmem:[#allocation3 + $0x8] sm:$0xff] %vm347_vm4, %v2244_v3  ;;  %v1937_v33 = vadd.f32 %v14200_v13, %v1581_v55  ;;  %v2243_v35 = vadd.f32 %v2084_v53, %v1977_v31  ;;  %v1985_v13 = vld [vmem:[#allocation3 + $0x40] sm:$0xff] }
 0x171   : > { %v1580_v18 = vld [vmem:[#allocation3 + $0xe0] sm:$0xff]  ;;  %v14217_v58 = vpop.f32.mrf.mxu0  ;;  %v14270_v36 = vpop.f32.mrf.mxu1 }
 0x172   : > { %1969 = vst.msk [vmem:[#allocation3 + $0xe8] sm:$0xff] %vm347_vm4, %v1937_v33  ;;  %2275 = vst.msk [vmem:[#allocation3] sm:$0xff] %vm347_vm4, %v2243_v35  ;;  %v1936_v38 = vadd.f32 %v1889_v16, %v1580_v18  ;;  %v2246_v26 = vadd.f32 %v14217_v58, %v1980_v59  ;;  %v1988_v16 = vld [vmem:[#allocation3 + $0x58] sm:$0xff] }
 0x173   : > { %v1583_v24 = vld [vmem:[#allocation3 + $0xf8] sm:$0xff]  ;;  %v2094_v42 = vpop.f32.mrf.mxu0  ;;  %v2419_v45 = vpop.f32.mrf.mxu1 }
 0x174   : > { %1968 = vst.msk [vmem:[#allocation3 + $0xe0] sm:$0xff] %vm347_vm4, %v1936_v38  ;;  %2278 = vst.msk [vmem:[#allocation3 + $0x18] sm:$0xff] %vm347_vm4, %v2246_v26  ;;  %v1939_v7 = vadd.f32 %v14203_v27, %v1583_v24  ;;  %v2245_v6 = vadd.f32 %v2094_v42, %v1979_v39  ;;  %v1987_v27 = vld [vmem:[#allocation3 + $0x50] sm:$0xff] }
 0x175   : > { %v1582_v40 = vld [vmem:[#allocation3 + $0xf0] sm:$0xff]  ;;  %v14220_v50 = vpop.f32.mrf.mxu0  ;;  %v14273_v51 = vpop.f32.mrf.mxu1 }
 0x176   : > { %1971 = vst.msk [vmem:[#allocation3 + $0xf8] sm:$0xff] %vm347_vm4, %v1939_v7  ;;  %2277 = vst.msk [vmem:[#allocation3 + $0x10] sm:$0xff] %vm347_vm4, %v2245_v6  ;;  %v1938_v12 = vadd.f32 %v1899_v32, %v1582_v40  ;;  %v2248_v47 = vadd.f32 %v14220_v50, %v1982_v46  ;;  %v1990_v32 = vld [vmem:[#allocation3 + $0x68] sm:$0xff] }
 0x177   : > { %v2104_v10 = vpop.f32.mrf.mxu0  ;;  %v2313_v52 = vld [vmem:[#allocation3 + $0x8] sm:$0xff]  ;;  %v2429_v54 = vpop.f32.mrf.mxu1 }
 0x178   : > { %1970 = vst.msk [vmem:[#allocation3 + $0xf0] sm:$0xff] %vm347_vm4, %v1938_v12  ;;  %2280 = vst.msk [vmem:[#allocation3 + $0x28] sm:$0xff] %vm347_vm4, %v2248_v47  ;;  %v2247_v56 = vadd.f32 %v2104_v10, %v1981_v30  ;;  %v2579_v57 = vadd.f32 %v14270_v36, %v2313_v52  ;;  %v1989_v36 = vld [vmem:[#allocation3 + $0x60] sm:$0xff] }
 0x179   : > { %v14223_v23 = vpop.f32.mrf.mxu0  ;;  %v2312_v60 = vld [vmem:[#allocation3] sm:$0xff]  ;;  %v14276_v34 = vpop.f32.mrf.mxu1 }
 0x17a   : > { %2279 = vst.msk [vmem:[#allocation3 + $0x20] sm:$0xff] %vm347_vm4, %v2247_v56  ;;  %2611 = vst.msk [vmem:[#allocation3 + $0x8] sm:$0xff] %vm347_vm4, %v2579_v57  ;;  %v2250_v20 = vadd.f32 %v14223_v23, %v1984_v0  ;;  %v2578_v61 = vadd.f32 %v2419_v45, %v2312_v60  ;;  %v1992_v45 = vld [vmem:[#allocation3 + $0x78] sm:$0xff] }
 0x17b   : > { %v2114_v29 = vpop.f32.mrf.mxu0  ;;  %v2315_v62 = vld [vmem:[#allocation3 + $0x18] sm:$0xff]  ;;  %v2439_v1 = vpop.f32.mrf.mxu1 }
 0x17c   : > { %2282 = vst.msk [vmem:[#allocation3 + $0x38] sm:$0xff] %vm347_vm4, %v2250_v20  ;;  %2610 = vst.msk [vmem:[#allocation3] sm:$0xff] %vm347_vm4, %v2578_v61  ;;  %v2249_v2 = vadd.f32 %v2114_v29, %v1983_v9  ;;  %v2581_v25 = vadd.f32 %v14273_v51, %v2315_v62  ;;  %v1991_v51 = vld [vmem:[#allocation3 + $0x70] sm:$0xff] }
 0x17d   : > { %v14226_v8 = vpop.f32.mrf.mxu0  ;;  %v2314_v22 = vld [vmem:[#allocation3 + $0x10] sm:$0xff]  ;;  %v14279_v43 = vpop.f32.mrf.mxu1 }
 0x17e   : > { %2281 = vst.msk [vmem:[#allocation3 + $0x30] sm:$0xff] %vm347_vm4, %v2249_v2  ;;  %2613 = vst.msk [vmem:[#allocation3 + $0x18] sm:$0xff] %vm347_vm4, %v2581_v25  ;;  %v2252_v44 = vadd.f32 %v14226_v8, %v1986_v5  ;;  %v2580_v11 = vadd.f32 %v2429_v54, %v2314_v22  ;;  %v1994_v54 = vld [vmem:[#allocation3 + $0x88] sm:$0xff] }
 0x17f   : > { %v2124_v14 = vpop.f32.mrf.mxu0  ;;  %v2317_v49 = vld [vmem:[#allocation3 + $0x28] sm:$0xff]  ;;  %v2449_v37 = vpop.f32.mrf.mxu1 }
 0x180   : > { %2284 = vst.msk [vmem:[#allocation3 + $0x48] sm:$0xff] %vm347_vm4, %v2252_v44  ;;  %2612 = vst.msk [vmem:[#allocation3 + $0x10] sm:$0xff] %vm347_vm4, %v2580_v11  ;;  %v2251_v15 = vadd.f32 %v2124_v14, %v1985_v13  ;;  %v2583_v48 = vadd.f32 %v14276_v34, %v2317_v49  ;;  %v1993_v34 = vld [vmem:[#allocation3 + $0x80] sm:$0xff] }
 0x181   : > { %v14229_v17 = vpop.f32.mrf.mxu0  ;;  %v2316_v41 = vld [vmem:[#allocation3 + $0x20] sm:$0xff]  ;;  %v14282_v63 = vpop.f32.mrf.mxu1 }
 0x182   : > { %2283 = vst.msk [vmem:[#allocation3 + $0x40] sm:$0xff] %vm347_vm4, %v2251_v15  ;;  %2615 = vst.msk [vmem:[#allocation3 + $0x28] sm:$0xff] %vm347_vm4, %v2583_v48  ;;  %v2254_v19 = vadd.f32 %v14229_v17, %v1988_v16  ;;  %v2582_v21 = vadd.f32 %v2439_v1, %v2316_v41  ;;  %v1996_v1 = vld [vmem:[#allocation3 + $0x98] sm:$0xff] }
 0x183   : > { %v2134_v28 = vpop.f32.mrf.mxu0  ;;  %v2319_v3 = vld [vmem:[#allocation3 + $0x38] sm:$0xff]  ;;  %v2459_v55 = vpop.f32.mrf.mxu1 }
 0x184   : > { %2286 = vst.msk [vmem:[#allocation3 + $0x58] sm:$0xff] %vm347_vm4, %v2254_v19  ;;  %2614 = vst.msk [vmem:[#allocation3 + $0x20] sm:$0xff] %vm347_vm4, %v2582_v21  ;;  %v2253_v31 = vadd.f32 %v2134_v28, %v1987_v27  ;;  %v2585_v53 = vadd.f32 %v14279_v43, %v2319_v3  ;;  %v1995_v43 = vld [vmem:[#allocation3 + $0x90] sm:$0xff] }
 0x185   : > { %v14232_v33 = vpop.f32.mrf.mxu0  ;;  %v2318_v35 = vld [vmem:[#allocation3 + $0x30] sm:$0xff]  ;;  %v14285_v18 = vpop.f32.mrf.mxu1 }
 0x186   : > { %2285 = vst.msk [vmem:[#allocation3 + $0x50] sm:$0xff] %vm347_vm4, %v2253_v31  ;;  %2617 = vst.msk [vmem:[#allocation3 + $0x38] sm:$0xff] %vm347_vm4, %v2585_v53  ;;  %v2256_v59 = vadd.f32 %v14232_v33, %v1990_v32  ;;  %v2584_v58 = vadd.f32 %v2449_v37, %v2318_v35  ;;  %v1998_v37 = vld [vmem:[#allocation3 + $0xa8] sm:$0xff] }
 0x187   : > { %v2144_v38 = vpop.f32.mrf.mxu0  ;;  %v2321_v26 = vld [vmem:[#allocation3 + $0x48] sm:$0xff]  ;;  %v2469_v24 = vpop.f32.mrf.mxu1 }
 0x188   : > { %2288 = vst.msk [vmem:[#allocation3 + $0x68] sm:$0xff] %vm347_vm4, %v2256_v59  ;;  %2616 = vst.msk [vmem:[#allocation3 + $0x30] sm:$0xff] %vm347_vm4, %v2584_v58  ;;  %v2255_v39 = vadd.f32 %v2144_v38, %v1989_v36  ;;  %v2587_v42 = vadd.f32 %v14282_v63, %v2321_v26  ;;  %v1997_v63 = vld [vmem:[#allocation3 + $0xa0] sm:$0xff] }
 0x189   : > { %v14235_v7 = vpop.f32.mrf.mxu0  ;;  %v2320_v6 = vld [vmem:[#allocation3 + $0x40] sm:$0xff]  ;;  %v14288_v40 = vpop.f32.mrf.mxu1 }
 0x18a   : > { %2287 = vst.msk [vmem:[#allocation3 + $0x60] sm:$0xff] %vm347_vm4, %v2255_v39  ;;  %2619 = vst.msk [vmem:[#allocation3 + $0x48] sm:$0xff] %vm347_vm4, %v2587_v42  ;;  %v2258_v46 = vadd.f32 %v14235_v7, %v1992_v45  ;;  %v2586_v50 = vadd.f32 %v2459_v55, %v2320_v6  ;;  %v2000_v55 = vld [vmem:[#allocation3 + $0xb8] sm:$0xff] }
 0x18b   : > { %v2154_v12 = vpop.f32.mrf.mxu0  ;;  %v2323_v47 = vld [vmem:[#allocation3 + $0x58] sm:$0xff]  ;;  %v2479_v30 = vpop.f32.mrf.mxu1 }
 0x18c   : > { %2290 = vst.msk [vmem:[#allocation3 + $0x78] sm:$0xff] %vm347_vm4, %v2258_v46  ;;  %2618 = vst.msk [vmem:[#allocation3 + $0x40] sm:$0xff] %vm347_vm4, %v2586_v50  ;;  %v2257_v10 = vadd.f32 %v2154_v12, %v1991_v51  ;;  %v2589_v52 = vadd.f32 %v14285_v18, %v2323_v47  ;;  %v1999_v18 = vld [vmem:[#allocation3 + $0xb0] sm:$0xff] }
 0x18d   : > { %v14238_v56 = vpop.f32.mrf.mxu0  ;;  %v2322_v57 = vld [vmem:[#allocation3 + $0x50] sm:$0xff]  ;;  %v14291_v0 = vpop.f32.mrf.mxu1 }
 0x18e   : > { %2289 = vst.msk [vmem:[#allocation3 + $0x70] sm:$0xff] %vm347_vm4, %v2257_v10  ;;  %2621 = vst.msk [vmem:[#allocation3 + $0x58] sm:$0xff] %vm347_vm4, %v2589_v52  ;;  %v2260_v23 = vadd.f32 %v14238_v56, %v1994_v54  ;;  %v2588_v60 = vadd.f32 %v2469_v24, %v2322_v57  ;;  %v2002_v24 = vld [vmem:[#allocation3 + $0xc8] sm:$0xff] }
 0x18f   : > { %v2164_v20 = vpop.f32.mrf.mxu0  ;;  %v2325_v61 = vld [vmem:[#allocation3 + $0x68] sm:$0xff]  ;;  %v2489_v9 = vpop.f32.mrf.mxu1 }
 0x190   : > { %2292 = vst.msk [vmem:[#allocation3 + $0x88] sm:$0xff] %vm347_vm4, %v2260_v23  ;;  %2620 = vst.msk [vmem:[#allocation3 + $0x50] sm:$0xff] %vm347_vm4, %v2588_v60  ;;  %v2259_v29 = vadd.f32 %v2164_v20, %v1993_v34  ;;  %v2591_v62 = vadd.f32 %v14288_v40, %v2325_v61  ;;  %v2001_v40 = vld [vmem:[#allocation3 + $0xc0] sm:$0xff] }
 0x191   : > { %v14241_v2 = vpop.f32.mrf.mxu0  ;;  %v2324_v25 = vld [vmem:[#allocation3 + $0x60] sm:$0xff]  ;;  %v14294_v5 = vpop.f32.mrf.mxu1 }
 0x192   : > { %2291 = vst.msk [vmem:[#allocation3 + $0x80] sm:$0xff] %vm347_vm4, %v2259_v29  ;;  %2623 = vst.msk [vmem:[#allocation3 + $0x68] sm:$0xff] %vm347_vm4, %v2591_v62  ;;  %v2262_v8 = vadd.f32 %v14241_v2, %v1996_v1  ;;  %v2590_v22 = vadd.f32 %v2479_v30, %v2324_v25  ;;  %v2004_v30 = vld [vmem:[#allocation3 + $0xd8] sm:$0xff] }
 0x193   : > { %v2174_v44 = vpop.f32.mrf.mxu0  ;;  %v2327_v11 = vld [vmem:[#allocation3 + $0x78] sm:$0xff]  ;;  %v2499_v13 = vpop.f32.mrf.mxu1 }
 0x194   : > { %2294 = vst.msk [vmem:[#allocation3 + $0x98] sm:$0xff] %vm347_vm4, %v2262_v8  ;;  %2622 = vst.msk [vmem:[#allocation3 + $0x60] sm:$0xff] %vm347_vm4, %v2590_v22  ;;  %v2261_v14 = vadd.f32 %v2174_v44, %v1995_v43  ;;  %v2593_v49 = vadd.f32 %v14291_v0, %v2327_v11  ;;  %v2003_v0 = vld [vmem:[#allocation3 + $0xd0] sm:$0xff] }
 0x195   : > { %v14244_v15 = vpop.f32.mrf.mxu0  ;;  %v2326_v48 = vld [vmem:[#allocation3 + $0x70] sm:$0xff]  ;;  %v14297_v16 = vpop.f32.mrf.mxu1 }
 0x196   : > { %2293 = vst.msk [vmem:[#allocation3 + $0x90] sm:$0xff] %vm347_vm4, %v2261_v14  ;;  %2625 = vst.msk [vmem:[#allocation3 + $0x78] sm:$0xff] %vm347_vm4, %v2593_v49  ;;  %v2264_v17 = vadd.f32 %v14244_v15, %v1998_v37  ;;  %v2592_v41 = vadd.f32 %v2489_v9, %v2326_v48  ;;  %v2006_v9 = vld [vmem:[#allocation3 + $0xe8] sm:$0xff] }
 0x197   : > { %v2184_v19 = vpop.f32.mrf.mxu0  ;;  %v2329_v21 = vld [vmem:[#allocation3 + $0x88] sm:$0xff]  ;;  %v2509_v27 = vpop.f32.mrf.mxu1 }
 0x198   : > { %2296 = vst.msk [vmem:[#allocation3 + $0xa8] sm:$0xff] %vm347_vm4, %v2264_v17  ;;  %2624 = vst.msk [vmem:[#allocation3 + $0x70] sm:$0xff] %vm347_vm4, %v2592_v41  ;;  %v2263_v28 = vadd.f32 %v2184_v19, %v1997_v63  ;;  %v2595_v3 = vadd.f32 %v14294_v5, %v2329_v21  ;;  %v2005_v5 = vld [vmem:[#allocation3 + $0xe0] sm:$0xff] }
 0x199   : > { %v14247_v31 = vpop.f32.mrf.mxu0  ;;  %v2328_v53 = vld [vmem:[#allocation3 + $0x80] sm:$0xff]  ;;  %v14300_v32 = vpop.f32.mrf.mxu1 }
 0x19a   : > { %2295 = vst.msk [vmem:[#allocation3 + $0xa0] sm:$0xff] %vm347_vm4, %v2263_v28  ;;  %2627 = vst.msk [vmem:[#allocation3 + $0x88] sm:$0xff] %vm347_vm4, %v2595_v3  ;;  %v2266_v33 = vadd.f32 %v14247_v31, %v2000_v55  ;;  %v2594_v35 = vadd.f32 %v2499_v13, %v2328_v53  ;;  %v2008_v13 = vld [vmem:[#allocation3 + $0xf8] sm:$0xff]  ;;  %v2684_v28 = vld [vmem:[#allocation3 + $0x8] sm:$0xff] }
 0x19b   : > { %v2194_v59 = vpop.f32.mrf.mxu0  ;;  %v2331_v58 = vld [vmem:[#allocation3 + $0x98] sm:$0xff]  ;;  %v2519_v36 = vpop.f32.mrf.mxu1 }
 0x19c   : > { %2298 = vst.msk [vmem:[#allocation3 + $0xb8] sm:$0xff] %vm347_vm4, %v2266_v33  ;;  %2626 = vst.msk [vmem:[#allocation3 + $0x80] sm:$0xff] %vm347_vm4, %v2594_v35  ;;  %v2265_v38 = vadd.f32 %v2194_v59, %v1999_v18  ;;  %v2597_v26 = vadd.f32 %v14297_v16, %v2331_v58  ;;  %v2007_v16 = vld [vmem:[#allocation3 + $0xf0] sm:$0xff]  ;;  %v2683_v33 = vld [vmem:[#allocation3] sm:$0xff] }
 0x19d   : > { %v14250_v39 = vpop.f32.mrf.mxu0  ;;  %v2330_v42 = vld [vmem:[#allocation3 + $0x90] sm:$0xff]  ;;  %v14303_v45 = vpop.f32.mrf.mxu1 }
 0x19e   : > { %2297 = vst.msk [vmem:[#allocation3 + $0xb0] sm:$0xff] %vm347_vm4, %v2265_v38  ;;  %2629 = vst.msk [vmem:[#allocation3 + $0x98] sm:$0xff] %vm347_vm4, %v2597_v26  ;;  %v2268_v7 = vadd.f32 %v14250_v39, %v2002_v24  ;;  %v2596_v6 = vadd.f32 %v2509_v27, %v2330_v42  ;;  %v2686_v38 = vld [vmem:[#allocation3 + $0x18] sm:$0xff] }
 0x19f   : > { %v2204_v46 = vpop.f32.mrf.mxu0  ;;  %v2333_v50 = vld [vmem:[#allocation3 + $0xa8] sm:$0xff]  ;;  %v2529_v51 = vpop.f32.mrf.mxu1 }
 0x1a0   : > { %2300 = vst.msk [vmem:[#allocation3 + $0xc8] sm:$0xff] %vm347_vm4, %v2268_v7  ;;  %2628 = vst.msk [vmem:[#allocation3 + $0x90] sm:$0xff] %vm347_vm4, %v2596_v6  ;;  %v2267_v12 = vadd.f32 %v2204_v46, %v2001_v40  ;;  %v2599_v47 = vadd.f32 %v14300_v32, %v2333_v50  ;;  %v2685_v7 = vld [vmem:[#allocation3 + $0x10] sm:$0xff] }
 0x1a1   : > { %v14253_v10 = vpop.f32.mrf.mxu0  ;;  %v2332_v52 = vld [vmem:[#allocation3 + $0xa0] sm:$0xff]  ;;  %v14306_v54 = vpop.f32.mrf.mxu1 }
 0x1a2   : > { %2299 = vst.msk [vmem:[#allocation3 + $0xc0] sm:$0xff] %vm347_vm4, %v2267_v12  ;;  %2631 = vst.msk [vmem:[#allocation3 + $0xa8] sm:$0xff] %vm347_vm4, %v2599_v47  ;;  %v2270_v56 = vadd.f32 %v14253_v10, %v2004_v30  ;;  %v2598_v57 = vadd.f32 %v2519_v36, %v2332_v52  ;;  %v2688_v12 = vld [vmem:[#allocation3 + $0x28] sm:$0xff] }
 0x1a3   : > { %v2214_v23 = vpop.f32.mrf.mxu0  ;;  %v2335_v60 = vld [vmem:[#allocation3 + $0xb8] sm:$0xff]  ;;  %v2539_v34 = vpop.f32.mrf.mxu1 }
 0x1a4   : > { %2302 = vst.msk [vmem:[#allocation3 + $0xd8] sm:$0xff] %vm347_vm4, %v2270_v56  ;;  %2630 = vst.msk [vmem:[#allocation3 + $0xa0] sm:$0xff] %vm347_vm4, %v2598_v57  ;;  %v2269_v20 = vadd.f32 %v2214_v23, %v2003_v0  ;;  %v2601_v61 = vadd.f32 %v14303_v45, %v2335_v60  ;;  %v2687_v56 = vld [vmem:[#allocation3 + $0x20] sm:$0xff] }
 0x1a5   : > { %v14256_v29 = vpop.f32.mrf.mxu0  ;;  %v2334_v62 = vld [vmem:[#allocation3 + $0xb0] sm:$0xff]  ;;  %v14309_v1 = vpop.f32.mrf.mxu1 }
 0x1a6   : > { %2301 = vst.msk [vmem:[#allocation3 + $0xd0] sm:$0xff] %vm347_vm4, %v2269_v20  ;;  %2633 = vst.msk [vmem:[#allocation3 + $0xb8] sm:$0xff] %vm347_vm4, %v2601_v61  ;;  %v2272_v2 = vadd.f32 %v14256_v29, %v2006_v9  ;;  %v2600_v25 = vadd.f32 %v2529_v51, %v2334_v62  ;;  %v2690_v20 = vld [vmem:[#allocation3 + $0x38] sm:$0xff] }
 0x1a7   : > { %v2224_v8 = vpop.f32.mrf.mxu0  ;;  %v2337_v22 = vld [vmem:[#allocation3 + $0xc8] sm:$0xff]  ;;  %v2549_v43 = vpop.f32.mrf.mxu1 }
 0x1a8   : > { %2304 = vst.msk [vmem:[#allocation3 + $0xe8] sm:$0xff] %vm347_vm4, %v2272_v2  ;;  %2632 = vst.msk [vmem:[#allocation3 + $0xb0] sm:$0xff] %vm347_vm4, %v2600_v25  ;;  %v2271_v44 = vadd.f32 %v2224_v8, %v2005_v5  ;;  %v2603_v11 = vadd.f32 %v14306_v54, %v2337_v22  ;;  %v12269_v54 = vld [vmem:[%s19997_s1 + $0x138] sm:$0xf]  ;;  %v2689_v2 = vld [vmem:[#allocation3 + $0x30] sm:$0xff] }
 0x1a9   : > { %v14259_v14 = vpop.f32.mrf.mxu0  ;;  %v2336_v49 = vld [vmem:[#allocation3 + $0xc0] sm:$0xff]  ;;  %v14312_v37 = vpop.f32.mrf.mxu1  ;;  %14484 = vmatprep.subr.msk.mxu1 %vm548_vm0, %v12269_v54 }
 0x1aa   : > { %2303 = vst.msk [vmem:[#allocation3 + $0xe0] sm:$0xff] %vm347_vm4, %v2271_v44  ;;  %2635 = vst.msk [vmem:[#allocation3 + $0xc8] sm:$0xff] %vm347_vm4, %v2603_v11  ;;  %v2274_v15 = vadd.f32 %v14259_v14, %v2008_v13  ;;  %v2602_v48 = vadd.f32 %v2539_v34, %v2336_v49  ;;  %14485 = vmatpush3.msk.msra.mxu1 %vm548_vm0, %v12269_v54  ;;  %v2692_v44 = vld [vmem:[#allocation3 + $0x48] sm:$0xff] }
 0x1ab   : > { %v2234_v17 = vpop.f32.mrf.mxu0  ;;  %v2339_v41 = vld [vmem:[#allocation3 + $0xd8] sm:$0xff]  ;;  %v2559_v63 = vpop.f32.mrf.mxu1 }
 0x1ac   : > { %2306 = vst.msk [vmem:[#allocation3 + $0xf8] sm:$0xff] %vm347_vm4, %v2274_v15  ;;  %2634 = vst.msk [vmem:[#allocation3 + $0xc0] sm:$0xff] %vm347_vm4, %v2602_v48  ;;  %v2273_v19 = vadd.f32 %v2234_v17, %v2007_v16  ;;  %v2605_v21 = vadd.f32 %v14309_v1, %v2339_v41  ;;  %v12268_v15 = vld [vmem:[%s19997_s1 + $0x130] sm:$0xff]  ;;  %v12267_v48 = vld [vmem:[%s19997_s1 + $0x128] sm:$0xff] }
 0x1ad   : > { %v2338_v27 = vld [vmem:[#allocation3 + $0xd0] sm:$0xff]  ;;  %v14326_v3 = vpop.f32.mrf.mxu0  ;;  %v14315_v55 = vpop.f32.mrf.mxu1  ;;  %v2691_v16 = vld [vmem:[#allocation3 + $0x40] sm:$0xff]  ;;  %14486 = vmatprep.subr.mxu1 %v12268_v15 }
 0x1ae   : > { %2305 = vst.msk [vmem:[#allocation3 + $0xf0] sm:$0xff] %vm347_vm4, %v2273_v19  ;;  %2637 = vst.msk [vmem:[#allocation3 + $0xd8] sm:$0xff] %vm347_vm4, %v2605_v21  ;;  %v2604_v31 = vadd.f32 %v2549_v43, %v2338_v27  ;;  %v3040_v53 = vadd.f32 %v14326_v3, %v2684_v28  ;;  %v12306_v19 = vld [vmem:[%s19997_s1 + $0x198] sm:$0xf]  ;;  %14487 = vmatpush3.msra.mxu1 %v12268_v15  ;;  %v12266_v28 = vld [vmem:[%s19997_s1 + $0x120] sm:$0xff] }
 0x1af   : > { %v2341_v32 = vld [vmem:[#allocation3 + $0xe8] sm:$0xff]  ;;  %v2880_v35 = vpop.f32.mrf.mxu0  ;;  %v2569_v18 = vpop.f32.mrf.mxu1  ;;  %14540 = vmatprep.subr.msk.mxu0 %vm548_vm0, %v12306_v19  ;;  %v2694_v3 = vld [vmem:[#allocation3 + $0x58] sm:$0xff]  ;;  %14488 = vmatprep.subr.mxu1 %v12267_v48 }
 0x1b0   : > { %2636 = vst.msk [vmem:[#allocation3 + $0xd0] sm:$0xff] %vm347_vm4, %v2604_v31  ;;  %3072 = vst.msk [vmem:[#allocation3 + $0x8] sm:$0xff] %vm347_vm4, %v3040_v53  ;;  %v2607_v59 = vadd.f32 %v14312_v37, %v2341_v32  ;;  %v3039_v58 = vadd.f32 %v2880_v35, %v2683_v33  ;;  %14541 = vmatpush3.msk.msra.mxu0 %vm548_vm0, %v12306_v19  ;;  %14489 = vmatpush3.msra.mxu1 %v12267_v48  ;;  %v2693_v35 = vld [vmem:[#allocation3 + $0x50] sm:$0xff] }
 0x1b1   : > { %v2340_v36 = vld [vmem:[#allocation3 + $0xe0] sm:$0xff]  ;;  %v14329_v26 = vpop.f32.mrf.mxu0  ;;  %v14382_v24 = vpop.f32.mrf.mxu1  ;;  %14490 = vmatprep.subr.mxu1 %v12266_v28  ;;  %v2701_v48 = vld [vmem:[#allocation3 + $0x90] sm:$0xff] }
 0x1b2   : > { %2639 = vst.msk [vmem:[#allocation3 + $0xe8] sm:$0xff] %vm347_vm4, %v2607_v59  ;;  %3071 = vst.msk [vmem:[#allocation3] sm:$0xff] %vm347_vm4, %v3039_v58  ;;  %v2606_v39 = vadd.f32 %v2559_v63, %v2340_v36  ;;  %v3042_v42 = vadd.f32 %v14329_v26, %v2686_v38  ;;  %14491 = vmatpush3.msra.mxu1 %v12266_v28  ;;  %v2696_v26 = vld [vmem:[#allocation3 + $0x68] sm:$0xff] }
 0x1b3   : > { %v2343_v45 = vld [vmem:[#allocation3 + $0xf8] sm:$0xff]  ;;  %v2890_v6 = vpop.f32.mrf.mxu0  ;;  %v3215_v40 = vpop.f32.mrf.mxu1 }
 0x1b4   : > { %2638 = vst.msk [vmem:[#allocation3 + $0xe0] sm:$0xff] %vm347_vm4, %v2606_v39  ;;  %3074 = vst.msk [vmem:[#allocation3 + $0x18] sm:$0xff] %vm347_vm4, %v3042_v42  ;;  %v2609_v46 = vadd.f32 %v14315_v55, %v2343_v45  ;;  %v3041_v50 = vadd.f32 %v2890_v6, %v2685_v7  ;;  %v2695_v6 = vld [vmem:[#allocation3 + $0x60] sm:$0xff] }
 0x1b5   : > { %v2342_v51 = vld [vmem:[#allocation3 + $0xf0] sm:$0xff]  ;;  %v14332_v47 = vpop.f32.mrf.mxu0  ;;  %v14385_v30 = vpop.f32.mrf.mxu1 }
 0x1b6   : > { %2641 = vst.msk [vmem:[#allocation3 + $0xf8] sm:$0xff] %vm347_vm4, %v2609_v46  ;;  %3073 = vst.msk [vmem:[#allocation3 + $0x10] sm:$0xff] %vm347_vm4, %v3041_v50  ;;  %v2608_v10 = vadd.f32 %v2569_v18, %v2342_v51  ;;  %v3044_v52 = vadd.f32 %v14332_v47, %v2688_v12  ;;  %v2698_v47 = vld [vmem:[#allocation3 + $0x78] sm:$0xff] }
 0x1b7   : > { %v2900_v57 = vpop.f32.mrf.mxu0  ;;  %v3109_v0 = vld [vmem:[#allocation3 + $0x8] sm:$0xff]  ;;  %v3225_v23 = vpop.f32.mrf.mxu1 }
 0x1b8   : > { %2640 = vst.msk [vmem:[#allocation3 + $0xf0] sm:$0xff] %vm347_vm4, %v2608_v10  ;;  %3076 = vst.msk [vmem:[#allocation3 + $0x28] sm:$0xff] %vm347_vm4, %v3044_v52  ;;  %v3043_v60 = vadd.f32 %v2900_v57, %v2687_v56  ;;  %v3375_v34 = vadd.f32 %v14382_v24, %v3109_v0  ;;  %v2697_v57 = vld [vmem:[#allocation3 + $0x70] sm:$0xff] }
 0x1b9   : > { %v14335_v61 = vpop.f32.mrf.mxu0  ;;  %v3108_v9 = vld [vmem:[#allocation3] sm:$0xff]  ;;  %v14388_v29 = vpop.f32.mrf.mxu1 }
 0x1ba   : > { %3075 = vst.msk [vmem:[#allocation3 + $0x20] sm:$0xff] %vm347_vm4, %v3043_v60  ;;  %3407 = vst.msk [vmem:[#allocation3 + $0x8] sm:$0xff] %vm347_vm4, %v3375_v34  ;;  %v3046_v62 = vadd.f32 %v14335_v61, %v2690_v20  ;;  %v3374_v1 = vadd.f32 %v3215_v40, %v3108_v9  ;;  %v2700_v61 = vld [vmem:[#allocation3 + $0x88] sm:$0xff] }
 0x1bb   : > { %v2910_v25 = vpop.f32.mrf.mxu0  ;;  %v3111_v5 = vld [vmem:[#allocation3 + $0x18] sm:$0xff]  ;;  %v3235_v8 = vpop.f32.mrf.mxu1 }
 0x1bc   : > { %3078 = vst.msk [vmem:[#allocation3 + $0x38] sm:$0xff] %vm347_vm4, %v3046_v62  ;;  %3406 = vst.msk [vmem:[#allocation3] sm:$0xff] %vm347_vm4, %v3374_v1  ;;  %v3045_v22 = vadd.f32 %v2910_v25, %v2689_v2  ;;  %v3377_v43 = vadd.f32 %v14385_v30, %v3111_v5  ;;  %v2699_v25 = vld [vmem:[#allocation3 + $0x80] sm:$0xff] }
 0x1bd   : > { %v14338_v11 = vpop.f32.mrf.mxu0  ;;  %v3110_v13 = vld [vmem:[#allocation3 + $0x10] sm:$0xff]  ;;  %v14391_v14 = vpop.f32.mrf.mxu1 }
 0x1be   : > { %3077 = vst.msk [vmem:[#allocation3 + $0x30] sm:$0xff] %vm347_vm4, %v3045_v22  ;;  %3409 = vst.msk [vmem:[#allocation3 + $0x18] sm:$0xff] %vm347_vm4, %v3377_v43  ;;  %v3048_v49 = vadd.f32 %v14338_v11, %v2692_v44  ;;  %v3376_v37 = vadd.f32 %v3225_v23, %v3110_v13  ;;  %v2702_v11 = vld [vmem:[#allocation3 + $0x98] sm:$0xff] }
 0x1bf   : > { %v2920_v17 = vpop.f32.mrf.mxu0  ;;  %v3113_v41 = vld [vmem:[#allocation3 + $0x28] sm:$0xff]  ;;  %v3245_v63 = vpop.f32.mrf.mxu1 }
 0x1c0   : > { %3080 = vst.msk [vmem:[#allocation3 + $0x48] sm:$0xff] %vm347_vm4, %v3048_v49  ;;  %3408 = vst.msk [vmem:[#allocation3 + $0x10] sm:$0xff] %vm347_vm4, %v3376_v37  ;;  %v3047_v21 = vadd.f32 %v2920_v17, %v2691_v16  ;;  %v3379_v27 = vadd.f32 %v14388_v29, %v3113_v41 }
 0x1c1   : > { %v14341_v55 = vpop.f32.mrf.mxu0  ;;  %v3112_v31 = vld [vmem:[#allocation3 + $0x20] sm:$0xff]  ;;  %v14394_v53 = vpop.f32.mrf.mxu1 }
 0x1c2   : > { %3079 = vst.msk [vmem:[#allocation3 + $0x40] sm:$0xff] %vm347_vm4, %v3047_v21  ;;  %3411 = vst.msk [vmem:[#allocation3 + $0x28] sm:$0xff] %vm347_vm4, %v3379_v27  ;;  %v3050_v32 = vadd.f32 %v14341_v55, %v2694_v3  ;;  %v3378_v33 = vadd.f32 %v3235_v8, %v3112_v31  ;;  %v2704_v21 = vld [vmem:[#allocation3 + $0xa8] sm:$0xff] }
 0x1c3   : > { %v2930_v18 = vpop.f32.mrf.mxu0  ;;  %v3115_v59 = vld [vmem:[#allocation3 + $0x38] sm:$0xff]  ;;  %v3255_v58 = vpop.f32.mrf.mxu1 }
 0x1c4   : > { %3082 = vst.msk [vmem:[#allocation3 + $0x58] sm:$0xff] %vm347_vm4, %v3050_v32  ;;  %3410 = vst.msk [vmem:[#allocation3 + $0x20] sm:$0xff] %vm347_vm4, %v3378_v33  ;;  %v3049_v36 = vadd.f32 %v2930_v18, %v2693_v35  ;;  %v3381_v38 = vadd.f32 %v14391_v14, %v3115_v59 }
 0x1c5   : > { %v14344_v24 = vpop.f32.mrf.mxu0  ;;  %v3114_v39 = vld [vmem:[#allocation3 + $0x30] sm:$0xff]  ;;  %v14397_v42 = vpop.f32.mrf.mxu1 }
 0x1c6   : > { %3081 = vst.msk [vmem:[#allocation3 + $0x50] sm:$0xff] %vm347_vm4, %v3049_v36  ;;  %3413 = vst.msk [vmem:[#allocation3 + $0x38] sm:$0xff] %vm347_vm4, %v3381_v38  ;;  %v3052_v45 = vadd.f32 %v14344_v24, %v2696_v26  ;;  %v3380_v7 = vadd.f32 %v3245_v63, %v3114_v39 }
 0x1c7   : > { %v2940_v40 = vpop.f32.mrf.mxu0  ;;  %v3117_v46 = vld [vmem:[#allocation3 + $0x48] sm:$0xff]  ;;  %v3265_v50 = vpop.f32.mrf.mxu1 }
 0x1c8   : > { %3084 = vst.msk [vmem:[#allocation3 + $0x68] sm:$0xff] %vm347_vm4, %v3052_v45  ;;  %3412 = vst.msk [vmem:[#allocation3 + $0x30] sm:$0xff] %vm347_vm4, %v3380_v7  ;;  %v3051_v51 = vadd.f32 %v2940_v40, %v2695_v6  ;;  %v3383_v12 = vadd.f32 %v14394_v53, %v3117_v46  ;;  %v2703_v53 = vld [vmem:[#allocation3 + $0xa0] sm:$0xff] }
 0x1c9   : > { %v14347_v30 = vpop.f32.mrf.mxu0  ;;  %v3116_v10 = vld [vmem:[#allocation3 + $0x40] sm:$0xff]  ;;  %v14400_v52 = vpop.f32.mrf.mxu1 }
 0x1ca   : > { %3083 = vst.msk [vmem:[#allocation3 + $0x60] sm:$0xff] %vm347_vm4, %v3051_v51  ;;  %3415 = vst.msk [vmem:[#allocation3 + $0x48] sm:$0xff] %vm347_vm4, %v3383_v12  ;;  %v3054_v54 = vadd.f32 %v14347_v30, %v2698_v47  ;;  %v3382_v56 = vadd.f32 %v3255_v58, %v3116_v10  ;;  %v2706_v58 = vld [vmem:[#allocation3 + $0xb8] sm:$0xff] }
 0x1cb   : > { %v2950_v0 = vpop.f32.mrf.mxu0  ;;  %v3119_v23 = vld [vmem:[#allocation3 + $0x58] sm:$0xff]  ;;  %v3275_v60 = vpop.f32.mrf.mxu1 }
 0x1cc   : > { %3086 = vst.msk [vmem:[#allocation3 + $0x78] sm:$0xff] %vm347_vm4, %v3054_v54  ;;  %3414 = vst.msk [vmem:[#allocation3 + $0x40] sm:$0xff] %vm347_vm4, %v3382_v56  ;;  %v3053_v34 = vadd.f32 %v2950_v0, %v2697_v57  ;;  %v3385_v20 = vadd.f32 %v14397_v42, %v3119_v23  ;;  %v2705_v42 = vld [vmem:[#allocation3 + $0xb0] sm:$0xff] }
 0x1cd   : > { %v14350_v9 = vpop.f32.mrf.mxu0  ;;  %v3118_v29 = vld [vmem:[#allocation3 + $0x50] sm:$0xff]  ;;  %v14403_v62 = vpop.f32.mrf.mxu1 }
 0x1ce   : > { %3085 = vst.msk [vmem:[#allocation3 + $0x70] sm:$0xff] %vm347_vm4, %v3053_v34  ;;  %3417 = vst.msk [vmem:[#allocation3 + $0x58] sm:$0xff] %vm347_vm4, %v3385_v20  ;;  %v3056_v1 = vadd.f32 %v14350_v9, %v2700_v61  ;;  %v3384_v2 = vadd.f32 %v3265_v50, %v3118_v29  ;;  %v2708_v50 = vld [vmem:[#allocation3 + $0xc8] sm:$0xff] }
 0x1cf   : > { %v2960_v5 = vpop.f32.mrf.mxu0  ;;  %v3121_v8 = vld [vmem:[#allocation3 + $0x68] sm:$0xff]  ;;  %v3285_v22 = vpop.f32.mrf.mxu1 }
 0x1d0   : > { %3088 = vst.msk [vmem:[#allocation3 + $0x88] sm:$0xff] %vm347_vm4, %v3056_v1  ;;  %3416 = vst.msk [vmem:[#allocation3 + $0x50] sm:$0xff] %vm347_vm4, %v3384_v2  ;;  %v3055_v43 = vadd.f32 %v2960_v5, %v2699_v25  ;;  %v3387_v44 = vadd.f32 %v14400_v52, %v3121_v8  ;;  %v2707_v52 = vld [vmem:[#allocation3 + $0xc0] sm:$0xff] }
 0x1d1   : > { %v14353_v13 = vpop.f32.mrf.mxu0  ;;  %v3120_v14 = vld [vmem:[#allocation3 + $0x60] sm:$0xff]  ;;  %v14406_v49 = vpop.f32.mrf.mxu1 }
 0x1d2   : > { %3087 = vst.msk [vmem:[#allocation3 + $0x80] sm:$0xff] %vm347_vm4, %v3055_v43  ;;  %3419 = vst.msk [vmem:[#allocation3 + $0x68] sm:$0xff] %vm347_vm4, %v3387_v44  ;;  %v3058_v37 = vadd.f32 %v14353_v13, %v2702_v11  ;;  %v3386_v15 = vadd.f32 %v3275_v60, %v3120_v14  ;;  %v2710_v60 = vld [vmem:[#allocation3 + $0xd8] sm:$0xff] }
 0x1d3   : > { %v2970_v16 = vpop.f32.mrf.mxu0  ;;  %v3123_v17 = vld [vmem:[#allocation3 + $0x78] sm:$0xff]  ;;  %v3295_v41 = vpop.f32.mrf.mxu1 }
 0x1d4   : > { %3090 = vst.msk [vmem:[#allocation3 + $0x98] sm:$0xff] %vm347_vm4, %v3058_v37  ;;  %3418 = vst.msk [vmem:[#allocation3 + $0x60] sm:$0xff] %vm347_vm4, %v3386_v15  ;;  %v3057_v63 = vadd.f32 %v2970_v16, %v2701_v48  ;;  %v3389_v19 = vadd.f32 %v14403_v62, %v3123_v17  ;;  %v2709_v62 = vld [vmem:[#allocation3 + $0xd0] sm:$0xff] }
 0x1d5   : > { %v14356_v27 = vpop.f32.mrf.mxu0  ;;  %v3122_v28 = vld [vmem:[#allocation3 + $0x70] sm:$0xff]  ;;  %v14409_v3 = vpop.f32.mrf.mxu1 }
 0x1d6   : > { %3089 = vst.msk [vmem:[#allocation3 + $0x90] sm:$0xff] %vm347_vm4, %v3057_v63  ;;  %3421 = vst.msk [vmem:[#allocation3 + $0x78] sm:$0xff] %vm347_vm4, %v3389_v19  ;;  %v3060_v55 = vadd.f32 %v14356_v27, %v2704_v21  ;;  %v3388_v31 = vadd.f32 %v3285_v22, %v3122_v28  ;;  %v2712_v22 = vld [vmem:[#allocation3 + $0xe8] sm:$0xff] }
 0x1d7   : > { %v2980_v32 = vpop.f32.mrf.mxu0  ;;  %v3125_v33 = vld [vmem:[#allocation3 + $0x88] sm:$0xff]  ;;  %v3305_v35 = vpop.f32.mrf.mxu1 }
 0x1d8   : > { %3092 = vst.msk [vmem:[#allocation3 + $0xa8] sm:$0xff] %vm347_vm4, %v3060_v55  ;;  %3420 = vst.msk [vmem:[#allocation3 + $0x70] sm:$0xff] %vm347_vm4, %v3388_v31  ;;  %v3059_v18 = vadd.f32 %v2980_v32, %v2703_v53  ;;  %v3391_v59 = vadd.f32 %v14406_v49, %v3125_v33  ;;  %v2711_v49 = vld [vmem:[#allocation3 + $0xe0] sm:$0xff] }
 0x1d9   : > { %v14359_v36 = vpop.f32.mrf.mxu0  ;;  %v3124_v38 = vld [vmem:[#allocation3 + $0x80] sm:$0xff]  ;;  %v14412_v26 = vpop.f32.mrf.mxu1 }
 0x1da   : > { %3091 = vst.msk [vmem:[#allocation3 + $0xa0] sm:$0xff] %vm347_vm4, %v3059_v18  ;;  %3423 = vst.msk [vmem:[#allocation3 + $0x88] sm:$0xff] %vm347_vm4, %v3391_v59  ;;  %v3062_v24 = vadd.f32 %v14359_v36, %v2706_v58  ;;  %v3390_v39 = vadd.f32 %v3295_v41, %v3124_v38  ;;  %v2714_v41 = vld [vmem:[#allocation3 + $0xf8] sm:$0xff]  ;;  %v3444_v18 = vld [vmem:[#allocation3 + $0x8] sm:$0xff] }
 0x1db   : > { %v2990_v45 = vpop.f32.mrf.mxu0  ;;  %v3127_v7 = vld [vmem:[#allocation3 + $0x98] sm:$0xff]  ;;  %v3315_v6 = vpop.f32.mrf.mxu1 }
 0x1dc   : > { %3094 = vst.msk [vmem:[#allocation3 + $0xb8] sm:$0xff] %vm347_vm4, %v3062_v24  ;;  %3422 = vst.msk [vmem:[#allocation3 + $0x80] sm:$0xff] %vm347_vm4, %v3390_v39  ;;  %v3061_v40 = vadd.f32 %v2990_v45, %v2705_v42  ;;  %v3393_v46 = vadd.f32 %v14409_v3, %v3127_v7  ;;  %v2713_v3 = vld [vmem:[#allocation3 + $0xf0] sm:$0xff] }
 0x1dd   : > { %v14362_v51 = vpop.f32.mrf.mxu0  ;;  %v3126_v12 = vld [vmem:[#allocation3 + $0x90] sm:$0xff]  ;;  %v14415_v47 = vpop.f32.mrf.mxu1 }
 0x1de   : > { %3093 = vst.msk [vmem:[#allocation3 + $0xb0] sm:$0xff] %vm347_vm4, %v3061_v40  ;;  %3425 = vst.msk [vmem:[#allocation3 + $0x98] sm:$0xff] %vm347_vm4, %v3393_v46  ;;  %v3064_v30 = vadd.f32 %v14362_v51, %v2708_v50  ;;  %v3392_v10 = vadd.f32 %v3305_v35, %v3126_v12  ;;  %v4067_v46 = vld [vmem:[#allocation2] sm:$0xff]  ;;  %v4068_v12 = vld [vmem:[#allocation2 + $0x8] sm:$0xff] }
 0x1df   : > { %v3000_v54 = vpop.f32.mrf.mxu0  ;;  %v3129_v56 = vld [vmem:[#allocation3 + $0xa8] sm:$0xff]  ;;  %v3325_v57 = vpop.f32.mrf.mxu1  ;;  %14492 = vmatprep.mubr.msk.f32.mxu1 %vm225_vm1, %v4067_v46 }
 0x1e0   : > { %3096 = vst.msk [vmem:[#allocation3 + $0xc8] sm:$0xff] %vm347_vm4, %v3064_v30  ;;  %3424 = vst.msk [vmem:[#allocation3 + $0x90] sm:$0xff] %vm347_vm4, %v3392_v10  ;;  %v3063_v0 = vadd.f32 %v3000_v54, %v2707_v52  ;;  %v3395_v23 = vadd.f32 %v14412_v26, %v3129_v56  ;;  %v3443_v26 = vld [vmem:[#allocation3] sm:$0xff]  ;;  %v3445_v30 = vld [vmem:[#allocation3 + $0x10] sm:$0xff]  ;;  %14493 = vmatmul.mubr.msk.f32.vlgmr.msra.gmra.mxu1 %vm225_vm1, %v4068_v12 }
 0x1e1   : > { %v14365_v34 = vpop.f32.mrf.mxu0  ;;  %v3128_v20 = vld [vmem:[#allocation3 + $0xa0] sm:$0xff]  ;;  %v14418_v61 = vpop.f32.mrf.mxu1 }
 0x1e2   : > { %3095 = vst.msk [vmem:[#allocation3 + $0xc0] sm:$0xff] %vm347_vm4, %v3063_v0  ;;  %3427 = vst.msk [vmem:[#allocation3 + $0xa8] sm:$0xff] %vm347_vm4, %v3395_v23  ;;  %v3066_v9 = vadd.f32 %v14365_v34, %v2710_v60  ;;  %v3394_v29 = vadd.f32 %v3315_v6, %v3128_v20  ;;  %v3446_v6 = vld [vmem:[#allocation3 + $0x18] sm:$0xff]  ;;  %v3448_v0 = vld [vmem:[#allocation3 + $0x28] sm:$0xff] }
 0x1e3   : > { %v3010_v1 = vpop.f32.mrf.mxu0  ;;  %v3131_v2 = vld [vmem:[#allocation3 + $0xb8] sm:$0xff]  ;;  %v3335_v25 = vpop.f32.mrf.mxu1  ;;  %v12305_v60 = vld [vmem:[%s19997_s1 + $0x190] sm:$0xff] }
 0x1e4   : > { %3098 = vst.msk [vmem:[#allocation3 + $0xd8] sm:$0xff] %vm347_vm4, %v3066_v9  ;;  %3426 = vst.msk [vmem:[#allocation3 + $0xa0] sm:$0xff] %vm347_vm4, %v3394_v29  ;;  %v3065_v5 = vadd.f32 %v3010_v1, %v2709_v62  ;;  %v3397_v8 = vadd.f32 %v14415_v47, %v3131_v2  ;;  %14542 = vmatprep.subr.mxu0 %v12305_v60  ;;  %v3447_v9 = vld [vmem:[#allocation3 + $0x20] sm:$0xff]  ;;  %v17048_v2 = vld [vmem:[%s19998_s2] ss:$0 sm:$0xff] }
 0x1e5   : > { %v14368_v43 = vpop.f32.mrf.mxu0  ;;  %v3130_v44 = vld [vmem:[#allocation3 + $0xb0] sm:$0xff]  ;;  %v14421_v11 = vpop.f32.mrf.mxu1  ;;  %14543 = vmatpush3.msra.mxu0 %v12305_v60 }
 0x1e6   : > { %3097 = vst.msk [vmem:[#allocation3 + $0xd0] sm:$0xff] %vm347_vm4, %v3065_v5  ;;  %3429 = vst.msk [vmem:[#allocation3 + $0xb8] sm:$0xff] %vm347_vm4, %v3397_v8  ;;  %v3068_v13 = vadd.f32 %v14368_v43, %v2712_v22  ;;  %v3396_v14 = vadd.f32 %v3325_v57, %v3130_v44  ;;  %v3450_v5 = vld [vmem:[#allocation3 + $0x38] sm:$0xff]  ;;  %v12303_v43 = vld [vmem:[%s19997_s1 + $0x180] sm:$0xff] }
 0x1e7   : > { %v3020_v37 = vpop.f32.mrf.mxu0  ;;  %v3133_v15 = vld [vmem:[#allocation3 + $0xc8] sm:$0xff]  ;;  %v3345_v48 = vpop.f32.mrf.mxu1 }
 0x1e8   : > { %3100 = vst.msk [vmem:[#allocation3 + $0xe8] sm:$0xff] %vm347_vm4, %v3068_v13  ;;  %3428 = vst.msk [vmem:[#allocation3 + $0xb0] sm:$0xff] %vm347_vm4, %v3396_v14  ;;  %v3067_v16 = vadd.f32 %v3020_v37, %v2711_v49  ;;  %v3399_v17 = vadd.f32 %v14418_v61, %v3133_v15  ;;  %v12343_v61 = vld [vmem:[%s19997_s1 + $0x1f8] sm:$0xf]  ;;  %v3449_v13 = vld [vmem:[#allocation3 + $0x30] sm:$0xff] }
 0x1e9   : > { %v14371_v63 = vpop.f32.mrf.mxu0  ;;  %v3132_v19 = vld [vmem:[#allocation3 + $0xc0] sm:$0xff]  ;;  %v14424_v21 = vpop.f32.mrf.mxu1  ;;  %14596 = vmatprep.subr.msk.mxu1 %vm548_vm0, %v12343_v61 }
 0x1ea   : > { %3099 = vst.msk [vmem:[#allocation3 + $0xe0] sm:$0xff] %vm347_vm4, %v3067_v16  ;;  %3431 = vst.msk [vmem:[#allocation3 + $0xc8] sm:$0xff] %vm347_vm4, %v3399_v17  ;;  %v3070_v27 = vadd.f32 %v14371_v63, %v2714_v41  ;;  %v3398_v28 = vadd.f32 %v3335_v25, %v3132_v19  ;;  %v12304_v25 = vld [vmem:[%s19997_s1 + $0x188] sm:$0xff]  ;;  %14597 = vmatpush3.msk.msra.mxu1 %vm548_vm0, %v12343_v61  ;;  %v3452_v16 = vld [vmem:[#allocation3 + $0x48] sm:$0xff] }
 0x1eb   : > { %v3030_v55 = vpop.f32.mrf.mxu0  ;;  %v3135_v31 = vld [vmem:[#allocation3 + $0xd8] sm:$0xff]  ;;  %v3355_v53 = vpop.f32.mrf.mxu1  ;;  %14544 = vmatprep.subr.mxu0 %v12304_v25 }
 0x1ec   : > { %3102 = vst.msk [vmem:[#allocation3 + $0xf8] sm:$0xff] %vm347_vm4, %v3070_v27  ;;  %3430 = vst.msk [vmem:[#allocation3 + $0xc0] sm:$0xff] %vm347_vm4, %v3398_v28  ;;  %v3069_v32 = vadd.f32 %v3030_v55, %v2713_v3  ;;  %v3401_v33 = vadd.f32 %v14421_v11, %v3135_v31  ;;  %14545 = vmatpush3.msra.mxu0 %v12304_v25  ;;  %v3460_v25 = vld [vmem:[#allocation3 + $0x88] sm:$0xff] }
 0x1ed   : > { %v3134_v35 = vld [vmem:[#allocation3 + $0xd0] sm:$0xff]  ;;  %v14438_v59 = vpop.f32.mrf.mxu0  ;;  %v14427_v39 = vpop.f32.mrf.mxu1  ;;  %14546 = vmatprep.subr.mxu0 %v12303_v43 }
 0x1ee   : > { %3101 = vst.msk [vmem:[#allocation3 + $0xf0] sm:$0xff] %vm347_vm4, %v3069_v32  ;;  %3433 = vst.msk [vmem:[#allocation3 + $0xd8] sm:$0xff] %vm347_vm4, %v3401_v33  ;;  %v3400_v58 = vadd.f32 %v3345_v48, %v3134_v35  ;;  %v3710_v36 = vadd.f32 %v14438_v59, %v3444_v18  ;;  %14547 = vmatpush3.msra.mxu0 %v12303_v43  ;;  %v3454_v32 = vld [vmem:[#allocation3 + $0x58] sm:$0xff] }
 0x1ef   : > { %v3137_v38 = vld [vmem:[#allocation3 + $0xe8] sm:$0xff]  ;;  %v3550_v24 = vpop.f32.mrf.mxu0  ;;  %v3365_v52 = vpop.f32.mrf.mxu1 }
 0x1f0   : > { %3432 = vst.msk [vmem:[#allocation3 + $0xd0] sm:$0xff] %vm347_vm4, %v3400_v58  ;;  %3742 = vst.msk [vmem:[#allocation3 + $0x8] sm:$0xff] %vm347_vm4, %v3710_v36  ;;  %v3403_v42 = vadd.f32 %v14424_v21, %v3137_v38  ;;  %v3709_v45 = vadd.f32 %v3550_v24, %v3443_v26  ;;  %v3451_v21 = vld [vmem:[#allocation3 + $0x40] sm:$0xff]  ;;  %v3453_v58 = vld [vmem:[#allocation3 + $0x50] sm:$0xff] }
 0x1f1   : > { %v3136_v7 = vld [vmem:[#allocation3 + $0xe0] sm:$0xff]  ;;  %v14441_v40 = vpop.f32.mrf.mxu0 }
 0x1f2   : > { %3435 = vst.msk [vmem:[#allocation3 + $0xe8] sm:$0xff] %vm347_vm4, %v3403_v42  ;;  %3741 = vst.msk [vmem:[#allocation3] sm:$0xff] %vm347_vm4, %v3709_v45  ;;  %v3402_v50 = vadd.f32 %v3355_v53, %v3136_v7  ;;  %v3712_v51 = vadd.f32 %v14441_v40, %v3446_v6  ;;  %v3456_v45 = vld [vmem:[#allocation3 + $0x68] sm:$0xff] }
 0x1f3   : > { %v3139_v47 = vld [vmem:[#allocation3 + $0xf8] sm:$0xff]  ;;  %v3560_v10 = vpop.f32.mrf.mxu0 }
 0x1f4   : > { %3434 = vst.msk [vmem:[#allocation3 + $0xe0] sm:$0xff] %vm347_vm4, %v3402_v50  ;;  %3744 = vst.msk [vmem:[#allocation3 + $0x18] sm:$0xff] %vm347_vm4, %v3712_v51  ;;  %v3405_v54 = vadd.f32 %v14427_v39, %v3139_v47  ;;  %v3711_v56 = vadd.f32 %v3560_v10, %v3445_v30  ;;  %v12342_v50 = vld [vmem:[%s19997_s1 + $0x1f0] sm:$0xff] }
 0x1f5   : > { %v3138_v57 = vld [vmem:[#allocation3 + $0xf0] sm:$0xff]  ;;  %v14444_v23 = vpop.f32.mrf.mxu0  ;;  %v3455_v51 = vld [vmem:[#allocation3 + $0x60] sm:$0xff]  ;;  %14598 = vmatprep.subr.mxu1 %v12342_v50 }
 0x1f6   : > { %3437 = vst.msk [vmem:[#allocation3 + $0xf8] sm:$0xff] %vm347_vm4, %v3405_v54  ;;  %3743 = vst.msk [vmem:[#allocation3 + $0x10] sm:$0xff] %vm347_vm4, %v3711_v56  ;;  %v3404_v34 = vadd.f32 %v3365_v52, %v3138_v57  ;;  %v3714_v20 = vadd.f32 %v14444_v23, %v3448_v0  ;;  %14599 = vmatpush3.msra.mxu1 %v12342_v50  ;;  %v3458_v56 = vld [vmem:[#allocation3 + $0x78] sm:$0xff]  ;;  %v3465_v50 = vld [vmem:[#allocation3 + $0xb0] sm:$0xff] }
 0x1f7   : > { %v3570_v29 = vpop.f32.mrf.mxu0  ;;  %v3774_v62 = vld [vmem:[#allocation3 + $0x8] sm:$0xff] }
 0x1f8   : > { %3436 = vst.msk [vmem:[#allocation3 + $0xf0] sm:$0xff] %vm347_vm4, %v3404_v34  ;;  %3746 = vst.msk [vmem:[#allocation3 + $0x28] sm:$0xff] %vm347_vm4, %v3714_v20  ;;  %v3713_v1 = vadd.f32 %v3570_v29, %v3447_v9  ;;  %v3811_v48 = vadd.f32 %v17048_v2, %v3774_v62  ;;  %v3457_v34 = vld [vmem:[#allocation3 + $0x70] sm:$0xff] }
 0x1f9   : > { %4036 = vst.msk [vmem:[#allocation3 + $0x8] sm:$0xff] %vm347_vm4, %v15568_v4  ;;  %v14447_v8 = vpop.f32.mrf.mxu0  ;;  %v3773_v22 = vld [vmem:[#allocation3] sm:$0xff] }
 0x1fa   : > { %3745 = vst.msk [vmem:[#allocation3 + $0x20] sm:$0xff] %vm347_vm4, %v3713_v1  ;;  %v3716_v44 = vadd.f32 %v14447_v8, %v3450_v5  ;;  %v3810_v11 = vadd.f32 %v17048_v2, %v3773_v22  ;;  %4035 = vst.msk [vmem:[#allocation3] sm:$0xff] %vm347_vm4, %v15568_v4  ;;  %v3843_v55 = vmax.f32 %v3811_v48, 0.0  ;;  %v3462_v48 = vld [vmem:[#allocation3 + $0x98] sm:$0xff] }
 0x1fb   : > { %v3580_v14 = vpop.f32.mrf.mxu0  ;;  %v3776_v49 = vld [vmem:[#allocation3 + $0x18] sm:$0xff] }
 0x1fc   : > { %3748 = vst.msk [vmem:[#allocation3 + $0x38] sm:$0xff] %vm347_vm4, %v3716_v44  ;;  %v3715_v37 = vadd.f32 %v3580_v14, %v3449_v13  ;;  %v3842_v15 = vmax.f32 %v3810_v11, 0.0  ;;  %4038 = vst.msk [vmem:[#allocation3 + $0x18] sm:$0xff] %vm347_vm4, %v15568_v4  ;;  %v3813_v53 = vadd.f32 %v17048_v2, %v3776_v49  ;;  %v3459_v44 = vld [vmem:[#allocation3 + $0x80] sm:$0xff] }
 0x1fd   : > { %v14450_v17 = vpop.f32.mrf.mxu0  ;;  %v3775_v41 = vld [vmem:[#allocation3 + $0x10] sm:$0xff] }
 0x1fe   : > { %3747 = vst.msk [vmem:[#allocation3 + $0x30] sm:$0xff] %vm347_vm4, %v3715_v37  ;;  %v3718_v63 = vadd.f32 %v14450_v17, %v3452_v16  ;;  %3906 = vrot.lane.b32.xlu0 %v3842_v15, %s15569_s6  ;;  %v3812_v19 = vadd.f32 %v17048_v2, %v3775_v41  ;;  %4037 = vst.msk [vmem:[#allocation3 + $0x10] sm:$0xff] %vm347_vm4, %v15568_v4  ;;  %v3845_v24 = vmax.f32 %v3813_v53, 0.0  ;;  %v3464_v53 = vld [vmem:[#allocation3 + $0xa8] sm:$0xff] }
 0x1ff   : > { %v3590_v27 = vpop.f32.mrf.mxu0  ;;  %v3778_v28 = vld [vmem:[#allocation3 + $0x28] sm:$0xff] }
 0x200   : > { %3750 = vst.msk [vmem:[#allocation3 + $0x48] sm:$0xff] %vm347_vm4, %v3718_v63  ;;  %v3717_v3 = vadd.f32 %v3590_v27, %v3451_v21  ;;  %v3844_v31 = vmax.f32 %v3812_v19, 0.0  ;;  %4040 = vst.msk [vmem:[#allocation3 + $0x28] sm:$0xff] %vm347_vm4, %v15568_v4  ;;  %v3815_v42 = vadd.f32 %v17048_v2, %v3778_v28  ;;  %v3461_v19 = vld [vmem:[#allocation3 + $0x90] sm:$0xff] }
 0x201   : > { %v14453_v33 = vpop.f32.mrf.mxu0  ;;  %v3777_v35 = vld [vmem:[#allocation3 + $0x20] sm:$0xff] }
 0x202   : > { %3749 = vst.msk [vmem:[#allocation3 + $0x40] sm:$0xff] %vm347_vm4, %v3717_v3  ;;  %v3720_v18 = vadd.f32 %v14453_v33, %v3454_v32  ;;  %3908 = vrot.lane.b32.xlu0 %v3843_v55, %s15569_s6  ;;  %3910 = vrot.lane.b32.xlu1 %v3844_v31, %s15569_s6  ;;  %v3814_v59 = vadd.f32 %v17048_v2, %v3777_v35  ;;  %4039 = vst.msk [vmem:[#allocation3 + $0x20] sm:$0xff] %vm347_vm4, %v15568_v4  ;;  %v3847_v10 = vmax.f32 %v3815_v42, 0.0 }
 0x203   : > { %v3600_v36 = vpop.f32.mrf.mxu0  ;;  %v3780_v38 = vld [vmem:[#allocation3 + $0x38] sm:$0xff] }
 0x204   : > { %3752 = vst.msk [vmem:[#allocation3 + $0x58] sm:$0xff] %vm347_vm4, %v3720_v18  ;;  %v3719_v26 = vadd.f32 %v3600_v36, %v3453_v58  ;;  %v3846_v39 = vmax.f32 %v3814_v59, 0.0  ;;  %4042 = vst.msk [vmem:[#allocation3 + $0x38] sm:$0xff] %vm347_vm4, %v15568_v4  ;;  %v3817_v54 = vadd.f32 %v17048_v2, %v3780_v38  ;;  %v12341_v59 = vld [vmem:[%s19997_s1 + $0x1e8] sm:$0xff]  ;;  %v3463_v58 = vld [vmem:[#allocation3 + $0xa0] sm:$0xff] }
 0x205   : > { %v14456_v7 = vpop.f32.mrf.mxu0  ;;  %v3779_v6 = vld [vmem:[#allocation3 + $0x30] sm:$0xff]  ;;  %14600 = vmatprep.subr.mxu1 %v12341_v59 }
 0x206   : > { %3751 = vst.msk [vmem:[#allocation3 + $0x50] sm:$0xff] %vm347_vm4, %v3719_v26  ;;  %v3722_v40 = vadd.f32 %v14456_v7, %v3456_v45  ;;  %3912 = vrot.lane.b32.xlu1 %v3845_v24, %s15569_s6  ;;  %3914 = vrot.lane.b32.xlu0 %v3846_v39, %s15569_s6  ;;  %v3816_v46 = vadd.f32 %v17048_v2, %v3779_v6  ;;  %4041 = vst.msk [vmem:[#allocation3 + $0x30] sm:$0xff] %vm347_vm4, %v15568_v4  ;;  %v3849_v29 = vmax.f32 %v3817_v54, 0.0  ;;  %v3466_v45 = vld [vmem:[#allocation3 + $0xb8] sm:$0xff]  ;;  %v3468_v54 = vld [vmem:[#allocation3 + $0xc8] sm:$0xff] }
 0x207   : > { %v3610_v12 = vpop.f32.mrf.mxu0  ;;  %v3782_v47 = vld [vmem:[#allocation3 + $0x48] sm:$0xff]  ;;  %14601 = vmatpush3.msra.mxu1 %v12341_v59  ;;  %v3473_v59 = vld [vmem:[#allocation3 + $0xf0] sm:$0xff] }
 0x208   : > { %3754 = vst.msk [vmem:[#allocation3 + $0x68] sm:$0xff] %vm347_vm4, %v3722_v40  ;;  %v3721_v30 = vadd.f32 %v3610_v12, %v3455_v51  ;;  %v3848_v52 = vmax.f32 %v3816_v46, 0.0  ;;  %4044 = vst.msk [vmem:[#allocation3 + $0x48] sm:$0xff] %vm347_vm4, %v15568_v4  ;;  %v3819_v1 = vadd.f32 %v17048_v2, %v3782_v47 }
 0x209   : > { %v14459_v57 = vpop.f32.mrf.mxu0  ;;  %v3781_v0 = vld [vmem:[#allocation3 + $0x40] sm:$0xff] }
 0x20a   : > { %3753 = vst.msk [vmem:[#allocation3 + $0x60] sm:$0xff] %vm347_vm4, %v3721_v30  ;;  %v3724_v23 = vadd.f32 %v14459_v57, %v3458_v56  ;;  %3916 = vrot.lane.b32.xlu1 %v3847_v10, %s15569_s6  ;;  %3918 = vrot.lane.b32.xlu0 %v3848_v52, %s15569_s6  ;;  %v3818_v60 = vadd.f32 %v17048_v2, %v3781_v0  ;;  %4043 = vst.msk [vmem:[#allocation3 + $0x40] sm:$0xff] %vm347_vm4, %v15568_v4  ;;  %v3851_v49 = vmax.f32 %v3819_v1, 0.0  ;;  %v3470_v1 = vld [vmem:[#allocation3 + $0xd8] sm:$0xff] }
 0x20b   : > { %v3620_v20 = vpop.f32.mrf.mxu0  ;;  %v3784_v61 = vld [vmem:[#allocation3 + $0x58] sm:$0xff] }
 0x20c   : > { %3756 = vst.msk [vmem:[#allocation3 + $0x78] sm:$0xff] %vm347_vm4, %v3724_v23  ;;  %v3723_v9 = vadd.f32 %v3620_v20, %v3457_v34  ;;  %v3850_v62 = vmax.f32 %v3818_v60, 0.0  ;;  %4046 = vst.msk [vmem:[#allocation3 + $0x58] sm:$0xff] %vm347_vm4, %v15568_v4  ;;  %v3821_v15 = vadd.f32 %v17048_v2, %v3784_v61  ;;  %v3467_v60 = vld [vmem:[#allocation3 + $0xc0] sm:$0xff] }
 0x20d   : > { %v14462_v5 = vpop.f32.mrf.mxu0  ;;  %v3783_v8 = vld [vmem:[#allocation3 + $0x50] sm:$0xff] }
 0x20e   : > { %3755 = vst.msk [vmem:[#allocation3 + $0x70] sm:$0xff] %vm347_vm4, %v3723_v9  ;;  %v3726_v22 = vadd.f32 %v14462_v5, %v3460_v25  ;;  %3920 = vrot.lane.b32.xlu1 %v3849_v29, %s15569_s6  ;;  %3922 = vrot.lane.b32.xlu0 %v3850_v62, %s15569_s6  ;;  %v3820_v43 = vadd.f32 %v17048_v2, %v3783_v8  ;;  %4045 = vst.msk [vmem:[#allocation3 + $0x50] sm:$0xff] %vm347_vm4, %v15568_v4  ;;  %v3853_v3 = vmax.f32 %v3821_v15, 0.0  ;;  %v3472_v15 = vld [vmem:[#allocation3 + $0xe8] sm:$0xff] }
 0x20f   : > { %v3630_v11 = vpop.f32.mrf.mxu0  ;;  %v3786_v13 = vld [vmem:[#allocation3 + $0x68] sm:$0xff] }
 0x210   : > { %3758 = vst.msk [vmem:[#allocation3 + $0x88] sm:$0xff] %vm347_vm4, %v3726_v22  ;;  %v3725_v14 = vadd.f32 %v3630_v11, %v3459_v44  ;;  %v3852_v37 = vmax.f32 %v3820_v43, 0.0  ;;  %4048 = vst.msk [vmem:[#allocation3 + $0x68] sm:$0xff] %vm347_vm4, %v15568_v4  ;;  %v3823_v31 = vadd.f32 %v17048_v2, %v3786_v13  ;;  %v3469_v43 = vld [vmem:[#allocation3 + $0xd0] sm:$0xff] }
 0x211   : > { %v14465_v16 = vpop.f32.mrf.mxu0  ;;  %v3785_v17 = vld [vmem:[#allocation3 + $0x60] sm:$0xff] }
 0x212   : > { %3757 = vst.msk [vmem:[#allocation3 + $0x80] sm:$0xff] %vm347_vm4, %v3725_v14  ;;  %v3728_v41 = vadd.f32 %v14465_v16, %v3462_v48  ;;  %3924 = vrot.lane.b32.xlu1 %v3851_v49, %s15569_s6  ;;  %3926 = vrot.lane.b32.xlu0 %v3852_v37, %s15569_s6  ;;  %v3822_v63 = vadd.f32 %v17048_v2, %v3785_v17  ;;  %4047 = vst.msk [vmem:[#allocation3 + $0x60] sm:$0xff] %vm347_vm4, %v15568_v4  ;;  %v3855_v24 = vmax.f32 %v3823_v31, 0.0 }
 0x213   : > { %v3640_v21 = vpop.f32.mrf.mxu0  ;;  %v3788_v27 = vld [vmem:[#allocation3 + $0x78] sm:$0xff] }
 0x214   : > { %3760 = vst.msk [vmem:[#allocation3 + $0x98] sm:$0xff] %vm347_vm4, %v3728_v41  ;;  %v3727_v28 = vadd.f32 %v3640_v21, %v3461_v19  ;;  %v3854_v55 = vmax.f32 %v3822_v63, 0.0  ;;  %4050 = vst.msk [vmem:[#allocation3 + $0x78] sm:$0xff] %vm347_vm4, %v15568_v4  ;;  %v3825_v42 = vadd.f32 %v17048_v2, %v3788_v27  ;;  %v12340_v63 = vld [vmem:[%s19997_s1 + $0x1e0] sm:$0xff]  ;;  %v3471_v19 = vld [vmem:[#allocation3 + $0xe0] sm:$0xff] }
 0x215   : > { %v14468_v32 = vpop.f32.mrf.mxu0  ;;  %v3787_v33 = vld [vmem:[#allocation3 + $0x70] sm:$0xff]  ;;  %14602 = vmatprep.subr.mxu1 %v12340_v63 }
 0x216   : > { %3759 = vst.msk [vmem:[#allocation3 + $0x90] sm:$0xff] %vm347_vm4, %v3727_v28  ;;  %v3730_v35 = vadd.f32 %v14468_v32, %v3464_v53  ;;  %3928 = vrot.lane.b32.xlu1 %v3853_v3, %s15569_s6  ;;  %3930 = vrot.lane.b32.xlu0 %v3854_v55, %s15569_s6  ;;  %v3824_v18 = vadd.f32 %v17048_v2, %v3787_v33  ;;  %4049 = vst.msk [vmem:[#allocation3 + $0x70] sm:$0xff] %vm347_vm4, %v15568_v4  ;;  %v3857_v30 = vmax.f32 %v3825_v42, 0.0  ;;  %v3474_v53 = vld [vmem:[#allocation3 + $0xf8] sm:$0xff] }
 0x217   : > { %v3650_v36 = vpop.f32.mrf.mxu0  ;;  %v3790_v38 = vld [vmem:[#allocation3 + $0x88] sm:$0xff]  ;;  %14603 = vmatpush3.msra.mxu1 %v12340_v63 }
 0x218   : > { %3762 = vst.msk [vmem:[#allocation3 + $0xa8] sm:$0xff] %vm347_vm4, %v3730_v35  ;;  %v3729_v26 = vadd.f32 %v3650_v36, %v3463_v58  ;;  %v3856_v39 = vmax.f32 %v3824_v18, 0.0  ;;  %4052 = vst.msk [vmem:[#allocation3 + $0x88] sm:$0xff] %vm347_vm4, %v15568_v4  ;;  %v3827_v52 = vadd.f32 %v17048_v2, %v3790_v38 }
 0x219   : > { %v14471_v7 = vpop.f32.mrf.mxu0  ;;  %v3789_v6 = vld [vmem:[#allocation3 + $0x80] sm:$0xff] }
 0x21a   : > { %3761 = vst.msk [vmem:[#allocation3 + $0xa0] sm:$0xff] %vm347_vm4, %v3729_v26  ;;  %v3732_v40 = vadd.f32 %v14471_v7, %v3466_v45  ;;  %3932 = vrot.lane.b32.xlu1 %v3855_v24, %s15569_s6  ;;  %3934 = vrot.lane.b32.xlu0 %v3856_v39, %s15569_s6  ;;  %v3826_v46 = vadd.f32 %v17048_v2, %v3789_v6  ;;  %4051 = vst.msk [vmem:[#allocation3 + $0x80] sm:$0xff] %vm347_vm4, %v15568_v4  ;;  %v3859_v9 = vmax.f32 %v3827_v52, 0.0  ;;  %v12380_v7 = vld [vmem:[%s19997_s1 + $0x158] sm:$0xf] }
 0x21b   : > { %v3660_v51 = vpop.f32.mrf.mxu0  ;;  %v3792_v12 = vld [vmem:[#allocation3 + $0x98] sm:$0xff]  ;;  %14652 = vmatprep.subr.msk.mxu0 %vm548_vm0, %v12380_v7 }
 0x21c   : > { %3764 = vst.msk [vmem:[#allocation3 + $0xb8] sm:$0xff] %vm347_vm4, %v3732_v40  ;;  %v3731_v47 = vadd.f32 %v3660_v51, %v3465_v50  ;;  %v3858_v10 = vmax.f32 %v3826_v46, 0.0  ;;  %4054 = vst.msk [vmem:[#allocation3 + $0x98] sm:$0xff] %vm347_vm4, %v15568_v4  ;;  %v3829_v62 = vadd.f32 %v17048_v2, %v3792_v12 }
 0x21d   : > { %v14474_v56 = vpop.f32.mrf.mxu0  ;;  %v3791_v57 = vld [vmem:[#allocation3 + $0x90] sm:$0xff] }
 0x21e   : > { %3763 = vst.msk [vmem:[#allocation3 + $0xb0] sm:$0xff] %vm347_vm4, %v3731_v47  ;;  %v3734_v0 = vadd.f32 %v14474_v56, %v3468_v54  ;;  %3936 = vrot.lane.b32.xlu1 %v3857_v30, %s15569_s6  ;;  %3938 = vrot.lane.b32.xlu0 %v3858_v10, %s15569_s6  ;;  %v3828_v23 = vadd.f32 %v17048_v2, %v3791_v57  ;;  %4053 = vst.msk [vmem:[#allocation3 + $0x90] sm:$0xff] %vm347_vm4, %v15568_v4  ;;  %v3861_v14 = vmax.f32 %v3829_v62, 0.0  ;;  %v17224_v57 = vld [vmem:[%s19997_s1 + $0x1b8] sm:$0xf] }
 0x21f   : > { %v3670_v34 = vpop.f32.mrf.mxu0  ;;  %v3794_v20 = vld [vmem:[#allocation3 + $0xa8] sm:$0xff]  ;;  %14708 = vmatprep.subr.msk.mxu1 %vm548_vm0, %v17224_v57 }
 0x220   : > { %3766 = vst.msk [vmem:[#allocation3 + $0xc8] sm:$0xff] %vm347_vm4, %v3734_v0  ;;  %v3733_v61 = vadd.f32 %v3670_v34, %v3467_v60  ;;  %v3860_v29 = vmax.f32 %v3828_v23, 0.0  ;;  %4056 = vst.msk [vmem:[#allocation3 + $0xa8] sm:$0xff] %vm347_vm4, %v15568_v4  ;;  %v3831_v37 = vadd.f32 %v17048_v2, %v3794_v20 }
 0x221   : > { %v14477_v25 = vpop.f32.mrf.mxu0  ;;  %v3793_v5 = vld [vmem:[#allocation3 + $0xa0] sm:$0xff] }
 0x222   : > { %3765 = vst.msk [vmem:[#allocation3 + $0xc0] sm:$0xff] %vm347_vm4, %v3733_v61  ;;  %v3736_v8 = vadd.f32 %v14477_v25, %v3470_v1  ;;  %3940 = vrot.lane.b32.xlu1 %v3859_v9, %s15569_s6  ;;  %3942 = vrot.lane.b32.xlu0 %v3860_v29, %s15569_s6  ;;  %v3830_v22 = vadd.f32 %v17048_v2, %v3793_v5  ;;  %4055 = vst.msk [vmem:[#allocation3 + $0xa0] sm:$0xff] %vm347_vm4, %v15568_v4  ;;  %v3863_v3 = vmax.f32 %v3831_v37, 0.0 }
 0x223   : > { %v3680_v44 = vpop.f32.mrf.mxu0  ;;  %v3796_v11 = vld [vmem:[#allocation3 + $0xb8] sm:$0xff] }
 0x224   : > { %3768 = vst.msk [vmem:[#allocation3 + $0xd8] sm:$0xff] %vm347_vm4, %v3736_v8  ;;  %v3735_v13 = vadd.f32 %v3680_v44, %v3469_v43  ;;  %v3862_v49 = vmax.f32 %v3830_v22, 0.0  ;;  %4058 = vst.msk [vmem:[#allocation3 + $0xb8] sm:$0xff] %vm347_vm4, %v15568_v4  ;;  %v3833_v31 = vadd.f32 %v17048_v2, %v3796_v11  ;;  %v12379_v22 = vld [vmem:[%s19997_s1 + $0x150] sm:$0xff] }
 0x225   : > { %v14480_v48 = vpop.f32.mrf.mxu0  ;;  %v3795_v16 = vld [vmem:[#allocation3 + $0xb0] sm:$0xff] }
 0x226   : > { %3767 = vst.msk [vmem:[#allocation3 + $0xd0] sm:$0xff] %vm347_vm4, %v3735_v13  ;;  %v3738_v17 = vadd.f32 %v14480_v48, %v3472_v15  ;;  %3944 = vrot.lane.b32.xlu1 %v3861_v14, %s15569_s6  ;;  %3946 = vrot.lane.b32.xlu0 %v3862_v49, %s15569_s6  ;;  %v3832_v41 = vadd.f32 %v17048_v2, %v3795_v16  ;;  %4057 = vst.msk [vmem:[#allocation3 + $0xb0] sm:$0xff] %vm347_vm4, %v15568_v4  ;;  %v3865_v26 = vmax.f32 %v3833_v31, 0.0  ;;  %v12378_v14 = vld [vmem:[%s19997_s1 + $0x148] sm:$0xff]  ;;  %v12377_v16 = vld [vmem:[%s19997_s1 + $0x140] sm:$0xff] }
 0x227   : > { %v3690_v21 = vpop.f32.mrf.mxu0  ;;  %v3798_v27 = vld [vmem:[#allocation3 + $0xc8] sm:$0xff] }
 0x228   : > { %3770 = vst.msk [vmem:[#allocation3 + $0xe8] sm:$0xff] %vm347_vm4, %v3738_v17  ;;  %v3737_v28 = vadd.f32 %v3690_v21, %v3471_v19  ;;  %v3864_v55 = vmax.f32 %v3832_v41, 0.0  ;;  %4060 = vst.msk [vmem:[#allocation3 + $0xc8] sm:$0xff] %vm347_vm4, %v15568_v4  ;;  %v3835_v39 = vadd.f32 %v17048_v2, %v3798_v27  ;;  %v17300_v21 = vld [vmem:[%s19997_s1 + $0x218] sm:$0xf] }
 0x229   : > { %v14483_v32 = vpop.f32.mrf.mxu0  ;;  %v3797_v33 = vld [vmem:[#allocation3 + $0xc0] sm:$0xff] }
 0x22a   : > { %3769 = vst.msk [vmem:[#allocation3 + $0xe0] sm:$0xff] %vm347_vm4, %v3737_v28  ;;  %v3740_v35 = vadd.f32 %v14483_v32, %v3474_v53  ;;  %3948 = vrot.lane.b32.xlu1 %v3863_v3, %s15569_s6  ;;  %3950 = vrot.lane.b32.xlu0 %v3864_v55, %s15569_s6  ;;  %v3834_v18 = vadd.f32 %v17048_v2, %v3797_v33  ;;  %4059 = vst.msk [vmem:[#allocation3 + $0xc0] sm:$0xff] %vm347_vm4, %v15568_v4  ;;  %v3867_v40 = vmax.f32 %v3835_v39, 0.0 }
 0x22b   : > { %v3700_v58 = vpop.f32.mrf.mxu0  ;;  %v3800_v36 = vld [vmem:[#allocation3 + $0xd8] sm:$0xff] }
 0x22c   : > { %3772 = vst.msk [vmem:[#allocation3 + $0xf8] sm:$0xff] %vm347_vm4, %v3740_v35  ;;  %v3739_v38 = vadd.f32 %v3700_v58, %v3473_v59  ;;  %v3866_v24 = vmax.f32 %v3834_v18, 0.0  ;;  %4062 = vst.msk [vmem:[#allocation3 + $0xd8] sm:$0xff] %vm347_vm4, %v15568_v4  ;;  %v3837_v50 = vadd.f32 %v17048_v2, %v3800_v36 }
 0x22d   : > { %v3799_v42 = vld [vmem:[#allocation3 + $0xd0] sm:$0xff] }
 0x22e   : > { %3771 = vst.msk [vmem:[#allocation3 + $0xf0] sm:$0xff] %vm347_vm4, %v3739_v38  ;;  %3952 = vrot.lane.b32.xlu1 %v3865_v26, %s15569_s6  ;;  %3954 = vrot.lane.b32.xlu0 %v3866_v24, %s15569_s6  ;;  %v3836_v45 = vadd.f32 %v17048_v2, %v3799_v42  ;;  %4061 = vst.msk [vmem:[#allocation3 + $0xd0] sm:$0xff] %vm347_vm4, %v15568_v4  ;;  %v3869_v30 = vmax.f32 %v3837_v50, 0.0 }
 0x22f   : > { %v3802_v6 = vld [vmem:[#allocation3 + $0xe8] sm:$0xff] }
 0x230   : > { %v3868_v46 = vmax.f32 %v3836_v45, 0.0  ;;  %4064 = vst.msk [vmem:[#allocation3 + $0xe8] sm:$0xff] %vm347_vm4, %v15568_v4  ;;  %v3839_v52 = vadd.f32 %v17048_v2, %v3802_v6 }
 0x231   : > { %v3801_v51 = vld [vmem:[#allocation3 + $0xe0] sm:$0xff] }
 0x232   : > { %3956 = vrot.lane.b32.xlu1 %v3867_v40, %s15569_s6  ;;  %3958 = vrot.lane.b32.xlu0 %v3868_v46, %s15569_s6  ;;  %v3838_v12 = vadd.f32 %v17048_v2, %v3801_v51  ;;  %4063 = vst.msk [vmem:[#allocation3 + $0xe0] sm:$0xff] %vm347_vm4, %v15568_v4  ;;  %v3871_v0 = vmax.f32 %v3839_v52, 0.0 }
 0x233   : > { %v3804_v47 = vld [vmem:[#allocation3 + $0xf8] sm:$0xff] }
 0x234   : > { %v3870_v10 = vmax.f32 %v3838_v12, 0.0  ;;  %4066 = vst.msk [vmem:[#allocation3 + $0xf8] sm:$0xff] %vm347_vm4, %v15568_v4  ;;  %v3841_v60 = vadd.f32 %v17048_v2, %v3804_v47 }
 0x235   : > { %v3803_v54 = vld [vmem:[#allocation3 + $0xf0] sm:$0xff] }
 0x236   : > { %3960 = vrot.lane.b32.xlu1 %v3869_v30, %s15569_s6  ;;  %3962 = vrot.lane.b32.xlu0 %v3870_v10, %s15569_s6  ;;  %v3840_v56 = vadd.f32 %v17048_v2, %v3803_v54  ;;  %4065 = vst.msk [vmem:[#allocation3 + $0xf0] sm:$0xff] %vm347_vm4, %v15568_v4  ;;  %v3873_v34 = vmax.f32 %v3841_v60, 0.0 }
 0x238   : > { %v3872_v23 = vmax.f32 %v3840_v56, 0.0 }
 0x23a   : > { %3964 = vrot.lane.b32.xlu1 %v3871_v0, %s15569_s6  ;;  %3966 = vrot.lane.b32.xlu0 %v3872_v23, %s15569_s6 }
 0x23e   : > { %3968 = vrot.lane.b32.xlu1 %v3873_v34, %s15569_s6 }
 0x270   : > { %v3907_v20 = vpop.permute.xlu0 %3906 }
 0x271   : > { %4003 = vst.msk [vmem:[#allocation2 + $0x19] sm:$0xff] %vm4002_vm5, %v3907_v20 }
 0x274   : > { %v3909_v61 = vpop.permute.xlu0 %3908  ;;  %v3911_v9 = vpop.permute.xlu1 %3910 }
 0x275   : > { %4004 = vst.msk [vmem:[#allocation2 + $0x21] sm:$0xff] %vm4002_vm5, %v3909_v61  ;;  %4005 = vst.msk [vmem:[#allocation2 + $0x31] sm:$0xff] %vm4002_vm5, %v3911_v9 }
 0x278   : > { %v3913_v29 = vpop.permute.xlu1 %3912  ;;  %v3915_v62 = vpop.permute.xlu0 %3914  ;;  %v4069_v2 = vld [vmem:[#allocation2 + $0x18] sm:$0xff] }
 0x279   : > { %4006 = vst.msk [vmem:[#allocation2 + $0x39] sm:$0xff] %vm4002_vm5, %v3913_v29  ;;  %4007 = vst.msk [vmem:[#allocation2 + $0x49] sm:$0xff] %vm4002_vm5, %v3915_v62  ;;  %14495 = vmatprep.mubr.msk.f32.mxu1 %vm225_vm1, %v4069_v2  ;;  %14548 = vmatprep.mubr.msk.f32.mxu0 %vm225_vm1, %v4069_v2  ;;  %v4109_v29 = vld [vmem:[#allocation3 + $0x8] sm:$0xff]  ;;  %v4108_v2 = vld [vmem:[#allocation3] sm:$0xff] }
 0x27c   : > { %v3917_v1 = vpop.permute.xlu1 %3916  ;;  %v3919_v25 = vpop.permute.xlu0 %3918  ;;  %v4070_v5 = vld [vmem:[#allocation2 + $0x20] sm:$0xff]  ;;  %v17239_v8 = vld [vmem:[#allocation2 + $0x30] sm:$0xff] }
 0x27d   : > { %4008 = vst.msk [vmem:[#allocation2 + $0x51] sm:$0xff] %vm4002_vm5, %v3917_v1  ;;  %4009 = vst.msk [vmem:[#allocation2 + $0x61] sm:$0xff] %vm4002_vm5, %v3919_v25  ;;  %14496 = vmatmul.mubr.msk.f32.gmra.mxu1 %vm225_vm1, %v4070_v5  ;;  %14549 = vmatmul.mubr.msk.f32.vlgmr.msra.gmra.mxu0 %vm225_vm1, %v4070_v5 }
 0x27e   : > { %14498 = vmatprep.mubr.msk.f32.mxu1 %vm225_vm1, %v17239_v8  ;;  %14551 = vmatprep.mubr.msk.f32.mxu0 %vm225_vm1, %v17239_v8 }
 0x27f   : > { %14653 = vmatpush3.msk.msra.mxu0 %vm548_vm0, %v12380_v7 }
 0x280   : > { %v3921_v43 = vpop.permute.xlu1 %3920  ;;  %v3923_v44 = vpop.permute.xlu0 %3922  ;;  %v17253_v11 = vld [vmem:[#allocation2 + $0x38] sm:$0xff]  ;;  %v17255_v13 = vld [vmem:[#allocation2 + $0x48] sm:$0xff]  ;;  %14654 = vmatprep.subr.mxu0 %v12379_v22 }
 0x281   : > { %4010 = vst.msk [vmem:[#allocation2 + $0x69] sm:$0xff] %vm4002_vm5, %v3921_v43  ;;  %4011 = vst.msk [vmem:[#allocation2 + $0x79] sm:$0xff] %vm4002_vm5, %v3923_v44  ;;  %14499 = vmatmul.mubr.msk.f32.gmra.mxu1 %vm225_vm1, %v17253_v11  ;;  %14552 = vmatmul.mubr.msk.f32.gmra.mxu0 %vm225_vm1, %v17253_v11 }
 0x282   : > { %14501 = vmatprep.mubr.msk.f32.mxu1 %vm225_vm1, %v17255_v13  ;;  %14554 = vmatprep.mubr.msk.f32.mxu0 %vm225_vm1, %v17255_v13 }
 0x283   : > { %14655 = vmatpush3.msra.mxu0 %v12379_v22 }
 0x284   : > { %v3925_v49 = vpop.permute.xlu1 %3924  ;;  %v3927_v37 = vpop.permute.xlu0 %3926  ;;  %v17270_v15 = vld [vmem:[#allocation2 + $0x50] sm:$0xff]  ;;  %v17272_v48 = vld [vmem:[#allocation2 + $0x60] sm:$0xff]  ;;  %14656 = vmatprep.subr.mxu0 %v12378_v14 }
 0x285   : > { %4012 = vst.msk [vmem:[#allocation2 + $0x81] sm:$0xff] %vm4002_vm5, %v3925_v49  ;;  %4013 = vst.msk [vmem:[#allocation2 + $0x91] sm:$0xff] %vm4002_vm5, %v3927_v37  ;;  %14502 = vmatmul.mubr.msk.f32.gmra.mxu1 %vm225_vm1, %v17270_v15  ;;  %14555 = vmatmul.mubr.msk.f32.gmra.mxu0 %vm225_vm1, %v17270_v15  ;;  %v12416_v49 = vld [vmem:[%s19997_s1 + $0x1b0] sm:$0xff]  ;;  %v12415_v37 = vld [vmem:[%s19997_s1 + $0x1a8] sm:$0xff] }
 0x286   : > { %14504 = vmatprep.mubr.msk.f32.mxu1 %vm225_vm1, %v17272_v48  ;;  %14557 = vmatprep.mubr.msk.f32.mxu0 %vm225_vm1, %v17272_v48 }
 0x287   : > { %14657 = vmatpush3.msra.mxu0 %v12378_v14  ;;  %v5198_v14 = vld [vmem:[#allocation2 + $0x1] sm:$0xff] }
 0x288   : > { %v3929_v17 = vpop.permute.xlu1 %3928  ;;  %v3931_v41 = vpop.permute.xlu0 %3930  ;;  %v17287_v63 = vld [vmem:[#allocation2 + $0x68] sm:$0xff]  ;;  %v17289_v19 = vld [vmem:[#allocation2 + $0x78] sm:$0xff]  ;;  %14658 = vmatprep.subr.mxu0 %v12377_v16 }
 0x289   : > { %4014 = vst.msk [vmem:[#allocation2 + $0x99] sm:$0xff] %vm4002_vm5, %v3929_v17  ;;  %4015 = vst.msk [vmem:[#allocation2 + $0xa9] sm:$0xff] %vm4002_vm5, %v3931_v41  ;;  %14505 = vmatmul.mubr.msk.f32.gmra.mxu1 %vm225_vm1, %v17287_v63  ;;  %14558 = vmatmul.mubr.msk.f32.gmra.mxu0 %vm225_vm1, %v17287_v63  ;;  %v17510_v17 = vld [vmem:[#allocation2 + $0x39] sm:$0xff] }
 0x28a   : > { %14507 = vmatprep.mubr.msk.f32.mxu1 %vm225_vm1, %v17289_v19  ;;  %14560 = vmatprep.mubr.msk.f32.mxu0 %vm225_vm1, %v17289_v19  ;;  %v17515_v41 = vld [vmem:[%s19997_s1 + $0x178] sm:$0xf] }
 0x28b   : > { %14659 = vmatpush3.msra.mxu0 %v12377_v16  ;;  %v12452_v16 = vld [vmem:[%s19997_s1 + $0x208] sm:$0xff] }
 0x28c   : > { %v3933_v27 = vpop.permute.xlu1 %3932  ;;  %v3935_v28 = vpop.permute.xlu0 %3934  ;;  %v17306_v3 = vld [vmem:[#allocation2 + $0x80] sm:$0xff]  ;;  %v17308_v55 = vld [vmem:[#allocation2 + $0x90] sm:$0xff]  ;;  %14764 = vmatprep.subr.msk.mxu0 %vm548_vm0, %v17300_v21 }
 0x28d   : > { %4016 = vst.msk [vmem:[#allocation2 + $0xb1] sm:$0xff] %vm4002_vm5, %v3933_v27  ;;  %4017 = vst.msk [vmem:[#allocation2 + $0xc1] sm:$0xff] %vm4002_vm5, %v3935_v28  ;;  %14508 = vmatmul.mubr.msk.f32.gmra.mxu1 %vm225_vm1, %v17306_v3  ;;  %14561 = vmatmul.mubr.msk.f32.gmra.mxu0 %vm225_vm1, %v17306_v3  ;;  %v17538_v27 = vld [vmem:[#allocation2 + $0x61] sm:$0xff]  ;;  %v17543_v28 = vld [vmem:[%s19997_s1 + $0x1d8] sm:$0xf] }
 0x28e   : > { %14510 = vmatprep.mubr.msk.f32.mxu1 %vm225_vm1, %v17308_v55  ;;  %14563 = vmatprep.mubr.msk.f32.mxu0 %vm225_vm1, %v17308_v55 }
 0x290   : > { %v3937_v31 = vpop.permute.xlu1 %3936  ;;  %v3939_v53 = vpop.permute.xlu0 %3938  ;;  %v17322_v32 = vld [vmem:[#allocation2 + $0x98] sm:$0xff]  ;;  %v17324_v33 = vld [vmem:[#allocation2 + $0xa8] sm:$0xff] }
 0x291   : > { %4018 = vst.msk [vmem:[#allocation2 + $0xc9] sm:$0xff] %vm4002_vm5, %v3937_v31  ;;  %4019 = vst.msk [vmem:[#allocation2 + $0xd9] sm:$0xff] %vm4002_vm5, %v3939_v53  ;;  %14511 = vmatmul.mubr.msk.f32.gmra.mxu1 %vm225_vm1, %v17322_v32  ;;  %14564 = vmatmul.mubr.msk.f32.gmra.mxu0 %vm225_vm1, %v17322_v32  ;;  %v17563_v31 = vld [vmem:[#allocation2 + $0x81] sm:$0xff]  ;;  %v17569_v53 = vld [vmem:[#allocation2 + $0x91] sm:$0xff] }
 0x292   : > { %14513 = vmatprep.mubr.msk.f32.mxu1 %vm225_vm1, %v17324_v33  ;;  %14566 = vmatprep.mubr.msk.f32.mxu0 %vm225_vm1, %v17324_v33 }
 0x294   : > { %v3941_v35 = vpop.permute.xlu1 %3940  ;;  %v3943_v18 = vpop.permute.xlu0 %3942  ;;  %v17336_v59 = vld [vmem:[#allocation2 + $0xb0] sm:$0xff]  ;;  %v17338_v58 = vld [vmem:[#allocation2 + $0xc0] sm:$0xff] }
 0x295   : > { %4020 = vst.msk [vmem:[#allocation2 + $0xe1] sm:$0xff] %vm4002_vm5, %v3941_v35  ;;  %4021 = vst.msk [vmem:[#allocation2 + $0xf1] sm:$0xff] %vm4002_vm5, %v3943_v18  ;;  %14514 = vmatmul.mubr.msk.f32.gmra.mxu1 %vm225_vm1, %v17336_v59  ;;  %14567 = vmatmul.mubr.msk.f32.gmra.mxu0 %vm225_vm1, %v17336_v59  ;;  %v17587_v35 = vld [vmem:[#allocation2 + $0xb1] sm:$0xff]  ;;  %v17593_v18 = vld [vmem:[#allocation2 + $0xc1] sm:$0xff] }
 0x296   : > { %14516 = vmatprep.mubr.msk.f32.mxu1 %vm225_vm1, %v17338_v58  ;;  %14569 = vmatprep.mubr.msk.f32.mxu0 %vm225_vm1, %v17338_v58 }
 0x298   : > { %v3945_v36 = vpop.permute.xlu1 %3944  ;;  %v3947_v38 = vpop.permute.xlu0 %3946  ;;  %v17350_v26 = vld [vmem:[#allocation2 + $0xc8] sm:$0xff]  ;;  %v17352_v24 = vld [vmem:[#allocation2 + $0xd8] sm:$0xff] }
 0x299   : > { %4022 = vst.msk [vmem:[#allocation2 + $0xf9] sm:$0xff] %vm4002_vm5, %v3945_v36  ;;  %4023 = vst.msk [vmem:[#allocation2 + $0x109] sm:$0xff] %vm4002_vm5, %v3947_v38  ;;  %14517 = vmatmul.mubr.msk.f32.gmra.mxu1 %vm225_vm1, %v17350_v26  ;;  %14570 = vmatmul.mubr.msk.f32.gmra.mxu0 %vm225_vm1, %v17350_v26 }
 0x29a   : > { %14519 = vmatprep.mubr.msk.f32.mxu1 %vm225_vm1, %v17352_v24  ;;  %14572 = vmatprep.mubr.msk.f32.mxu0 %vm225_vm1, %v17352_v24 }
 0x29c   : > { %v3949_v39 = vpop.permute.xlu1 %3948  ;;  %v3951_v42 = vpop.permute.xlu0 %3950  ;;  %v17364_v45 = vld [vmem:[#allocation2 + $0xe0] sm:$0xff]  ;;  %v17366_v7 = vld [vmem:[#allocation2 + $0xf0] sm:$0xff] }
 0x29d   : > { %4024 = vst.msk [vmem:[#allocation2 + $0x111] sm:$0xff] %vm4002_vm5, %v3949_v39  ;;  %4025 = vst.msk [vmem:[#allocation2 + $0x121] sm:$0xff] %vm4002_vm5, %v3951_v42  ;;  %14520 = vmatmul.mubr.msk.f32.gmra.mxu1 %vm225_vm1, %v17364_v45  ;;  %14573 = vmatmul.mubr.msk.f32.gmra.mxu0 %vm225_vm1, %v17364_v45  ;;  %v17611_v36 = vld [vmem:[#allocation2 + $0xe1] sm:$0xff]  ;;  %v17617_v38 = vld [vmem:[#allocation2 + $0xf1] sm:$0xff] }
 0x29e   : > { %14522 = vmatprep.mubr.msk.f32.mxu1 %vm225_vm1, %v17366_v7  ;;  %14575 = vmatprep.mubr.msk.f32.mxu0 %vm225_vm1, %v17366_v7 }
 0x2a0   : > { %v3953_v6 = vpop.permute.xlu1 %3952  ;;  %v3955_v40 = vpop.permute.xlu0 %3954  ;;  %v17378_v46 = vld [vmem:[#allocation2 + $0xf8] sm:$0xff]  ;;  %v17380_v50 = vld [vmem:[#allocation2 + $0x108] sm:$0xff] }
 0x2a1   : > { %4026 = vst.msk [vmem:[#allocation2 + $0x129] sm:$0xff] %vm4002_vm5, %v3953_v6  ;;  %4027 = vst.msk [vmem:[#allocation2 + $0x139] sm:$0xff] %vm4002_vm5, %v3955_v40  ;;  %14523 = vmatmul.mubr.msk.f32.gmra.mxu1 %vm225_vm1, %v17378_v46  ;;  %14576 = vmatmul.mubr.msk.f32.gmra.mxu0 %vm225_vm1, %v17378_v46  ;;  %v14494_v62 = vpop.f32.mrf.mxu1  ;;  %v4101_v6 = vld [vmem:[#allocation2 + $0x198] sm:$0xff] }
 0x2a2   : > { %14525 = vmatprep.mubr.msk.f32.mxu1 %vm225_vm1, %v17380_v50  ;;  %14578 = vmatprep.mubr.msk.f32.mxu0 %vm225_vm1, %v17380_v50  ;;  %v4465_v5 = vadd.f32 %v14494_v62, %v4109_v29  ;;  %v6330_v29 = vld [vmem:[#allocation2 + $0xa] sm:$0xff] }
 0x2a3   : > { %v4305_v22 = vpop.f32.mrf.mxu1  ;;  %v12564_v62 = vld [vmem:[%s19997_s1 + $0x230] sm:$0xff] }
 0x2a4   : > { %v3957_v51 = vpop.permute.xlu1 %3956  ;;  %v3959_v12 = vpop.permute.xlu0 %3958  ;;  %v17392_v47 = vld [vmem:[#allocation2 + $0x110] sm:$0xff]  ;;  %v17394_v30 = vld [vmem:[#allocation2 + $0x120] sm:$0xff]  ;;  %4497 = vst.msk [vmem:[#allocation3 + $0x8] sm:$0xff] %vm347_vm4, %v4465_v5  ;;  %v4464_v43 = vadd.f32 %v4305_v22, %v4108_v2  ;;  %v12563_v22 = vld [vmem:[%s19997_s1 + $0x228] sm:$0xff] }
 0x2a5   : > { %4028 = vst.msk [vmem:[#allocation2 + $0x141] sm:$0xff] %vm4002_vm5, %v3957_v51  ;;  %4029 = vst.msk [vmem:[#allocation2 + $0x151] sm:$0xff] %vm4002_vm5, %v3959_v12  ;;  %14526 = vmatmul.mubr.msk.f32.gmra.mxu1 %vm225_vm1, %v17392_v47  ;;  %14579 = vmatmul.mubr.msk.f32.gmra.mxu0 %vm225_vm1, %v17392_v47  ;;  %v17635_v39 = vld [vmem:[#allocation2 + $0x111] sm:$0xff]  ;;  %v17641_v42 = vld [vmem:[#allocation2 + $0x121] sm:$0xff] }
 0x2a6   : > { %14528 = vmatprep.mubr.msk.f32.mxu1 %vm225_vm1, %v17394_v30  ;;  %14581 = vmatprep.mubr.msk.f32.mxu0 %vm225_vm1, %v17394_v30  ;;  %4496 = vst.msk [vmem:[#allocation3] sm:$0xff] %vm347_vm4, %v4464_v43  ;;  %v6331_v2 = vld [vmem:[#allocation2 + $0x1a] sm:$0xff]  ;;  %v6332_v5 = vld [vmem:[#allocation2 + $0x22] sm:$0xff] }
 0x2a8   : > { %v3961_v10 = vpop.permute.xlu1 %3960  ;;  %v3963_v52 = vpop.permute.xlu0 %3962  ;;  %v17406_v54 = vld [vmem:[#allocation2 + $0x128] sm:$0xff]  ;;  %v17408_v56 = vld [vmem:[#allocation2 + $0x138] sm:$0xff] }
 0x2a9   : > { %4030 = vst.msk [vmem:[#allocation2 + $0x159] sm:$0xff] %vm4002_vm5, %v3961_v10  ;;  %4031 = vst.msk [vmem:[#allocation2 + $0x169] sm:$0xff] %vm4002_vm5, %v3963_v52  ;;  %14529 = vmatmul.mubr.msk.f32.gmra.mxu1 %vm225_vm1, %v17406_v54  ;;  %14582 = vmatmul.mubr.msk.f32.gmra.mxu0 %vm225_vm1, %v17406_v54  ;;  %v12489_v10 = vld [vmem:[%s19997_s1 + $0x168] sm:$0xff]  ;;  %v12527_v52 = vld [vmem:[%s19997_s1 + $0x1d0] sm:$0xff] }
 0x2aa   : > { %14531 = vmatprep.mubr.msk.f32.mxu1 %vm225_vm1, %v17408_v56  ;;  %14584 = vmatprep.mubr.msk.f32.mxu0 %vm225_vm1, %v17408_v56 }
 0x2ac   : > { %v3965_v0 = vpop.permute.xlu1 %3964  ;;  %v3967_v23 = vpop.permute.xlu0 %3966  ;;  %v17420_v60 = vld [vmem:[#allocation2 + $0x140] sm:$0xff]  ;;  %v17422_v34 = vld [vmem:[#allocation2 + $0x150] sm:$0xff] }
 0x2ad   : > { %4032 = vst.msk [vmem:[#allocation2 + $0x171] sm:$0xff] %vm4002_vm5, %v3965_v0  ;;  %4033 = vst.msk [vmem:[#allocation2 + $0x181] sm:$0xff] %vm4002_vm5, %v3967_v23  ;;  %14532 = vmatmul.mubr.msk.f32.gmra.mxu1 %vm225_vm1, %v17420_v60  ;;  %14585 = vmatmul.mubr.msk.f32.gmra.mxu0 %vm225_vm1, %v17420_v60  ;;  %v17659_v40 = vld [vmem:[#allocation2 + $0x141] sm:$0xff]  ;;  %v17729_v0 = vld [vmem:[%s19997_s1 + $0x238] sm:$0xf] }
 0x2ae   : > { %14534 = vmatprep.mubr.msk.f32.mxu1 %vm225_vm1, %v17422_v34  ;;  %14587 = vmatprep.mubr.msk.f32.mxu0 %vm225_vm1, %v17422_v34  ;;  %v12525_v23 = vld [vmem:[%s19997_s1 + $0x1c0] sm:$0xff] }
 0x2b0   : > { %v3969_v20 = vpop.permute.xlu1 %3968  ;;  %v17434_v61 = vld [vmem:[#allocation2 + $0x158] sm:$0xff]  ;;  %v17436_v9 = vld [vmem:[#allocation2 + $0x168] sm:$0xff] }
 0x2b1   : > { %4034 = vst.msk [vmem:[#allocation2 + $0x189] sm:$0xff] %vm4002_vm5, %v3969_v20  ;;  %14535 = vmatmul.mubr.msk.f32.gmra.mxu1 %vm225_vm1, %v17434_v61  ;;  %14588 = vmatmul.mubr.msk.f32.gmra.mxu0 %vm225_vm1, %v17434_v61  ;;  %v17670_v51 = vld [vmem:[#allocation2 + $0x159] sm:$0xff]  ;;  %v17675_v12 = vld [vmem:[#allocation2 + $0x169] sm:$0xff] }
 0x2b2   : > { %14537 = vmatprep.mubr.msk.f32.mxu1 %vm225_vm1, %v17436_v9  ;;  %14590 = vmatprep.mubr.msk.f32.mxu0 %vm225_vm1, %v17436_v9  ;;  %v6329_v20 = vld [vmem:[#allocation2 + $0x2] sm:$0xff] }
 0x2b4   : > { %v17447_v1 = vld [vmem:[#allocation2 + $0x170] sm:$0xff]  ;;  %v17449_v25 = vld [vmem:[#allocation2 + $0x180] sm:$0xff] }
 0x2b5   : > { %14538 = vmatmul.mubr.msk.f32.gmra.mxu1 %vm225_vm1, %v17447_v1  ;;  %14591 = vmatmul.mubr.msk.f32.gmra.mxu0 %vm225_vm1, %v17447_v1 }
 0x2b6   : > { %14593 = vmatprep.mubr.msk.f32.mxu0 %vm225_vm1, %v17449_v25  ;;  %14604 = vmatprep.mubr.msk.f32.mxu1 %vm225_vm1, %v17239_v8  ;;  %v5199_v8 = vld [vmem:[#allocation2 + $0x9] sm:$0xff] }
 0x2b8   : > { %v17460_v44 = vld [vmem:[#allocation2 + $0x188] sm:$0xff] }
 0x2b9   : > { %14594 = vmatmul.mubr.msk.f32.gmra.mxu0 %vm225_vm1, %v17460_v44  ;;  %14605 = vmatmul.mubr.msk.f32.vlgmr.msra.gmra.mxu1 %vm225_vm1, %v17253_v11  ;;  %v17481_v11 = vld [vmem:[#allocation2 + $0x19] sm:$0xff] }
 0x2ba   : > { %14709 = vmatpush3.msk.msra.mxu1 %vm548_vm0, %v17224_v57  ;;  %14607 = vmatprep.mubr.msk.f32.mxu1 %vm225_vm1, %v17255_v13  ;;  %v12453_v57 = vld [vmem:[%s19997_s1 + $0x210] sm:$0xff]  ;;  %v17492_v13 = vld [vmem:[#allocation2 + $0x21] sm:$0xff] }
 0x2bb   : > { %14660 = vmatprep.mubr.msk.f32.mxu0 %vm225_vm1, %v5198_v14  ;;  %14710 = vmatprep.subr.mxu1 %v12416_v49  ;;  %v17848_v14 = vld [vmem:[#allocation2 + $0x32] sm:$0xff] }
 0x2bc   : > { %14711 = vmatpush3.msra.mxu1 %v12416_v49  ;;  %v4110_v49 = vld [vmem:[#allocation3 + $0x10] sm:$0xff] }
 0x2bd   : > { %14608 = vmatmul.mubr.msk.f32.gmra.mxu1 %vm225_vm1, %v17270_v15  ;;  %14661 = vmatmul.mubr.msk.f32.vlgmr.msra.gmra.mxu0 %vm225_vm1, %v5199_v8  ;;  %v12414_v15 = vld [vmem:[%s19997_s1 + $0x1a0] sm:$0xff]  ;;  %v4533_v8 = vld [vmem:[#allocation3] sm:$0xff] }
 0x2be   : > { %14610 = vmatprep.mubr.msk.f32.mxu1 %vm225_vm1, %v17272_v48  ;;  %14663 = vmatprep.mubr.msk.f32.mxu0 %vm225_vm1, %v17481_v11  ;;  %v17501_v48 = vld [vmem:[#allocation2 + $0x31] sm:$0xff] }
 0x2bf   : > { %14712 = vmatprep.subr.mxu1 %v12415_v37  ;;  %14765 = vmatpush3.msk.msra.mxu0 %vm548_vm0, %v17300_v21  ;;  %v17532_v21 = vld [vmem:[#allocation2 + $0x51] sm:$0xff] }
 0x2c0   : > { %14713 = vmatpush3.msra.mxu1 %v12415_v37  ;;  %14766 = vmatprep.subr.mxu0 %v12453_v57 }
 0x2c1   : > { %14611 = vmatmul.mubr.msk.f32.gmra.mxu1 %vm225_vm1, %v17287_v63  ;;  %14664 = vmatmul.mubr.msk.f32.gmra.mxu0 %vm225_vm1, %v17492_v13  ;;  %v17521_v63 = vld [vmem:[#allocation2 + $0x49] sm:$0xff] }
 0x2c2   : > { %14613 = vmatprep.mubr.msk.f32.mxu1 %vm225_vm1, %v17289_v19  ;;  %14666 = vmatprep.mubr.msk.f32.mxu0 %vm225_vm1, %v17501_v48  ;;  %v12451_v19 = vld [vmem:[%s19997_s1 + $0x200] sm:$0xff] }
 0x2c3   : > { %14714 = vmatprep.subr.mxu1 %v12414_v15  ;;  %14767 = vmatpush3.msra.mxu0 %v12453_v57 }
 0x2c4   : > { %14715 = vmatpush3.msra.mxu1 %v12414_v15  ;;  %14768 = vmatprep.subr.mxu0 %v12452_v16  ;;  %v4113_v15 = vld [vmem:[#allocation3 + $0x28] sm:$0xff] }
 0x2c5   : > { %14614 = vmatmul.mubr.msk.f32.gmra.mxu1 %vm225_vm1, %v17306_v3  ;;  %14667 = vmatmul.mubr.msk.f32.gmra.mxu0 %vm225_vm1, %v17510_v17  ;;  %v17549_v3 = vld [vmem:[#allocation2 + $0x69] sm:$0xff] }
 0x2c6   : > { %14616 = vmatprep.mubr.msk.f32.mxu1 %vm225_vm1, %v17308_v55  ;;  %14669 = vmatprep.mubr.msk.f32.mxu0 %vm225_vm1, %v17521_v63  ;;  %v17557_v55 = vld [vmem:[#allocation2 + $0x79] sm:$0xff] }
 0x2c7   : > { %14820 = vmatprep.subr.msk.mxu1 %vm548_vm0, %v17515_v41  ;;  %14769 = vmatpush3.msra.mxu0 %v12452_v16 }
 0x2c8   : > { %14770 = vmatprep.subr.mxu0 %v12451_v19 }
 0x2c9   : > { %14617 = vmatmul.mubr.msk.f32.gmra.mxu1 %vm225_vm1, %v17322_v32  ;;  %14670 = vmatmul.mubr.msk.f32.gmra.mxu0 %vm225_vm1, %v17532_v21  ;;  %v17575_v32 = vld [vmem:[#allocation2 + $0x99] sm:$0xff] }
 0x2ca   : > { %14619 = vmatprep.mubr.msk.f32.mxu1 %vm225_vm1, %v17324_v33  ;;  %14672 = vmatprep.mubr.msk.f32.mxu0 %vm225_vm1, %v17538_v27  ;;  %v17581_v33 = vld [vmem:[#allocation2 + $0xa9] sm:$0xff] }
 0x2cb   : > { %14771 = vmatpush3.msra.mxu0 %v12451_v19 }
 0x2cc   : > { %14876 = vmatprep.subr.msk.mxu0 %vm548_vm0, %v17543_v28 }
 0x2cd   : > { %14620 = vmatmul.mubr.msk.f32.gmra.mxu1 %vm225_vm1, %v17336_v59  ;;  %14673 = vmatmul.mubr.msk.f32.gmra.mxu0 %vm225_vm1, %v17549_v3  ;;  %v17599_v59 = vld [vmem:[#allocation2 + $0xc9] sm:$0xff] }
 0x2ce   : > { %14622 = vmatprep.mubr.msk.f32.mxu1 %vm225_vm1, %v17338_v58  ;;  %14675 = vmatprep.mubr.msk.f32.mxu0 %vm225_vm1, %v17557_v55  ;;  %v17605_v58 = vld [vmem:[#allocation2 + $0xd9] sm:$0xff] }
 0x2d1   : > { %14623 = vmatmul.mubr.msk.f32.gmra.mxu1 %vm225_vm1, %v17350_v26  ;;  %14676 = vmatmul.mubr.msk.f32.gmra.mxu0 %vm225_vm1, %v17563_v31  ;;  %v17623_v26 = vld [vmem:[#allocation2 + $0xf9] sm:$0xff] }
 0x2d2   : > { %14625 = vmatprep.mubr.msk.f32.mxu1 %vm225_vm1, %v17352_v24  ;;  %14678 = vmatprep.mubr.msk.f32.mxu0 %vm225_vm1, %v17569_v53  ;;  %v17629_v24 = vld [vmem:[#allocation2 + $0x109] sm:$0xff] }
 0x2d5   : > { %14626 = vmatmul.mubr.msk.f32.gmra.mxu1 %vm225_vm1, %v17364_v45  ;;  %14679 = vmatmul.mubr.msk.f32.gmra.mxu0 %vm225_vm1, %v17575_v32  ;;  %v17647_v45 = vld [vmem:[#allocation2 + $0x129] sm:$0xff] }
 0x2d6   : > { %14628 = vmatprep.mubr.msk.f32.mxu1 %vm225_vm1, %v17366_v7  ;;  %14681 = vmatprep.mubr.msk.f32.mxu0 %vm225_vm1, %v17581_v33  ;;  %v17653_v7 = vld [vmem:[#allocation2 + $0x139] sm:$0xff] }
 0x2d9   : > { %14629 = vmatmul.mubr.msk.f32.gmra.mxu1 %vm225_vm1, %v17378_v46  ;;  %14682 = vmatmul.mubr.msk.f32.gmra.mxu0 %vm225_vm1, %v17587_v35  ;;  %v17665_v46 = vld [vmem:[#allocation2 + $0x151] sm:$0xff] }
 0x2da   : > { %14631 = vmatprep.mubr.msk.f32.mxu1 %vm225_vm1, %v17380_v50  ;;  %14684 = vmatprep.mubr.msk.f32.mxu0 %vm225_vm1, %v17593_v18  ;;  %v4102_v50 = vld [vmem:[#allocation2 + $0x1a0] sm:$0xff] }
 0x2dd   : > { %14632 = vmatmul.mubr.msk.f32.gmra.mxu1 %vm225_vm1, %v17392_v47  ;;  %14685 = vmatmul.mubr.msk.f32.gmra.mxu0 %vm225_vm1, %v17599_v59  ;;  %v17681_v47 = vld [vmem:[#allocation2 + $0x171] sm:$0xff] }
 0x2de   : > { %14634 = vmatprep.mubr.msk.f32.mxu1 %vm225_vm1, %v17394_v30  ;;  %14687 = vmatprep.mubr.msk.f32.mxu0 %vm225_vm1, %v17605_v58  ;;  %v12490_v30 = vld [vmem:[%s19997_s1 + $0x170] sm:$0xff] }
 0x2e1   : > { %14635 = vmatmul.mubr.msk.f32.gmra.mxu1 %vm225_vm1, %v17406_v54  ;;  %14688 = vmatmul.mubr.msk.f32.gmra.mxu0 %vm225_vm1, %v17611_v36  ;;  %v12488_v54 = vld [vmem:[%s19997_s1 + $0x160] sm:$0xff] }
 0x2e2   : > { %14637 = vmatprep.mubr.msk.f32.mxu1 %vm225_vm1, %v17408_v56  ;;  %14690 = vmatprep.mubr.msk.f32.mxu0 %vm225_vm1, %v17617_v38  ;;  %v12526_v56 = vld [vmem:[%s19997_s1 + $0x1c8] sm:$0xff] }
 0x2e5   : > { %14638 = vmatmul.mubr.msk.f32.gmra.mxu1 %vm225_vm1, %v17420_v60  ;;  %14691 = vmatmul.mubr.msk.f32.gmra.mxu0 %vm225_vm1, %v17623_v26  ;;  %v5230_v60 = vld [vmem:[#allocation2 + $0x181] sm:$0xff] }
 0x2e6   : > { %14640 = vmatprep.mubr.msk.f32.mxu1 %vm225_vm1, %v17422_v34  ;;  %14693 = vmatprep.mubr.msk.f32.mxu0 %vm225_vm1, %v17629_v24  ;;  %v5232_v34 = vld [vmem:[#allocation2 + $0x199] sm:$0xff] }
 0x2e9   : > { %14641 = vmatmul.mubr.msk.f32.gmra.mxu1 %vm225_vm1, %v17434_v61  ;;  %14694 = vmatmul.mubr.msk.f32.gmra.mxu0 %vm225_vm1, %v17635_v39  ;;  %v5231_v61 = vld [vmem:[#allocation2 + $0x189] sm:$0xff] }
 0x2ea   : > { %14643 = vmatprep.mubr.msk.f32.mxu1 %vm225_vm1, %v17436_v9  ;;  %14696 = vmatprep.mubr.msk.f32.mxu0 %vm225_vm1, %v17641_v42  ;;  %v5233_v9 = vld [vmem:[#allocation2 + $0x1a1] sm:$0xff] }
 0x2ed   : > { %14644 = vmatmul.mubr.msk.f32.gmra.mxu1 %vm225_vm1, %v17447_v1  ;;  %14697 = vmatmul.mubr.msk.f32.gmra.mxu0 %vm225_vm1, %v17647_v45  ;;  %v4111_v1 = vld [vmem:[#allocation3 + $0x18] sm:$0xff] }
 0x2ee   : > { %14646 = vmatprep.mubr.msk.f32.mxu1 %vm225_vm1, %v17449_v25  ;;  %14699 = vmatprep.mubr.msk.f32.mxu0 %vm225_vm1, %v17653_v7  ;;  %v4534_v25 = vld [vmem:[#allocation3 + $0x8] sm:$0xff] }
 0x2f1   : > { %14647 = vmatmul.mubr.msk.f32.gmra.mxu1 %vm225_vm1, %v17460_v44  ;;  %14700 = vmatmul.mubr.msk.f32.gmra.mxu0 %vm225_vm1, %v17659_v40 }
 0x2f2   : > { %14702 = vmatprep.mubr.msk.f32.mxu0 %vm225_vm1, %v17665_v46  ;;  %14649 = vmatprep.mubr.msk.f32.mxu1 %vm225_vm1, %v4101_v6 }
 0x2f5   : > { %14650 = vmatmul.mubr.msk.f32.gmra.mxu1 %vm225_vm1, %v4102_v50  ;;  %14703 = vmatmul.mubr.msk.f32.gmra.mxu0 %vm225_vm1, %v17670_v51  ;;  %v4116_v50 = vld [vmem:[#allocation3 + $0x40] sm:$0xff] }
 0x2f6   : > { %14705 = vmatprep.mubr.msk.f32.mxu0 %vm225_vm1, %v17675_v12  ;;  %14716 = vmatprep.mubr.msk.f32.mxu1 %vm225_vm1, %v17481_v11 }
 0x2f9   : > { %14706 = vmatmul.mubr.msk.f32.gmra.mxu0 %vm225_vm1, %v17681_v47  ;;  %14717 = vmatmul.mubr.msk.f32.vlgmr.msra.gmra.mxu1 %vm225_vm1, %v17492_v13 }
 0x2fa   : > { %14821 = vmatpush3.msk.msra.mxu1 %vm548_vm0, %v17515_v41  ;;  %14719 = vmatprep.mubr.msk.f32.mxu1 %vm225_vm1, %v17501_v48  ;;  %v12562_v41 = vld [vmem:[%s19997_s1 + $0x220] sm:$0xff] }
 0x2fb   : > { %14772 = vmatprep.mubr.msk.f32.mxu0 %vm225_vm1, %v17501_v48  ;;  %14822 = vmatprep.subr.mxu1 %v12490_v30 }
 0x2fc   : > { %14823 = vmatpush3.msra.mxu1 %v12490_v30 }
 0x2fd   : > { %14720 = vmatmul.mubr.msk.f32.gmra.mxu1 %vm225_vm1, %v17510_v17  ;;  %14773 = vmatmul.mubr.msk.f32.vlgmr.msra.gmra.mxu0 %vm225_vm1, %v17510_v17  ;;  %v17856_v17 = vld [vmem:[#allocation2 + $0x3a] sm:$0xff] }
 0x2fe   : > { %14722 = vmatprep.mubr.msk.f32.mxu1 %vm225_vm1, %v17521_v63  ;;  %14775 = vmatprep.mubr.msk.f32.mxu0 %vm225_vm1, %v17521_v63 }
 0x2ff   : > { %14824 = vmatprep.subr.mxu1 %v12489_v10  ;;  %14877 = vmatpush3.msk.msra.mxu0 %vm548_vm0, %v17543_v28 }
 0x300   : > { %14825 = vmatpush3.msra.mxu1 %v12489_v10  ;;  %14878 = vmatprep.subr.mxu0 %v12527_v52 }
 0x301   : > { %14723 = vmatmul.mubr.msk.f32.gmra.mxu1 %vm225_vm1, %v17532_v21  ;;  %14776 = vmatmul.mubr.msk.f32.gmra.mxu0 %vm225_vm1, %v17532_v21  ;;  %v17865_v21 = vld [vmem:[#allocation2 + $0x4a] sm:$0xff] }
 0x302   : > { %14725 = vmatprep.mubr.msk.f32.mxu1 %vm225_vm1, %v17538_v27  ;;  %14778 = vmatprep.mubr.msk.f32.mxu0 %vm225_vm1, %v17538_v27  ;;  %v4112_v27 = vld [vmem:[#allocation3 + $0x20] sm:$0xff] }
 0x303   : > { %14826 = vmatprep.subr.mxu1 %v12488_v54  ;;  %14879 = vmatpush3.msra.mxu0 %v12527_v52  ;;  %v4119_v52 = vld [vmem:[#allocation3 + $0x58] sm:$0xff] }
 0x304   : > { %14827 = vmatpush3.msra.mxu1 %v12488_v54  ;;  %14880 = vmatprep.subr.mxu0 %v12526_v56 }
 0x305   : > { %14726 = vmatmul.mubr.msk.f32.gmra.mxu1 %vm225_vm1, %v17549_v3  ;;  %14779 = vmatmul.mubr.msk.f32.gmra.mxu0 %vm225_vm1, %v17549_v3 }
 0x306   : > { %14728 = vmatprep.mubr.msk.f32.mxu1 %vm225_vm1, %v17557_v55  ;;  %14781 = vmatprep.mubr.msk.f32.mxu0 %vm225_vm1, %v17557_v55 }
 0x307   : > { %14932 = vmatprep.subr.msk.mxu1 %vm548_vm0, %v17729_v0  ;;  %14881 = vmatpush3.msra.mxu0 %v12526_v56 }
 0x308   : > { %14882 = vmatprep.subr.mxu0 %v12525_v23 }
 0x309   : > { %14729 = vmatmul.mubr.msk.f32.gmra.mxu1 %vm225_vm1, %v17563_v31  ;;  %14782 = vmatmul.mubr.msk.f32.gmra.mxu0 %vm225_vm1, %v17563_v31  ;;  %v4115_v31 = vld [vmem:[#allocation3 + $0x38] sm:$0xff] }
 0x30a   : > { %14731 = vmatprep.mubr.msk.f32.mxu1 %vm225_vm1, %v17569_v53  ;;  %14784 = vmatprep.mubr.msk.f32.mxu0 %vm225_vm1, %v17569_v53 }
 0x30b   : > { %14883 = vmatpush3.msra.mxu0 %v12525_v23 }
 0x30d   : > { %14732 = vmatmul.mubr.msk.f32.gmra.mxu1 %vm225_vm1, %v17575_v32  ;;  %14785 = vmatmul.mubr.msk.f32.gmra.mxu0 %vm225_vm1, %v17575_v32  ;;  %v17874_v32 = vld [vmem:[#allocation2 + $0x52] sm:$0xff] }
 0x30e   : > { %14734 = vmatprep.mubr.msk.f32.mxu1 %vm225_vm1, %v17581_v33  ;;  %14787 = vmatprep.mubr.msk.f32.mxu0 %vm225_vm1, %v17581_v33 }
 0x311   : > { %14735 = vmatmul.mubr.msk.f32.gmra.mxu1 %vm225_vm1, %v17587_v35  ;;  %14788 = vmatmul.mubr.msk.f32.gmra.mxu0 %vm225_vm1, %v17587_v35 }
 0x312   : > { %14737 = vmatprep.mubr.msk.f32.mxu1 %vm225_vm1, %v17593_v18  ;;  %14790 = vmatprep.mubr.msk.f32.mxu0 %vm225_vm1, %v17593_v18  ;;  %v17880_v18 = vld [vmem:[#allocation2 + $0x62] sm:$0xff] }
 0x315   : > { %14738 = vmatmul.mubr.msk.f32.gmra.mxu1 %vm225_vm1, %v17599_v59  ;;  %14791 = vmatmul.mubr.msk.f32.gmra.mxu0 %vm225_vm1, %v17599_v59  ;;  %v4114_v59 = vld [vmem:[#allocation3 + $0x30] sm:$0xff] }
 0x316   : > { %14740 = vmatprep.mubr.msk.f32.mxu1 %vm225_vm1, %v17605_v58  ;;  %14793 = vmatprep.mubr.msk.f32.mxu0 %vm225_vm1, %v17605_v58 }
 0x319   : > { %14741 = vmatmul.mubr.msk.f32.gmra.mxu1 %vm225_vm1, %v17611_v36  ;;  %14794 = vmatmul.mubr.msk.f32.gmra.mxu0 %vm225_vm1, %v17611_v36 }
 0x31a   : > { %14743 = vmatprep.mubr.msk.f32.mxu1 %vm225_vm1, %v17617_v38  ;;  %14796 = vmatprep.mubr.msk.f32.mxu0 %vm225_vm1, %v17617_v38 }
 0x31d   : > { %14744 = vmatmul.mubr.msk.f32.gmra.mxu1 %vm225_vm1, %v17623_v26  ;;  %14797 = vmatmul.mubr.msk.f32.gmra.mxu0 %vm225_vm1, %v17623_v26 }
 0x31e   : > { %14746 = vmatprep.mubr.msk.f32.mxu1 %vm225_vm1, %v17629_v24  ;;  %14799 = vmatprep.mubr.msk.f32.mxu0 %vm225_vm1, %v17629_v24  ;;  %v4117_v24 = vld [vmem:[#allocation3 + $0x48] sm:$0xff] }
 0x321   : > { %14747 = vmatmul.mubr.msk.f32.gmra.mxu1 %vm225_vm1, %v17635_v39  ;;  %14800 = vmatmul.mubr.msk.f32.gmra.mxu0 %vm225_vm1, %v17635_v39 }
 0x322   : > { %14749 = vmatprep.mubr.msk.f32.mxu1 %vm225_vm1, %v17641_v42  ;;  %14802 = vmatprep.mubr.msk.f32.mxu0 %vm225_vm1, %v17641_v42 }
 0x325   : > { %14750 = vmatmul.mubr.msk.f32.gmra.mxu1 %vm225_vm1, %v17647_v45  ;;  %14803 = vmatmul.mubr.msk.f32.gmra.mxu0 %vm225_vm1, %v17647_v45  ;;  %v17888_v45 = vld [vmem:[#allocation2 + $0x6a] sm:$0xff] }
 0x326   : > { %14752 = vmatprep.mubr.msk.f32.mxu1 %vm225_vm1, %v17653_v7  ;;  %14805 = vmatprep.mubr.msk.f32.mxu0 %vm225_vm1, %v17653_v7 }
 0x329   : > { %14753 = vmatmul.mubr.msk.f32.gmra.mxu1 %vm225_vm1, %v17659_v40  ;;  %14806 = vmatmul.mubr.msk.f32.gmra.mxu0 %vm225_vm1, %v17659_v40 }
 0x32a   : > { %14755 = vmatprep.mubr.msk.f32.mxu1 %vm225_vm1, %v17665_v46  ;;  %14808 = vmatprep.mubr.msk.f32.mxu0 %vm225_vm1, %v17665_v46  ;;  %v17894_v46 = vld [vmem:[#allocation2 + $0x7a] sm:$0xff] }
 0x32d   : > { %14756 = vmatmul.mubr.msk.f32.gmra.mxu1 %vm225_vm1, %v17670_v51  ;;  %14809 = vmatmul.mubr.msk.f32.gmra.mxu0 %vm225_vm1, %v17670_v51 }
 0x32e   : > { %14758 = vmatprep.mubr.msk.f32.mxu1 %vm225_vm1, %v17675_v12  ;;  %14811 = vmatprep.mubr.msk.f32.mxu0 %vm225_vm1, %v17675_v12 }
 0x331   : > { %14759 = vmatmul.mubr.msk.f32.gmra.mxu1 %vm225_vm1, %v17681_v47  ;;  %14812 = vmatmul.mubr.msk.f32.gmra.mxu0 %vm225_vm1, %v17681_v47 }
 0x332   : > { %14761 = vmatprep.mubr.msk.f32.mxu1 %vm225_vm1, %v5230_v60  ;;  %14814 = vmatprep.mubr.msk.f32.mxu0 %vm225_vm1, %v5230_v60 }
 0x335   : > { %14762 = vmatmul.mubr.msk.f32.gmra.mxu1 %vm225_vm1, %v5231_v61  ;;  %14815 = vmatmul.mubr.msk.f32.gmra.mxu0 %vm225_vm1, %v5231_v61  ;;  %v4118_v61 = vld [vmem:[#allocation3 + $0x50] sm:$0xff] }
 0x336   : > { %14817 = vmatprep.mubr.msk.f32.mxu0 %vm225_vm1, %v5232_v34  ;;  %14828 = vmatprep.mubr.msk.f32.mxu1 %vm225_vm1, %v6329_v20  ;;  %v17910_v20 = vld [vmem:[#allocation2 + $0x92] sm:$0xff] }
 0x339   : > { %14818 = vmatmul.mubr.msk.f32.gmra.mxu0 %vm225_vm1, %v5233_v9  ;;  %14829 = vmatmul.mubr.msk.f32.vlgmr.msra.gmra.mxu1 %vm225_vm1, %v6330_v29 }
 0x33a   : > { %14933 = vmatpush3.msk.msra.mxu1 %vm548_vm0, %v17729_v0  ;;  %14831 = vmatprep.mubr.msk.f32.mxu1 %vm225_vm1, %v6331_v2  ;;  %v17904_v0 = vld [vmem:[#allocation2 + $0x82] sm:$0xff] }
 0x33b   : > { %14884 = vmatprep.mubr.msk.f32.mxu0 %vm225_vm1, %v6331_v2  ;;  %14934 = vmatprep.subr.mxu1 %v12564_v62 }
 0x33c   : > { %14935 = vmatpush3.msra.mxu1 %v12564_v62 }
 0x33d   : > { %v14497_v43 = vpop.f32.mrf.mxu1  ;;  %v14550_v44 = vpop.f32.mrf.mxu0  ;;  %14832 = vmatmul.mubr.msk.f32.gmra.mxu1 %vm225_vm1, %v6332_v5  ;;  %14885 = vmatmul.mubr.msk.f32.vlgmr.msra.gmra.mxu0 %vm225_vm1, %v6332_v5 }
 0x33e   : > { %v4467_v37 = vadd.f32 %v14497_v43, %v4111_v1  ;;  %v4800_v11 = vadd.f32 %v14550_v44, %v4534_v25  ;;  %14834 = vmatprep.mubr.msk.f32.mxu1 %vm225_vm1, %v17848_v14  ;;  %14887 = vmatprep.mubr.msk.f32.mxu0 %vm225_vm1, %v17848_v14  ;;  %v4121_v25 = vld [vmem:[#allocation3 + $0x68] sm:$0xff] }
 0x33f   : > { %v4315_v57 = vpop.f32.mrf.mxu1  ;;  %v4640_v13 = vpop.f32.mrf.mxu0  ;;  %14936 = vmatprep.subr.mxu1 %v12563_v22  ;;  %v17920_v43 = vld [vmem:[#allocation2 + $0x9a] sm:$0xff] }
 0x340   : > { %4499 = vst.msk [vmem:[#allocation3 + $0x18] sm:$0xff] %vm347_vm4, %v4467_v37  ;;  %4832 = vst.msk [vmem:[#allocation3 + $0x8] sm:$0xff] %vm347_vm4, %v4800_v11  ;;  %v4466_v48 = vadd.f32 %v4315_v57, %v4110_v49  ;;  %v4799_v16 = vadd.f32 %v4640_v13, %v4533_v8  ;;  %14937 = vmatpush3.msra.mxu1 %v12563_v22  ;;  %v17926_v37 = vld [vmem:[#allocation2 + $0xaa] sm:$0xff] }
 0x341   : > { %v14500_v63 = vpop.f32.mrf.mxu1  ;;  %v14553_v19 = vpop.f32.mrf.mxu0  ;;  %14835 = vmatmul.mubr.msk.f32.gmra.mxu1 %vm225_vm1, %v17856_v17  ;;  %14888 = vmatmul.mubr.msk.f32.gmra.mxu0 %vm225_vm1, %v17856_v17  ;;  %v4120_v11 = vld [vmem:[#allocation3 + $0x60] sm:$0xff] }
 0x342   : > { %4498 = vst.msk [vmem:[#allocation3 + $0x10] sm:$0xff] %vm347_vm4, %v4466_v48  ;;  %4831 = vst.msk [vmem:[#allocation3] sm:$0xff] %vm347_vm4, %v4799_v16  ;;  %v4469_v28 = vadd.f32 %v14500_v63, %v4113_v15  ;;  %14837 = vmatprep.mubr.msk.f32.mxu1 %vm225_vm1, %v17865_v21  ;;  %14890 = vmatprep.mubr.msk.f32.mxu0 %vm225_vm1, %v17865_v21 }
 0x343   : > { %v4325_v3 = vpop.f32.mrf.mxu1  ;;  %v4650_v55 = vpop.f32.mrf.mxu0  ;;  %14938 = vmatprep.subr.mxu1 %v12562_v41 }
 0x344   : > { %4501 = vst.msk [vmem:[#allocation3 + $0x28] sm:$0xff] %vm347_vm4, %v4469_v28  ;;  %v4468_v53 = vadd.f32 %v4325_v3, %v4112_v27  ;;  %14939 = vmatpush3.msra.mxu1 %v12562_v41  ;;  %v4123_v41 = vld [vmem:[#allocation3 + $0x78] sm:$0xff]  ;;  %v17936_v27 = vld [vmem:[#allocation2 + $0xb2] sm:$0xff] }
 0x345   : > { %v14503_v33 = vpop.f32.mrf.mxu1  ;;  %v14556_v35 = vpop.f32.mrf.mxu0  ;;  %14838 = vmatmul.mubr.msk.f32.gmra.mxu1 %vm225_vm1, %v17874_v32  ;;  %14891 = vmatmul.mubr.msk.f32.gmra.mxu0 %vm225_vm1, %v17874_v32 }
 0x346   : > { %4500 = vst.msk [vmem:[#allocation3 + $0x20] sm:$0xff] %vm347_vm4, %v4468_v53  ;;  %v4471_v58 = vadd.f32 %v14503_v33, %v4115_v31  ;;  %14840 = vmatprep.mubr.msk.f32.mxu1 %vm225_vm1, %v17880_v18  ;;  %14893 = vmatprep.mubr.msk.f32.mxu0 %vm225_vm1, %v17880_v18  ;;  %v17942_v31 = vld [vmem:[#allocation2 + $0xc2] sm:$0xff] }
 0x347   : > { %v4536_v36 = vld [vmem:[#allocation3 + $0x18] sm:$0xff]  ;;  %v4335_v38 = vpop.f32.mrf.mxu1  ;;  %v4660_v26 = vpop.f32.mrf.mxu0  ;;  %v4122_v53 = vld [vmem:[#allocation3 + $0x70] sm:$0xff] }
 0x348   : > { %v4802_v39 = vadd.f32 %v14553_v19, %v4536_v36  ;;  %4503 = vst.msk [vmem:[#allocation3 + $0x38] sm:$0xff] %vm347_vm4, %v4471_v58  ;;  %v4470_v42 = vadd.f32 %v4335_v38, %v4114_v59  ;;  %v4125_v38 = vld [vmem:[#allocation3 + $0x88] sm:$0xff] }
 0x349   : > { %v4535_v7 = vld [vmem:[#allocation3 + $0x10] sm:$0xff]  ;;  %v14506_v6 = vpop.f32.mrf.mxu1  ;;  %v14559_v40 = vpop.f32.mrf.mxu0  ;;  %14841 = vmatmul.mubr.msk.f32.gmra.mxu1 %vm225_vm1, %v17888_v45  ;;  %14894 = vmatmul.mubr.msk.f32.gmra.mxu0 %vm225_vm1, %v17888_v45 }
 0x34a   : > { %4834 = vst.msk [vmem:[#allocation3 + $0x18] sm:$0xff] %vm347_vm4, %v4802_v39  ;;  %v4801_v51 = vadd.f32 %v4650_v55, %v4535_v7  ;;  %4502 = vst.msk [vmem:[#allocation3 + $0x30] sm:$0xff] %vm347_vm4, %v4470_v42  ;;  %v4473_v12 = vadd.f32 %v14506_v6, %v4117_v24  ;;  %14843 = vmatprep.mubr.msk.f32.mxu1 %vm225_vm1, %v17894_v46  ;;  %14896 = vmatprep.mubr.msk.f32.mxu0 %vm225_vm1, %v17894_v46  ;;  %v17952_v39 = vld [vmem:[#allocation2 + $0xca] sm:$0xff] }
 0x34b   : > { %v4538_v47 = vld [vmem:[#allocation3 + $0x28] sm:$0xff]  ;;  %v4345_v30 = vpop.f32.mrf.mxu1  ;;  %v4670_v10 = vpop.f32.mrf.mxu0 }
 0x34c   : > { %4833 = vst.msk [vmem:[#allocation3 + $0x10] sm:$0xff] %vm347_vm4, %v4801_v51  ;;  %v4804_v54 = vadd.f32 %v14556_v35, %v4538_v47  ;;  %4505 = vst.msk [vmem:[#allocation3 + $0x48] sm:$0xff] %vm347_vm4, %v4473_v12  ;;  %v4472_v56 = vadd.f32 %v4345_v30, %v4116_v50  ;;  %v4124_v50 = vld [vmem:[#allocation3 + $0x80] sm:$0xff] }
 0x34d   : > { %v4537_v23 = vld [vmem:[#allocation3 + $0x20] sm:$0xff]  ;;  %v14509_v60 = vpop.f32.mrf.mxu1  ;;  %v14562_v34 = vpop.f32.mrf.mxu0  ;;  %14844 = vmatmul.mubr.msk.f32.gmra.mxu1 %vm225_vm1, %v17904_v0  ;;  %14897 = vmatmul.mubr.msk.f32.gmra.mxu0 %vm225_vm1, %v17904_v0 }
 0x34e   : > { %4836 = vst.msk [vmem:[#allocation3 + $0x28] sm:$0xff] %vm347_vm4, %v4804_v54  ;;  %v4803_v9 = vadd.f32 %v4660_v26, %v4537_v23  ;;  %4504 = vst.msk [vmem:[#allocation3 + $0x40] sm:$0xff] %vm347_vm4, %v4472_v56  ;;  %v4475_v29 = vadd.f32 %v14509_v60, %v4119_v52  ;;  %14846 = vmatprep.mubr.msk.f32.mxu1 %vm225_vm1, %v17910_v20  ;;  %14899 = vmatprep.mubr.msk.f32.mxu0 %vm225_vm1, %v17910_v20  ;;  %v4127_v52 = vld [vmem:[#allocation3 + $0x98] sm:$0xff] }
 0x34f   : > { %v4540_v62 = vld [vmem:[#allocation3 + $0x38] sm:$0xff]  ;;  %v4355_v2 = vpop.f32.mrf.mxu1  ;;  %v4680_v1 = vpop.f32.mrf.mxu0 }
 0x350   : > { %4835 = vst.msk [vmem:[#allocation3 + $0x20] sm:$0xff] %vm347_vm4, %v4803_v9  ;;  %v4806_v5 = vadd.f32 %v14559_v40, %v4540_v62  ;;  %4507 = vst.msk [vmem:[#allocation3 + $0x58] sm:$0xff] %vm347_vm4, %v4475_v29  ;;  %v4474_v22 = vadd.f32 %v4355_v2, %v4118_v61  ;;  %v17958_v40 = vld [vmem:[#allocation2 + $0xda] sm:$0xff]  ;;  %v17968_v23 = vld [vmem:[#allocation2 + $0xe2] sm:$0xff] }
 0x351   : > { %v4539_v44 = vld [vmem:[#allocation3 + $0x30] sm:$0xff]  ;;  %v14512_v49 = vpop.f32.mrf.mxu1  ;;  %v14565_v8 = vpop.f32.mrf.mxu0  ;;  %14847 = vmatmul.mubr.msk.f32.gmra.mxu1 %vm225_vm1, %v17920_v43  ;;  %14900 = vmatmul.mubr.msk.f32.gmra.mxu0 %vm225_vm1, %v17920_v43  ;;  %v17974_v9 = vld [vmem:[#allocation2 + $0xf2] sm:$0xff] }
 0x352   : > { %4838 = vst.msk [vmem:[#allocation3 + $0x38] sm:$0xff] %vm347_vm4, %v4806_v5  ;;  %v4805_v57 = vadd.f32 %v4670_v10, %v4539_v44  ;;  %4506 = vst.msk [vmem:[#allocation3 + $0x50] sm:$0xff] %vm347_vm4, %v4474_v22  ;;  %v4477_v13 = vadd.f32 %v14512_v49, %v4121_v25  ;;  %14849 = vmatprep.mubr.msk.f32.mxu1 %vm225_vm1, %v17926_v37  ;;  %14902 = vmatprep.mubr.msk.f32.mxu0 %vm225_vm1, %v17926_v37  ;;  %v4126_v29 = vld [vmem:[#allocation3 + $0x90] sm:$0xff]  ;;  %v4129_v22 = vld [vmem:[#allocation3 + $0xa8] sm:$0xff] }
 0x353   : > { %v4542_v15 = vld [vmem:[#allocation3 + $0x48] sm:$0xff]  ;;  %v4365_v48 = vpop.f32.mrf.mxu1  ;;  %v4690_v16 = vpop.f32.mrf.mxu0 }
 0x354   : > { %4837 = vst.msk [vmem:[#allocation3 + $0x30] sm:$0xff] %vm347_vm4, %v4805_v57  ;;  %v4808_v63 = vadd.f32 %v14562_v34, %v4542_v15  ;;  %4509 = vst.msk [vmem:[#allocation3 + $0x68] sm:$0xff] %vm347_vm4, %v4477_v13  ;;  %v4476_v19 = vadd.f32 %v4365_v48, %v4120_v11  ;;  %v17990_v15 = vld [vmem:[#allocation2 + $0x10a] sm:$0xff] }
 0x355   : > { %v4541_v28 = vld [vmem:[#allocation3 + $0x40] sm:$0xff]  ;;  %v14515_v3 = vpop.f32.mrf.mxu1  ;;  %v14568_v55 = vpop.f32.mrf.mxu0  ;;  %14850 = vmatmul.mubr.msk.f32.gmra.mxu1 %vm225_vm1, %v17936_v27  ;;  %14903 = vmatmul.mubr.msk.f32.gmra.mxu0 %vm225_vm1, %v17936_v27 }
 0x356   : > { %4840 = vst.msk [vmem:[#allocation3 + $0x48] sm:$0xff] %vm347_vm4, %v4808_v63  ;;  %v4807_v33 = vadd.f32 %v4680_v1, %v4541_v28  ;;  %4508 = vst.msk [vmem:[#allocation3 + $0x60] sm:$0xff] %vm347_vm4, %v4476_v19  ;;  %v4479_v35 = vadd.f32 %v14515_v3, %v4123_v41  ;;  %14852 = vmatprep.mubr.msk.f32.mxu1 %vm225_vm1, %v17942_v31  ;;  %14905 = vmatprep.mubr.msk.f32.mxu0 %vm225_vm1, %v17942_v31  ;;  %v4128_v48 = vld [vmem:[#allocation3 + $0xa0] sm:$0xff]  ;;  %v4131_v3 = vld [vmem:[#allocation3 + $0xb8] sm:$0xff] }
 0x357   : > { %v4544_v59 = vld [vmem:[#allocation3 + $0x58] sm:$0xff]  ;;  %v4375_v58 = vpop.f32.mrf.mxu1  ;;  %v4700_v36 = vpop.f32.mrf.mxu0 }
 0x358   : > { %4839 = vst.msk [vmem:[#allocation3 + $0x40] sm:$0xff] %vm347_vm4, %v4807_v33  ;;  %v4810_v26 = vadd.f32 %v14565_v8, %v4544_v59  ;;  %4511 = vst.msk [vmem:[#allocation3 + $0x78] sm:$0xff] %vm347_vm4, %v4479_v35  ;;  %v4478_v24 = vadd.f32 %v4375_v58, %v4122_v53  ;;  %v17984_v8 = vld [vmem:[#allocation2 + $0xfa] sm:$0xff]  ;;  %v18000_v33 = vld [vmem:[#allocation2 + $0x112] sm:$0xff] }
 0x359   : > { %v4543_v42 = vld [vmem:[#allocation3 + $0x50] sm:$0xff]  ;;  %v14518_v7 = vpop.f32.mrf.mxu1  ;;  %v14571_v6 = vpop.f32.mrf.mxu0  ;;  %14853 = vmatmul.mubr.msk.f32.gmra.mxu1 %vm225_vm1, %v17952_v39  ;;  %14906 = vmatmul.mubr.msk.f32.gmra.mxu0 %vm225_vm1, %v17952_v39 }
 0x35a   : > { %4842 = vst.msk [vmem:[#allocation3 + $0x58] sm:$0xff] %vm347_vm4, %v4810_v26  ;;  %v4809_v51 = vadd.f32 %v4690_v16, %v4543_v42  ;;  %4510 = vst.msk [vmem:[#allocation3 + $0x70] sm:$0xff] %vm347_vm4, %v4478_v24  ;;  %v4481_v12 = vadd.f32 %v14518_v7, %v4125_v38  ;;  %14855 = vmatprep.mubr.msk.f32.mxu1 %vm225_vm1, %v17958_v40  ;;  %14908 = vmatprep.mubr.msk.f32.mxu0 %vm225_vm1, %v17958_v40  ;;  %v4130_v38 = vld [vmem:[#allocation3 + $0xb0] sm:$0xff] }
 0x35b   : > { %v4546_v47 = vld [vmem:[#allocation3 + $0x68] sm:$0xff]  ;;  %v4385_v30 = vpop.f32.mrf.mxu1  ;;  %v4710_v10 = vpop.f32.mrf.mxu0 }
 0x35c   : > { %4841 = vst.msk [vmem:[#allocation3 + $0x50] sm:$0xff] %vm347_vm4, %v4809_v51  ;;  %v4812_v54 = vadd.f32 %v14568_v55, %v4546_v47  ;;  %4513 = vst.msk [vmem:[#allocation3 + $0x88] sm:$0xff] %vm347_vm4, %v4481_v12  ;;  %v4480_v56 = vadd.f32 %v4385_v30, %v4124_v50  ;;  %v4133_v50 = vld [vmem:[#allocation3 + $0xc8] sm:$0xff]  ;;  %v18016_v47 = vld [vmem:[#allocation2 + $0x12a] sm:$0xff] }
 0x35d   : > { %v4545_v60 = vld [vmem:[#allocation3 + $0x60] sm:$0xff]  ;;  %v14521_v34 = vpop.f32.mrf.mxu1  ;;  %v14574_v61 = vpop.f32.mrf.mxu0  ;;  %14856 = vmatmul.mubr.msk.f32.gmra.mxu1 %vm225_vm1, %v17968_v23  ;;  %14909 = vmatmul.mubr.msk.f32.gmra.mxu0 %vm225_vm1, %v17968_v23 }
 0x35e   : > { %4844 = vst.msk [vmem:[#allocation3 + $0x68] sm:$0xff] %vm347_vm4, %v4812_v54  ;;  %v4811_v62 = vadd.f32 %v4700_v36, %v4545_v60  ;;  %4512 = vst.msk [vmem:[#allocation3 + $0x80] sm:$0xff] %vm347_vm4, %v4480_v56  ;;  %v4483_v2 = vadd.f32 %v14521_v34, %v4127_v52  ;;  %14858 = vmatprep.mubr.msk.f32.mxu1 %vm225_vm1, %v17974_v9  ;;  %14911 = vmatprep.mubr.msk.f32.mxu0 %vm225_vm1, %v17974_v9  ;;  %v18006_v36 = vld [vmem:[#allocation2 + $0x122] sm:$0xff]  ;;  %v18022_v54 = vld [vmem:[#allocation2 + $0x13a] sm:$0xff] }
 0x35f   : > { %v4548_v1 = vld [vmem:[#allocation3 + $0x78] sm:$0xff]  ;;  %v4395_v25 = vpop.f32.mrf.mxu1  ;;  %v4720_v5 = vpop.f32.mrf.mxu0  ;;  %v4132_v56 = vld [vmem:[#allocation3 + $0xc0] sm:$0xff] }
 0x360   : > { %4843 = vst.msk [vmem:[#allocation3 + $0x60] sm:$0xff] %vm347_vm4, %v4811_v62  ;;  %v4814_v44 = vadd.f32 %v14571_v6, %v4548_v1  ;;  %4515 = vst.msk [vmem:[#allocation3 + $0x98] sm:$0xff] %vm347_vm4, %v4483_v2  ;;  %v4482_v49 = vadd.f32 %v4395_v25, %v4126_v29  ;;  %v4135_v2 = vld [vmem:[#allocation3 + $0xd8] sm:$0xff] }
 0x361   : > { %v4547_v11 = vld [vmem:[#allocation3 + $0x70] sm:$0xff]  ;;  %v14524_v57 = vpop.f32.mrf.mxu1  ;;  %v14577_v13 = vpop.f32.mrf.mxu0  ;;  %14859 = vmatmul.mubr.msk.f32.gmra.mxu1 %vm225_vm1, %v17984_v8  ;;  %14912 = vmatmul.mubr.msk.f32.gmra.mxu0 %vm225_vm1, %v17984_v8 }
 0x362   : > { %4846 = vst.msk [vmem:[#allocation3 + $0x78] sm:$0xff] %vm347_vm4, %v4814_v44  ;;  %v4813_v16 = vadd.f32 %v4710_v10, %v4547_v11  ;;  %4514 = vst.msk [vmem:[#allocation3 + $0x90] sm:$0xff] %vm347_vm4, %v4482_v49  ;;  %v4485_v41 = vadd.f32 %v14524_v57, %v4129_v22  ;;  %14861 = vmatprep.mubr.msk.f32.mxu1 %vm225_vm1, %v17990_v15  ;;  %14914 = vmatprep.mubr.msk.f32.mxu0 %vm225_vm1, %v17990_v15  ;;  %v18038_v11 = vld [vmem:[#allocation2 + $0x152] sm:$0xff]  ;;  %v4134_v57 = vld [vmem:[#allocation3 + $0xd0] sm:$0xff] }
 0x363   : > { %v4550_v63 = vld [vmem:[#allocation3 + $0x88] sm:$0xff]  ;;  %v4405_v19 = vpop.f32.mrf.mxu1  ;;  %v4730_v28 = vpop.f32.mrf.mxu0 }
 0x364   : > { %4845 = vst.msk [vmem:[#allocation3 + $0x70] sm:$0xff] %vm347_vm4, %v4813_v16  ;;  %v4816_v55 = vadd.f32 %v14574_v61, %v4550_v63  ;;  %4517 = vst.msk [vmem:[#allocation3 + $0xa8] sm:$0xff] %vm347_vm4, %v4485_v41  ;;  %v4484_v53 = vadd.f32 %v4405_v19, %v4128_v48  ;;  %v4137_v19 = vld [vmem:[#allocation3 + $0xe8] sm:$0xff] }
 0x365   : > { %v4549_v35 = vld [vmem:[#allocation3 + $0x80] sm:$0xff]  ;;  %v14527_v59 = vpop.f32.mrf.mxu1  ;;  %v14580_v58 = vpop.f32.mrf.mxu0  ;;  %14862 = vmatmul.mubr.msk.f32.gmra.mxu1 %vm225_vm1, %v18000_v33  ;;  %14915 = vmatmul.mubr.msk.f32.gmra.mxu0 %vm225_vm1, %v18000_v33 }
 0x366   : > { %4848 = vst.msk [vmem:[#allocation3 + $0x88] sm:$0xff] %vm347_vm4, %v4816_v55  ;;  %v4815_v26 = vadd.f32 %v4720_v5, %v4549_v35  ;;  %4516 = vst.msk [vmem:[#allocation3 + $0xa0] sm:$0xff] %vm347_vm4, %v4484_v53  ;;  %v4487_v24 = vadd.f32 %v14527_v59, %v4131_v3  ;;  %14864 = vmatprep.mubr.msk.f32.mxu1 %vm225_vm1, %v18006_v36  ;;  %14917 = vmatprep.mubr.msk.f32.mxu0 %vm225_vm1, %v18006_v36  ;;  %v18032_v5 = vld [vmem:[#allocation2 + $0x142] sm:$0xff]  ;;  %v18048_v55 = vld [vmem:[#allocation2 + $0x15a] sm:$0xff] }
 0x367   : > { %v4552_v42 = vld [vmem:[#allocation3 + $0x98] sm:$0xff]  ;;  %v4415_v7 = vpop.f32.mrf.mxu1  ;;  %v4740_v6 = vpop.f32.mrf.mxu0 }
 0x368   : > { %4847 = vst.msk [vmem:[#allocation3 + $0x80] sm:$0xff] %vm347_vm4, %v4815_v26  ;;  %v4818_v51 = vadd.f32 %v14577_v13, %v4552_v42  ;;  %4519 = vst.msk [vmem:[#allocation3 + $0xb8] sm:$0xff] %vm347_vm4, %v4487_v24  ;;  %v4486_v12 = vadd.f32 %v4415_v7, %v4130_v38  ;;  %v4136_v38 = vld [vmem:[#allocation3 + $0xe0] sm:$0xff] }
 0x369   : > { %v4551_v30 = vld [vmem:[#allocation3 + $0x90] sm:$0xff]  ;;  %v14530_v10 = vpop.f32.mrf.mxu1  ;;  %v14583_v52 = vpop.f32.mrf.mxu0  ;;  %14865 = vmatmul.mubr.msk.f32.gmra.mxu1 %vm225_vm1, %v18016_v47  ;;  %14918 = vmatmul.mubr.msk.f32.gmra.mxu0 %vm225_vm1, %v18016_v47 }
 0x36a   : > { %4850 = vst.msk [vmem:[#allocation3 + $0x98] sm:$0xff] %vm347_vm4, %v4818_v51  ;;  %v4817_v60 = vadd.f32 %v4730_v28, %v4551_v30  ;;  %4518 = vst.msk [vmem:[#allocation3 + $0xb0] sm:$0xff] %vm347_vm4, %v4486_v12  ;;  %v4489_v34 = vadd.f32 %v14530_v10, %v4133_v50  ;;  %14867 = vmatprep.mubr.msk.f32.mxu1 %vm225_vm1, %v18022_v54  ;;  %14920 = vmatprep.mubr.msk.f32.mxu0 %vm225_vm1, %v18022_v54  ;;  %v4139_v50 = vld [vmem:[#allocation3 + $0xf8] sm:$0xff]  ;;  %v18064_v30 = vld [vmem:[#allocation2 + $0x172] sm:$0xff] }
 0x36b   : > { %v4554_v61 = vld [vmem:[#allocation3 + $0xa8] sm:$0xff]  ;;  %v4425_v29 = vpop.f32.mrf.mxu1  ;;  %v4750_v62 = vpop.f32.mrf.mxu0 }
 0x36c   : > { %4849 = vst.msk [vmem:[#allocation3 + $0x90] sm:$0xff] %vm347_vm4, %v4817_v60  ;;  %v4820_v1 = vadd.f32 %v14580_v58, %v4554_v61  ;;  %4521 = vst.msk [vmem:[#allocation3 + $0xc8] sm:$0xff] %vm347_vm4, %v4489_v34  ;;  %v4488_v25 = vadd.f32 %v4425_v29, %v4132_v56  ;;  %v18054_v58 = vld [vmem:[#allocation2 + $0x16a] sm:$0xff]  ;;  %v18070_v60 = vld [vmem:[#allocation2 + $0x182] sm:$0xff] }
 0x36d   : > { %v4553_v22 = vld [vmem:[#allocation3 + $0xa0] sm:$0xff]  ;;  %v14533_v44 = vpop.f32.mrf.mxu1  ;;  %v14586_v49 = vpop.f32.mrf.mxu0  ;;  %14868 = vmatmul.mubr.msk.f32.gmra.mxu1 %vm225_vm1, %v18032_v5  ;;  %14921 = vmatmul.mubr.msk.f32.gmra.mxu0 %vm225_vm1, %v18032_v5  ;;  %v4138_v34 = vld [vmem:[#allocation3 + $0xf0] sm:$0xff] }
 0x36e   : > { %4852 = vst.msk [vmem:[#allocation3 + $0xa8] sm:$0xff] %vm347_vm4, %v4820_v1  ;;  %v4819_v13 = vadd.f32 %v4740_v6, %v4553_v22  ;;  %4520 = vst.msk [vmem:[#allocation3 + $0xc0] sm:$0xff] %vm347_vm4, %v4488_v25  ;;  %v4491_v48 = vadd.f32 %v14533_v44, %v4135_v2  ;;  %14870 = vmatprep.mubr.msk.f32.mxu1 %vm225_vm1, %v18038_v11  ;;  %14923 = vmatprep.mubr.msk.f32.mxu0 %vm225_vm1, %v18038_v11  ;;  %v18080_v44 = vld [vmem:[#allocation2 + $0x18a] sm:$0xff] }
 0x36f   : > { %v4556_v16 = vld [vmem:[#allocation3 + $0xb8] sm:$0xff]  ;;  %v4435_v41 = vpop.f32.mrf.mxu1  ;;  %v4760_v63 = vpop.f32.mrf.mxu0 }
 0x370   : > { %4851 = vst.msk [vmem:[#allocation3 + $0xa0] sm:$0xff] %vm347_vm4, %v4819_v13  ;;  %v4822_v28 = vadd.f32 %v14583_v52, %v4556_v16  ;;  %4523 = vst.msk [vmem:[#allocation3 + $0xd8] sm:$0xff] %vm347_vm4, %v4491_v48  ;;  %v4490_v3 = vadd.f32 %v4435_v41, %v4134_v57  ;;  %v4869_v13 = vld [vmem:[#allocation3 + $0x8] sm:$0xff] }
 0x371   : > { %v4555_v53 = vld [vmem:[#allocation3 + $0xb0] sm:$0xff]  ;;  %v14536_v35 = vpop.f32.mrf.mxu1  ;;  %v14589_v59 = vpop.f32.mrf.mxu0  ;;  %14871 = vmatmul.mubr.msk.f32.gmra.mxu1 %vm225_vm1, %v18048_v55  ;;  %14924 = vmatmul.mubr.msk.f32.gmra.mxu0 %vm225_vm1, %v18048_v55 }
 0x372   : > { %4854 = vst.msk [vmem:[#allocation3 + $0xb8] sm:$0xff] %vm347_vm4, %v4822_v28  ;;  %v4821_v26 = vadd.f32 %v4750_v62, %v4555_v53  ;;  %4522 = vst.msk [vmem:[#allocation3 + $0xd0] sm:$0xff] %vm347_vm4, %v4490_v3  ;;  %v4493_v24 = vadd.f32 %v14536_v35, %v4137_v19  ;;  %14873 = vmatprep.mubr.msk.f32.mxu1 %vm225_vm1, %v18054_v58  ;;  %14926 = vmatprep.mubr.msk.f32.mxu0 %vm225_vm1, %v18054_v58  ;;  %v4868_v19 = vld [vmem:[#allocation3] sm:$0xff]  ;;  %v4871_v35 = vld [vmem:[#allocation3 + $0x18] sm:$0xff] }
 0x373   : > { %v4558_v42 = vld [vmem:[#allocation3 + $0xc8] sm:$0xff]  ;;  %v4445_v7 = vpop.f32.mrf.mxu1  ;;  %v4770_v6 = vpop.f32.mrf.mxu0 }
 0x374   : > { %4853 = vst.msk [vmem:[#allocation3 + $0xb0] sm:$0xff] %vm347_vm4, %v4821_v26  ;;  %v4824_v51 = vadd.f32 %v14586_v49, %v4558_v42  ;;  %4525 = vst.msk [vmem:[#allocation3 + $0xe8] sm:$0xff] %vm347_vm4, %v4493_v24  ;;  %v4492_v12 = vadd.f32 %v4445_v7, %v4136_v38  ;;  %v4870_v42 = vld [vmem:[#allocation3 + $0x10] sm:$0xff] }
 0x375   : > { %v4557_v10 = vld [vmem:[#allocation3 + $0xc0] sm:$0xff]  ;;  %v14539_v52 = vpop.f32.mrf.mxu1  ;;  %v14592_v56 = vpop.f32.mrf.mxu0  ;;  %14874 = vmatmul.mubr.msk.f32.gmra.mxu1 %vm225_vm1, %v18064_v30  ;;  %14927 = vmatmul.mubr.msk.f32.gmra.mxu0 %vm225_vm1, %v18064_v30 }
 0x376   : > { %4856 = vst.msk [vmem:[#allocation3 + $0xc8] sm:$0xff] %vm347_vm4, %v4824_v51  ;;  %v4823_v61 = vadd.f32 %v4760_v63, %v4557_v10  ;;  %4524 = vst.msk [vmem:[#allocation3 + $0xe0] sm:$0xff] %vm347_vm4, %v4492_v12  ;;  %v4495_v29 = vadd.f32 %v14539_v52, %v4139_v50  ;;  %14929 = vmatprep.mubr.msk.f32.mxu0 %vm225_vm1, %v18070_v60  ;;  %14940 = vmatprep.mubr.msk.f32.mxu1 %vm225_vm1, %v17848_v14  ;;  %v4873_v12 = vld [vmem:[#allocation3 + $0x28] sm:$0xff] }
 0x377   : > { %v4560_v62 = vld [vmem:[#allocation3 + $0xd8] sm:$0xff]  ;;  %v4455_v2 = vpop.f32.mrf.mxu1  ;;  %v4780_v1 = vpop.f32.mrf.mxu0 }
 0x378   : > { %4855 = vst.msk [vmem:[#allocation3 + $0xc0] sm:$0xff] %vm347_vm4, %v4823_v61  ;;  %v4826_v25 = vadd.f32 %v14589_v59, %v4560_v62  ;;  %4527 = vst.msk [vmem:[#allocation3 + $0xf8] sm:$0xff] %vm347_vm4, %v4495_v29  ;;  %v4494_v22 = vadd.f32 %v4455_v2, %v4138_v34  ;;  %v4872_v61 = vld [vmem:[#allocation3 + $0x20] sm:$0xff] }
 0x379   : > { %v4559_v49 = vld [vmem:[#allocation3 + $0xd0] sm:$0xff]  ;;  %v14595_v57 = vpop.f32.mrf.mxu0  ;;  %v14606_v48 = vpop.f32.mrf.mxu1  ;;  %14930 = vmatmul.mubr.msk.f32.gmra.mxu0 %vm225_vm1, %v18080_v44  ;;  %14941 = vmatmul.mubr.msk.f32.vlgmr.msra.gmra.mxu1 %vm225_vm1, %v17856_v17 }
 0x37a   : > { %4858 = vst.msk [vmem:[#allocation3 + $0xd8] sm:$0xff] %vm347_vm4, %v4826_v25  ;;  %v4825_v14 = vadd.f32 %v4770_v6, %v4559_v49  ;;  %4526 = vst.msk [vmem:[#allocation3 + $0xf0] sm:$0xff] %vm347_vm4, %v4494_v22  ;;  %v5135_v16 = vadd.f32 %v14606_v48, %v4869_v13  ;;  %14943 = vmatprep.mubr.msk.f32.mxu1 %vm225_vm1, %v17865_v21  ;;  %v4875_v25 = vld [vmem:[#allocation3 + $0x38] sm:$0xff]  ;;  %v4874_v48 = vld [vmem:[#allocation3 + $0x30] sm:$0xff] }
 0x37b   : > { %v4562_v41 = vld [vmem:[#allocation3 + $0xe8] sm:$0xff]  ;;  %v4790_v63 = vpop.f32.mrf.mxu0  ;;  %v4975_v28 = vpop.f32.mrf.mxu1 }
 0x37c   : > { %4857 = vst.msk [vmem:[#allocation3 + $0xd0] sm:$0xff] %vm347_vm4, %v4825_v14  ;;  %v4828_v3 = vadd.f32 %v14592_v56, %v4562_v41  ;;  %5167 = vst.msk [vmem:[#allocation3 + $0x8] sm:$0xff] %vm347_vm4, %v5135_v16  ;;  %v5134_v53 = vadd.f32 %v4975_v28, %v4868_v19  ;;  %v4877_v19 = vld [vmem:[#allocation3 + $0x48] sm:$0xff] }
 0x37d   : > { %v4561_v17 = vld [vmem:[#allocation3 + $0xe0] sm:$0xff]  ;;  %v14609_v59 = vpop.f32.mrf.mxu1  ;;  %v14662_v38 = vpop.f32.mrf.mxu0  ;;  %14944 = vmatmul.mubr.msk.f32.gmra.mxu1 %vm225_vm1, %v17874_v32 }
 0x37e   : > { %4860 = vst.msk [vmem:[#allocation3 + $0xe8] sm:$0xff] %vm347_vm4, %v4828_v3  ;;  %v4827_v21 = vadd.f32 %v4780_v1, %v4561_v17  ;;  %5166 = vst.msk [vmem:[#allocation3] sm:$0xff] %vm347_vm4, %v5134_v53  ;;  %v5137_v26 = vadd.f32 %v14609_v59, %v4871_v35  ;;  %14946 = vmatprep.mubr.msk.f32.mxu1 %vm225_vm1, %v17880_v18  ;;  %v4876_v35 = vld [vmem:[#allocation3 + $0x40] sm:$0xff] }
 0x37f   : > { %v4564_v24 = vld [vmem:[#allocation3 + $0xf8] sm:$0xff]  ;;  %v4985_v7 = vpop.f32.mrf.mxu1  ;;  %v5436_v6 = vpop.f32.mrf.mxu0 }
 0x380   : > { %4859 = vst.msk [vmem:[#allocation3 + $0xe0] sm:$0xff] %vm347_vm4, %v4827_v21  ;;  %v4830_v50 = vadd.f32 %v14595_v57, %v4564_v24  ;;  %5169 = vst.msk [vmem:[#allocation3 + $0x18] sm:$0xff] %vm347_vm4, %v5137_v26  ;;  %v5136_v51 = vadd.f32 %v4985_v7, %v4870_v42  ;;  %v4879_v24 = vld [vmem:[#allocation3 + $0x58] sm:$0xff] }
 0x381   : > { %v4563_v32 = vld [vmem:[#allocation3 + $0xf0] sm:$0xff]  ;;  %v14612_v10 = vpop.f32.mrf.mxu1  ;;  %v14665_v52 = vpop.f32.mrf.mxu0  ;;  %14947 = vmatmul.mubr.msk.f32.gmra.mxu1 %vm225_vm1, %v17888_v45 }
 0x382   : > { %4862 = vst.msk [vmem:[#allocation3 + $0xf8] sm:$0xff] %vm347_vm4, %v4830_v50  ;;  %v4829_v18 = vadd.f32 %v4790_v63, %v4563_v32  ;;  %5168 = vst.msk [vmem:[#allocation3 + $0x10] sm:$0xff] %vm347_vm4, %v5136_v51  ;;  %v5139_v56 = vadd.f32 %v14612_v10, %v4873_v12  ;;  %14949 = vmatprep.mubr.msk.f32.mxu1 %vm225_vm1, %v17894_v46  ;;  %v4878_v51 = vld [vmem:[#allocation3 + $0x50] sm:$0xff] }
 0x383   : > { %v5240_v34 = vld [vmem:[#allocation3 + $0x8] sm:$0xff]  ;;  %v4995_v29 = vpop.f32.mrf.mxu1  ;;  %v5446_v62 = vpop.f32.mrf.mxu0 }
 0x384   : > { %4861 = vst.msk [vmem:[#allocation3 + $0xf0] sm:$0xff] %vm347_vm4, %v4829_v18  ;;  %v5596_v2 = vadd.f32 %v14662_v38, %v5240_v34  ;;  %5171 = vst.msk [vmem:[#allocation3 + $0x28] sm:$0xff] %vm347_vm4, %v5139_v56  ;;  %v5138_v1 = vadd.f32 %v4995_v29, %v4872_v61  ;;  %v4881_v18 = vld [vmem:[#allocation3 + $0x68] sm:$0xff] }
 0x385   : > { %v5239_v45 = vld [vmem:[#allocation3] sm:$0xff]  ;;  %v14615_v22 = vpop.f32.mrf.mxu1  ;;  %v14668_v49 = vpop.f32.mrf.mxu0  ;;  %14950 = vmatmul.mubr.msk.f32.gmra.mxu1 %vm225_vm1, %v17904_v0 }
 0x386   : > { %5628 = vst.msk [vmem:[#allocation3 + $0x8] sm:$0xff] %vm347_vm4, %v5596_v2  ;;  %v5595_v46 = vadd.f32 %v5436_v6, %v5239_v45  ;;  %5170 = vst.msk [vmem:[#allocation3 + $0x20] sm:$0xff] %vm347_vm4, %v5138_v1  ;;  %v5141_v57 = vadd.f32 %v14615_v22, %v4875_v25  ;;  %14952 = vmatprep.mubr.msk.f32.mxu1 %vm225_vm1, %v17910_v20  ;;  %v4883_v22 = vld [vmem:[#allocation3 + $0x78] sm:$0xff] }
 0x387   : > { %v5242_v13 = vld [vmem:[#allocation3 + $0x18] sm:$0xff]  ;;  %v5005_v14 = vpop.f32.mrf.mxu1  ;;  %v5456_v16 = vpop.f32.mrf.mxu0 }
 0x388   : > { %5627 = vst.msk [vmem:[#allocation3] sm:$0xff] %vm347_vm4, %v5595_v46  ;;  %v5598_v41 = vadd.f32 %v14665_v52, %v5242_v13  ;;  %5173 = vst.msk [vmem:[#allocation3 + $0x38] sm:$0xff] %vm347_vm4, %v5141_v57  ;;  %v5140_v63 = vadd.f32 %v5005_v14, %v4874_v48  ;;  %v4882_v48 = vld [vmem:[#allocation3 + $0x70] sm:$0xff] }
 0x389   : > { %v5241_v0 = vld [vmem:[#allocation3 + $0x10] sm:$0xff]  ;;  %v14618_v28 = vpop.f32.mrf.mxu1  ;;  %v14671_v3 = vpop.f32.mrf.mxu0  ;;  %14953 = vmatmul.mubr.msk.f32.gmra.mxu1 %vm225_vm1, %v17920_v43 }
 0x38a   : > { %5630 = vst.msk [vmem:[#allocation3 + $0x18] sm:$0xff] %vm347_vm4, %v5598_v41  ;;  %v5597_v20 = vadd.f32 %v5446_v62, %v5241_v0  ;;  %5172 = vst.msk [vmem:[#allocation3 + $0x30] sm:$0xff] %vm347_vm4, %v5140_v63  ;;  %v5143_v53 = vadd.f32 %v14618_v28, %v4877_v19  ;;  %14955 = vmatprep.mubr.msk.f32.mxu1 %vm225_vm1, %v17926_v37  ;;  %v4880_v62 = vld [vmem:[#allocation3 + $0x60] sm:$0xff]  ;;  %v4885_v0 = vld [vmem:[#allocation3 + $0x88] sm:$0xff] }
 0x38b   : > { %v5244_v17 = vld [vmem:[#allocation3 + $0x28] sm:$0xff]  ;;  %v5015_v59 = vpop.f32.mrf.mxu1  ;;  %v5466_v38 = vpop.f32.mrf.mxu0 }
 0x38c   : > { %5629 = vst.msk [vmem:[#allocation3 + $0x10] sm:$0xff] %vm347_vm4, %v5597_v20  ;;  %v5600_v21 = vadd.f32 %v14668_v49, %v5244_v17  ;;  %5175 = vst.msk [vmem:[#allocation3 + $0x48] sm:$0xff] %vm347_vm4, %v5143_v53  ;;  %v5142_v26 = vadd.f32 %v5015_v59, %v4876_v35  ;;  %v4884_v53 = vld [vmem:[#allocation3 + $0x80] sm:$0xff] }
 0x38d   : > { %v5243_v43 = vld [vmem:[#allocation3 + $0x20] sm:$0xff]  ;;  %v14621_v42 = vpop.f32.mrf.mxu1  ;;  %v14674_v7 = vpop.f32.mrf.mxu0  ;;  %14956 = vmatmul.mubr.msk.f32.gmra.mxu1 %vm225_vm1, %v17936_v27 }
 0x38e   : > { %5632 = vst.msk [vmem:[#allocation3 + $0x28] sm:$0xff] %vm347_vm4, %v5600_v21  ;;  %v5599_v37 = vadd.f32 %v5456_v16, %v5243_v43  ;;  %5174 = vst.msk [vmem:[#allocation3 + $0x40] sm:$0xff] %vm347_vm4, %v5142_v26  ;;  %v5145_v6 = vadd.f32 %v14621_v42, %v4879_v24  ;;  %14958 = vmatprep.mubr.msk.f32.mxu1 %vm225_vm1, %v17942_v31  ;;  %v4887_v21 = vld [vmem:[#allocation3 + $0x98] sm:$0xff] }
 0x38f   : > { %v5246_v50 = vld [vmem:[#allocation3 + $0x38] sm:$0xff]  ;;  %v5025_v32 = vpop.f32.mrf.mxu1  ;;  %v5476_v12 = vpop.f32.mrf.mxu0 }
 0x390   : > { %5631 = vst.msk [vmem:[#allocation3 + $0x20] sm:$0xff] %vm347_vm4, %v5599_v37  ;;  %v5602_v10 = vadd.f32 %v14671_v3, %v5246_v50  ;;  %5177 = vst.msk [vmem:[#allocation3 + $0x58] sm:$0xff] %vm347_vm4, %v5145_v6  ;;  %v5144_v52 = vadd.f32 %v5025_v32, %v4878_v51  ;;  %v4889_v32 = vld [vmem:[#allocation3 + $0xa8] sm:$0xff] }
 0x391   : > { %v5245_v27 = vld [vmem:[#allocation3 + $0x30] sm:$0xff]  ;;  %v14624_v56 = vpop.f32.mrf.mxu1  ;;  %v14677_v34 = vpop.f32.mrf.mxu0  ;;  %14959 = vmatmul.mubr.msk.f32.gmra.mxu1 %vm225_vm1, %v17952_v39 }
 0x392   : > { %5634 = vst.msk [vmem:[#allocation3 + $0x38] sm:$0xff] %vm347_vm4, %v5602_v10  ;;  %v5601_v31 = vadd.f32 %v5466_v38, %v5245_v27  ;;  %5176 = vst.msk [vmem:[#allocation3 + $0x50] sm:$0xff] %vm347_vm4, %v5144_v52  ;;  %v5147_v61 = vadd.f32 %v14624_v56, %v4881_v18  ;;  %14961 = vmatprep.mubr.msk.f32.mxu1 %vm225_vm1, %v17958_v40  ;;  %v4888_v18 = vld [vmem:[#allocation3 + $0xa0] sm:$0xff] }
 0x393   : > { %v5248_v29 = vld [vmem:[#allocation3 + $0x48] sm:$0xff]  ;;  %v5035_v2 = vpop.f32.mrf.mxu1  ;;  %v5486_v1 = vpop.f32.mrf.mxu0 }
 0x394   : > { %5633 = vst.msk [vmem:[#allocation3 + $0x30] sm:$0xff] %vm347_vm4, %v5601_v31  ;;  %v5604_v45 = vadd.f32 %v14674_v7, %v5248_v29  ;;  %5179 = vst.msk [vmem:[#allocation3 + $0x68] sm:$0xff] %vm347_vm4, %v5147_v61  ;;  %v5146_v25 = vadd.f32 %v5035_v2, %v4880_v62  ;;  %v4886_v7 = vld [vmem:[#allocation3 + $0x90] sm:$0xff]  ;;  %v4891_v29 = vld [vmem:[#allocation3 + $0xb8] sm:$0xff] }
 0x395   : > { %v5247_v39 = vld [vmem:[#allocation3 + $0x40] sm:$0xff]  ;;  %v14627_v49 = vpop.f32.mrf.mxu1  ;;  %v14680_v46 = vpop.f32.mrf.mxu0  ;;  %14962 = vmatmul.mubr.msk.f32.gmra.mxu1 %vm225_vm1, %v17968_v23 }
 0x396   : > { %5636 = vst.msk [vmem:[#allocation3 + $0x48] sm:$0xff] %vm347_vm4, %v5604_v45  ;;  %v5603_v40 = vadd.f32 %v5476_v12, %v5247_v39  ;;  %5178 = vst.msk [vmem:[#allocation3 + $0x60] sm:$0xff] %vm347_vm4, %v5146_v25  ;;  %v5149_v57 = vadd.f32 %v14627_v49, %v4883_v22  ;;  %14964 = vmatprep.mubr.msk.f32.mxu1 %vm225_vm1, %v17974_v9  ;;  %v4890_v25 = vld [vmem:[#allocation3 + $0xb0] sm:$0xff] }
 0x397   : > { %v5250_v13 = vld [vmem:[#allocation3 + $0x58] sm:$0xff]  ;;  %v5045_v14 = vpop.f32.mrf.mxu1  ;;  %v5496_v16 = vpop.f32.mrf.mxu0 }
 0x398   : > { %5635 = vst.msk [vmem:[#allocation3 + $0x40] sm:$0xff] %vm347_vm4, %v5603_v40  ;;  %v5606_v41 = vadd.f32 %v14677_v34, %v5250_v13  ;;  %5181 = vst.msk [vmem:[#allocation3 + $0x78] sm:$0xff] %vm347_vm4, %v5149_v57  ;;  %v5148_v63 = vadd.f32 %v5045_v14, %v4882_v48  ;;  %v4893_v40 = vld [vmem:[#allocation3 + $0xc8] sm:$0xff] }
 0x399   : > { %v5249_v23 = vld [vmem:[#allocation3 + $0x50] sm:$0xff]  ;;  %v14630_v19 = vpop.f32.mrf.mxu1  ;;  %v14683_v28 = vpop.f32.mrf.mxu0  ;;  %14965 = vmatmul.mubr.msk.f32.gmra.mxu1 %vm225_vm1, %v17984_v8 }
 0x39a   : > { %5638 = vst.msk [vmem:[#allocation3 + $0x58] sm:$0xff] %vm347_vm4, %v5606_v41  ;;  %v5605_v9 = vadd.f32 %v5486_v1, %v5249_v23  ;;  %5180 = vst.msk [vmem:[#allocation3 + $0x70] sm:$0xff] %vm347_vm4, %v5148_v63  ;;  %v5151_v3 = vadd.f32 %v14630_v19, %v4885_v0  ;;  %14967 = vmatprep.mubr.msk.f32.mxu1 %vm225_vm1, %v17990_v15  ;;  %v4895_v19 = vld [vmem:[#allocation3 + $0xd8] sm:$0xff] }
 0x39b   : > { %v5252_v20 = vld [vmem:[#allocation3 + $0x68] sm:$0xff]  ;;  %v5055_v17 = vpop.f32.mrf.mxu1  ;;  %v5506_v35 = vpop.f32.mrf.mxu0 }
 0x39c   : > { %5637 = vst.msk [vmem:[#allocation3 + $0x50] sm:$0xff] %vm347_vm4, %v5605_v9  ;;  %v5608_v59 = vadd.f32 %v14680_v46, %v5252_v20  ;;  %5183 = vst.msk [vmem:[#allocation3 + $0x88] sm:$0xff] %vm347_vm4, %v5151_v3  ;;  %v5150_v38 = vadd.f32 %v5055_v17, %v4884_v53  ;;  %v4894_v53 = vld [vmem:[#allocation3 + $0xd0] sm:$0xff] }
 0x39d   : > { %v5251_v8 = vld [vmem:[#allocation3 + $0x60] sm:$0xff]  ;;  %v14633_v26 = vpop.f32.mrf.mxu1  ;;  %v14686_v43 = vpop.f32.mrf.mxu0  ;;  %14968 = vmatmul.mubr.msk.f32.gmra.mxu1 %vm225_vm1, %v18000_v33 }
 0x39e   : > { %5640 = vst.msk [vmem:[#allocation3 + $0x68] sm:$0xff] %vm347_vm4, %v5608_v59  ;;  %v5607_v15 = vadd.f32 %v5496_v16, %v5251_v8  ;;  %5182 = vst.msk [vmem:[#allocation3 + $0x80] sm:$0xff] %vm347_vm4, %v5150_v38  ;;  %v5153_v24 = vadd.f32 %v14633_v26, %v4887_v21  ;;  %14970 = vmatprep.mubr.msk.f32.mxu1 %vm225_vm1, %v18006_v36  ;;  %v4892_v16 = vld [vmem:[#allocation3 + $0xc0] sm:$0xff]  ;;  %v6363_v59 = vld [vmem:[#allocation2 + $0x19a] sm:$0xff] }
 0x39f   : > { %v5254_v42 = vld [vmem:[#allocation3 + $0x78] sm:$0xff]  ;;  %v5065_v37 = vpop.f32.mrf.mxu1  ;;  %v5516_v6 = vpop.f32.mrf.mxu0  ;;  %v4897_v21 = vld [vmem:[#allocation3 + $0xe8] sm:$0xff] }
 0x3a0   : > { %5639 = vst.msk [vmem:[#allocation3 + $0x60] sm:$0xff] %vm347_vm4, %v5607_v15  ;;  %v5610_v50 = vadd.f32 %v14683_v28, %v5254_v42  ;;  %5185 = vst.msk [vmem:[#allocation3 + $0x98] sm:$0xff] %vm347_vm4, %v5153_v24  ;;  %v5152_v51 = vadd.f32 %v5065_v37, %v4886_v7  ;;  %v6364_v24 = vld [vmem:[#allocation2 + $0x1a2] sm:$0xff]  ;;  %v4896_v7 = vld [vmem:[#allocation3 + $0xe0] sm:$0xff] }
 0x3a1   : > { %v5253_v33 = vld [vmem:[#allocation3 + $0x70] sm:$0xff]  ;;  %v14636_v12 = vpop.f32.mrf.mxu1  ;;  %v14689_v10 = vpop.f32.mrf.mxu0  ;;  %14971 = vmatmul.mubr.msk.f32.gmra.mxu1 %vm225_vm1, %v18016_v47 }
 0x3a2   : > { %5642 = vst.msk [vmem:[#allocation3 + $0x78] sm:$0xff] %vm347_vm4, %v5610_v50  ;;  %v5609_v36 = vadd.f32 %v5506_v35, %v5253_v33  ;;  %5184 = vst.msk [vmem:[#allocation3 + $0x90] sm:$0xff] %vm347_vm4, %v5152_v51  ;;  %v5155_v52 = vadd.f32 %v14636_v12, %v4889_v32  ;;  %14973 = vmatprep.mubr.msk.f32.mxu1 %vm225_vm1, %v18022_v54  ;;  %v4899_v33 = vld [vmem:[#allocation3 + $0xf8] sm:$0xff] }
 0x3a3   : > { %v5256_v27 = vld [vmem:[#allocation3 + $0x88] sm:$0xff]  ;;  %v5075_v56 = vpop.f32.mrf.mxu1  ;;  %v5526_v34 = vpop.f32.mrf.mxu0 }
 0x3a4   : > { %5641 = vst.msk [vmem:[#allocation3 + $0x70] sm:$0xff] %vm347_vm4, %v5609_v36  ;;  %v5612_v31 = vadd.f32 %v14686_v43, %v5256_v27  ;;  %5187 = vst.msk [vmem:[#allocation3 + $0xa8] sm:$0xff] %vm347_vm4, %v5155_v52  ;;  %v5154_v61 = vadd.f32 %v5075_v56, %v4888_v18  ;;  %v4898_v27 = vld [vmem:[#allocation3 + $0xf0] sm:$0xff] }
 0x3a5   : > { %v5255_v47 = vld [vmem:[#allocation3 + $0x80] sm:$0xff]  ;;  %v14639_v62 = vpop.f32.mrf.mxu1  ;;  %v14692_v2 = vpop.f32.mrf.mxu0  ;;  %14974 = vmatmul.mubr.msk.f32.gmra.mxu1 %vm225_vm1, %v18032_v5 }
 0x3a6   : > { %5644 = vst.msk [vmem:[#allocation3 + $0x88] sm:$0xff] %vm347_vm4, %v5612_v31  ;;  %v5611_v54 = vadd.f32 %v5516_v6, %v5255_v47  ;;  %5186 = vst.msk [vmem:[#allocation3 + $0xa0] sm:$0xff] %vm347_vm4, %v5154_v61  ;;  %v5157_v1 = vadd.f32 %v14639_v62, %v4891_v29  ;;  %14976 = vmatprep.mubr.msk.f32.mxu1 %vm225_vm1, %v18038_v11  ;;  %v5665_v29 = vld [vmem:[#allocation3 + $0x8] sm:$0xff] }
 0x3a7   : > { %v5258_v45 = vld [vmem:[#allocation3 + $0x98] sm:$0xff]  ;;  %v5085_v39 = vpop.f32.mrf.mxu1  ;;  %v5536_v22 = vpop.f32.mrf.mxu0 }
 0x3a8   : > { %5643 = vst.msk [vmem:[#allocation3 + $0x80] sm:$0xff] %vm347_vm4, %v5611_v54  ;;  %v5614_v49 = vadd.f32 %v14689_v10, %v5258_v45  ;;  %5189 = vst.msk [vmem:[#allocation3 + $0xb8] sm:$0xff] %vm347_vm4, %v5157_v1  ;;  %v5156_v46 = vadd.f32 %v5085_v39, %v4890_v25  ;;  %v5664_v25 = vld [vmem:[#allocation3] sm:$0xff] }
 0x3a9   : > { %v5257_v5 = vld [vmem:[#allocation3 + $0x90] sm:$0xff]  ;;  %v14642_v57 = vpop.f32.mrf.mxu1  ;;  %v14695_v13 = vpop.f32.mrf.mxu0  ;;  %14977 = vmatmul.mubr.msk.f32.gmra.mxu1 %vm225_vm1, %v18048_v55 }
 0x3aa   : > { %5646 = vst.msk [vmem:[#allocation3 + $0x98] sm:$0xff] %vm347_vm4, %v5614_v49  ;;  %v5613_v11 = vadd.f32 %v5526_v34, %v5257_v5  ;;  %5188 = vst.msk [vmem:[#allocation3 + $0xb0] sm:$0xff] %vm347_vm4, %v5156_v46  ;;  %v5159_v48 = vadd.f32 %v14642_v57, %v4893_v40  ;;  %14979 = vmatprep.mubr.msk.f32.mxu1 %vm225_vm1, %v18054_v58  ;;  %v5667_v5 = vld [vmem:[#allocation3 + $0x18] sm:$0xff] }
 0x3ab   : > { %v5260_v14 = vld [vmem:[#allocation3 + $0xa8] sm:$0xff]  ;;  %v5095_v41 = vpop.f32.mrf.mxu1  ;;  %v5546_v63 = vpop.f32.mrf.mxu0 }
 0x3ac   : > { %5645 = vst.msk [vmem:[#allocation3 + $0x90] sm:$0xff] %vm347_vm4, %v5613_v11  ;;  %v5616_v23 = vadd.f32 %v14692_v2, %v5260_v14  ;;  %5191 = vst.msk [vmem:[#allocation3 + $0xc8] sm:$0xff] %vm347_vm4, %v5159_v48  ;;  %v5158_v0 = vadd.f32 %v5095_v41, %v4892_v16  ;;  %v5666_v14 = vld [vmem:[#allocation3 + $0x10] sm:$0xff] }
 0x3ad   : > { %v5259_v55 = vld [vmem:[#allocation3 + $0xa0] sm:$0xff]  ;;  %v14645_v28 = vpop.f32.mrf.mxu1  ;;  %v14698_v9 = vpop.f32.mrf.mxu0  ;;  %14980 = vmatmul.mubr.msk.f32.gmra.mxu1 %vm225_vm1, %v18064_v30 }
 0x3ae   : > { %5648 = vst.msk [vmem:[#allocation3 + $0xa8] sm:$0xff] %vm347_vm4, %v5616_v23  ;;  %v5615_v58 = vadd.f32 %v5536_v22, %v5259_v55  ;;  %5190 = vst.msk [vmem:[#allocation3 + $0xc0] sm:$0xff] %vm347_vm4, %v5158_v0  ;;  %v5161_v3 = vadd.f32 %v14645_v28, %v4895_v19  ;;  %14982 = vmatprep.mubr.msk.f32.mxu1 %vm225_vm1, %v18070_v60  ;;  %v5669_v55 = vld [vmem:[#allocation3 + $0x28] sm:$0xff] }
 0x3af   : > { %v5262_v20 = vld [vmem:[#allocation3 + $0xb8] sm:$0xff]  ;;  %v5105_v17 = vpop.f32.mrf.mxu1  ;;  %v5556_v35 = vpop.f32.mrf.mxu0 }
 0x3b0   : > { %5647 = vst.msk [vmem:[#allocation3 + $0xa0] sm:$0xff] %vm347_vm4, %v5615_v58  ;;  %v5618_v38 = vadd.f32 %v14695_v13, %v5262_v20  ;;  %5193 = vst.msk [vmem:[#allocation3 + $0xd8] sm:$0xff] %vm347_vm4, %v5161_v3  ;;  %v5160_v30 = vadd.f32 %v5105_v17, %v4894_v53  ;;  %v5668_v20 = vld [vmem:[#allocation3 + $0x20] sm:$0xff] }
 0x3b1   : > { %v5261_v8 = vld [vmem:[#allocation3 + $0xb0] sm:$0xff]  ;;  %v14648_v26 = vpop.f32.mrf.mxu1  ;;  %v14701_v43 = vpop.f32.mrf.mxu0  ;;  %14983 = vmatmul.mubr.msk.f32.gmra.mxu1 %vm225_vm1, %v18080_v44 }
 0x3b2   : > { %5650 = vst.msk [vmem:[#allocation3 + $0xb8] sm:$0xff] %vm347_vm4, %v5618_v38  ;;  %v5617_v60 = vadd.f32 %v5546_v63, %v5261_v8  ;;  %5192 = vst.msk [vmem:[#allocation3 + $0xd0] sm:$0xff] %vm347_vm4, %v5160_v30  ;;  %v5163_v15 = vadd.f32 %v14648_v26, %v4897_v21  ;;  %14985 = vmatprep.mubr.msk.f32.mxu1 %vm225_vm1, %v6363_v59  ;;  %v5671_v30 = vld [vmem:[#allocation3 + $0x38] sm:$0xff] }
 0x3b3   : > { %v5264_v42 = vld [vmem:[#allocation3 + $0xc8] sm:$0xff]  ;;  %v5115_v37 = vpop.f32.mrf.mxu1  ;;  %v5566_v6 = vpop.f32.mrf.mxu0 }
 0x3b4   : > { %5649 = vst.msk [vmem:[#allocation3 + $0xb0] sm:$0xff] %vm347_vm4, %v5617_v60  ;;  %v5620_v50 = vadd.f32 %v14698_v9, %v5264_v42  ;;  %5195 = vst.msk [vmem:[#allocation3 + $0xe8] sm:$0xff] %vm347_vm4, %v5163_v15  ;;  %v5162_v51 = vadd.f32 %v5115_v37, %v4896_v7  ;;  %v5670_v15 = vld [vmem:[#allocation3 + $0x30] sm:$0xff] }
 0x3b5   : > { %v5263_v44 = vld [vmem:[#allocation3 + $0xc0] sm:$0xff]  ;;  %v14651_v32 = vpop.f32.mrf.mxu1  ;;  %v14704_v12 = vpop.f32.mrf.mxu0  ;;  %14986 = vmatmul.mubr.msk.f32.gmra.mxu1 %vm225_vm1, %v6364_v24 }
 0x3b6   : > { %5652 = vst.msk [vmem:[#allocation3 + $0xc8] sm:$0xff] %vm347_vm4, %v5620_v50  ;;  %v5619_v10 = vadd.f32 %v5556_v35, %v5263_v44  ;;  %5194 = vst.msk [vmem:[#allocation3 + $0xe0] sm:$0xff] %vm347_vm4, %v5162_v51  ;;  %v5165_v36 = vadd.f32 %v14651_v32, %v4899_v33  ;;  %v5673_v50 = vld [vmem:[#allocation3 + $0x48] sm:$0xff] }
 0x3b7   : > { %v5266_v52 = vld [vmem:[#allocation3 + $0xd8] sm:$0xff]  ;;  %v5125_v18 = vpop.f32.mrf.mxu1  ;;  %v5576_v56 = vpop.f32.mrf.mxu0 }
 0x3b8   : > { %5651 = vst.msk [vmem:[#allocation3 + $0xc0] sm:$0xff] %vm347_vm4, %v5619_v10  ;;  %v5622_v34 = vadd.f32 %v14701_v43, %v5266_v52  ;;  %5197 = vst.msk [vmem:[#allocation3 + $0xf8] sm:$0xff] %vm347_vm4, %v5165_v36  ;;  %v5164_v31 = vadd.f32 %v5125_v18, %v4898_v27  ;;  %v5672_v10 = vld [vmem:[#allocation3 + $0x40] sm:$0xff] }
 0x3b9   : > { %v5265_v61 = vld [vmem:[#allocation3 + $0xd0] sm:$0xff]  ;;  %v14707_v47 = vpop.f32.mrf.mxu0  ;;  %v14718_v62 = vpop.f32.mrf.mxu1 }
 0x3ba   : > { %5654 = vst.msk [vmem:[#allocation3 + $0xd8] sm:$0xff] %vm347_vm4, %v5622_v34  ;;  %v5621_v2 = vadd.f32 %v5566_v6, %v5265_v61  ;;  %5196 = vst.msk [vmem:[#allocation3 + $0xf0] sm:$0xff] %vm347_vm4, %v5164_v31  ;;  %v5931_v54 = vadd.f32 %v14718_v62, %v5665_v29  ;;  %v5675_v34 = vld [vmem:[#allocation3 + $0x58] sm:$0xff] }
 0x3bb   : > { %v5268_v1 = vld [vmem:[#allocation3 + $0xe8] sm:$0xff]  ;;  %v5586_v45 = vpop.f32.mrf.mxu0  ;;  %v5771_v39 = vpop.f32.mrf.mxu1 }
 0x3bc   : > { %5653 = vst.msk [vmem:[#allocation3 + $0xd0] sm:$0xff] %vm347_vm4, %v5621_v2  ;;  %v5624_v22 = vadd.f32 %v14704_v12, %v5268_v1  ;;  %5963 = vst.msk [vmem:[#allocation3 + $0x8] sm:$0xff] %vm347_vm4, %v5931_v54  ;;  %v5930_v49 = vadd.f32 %v5771_v39, %v5664_v25  ;;  %v5674_v2 = vld [vmem:[#allocation3 + $0x50] sm:$0xff] }
 0x3bd   : > { %v5267_v46 = vld [vmem:[#allocation3 + $0xe0] sm:$0xff]  ;;  %v14721_v40 = vpop.f32.mrf.mxu1  ;;  %v14774_v57 = vpop.f32.mrf.mxu0 }
 0x3be   : > { %5656 = vst.msk [vmem:[#allocation3 + $0xe8] sm:$0xff] %vm347_vm4, %v5624_v22  ;;  %v5623_v13 = vadd.f32 %v5576_v56, %v5267_v46  ;;  %5962 = vst.msk [vmem:[#allocation3] sm:$0xff] %vm347_vm4, %v5930_v49  ;;  %v5933_v11 = vadd.f32 %v14721_v40, %v5667_v5  ;;  %v5677_v22 = vld [vmem:[#allocation3 + $0x68] sm:$0xff] }
 0x3bf   : > { %v5270_v48 = vld [vmem:[#allocation3 + $0xf8] sm:$0xff]  ;;  %v5781_v16 = vpop.f32.mrf.mxu1  ;;  %v6106_v41 = vpop.f32.mrf.mxu0 }
 0x3c0   : > { %5655 = vst.msk [vmem:[#allocation3 + $0xe0] sm:$0xff] %vm347_vm4, %v5623_v13  ;;  %v5626_v63 = vadd.f32 %v14707_v47, %v5270_v48  ;;  %5965 = vst.msk [vmem:[#allocation3 + $0x18] sm:$0xff] %vm347_vm4, %v5933_v11  ;;  %v5932_v23 = vadd.f32 %v5781_v16, %v5666_v14  ;;  %v5676_v13 = vld [vmem:[#allocation3 + $0x60] sm:$0xff] }
 0x3c1   : > { %v5269_v0 = vld [vmem:[#allocation3 + $0xf0] sm:$0xff]  ;;  %v14724_v19 = vpop.f32.mrf.mxu1  ;;  %v14777_v28 = vpop.f32.mrf.mxu0 }
 0x3c2   : > { %5658 = vst.msk [vmem:[#allocation3 + $0xf8] sm:$0xff] %vm347_vm4, %v5626_v63  ;;  %v5625_v9 = vadd.f32 %v5586_v45, %v5269_v0  ;;  %5964 = vst.msk [vmem:[#allocation3 + $0x10] sm:$0xff] %vm347_vm4, %v5932_v23  ;;  %v5935_v58 = vadd.f32 %v14724_v19, %v5669_v55  ;;  %v5679_v63 = vld [vmem:[#allocation3 + $0x78] sm:$0xff] }
 0x3c3   : > { %v6000_v3 = vld [vmem:[#allocation3 + $0x8] sm:$0xff]  ;;  %v5791_v53 = vpop.f32.mrf.mxu1  ;;  %v6116_v17 = vpop.f32.mrf.mxu0 }
 0x3c4   : > { %5657 = vst.msk [vmem:[#allocation3 + $0xf0] sm:$0xff] %vm347_vm4, %v5625_v9  ;;  %v6266_v35 = vadd.f32 %v14774_v57, %v6000_v3  ;;  %5967 = vst.msk [vmem:[#allocation3 + $0x28] sm:$0xff] %vm347_vm4, %v5935_v58  ;;  %v5934_v59 = vadd.f32 %v5791_v53, %v5668_v20  ;;  %v5678_v9 = vld [vmem:[#allocation3 + $0x70] sm:$0xff] }
 0x3c5   : > { %v5999_v38 = vld [vmem:[#allocation3] sm:$0xff]  ;;  %v14727_v8 = vpop.f32.mrf.mxu1  ;;  %v14780_v21 = vpop.f32.mrf.mxu0 }
 0x3c6   : > { %6298 = vst.msk [vmem:[#allocation3 + $0x8] sm:$0xff] %vm347_vm4, %v6266_v35  ;;  %v6265_v26 = vadd.f32 %v6106_v41, %v5999_v38  ;;  %5966 = vst.msk [vmem:[#allocation3 + $0x20] sm:$0xff] %vm347_vm4, %v5934_v59  ;;  %v5937_v43 = vadd.f32 %v14727_v8, %v5671_v30  ;;  %v5681_v35 = vld [vmem:[#allocation3 + $0x88] sm:$0xff] }
 0x3c7   : > { %v6002_v60 = vld [vmem:[#allocation3 + $0x18] sm:$0xff]  ;;  %v5801_v24 = vpop.f32.mrf.mxu1  ;;  %v6126_v42 = vpop.f32.mrf.mxu0 }
 0x3c8   : > { %6297 = vst.msk [vmem:[#allocation3] sm:$0xff] %vm347_vm4, %v6265_v26  ;;  %v6268_v7 = vadd.f32 %v14777_v28, %v6002_v60  ;;  %5969 = vst.msk [vmem:[#allocation3 + $0x38] sm:$0xff] %vm347_vm4, %v5937_v43  ;;  %v5936_v37 = vadd.f32 %v5801_v24, %v5670_v15  ;;  %v5680_v26 = vld [vmem:[#allocation3 + $0x80] sm:$0xff] }
 0x3c9   : > { %v6001_v6 = vld [vmem:[#allocation3 + $0x10] sm:$0xff]  ;;  %v14730_v51 = vpop.f32.mrf.mxu1  ;;  %v14783_v44 = vpop.f32.mrf.mxu0 }
 0x3ca   : > { %6300 = vst.msk [vmem:[#allocation3 + $0x18] sm:$0xff] %vm347_vm4, %v6268_v7  ;;  %v6267_v33 = vadd.f32 %v6116_v17, %v6001_v6  ;;  %5968 = vst.msk [vmem:[#allocation3 + $0x30] sm:$0xff] %vm347_vm4, %v5936_v37  ;;  %v5939_v32 = vadd.f32 %v14730_v51, %v5673_v50  ;;  %v5683_v7 = vld [vmem:[#allocation3 + $0x98] sm:$0xff] }
 0x3cb   : > { %v6004_v12 = vld [vmem:[#allocation3 + $0x28] sm:$0xff]  ;;  %v5811_v36 = vpop.f32.mrf.mxu1  ;;  %v6136_v52 = vpop.f32.mrf.mxu0 }
 0x3cc   : > { %6299 = vst.msk [vmem:[#allocation3 + $0x10] sm:$0xff] %vm347_vm4, %v6267_v33  ;;  %v6270_v27 = vadd.f32 %v14780_v21, %v6004_v12  ;;  %5971 = vst.msk [vmem:[#allocation3 + $0x48] sm:$0xff] %vm347_vm4, %v5939_v32  ;;  %v5938_v18 = vadd.f32 %v5811_v36, %v5672_v10  ;;  %v5682_v33 = vld [vmem:[#allocation3 + $0x90] sm:$0xff] }
 0x3cd   : > { %v6003_v56 = vld [vmem:[#allocation3 + $0x20] sm:$0xff]  ;;  %v14733_v31 = vpop.f32.mrf.mxu1  ;;  %v14786_v61 = vpop.f32.mrf.mxu0 }
 0x3ce   : > { %6302 = vst.msk [vmem:[#allocation3 + $0x28] sm:$0xff] %vm347_vm4, %v6270_v27  ;;  %v6269_v47 = vadd.f32 %v6126_v42, %v6003_v56  ;;  %5970 = vst.msk [vmem:[#allocation3 + $0x40] sm:$0xff] %vm347_vm4, %v5938_v18  ;;  %v5941_v29 = vadd.f32 %v14733_v31, %v5675_v34  ;;  %v5685_v27 = vld [vmem:[#allocation3 + $0xa8] sm:$0xff] }
 0x3cf   : > { %v6006_v62 = vld [vmem:[#allocation3 + $0x38] sm:$0xff]  ;;  %v5821_v54 = vpop.f32.mrf.mxu1  ;;  %v6146_v1 = vpop.f32.mrf.mxu0 }
 0x3d0   : > { %6301 = vst.msk [vmem:[#allocation3 + $0x20] sm:$0xff] %vm347_vm4, %v6269_v47  ;;  %v6272_v45 = vadd.f32 %v14783_v44, %v6006_v62  ;;  %5973 = vst.msk [vmem:[#allocation3 + $0x58] sm:$0xff] %vm347_vm4, %v5941_v29  ;;  %v5940_v25 = vadd.f32 %v5821_v54, %v5674_v2  ;;  %v5684_v47 = vld [vmem:[#allocation3 + $0xa0] sm:$0xff] }
 0x3d1   : > { %v6005_v39 = vld [vmem:[#allocation3 + $0x30] sm:$0xff]  ;;  %v14736_v49 = vpop.f32.mrf.mxu1  ;;  %v14789_v46 = vpop.f32.mrf.mxu0 }
 0x3d2   : > { %6304 = vst.msk [vmem:[#allocation3 + $0x38] sm:$0xff] %vm347_vm4, %v6272_v45  ;;  %v6271_v5 = vadd.f32 %v6136_v52, %v6005_v39  ;;  %5972 = vst.msk [vmem:[#allocation3 + $0x50] sm:$0xff] %vm347_vm4, %v5940_v25  ;;  %v5943_v40 = vadd.f32 %v14736_v49, %v5677_v22  ;;  %v5687_v45 = vld [vmem:[#allocation3 + $0xb8] sm:$0xff] }
 0x3d3   : > { %v6008_v57 = vld [vmem:[#allocation3 + $0x48] sm:$0xff]  ;;  %v5831_v11 = vpop.f32.mrf.mxu1  ;;  %v6156_v48 = vpop.f32.mrf.mxu0 }
 0x3d4   : > { %6303 = vst.msk [vmem:[#allocation3 + $0x30] sm:$0xff] %vm347_vm4, %v6271_v5  ;;  %v6274_v14 = vadd.f32 %v14786_v61, %v6008_v57  ;;  %5975 = vst.msk [vmem:[#allocation3 + $0x68] sm:$0xff] %vm347_vm4, %v5943_v40  ;;  %v5942_v16 = vadd.f32 %v5831_v11, %v5676_v13  ;;  %v5686_v5 = vld [vmem:[#allocation3 + $0xb0] sm:$0xff] }
 0x3d5   : > { %v6007_v41 = vld [vmem:[#allocation3 + $0x40] sm:$0xff]  ;;  %v14739_v23 = vpop.f32.mrf.mxu1  ;;  %v14792_v0 = vpop.f32.mrf.mxu0 }
 0x3d6   : > { %6306 = vst.msk [vmem:[#allocation3 + $0x48] sm:$0xff] %vm347_vm4, %v6274_v14  ;;  %v6273_v55 = vadd.f32 %v6146_v1, %v6007_v41  ;;  %5974 = vst.msk [vmem:[#allocation3 + $0x60] sm:$0xff] %vm347_vm4, %v5942_v16  ;;  %v5945_v19 = vadd.f32 %v14739_v23, %v5679_v63  ;;  %v5689_v14 = vld [vmem:[#allocation3 + $0xc8] sm:$0xff] }
 0x3d7   : > { %v6010_v28 = vld [vmem:[#allocation3 + $0x58] sm:$0xff]  ;;  %v5841_v58 = vpop.f32.mrf.mxu1  ;;  %v6166_v3 = vpop.f32.mrf.mxu0 }
 0x3d8   : > { %6305 = vst.msk [vmem:[#allocation3 + $0x40] sm:$0xff] %vm347_vm4, %v6273_v55  ;;  %v6276_v20 = vadd.f32 %v14789_v46, %v6010_v28  ;;  %5977 = vst.msk [vmem:[#allocation3 + $0x78] sm:$0xff] %vm347_vm4, %v5945_v19  ;;  %v5944_v53 = vadd.f32 %v5841_v58, %v5678_v9  ;;  %v5688_v55 = vld [vmem:[#allocation3 + $0xc0] sm:$0xff] }
 0x3d9   : > { %v6009_v17 = vld [vmem:[#allocation3 + $0x50] sm:$0xff]  ;;  %v14742_v59 = vpop.f32.mrf.mxu1  ;;  %v14795_v38 = vpop.f32.mrf.mxu0 }
 0x3da   : > { %6308 = vst.msk [vmem:[#allocation3 + $0x58] sm:$0xff] %vm347_vm4, %v6276_v20  ;;  %v6275_v30 = vadd.f32 %v6156_v48, %v6009_v17  ;;  %5976 = vst.msk [vmem:[#allocation3 + $0x70] sm:$0xff] %vm347_vm4, %v5944_v53  ;;  %v5947_v8 = vadd.f32 %v14742_v59, %v5681_v35  ;;  %v5691_v20 = vld [vmem:[#allocation3 + $0xd8] sm:$0xff] }
 0x3db   : > { %v6012_v21 = vld [vmem:[#allocation3 + $0x68] sm:$0xff]  ;;  %v5851_v43 = vpop.f32.mrf.mxu1  ;;  %v6176_v60 = vpop.f32.mrf.mxu0 }
 0x3dc   : > { %6307 = vst.msk [vmem:[#allocation3 + $0x50] sm:$0xff] %vm347_vm4, %v6275_v30  ;;  %v6278_v15 = vadd.f32 %v14792_v0, %v6012_v21  ;;  %5979 = vst.msk [vmem:[#allocation3 + $0x88] sm:$0xff] %vm347_vm4, %v5947_v8  ;;  %v5946_v24 = vadd.f32 %v5851_v43, %v5680_v26  ;;  %v5690_v30 = vld [vmem:[#allocation3 + $0xd0] sm:$0xff] }
 0x3dd   : > { %v6011_v42 = vld [vmem:[#allocation3 + $0x60] sm:$0xff]  ;;  %v14745_v37 = vpop.f32.mrf.mxu1  ;;  %v14798_v6 = vpop.f32.mrf.mxu0 }
 0x3de   : > { %6310 = vst.msk [vmem:[#allocation3 + $0x68] sm:$0xff] %vm347_vm4, %v6278_v15  ;;  %v6277_v50 = vadd.f32 %v6166_v3, %v6011_v42  ;;  %5978 = vst.msk [vmem:[#allocation3 + $0x80] sm:$0xff] %vm347_vm4, %v5946_v24  ;;  %v5949_v51 = vadd.f32 %v14745_v37, %v5683_v7  ;;  %v5693_v15 = vld [vmem:[#allocation3 + $0xe8] sm:$0xff] }
 0x3df   : > { %v6014_v44 = vld [vmem:[#allocation3 + $0x78] sm:$0xff]  ;;  %v5861_v32 = vpop.f32.mrf.mxu1  ;;  %v6186_v12 = vpop.f32.mrf.mxu0 }
 0x3e0   : > { %6309 = vst.msk [vmem:[#allocation3 + $0x60] sm:$0xff] %vm347_vm4, %v6277_v50  ;;  %v6280_v10 = vadd.f32 %v14795_v38, %v6014_v44  ;;  %5981 = vst.msk [vmem:[#allocation3 + $0x98] sm:$0xff] %vm347_vm4, %v5949_v51  ;;  %v5948_v36 = vadd.f32 %v5861_v32, %v5682_v33  ;;  %v5692_v50 = vld [vmem:[#allocation3 + $0xe0] sm:$0xff] }
 0x3e1   : > { %v6013_v52 = vld [vmem:[#allocation3 + $0x70] sm:$0xff]  ;;  %v14748_v18 = vpop.f32.mrf.mxu1  ;;  %v14801_v56 = vpop.f32.mrf.mxu0 }
 0x3e2   : > { %6312 = vst.msk [vmem:[#allocation3 + $0x78] sm:$0xff] %vm347_vm4, %v6280_v10  ;;  %v6279_v34 = vadd.f32 %v6176_v60, %v6013_v52  ;;  %5980 = vst.msk [vmem:[#allocation3 + $0x90] sm:$0xff] %vm347_vm4, %v5948_v36  ;;  %v5951_v31 = vadd.f32 %v14748_v18, %v5685_v27  ;;  %v5695_v10 = vld [vmem:[#allocation3 + $0xf8] sm:$0xff] }
 0x3e3   : > { %v6016_v61 = vld [vmem:[#allocation3 + $0x88] sm:$0xff]  ;;  %v5871_v29 = vpop.f32.mrf.mxu1  ;;  %v6196_v62 = vpop.f32.mrf.mxu0 }
 0x3e4   : > { %6311 = vst.msk [vmem:[#allocation3 + $0x70] sm:$0xff] %vm347_vm4, %v6279_v34  ;;  %v6282_v2 = vadd.f32 %v14798_v6, %v6016_v61  ;;  %5983 = vst.msk [vmem:[#allocation3 + $0xa8] sm:$0xff] %vm347_vm4, %v5951_v31  ;;  %v5950_v54 = vadd.f32 %v5871_v29, %v5684_v47  ;;  %v5694_v34 = vld [vmem:[#allocation3 + $0xf0] sm:$0xff] }
 0x3e5   : > { %v6015_v1 = vld [vmem:[#allocation3 + $0x80] sm:$0xff]  ;;  %v14751_v25 = vpop.f32.mrf.mxu1  ;;  %v14804_v39 = vpop.f32.mrf.mxu0 }
 0x3e6   : > { %6314 = vst.msk [vmem:[#allocation3 + $0x88] sm:$0xff] %vm347_vm4, %v6282_v2  ;;  %v6281_v22 = vadd.f32 %v6186_v12, %v6015_v1  ;;  %5982 = vst.msk [vmem:[#allocation3 + $0xa0] sm:$0xff] %vm347_vm4, %v5950_v54  ;;  %v5953_v49 = vadd.f32 %v14751_v25, %v5687_v45  ;;  %v6371_v54 = vld [vmem:[#allocation3 + $0x8] sm:$0xff] }
 0x3e7   : > { %v6018_v46 = vld [vmem:[#allocation3 + $0x98] sm:$0xff]  ;;  %v5881_v40 = vpop.f32.mrf.mxu1  ;;  %v6206_v57 = vpop.f32.mrf.mxu0 }
 0x3e8   : > { %6313 = vst.msk [vmem:[#allocation3 + $0x80] sm:$0xff] %vm347_vm4, %v6281_v22  ;;  %v6284_v13 = vadd.f32 %v14801_v56, %v6018_v46  ;;  %5985 = vst.msk [vmem:[#allocation3 + $0xb8] sm:$0xff] %vm347_vm4, %v5953_v49  ;;  %v5952_v11 = vadd.f32 %v5881_v40, %v5686_v5  ;;  %v6370_v49 = vld [vmem:[#allocation3] sm:$0xff] }
 0x3e9   : > { %v6017_v48 = vld [vmem:[#allocation3 + $0x90] sm:$0xff]  ;;  %v14754_v16 = vpop.f32.mrf.mxu1  ;;  %v14807_v41 = vpop.f32.mrf.mxu0 }
 0x3ea   : > { %6316 = vst.msk [vmem:[#allocation3 + $0x98] sm:$0xff] %vm347_vm4, %v6284_v13  ;;  %v6283_v63 = vadd.f32 %v6196_v62, %v6017_v48  ;;  %5984 = vst.msk [vmem:[#allocation3 + $0xb0] sm:$0xff] %vm347_vm4, %v5952_v11  ;;  %v5955_v23 = vadd.f32 %v14754_v16, %v5689_v14  ;;  %v6373_v13 = vld [vmem:[#allocation3 + $0x18] sm:$0xff] }
 0x3eb   : > { %v6020_v0 = vld [vmem:[#allocation3 + $0xa8] sm:$0xff]  ;;  %v5891_v19 = vpop.f32.mrf.mxu1  ;;  %v6216_v28 = vpop.f32.mrf.mxu0 }
 0x3ec   : > { %6315 = vst.msk [vmem:[#allocation3 + $0x90] sm:$0xff] %vm347_vm4, %v6283_v63  ;;  %v6286_v9 = vadd.f32 %v14804_v39, %v6020_v0  ;;  %5987 = vst.msk [vmem:[#allocation3 + $0xc8] sm:$0xff] %vm347_vm4, %v5955_v23  ;;  %v5954_v58 = vadd.f32 %v5891_v19, %v5688_v55  ;;  %v6372_v63 = vld [vmem:[#allocation3 + $0x10] sm:$0xff] }
 0x3ed   : > { %v6019_v3 = vld [vmem:[#allocation3 + $0xa0] sm:$0xff]  ;;  %v14757_v53 = vpop.f32.mrf.mxu1  ;;  %v14810_v17 = vpop.f32.mrf.mxu0 }
 0x3ee   : > { %6318 = vst.msk [vmem:[#allocation3 + $0xa8] sm:$0xff] %vm347_vm4, %v6286_v9  ;;  %v6285_v35 = vadd.f32 %v6206_v57, %v6019_v3  ;;  %5986 = vst.msk [vmem:[#allocation3 + $0xc0] sm:$0xff] %vm347_vm4, %v5954_v58  ;;  %v5957_v59 = vadd.f32 %v14757_v53, %v5691_v20  ;;  %v6375_v58 = vld [vmem:[#allocation3 + $0x28] sm:$0xff] }
 0x3ef   : > { %v6022_v38 = vld [vmem:[#allocation3 + $0xb8] sm:$0xff]  ;;  %v5901_v8 = vpop.f32.mrf.mxu1  ;;  %v6226_v21 = vpop.f32.mrf.mxu0 }
 0x3f0   : > { %6317 = vst.msk [vmem:[#allocation3 + $0xa0] sm:$0xff] %vm347_vm4, %v6285_v35  ;;  %v6288_v26 = vadd.f32 %v14807_v41, %v6022_v38  ;;  %5989 = vst.msk [vmem:[#allocation3 + $0xd8] sm:$0xff] %vm347_vm4, %v5957_v59  ;;  %v5956_v43 = vadd.f32 %v5901_v8, %v5690_v30  ;;  %v6374_v59 = vld [vmem:[#allocation3 + $0x20] sm:$0xff] }
 0x3f1   : > { %v6021_v60 = vld [vmem:[#allocation3 + $0xb0] sm:$0xff]  ;;  %v14760_v24 = vpop.f32.mrf.mxu1  ;;  %v14813_v42 = vpop.f32.mrf.mxu0 }
 0x3f2   : > { %6320 = vst.msk [vmem:[#allocation3 + $0xb8] sm:$0xff] %vm347_vm4, %v6288_v26  ;;  %v6287_v7 = vadd.f32 %v6216_v28, %v6021_v60  ;;  %5988 = vst.msk [vmem:[#allocation3 + $0xd0] sm:$0xff] %vm347_vm4, %v5956_v43  ;;  %v5959_v37 = vadd.f32 %v14760_v24, %v5693_v15  ;;  %v12603_v28 = vld [vmem:[%s19997_s1 + $0x258] sm:$0xf]  ;;  %v6377_v43 = vld [vmem:[#allocation3 + $0x38] sm:$0xff] }
 0x3f3   : > { %v6024_v6 = vld [vmem:[#allocation3 + $0xc8] sm:$0xff]  ;;  %v5911_v51 = vpop.f32.mrf.mxu1  ;;  %v6236_v44 = vpop.f32.mrf.mxu0  ;;  %14988 = vmatprep.subr.msk.mxu0 %vm548_vm0, %v12603_v28 }
 0x3f4   : > { %6319 = vst.msk [vmem:[#allocation3 + $0xb0] sm:$0xff] %vm347_vm4, %v6287_v7  ;;  %v6290_v33 = vadd.f32 %v14810_v17, %v6024_v6  ;;  %5991 = vst.msk [vmem:[#allocation3 + $0xe8] sm:$0xff] %vm347_vm4, %v5959_v37  ;;  %v5958_v32 = vadd.f32 %v5911_v51, %v5692_v50  ;;  %14989 = vmatpush3.msk.msra.mxu0 %vm548_vm0, %v12603_v28  ;;  %v12602_v7 = vld [vmem:[%s19997_s1 + $0x250] sm:$0xff]  ;;  %v12601_v37 = vld [vmem:[%s19997_s1 + $0x248] sm:$0xff] }
 0x3f5   : > { %v6023_v12 = vld [vmem:[#allocation3 + $0xc0] sm:$0xff]  ;;  %v14763_v36 = vpop.f32.mrf.mxu1  ;;  %v14816_v52 = vpop.f32.mrf.mxu0  ;;  %v6376_v50 = vld [vmem:[#allocation3 + $0x30] sm:$0xff]  ;;  %14990 = vmatprep.subr.mxu0 %v12602_v7 }
 0x3f6   : > { %6322 = vst.msk [vmem:[#allocation3 + $0xc8] sm:$0xff] %vm347_vm4, %v6290_v33  ;;  %v6289_v27 = vadd.f32 %v6226_v21, %v6023_v12  ;;  %5990 = vst.msk [vmem:[#allocation3 + $0xe0] sm:$0xff] %vm347_vm4, %v5958_v32  ;;  %v5961_v18 = vadd.f32 %v14763_v36, %v5695_v10  ;;  %v12640_v33 = vld [vmem:[%s19997_s1 + $0x2b8] sm:$0xf]  ;;  %14991 = vmatpush3.msra.mxu0 %v12602_v7  ;;  %v12600_v10 = vld [vmem:[%s19997_s1 + $0x240] sm:$0xff] }
 0x3f7   : > { %v6026_v56 = vld [vmem:[#allocation3 + $0xd8] sm:$0xff]  ;;  %v5921_v31 = vpop.f32.mrf.mxu1  ;;  %v6246_v61 = vpop.f32.mrf.mxu0  ;;  %15044 = vmatprep.subr.msk.mxu1 %vm548_vm0, %v12640_v33  ;;  %14992 = vmatprep.subr.mxu0 %v12601_v37 }
 0x3f8   : > { %6321 = vst.msk [vmem:[#allocation3 + $0xc0] sm:$0xff] %vm347_vm4, %v6289_v27  ;;  %v6292_v47 = vadd.f32 %v14813_v42, %v6026_v56  ;;  %5993 = vst.msk [vmem:[#allocation3 + $0xf8] sm:$0xff] %vm347_vm4, %v5961_v18  ;;  %v5960_v29 = vadd.f32 %v5921_v31, %v5694_v34  ;;  %15045 = vmatpush3.msk.msra.mxu1 %vm548_vm0, %v12640_v33  ;;  %14993 = vmatpush3.msra.mxu0 %v12601_v37 }
 0x3f9   : > { %v6025_v62 = vld [vmem:[#allocation3 + $0xd0] sm:$0xff]  ;;  %v14819_v2 = vpop.f32.mrf.mxu0  ;;  %v14830_v1 = vpop.f32.mrf.mxu1  ;;  %14994 = vmatprep.subr.mxu0 %v12600_v10 }
 0x3fa   : > { %6324 = vst.msk [vmem:[#allocation3 + $0xd8] sm:$0xff] %vm347_vm4, %v6292_v47  ;;  %v6291_v45 = vadd.f32 %v6236_v44, %v6025_v62  ;;  %5992 = vst.msk [vmem:[#allocation3 + $0xf0] sm:$0xff] %vm347_vm4, %v5960_v29  ;;  %v6727_v25 = vadd.f32 %v14830_v1, %v6371_v54  ;;  %14995 = vmatpush3.msra.mxu0 %v12600_v10  ;;  %v6381_v1 = vld [vmem:[#allocation3 + $0x58] sm:$0xff] }
 0x3fb   : > { %v6028_v39 = vld [vmem:[#allocation3 + $0xe8] sm:$0xff]  ;;  %v6256_v22 = vpop.f32.mrf.mxu0  ;;  %v6567_v46 = vpop.f32.mrf.mxu1 }
 0x3fc   : > { %6323 = vst.msk [vmem:[#allocation3 + $0xd0] sm:$0xff] %vm347_vm4, %v6291_v45  ;;  %v6294_v5 = vadd.f32 %v14816_v52, %v6028_v39  ;;  %6759 = vst.msk [vmem:[#allocation3 + $0x8] sm:$0xff] %vm347_vm4, %v6727_v25  ;;  %v6726_v40 = vadd.f32 %v6567_v46, %v6370_v49  ;;  %v6379_v52 = vld [vmem:[#allocation3 + $0x48] sm:$0xff]  ;;  %v6380_v46 = vld [vmem:[#allocation3 + $0x50] sm:$0xff] }
 0x3fd   : > { %v6027_v57 = vld [vmem:[#allocation3 + $0xe0] sm:$0xff]  ;;  %v14833_v11 = vpop.f32.mrf.mxu1  ;;  %v14886_v48 = vpop.f32.mrf.mxu0 }
 0x3fe   : > { %6326 = vst.msk [vmem:[#allocation3 + $0xe8] sm:$0xff] %vm347_vm4, %v6294_v5  ;;  %v6293_v14 = vadd.f32 %v6246_v61, %v6027_v57  ;;  %6758 = vst.msk [vmem:[#allocation3] sm:$0xff] %vm347_vm4, %v6726_v40  ;;  %v6729_v16 = vadd.f32 %v14833_v11, %v6373_v13  ;;  %v6378_v61 = vld [vmem:[#allocation3 + $0x40] sm:$0xff] }
 0x3ff   : > { %v6030_v41 = vld [vmem:[#allocation3 + $0xf8] sm:$0xff]  ;;  %v6577_v23 = vpop.f32.mrf.mxu1  ;;  %v6902_v0 = vpop.f32.mrf.mxu0 }
 0x400   : > { %6325 = vst.msk [vmem:[#allocation3 + $0xe0] sm:$0xff] %vm347_vm4, %v6293_v14  ;;  %v6296_v55 = vadd.f32 %v14819_v2, %v6030_v41  ;;  %6761 = vst.msk [vmem:[#allocation3 + $0x18] sm:$0xff] %vm347_vm4, %v6729_v16  ;;  %v6728_v19 = vadd.f32 %v6577_v23, %v6372_v63 }
 0x401   : > { %v6029_v9 = vld [vmem:[#allocation3 + $0xf0] sm:$0xff]  ;;  %v14836_v3 = vpop.f32.mrf.mxu1  ;;  %v14889_v20 = vpop.f32.mrf.mxu0 }
 0x402   : > { %6328 = vst.msk [vmem:[#allocation3 + $0xf8] sm:$0xff] %vm347_vm4, %v6296_v55  ;;  %v6295_v53 = vadd.f32 %v6256_v22, %v6029_v9  ;;  %6760 = vst.msk [vmem:[#allocation3 + $0x10] sm:$0xff] %vm347_vm4, %v6728_v19  ;;  %v6731_v17 = vadd.f32 %v14836_v3, %v6375_v58  ;;  %v6385_v3 = vld [vmem:[#allocation3 + $0x78] sm:$0xff] }
 0x403   : > { %v6796_v35 = vld [vmem:[#allocation3 + $0x8] sm:$0xff]  ;;  %v6587_v38 = vpop.f32.mrf.mxu1  ;;  %v6912_v30 = vpop.f32.mrf.mxu0 }
 0x404   : > { %6327 = vst.msk [vmem:[#allocation3 + $0xf0] sm:$0xff] %vm347_vm4, %v6295_v53  ;;  %v7062_v8 = vadd.f32 %v14886_v48, %v6796_v35  ;;  %6763 = vst.msk [vmem:[#allocation3 + $0x28] sm:$0xff] %vm347_vm4, %v6731_v17  ;;  %v6730_v21 = vadd.f32 %v6587_v38, %v6374_v59  ;;  %v6383_v48 = vld [vmem:[#allocation3 + $0x68] sm:$0xff]  ;;  %v6384_v38 = vld [vmem:[#allocation3 + $0x70] sm:$0xff] }
 0x405   : > { %v6795_v26 = vld [vmem:[#allocation3] sm:$0xff]  ;;  %v14839_v60 = vpop.f32.mrf.mxu1  ;;  %v14892_v15 = vpop.f32.mrf.mxu0 }
 0x406   : > { %7094 = vst.msk [vmem:[#allocation3 + $0x8] sm:$0xff] %vm347_vm4, %v7062_v8  ;;  %v7061_v24 = vadd.f32 %v6902_v0, %v6795_v26  ;;  %6762 = vst.msk [vmem:[#allocation3 + $0x20] sm:$0xff] %vm347_vm4, %v6730_v21  ;;  %v6733_v42 = vadd.f32 %v14839_v60, %v6377_v43  ;;  %v6382_v0 = vld [vmem:[#allocation3 + $0x60] sm:$0xff]  ;;  %v6387_v60 = vld [vmem:[#allocation3 + $0x88] sm:$0xff] }
 0x407   : > { %v6798_v6 = vld [vmem:[#allocation3 + $0x18] sm:$0xff]  ;;  %v6597_v51 = vpop.f32.mrf.mxu1  ;;  %v6922_v44 = vpop.f32.mrf.mxu0 }
 0x408   : > { %7093 = vst.msk [vmem:[#allocation3] sm:$0xff] %vm347_vm4, %v7061_v24  ;;  %v7064_v32 = vadd.f32 %v14889_v20, %v6798_v6  ;;  %6765 = vst.msk [vmem:[#allocation3 + $0x38] sm:$0xff] %vm347_vm4, %v6733_v42  ;;  %v6732_v12 = vadd.f32 %v6597_v51, %v6376_v50  ;;  %v6386_v6 = vld [vmem:[#allocation3 + $0x80] sm:$0xff] }
 0x409   : > { %v6797_v36 = vld [vmem:[#allocation3 + $0x10] sm:$0xff]  ;;  %v14842_v27 = vpop.f32.mrf.mxu1  ;;  %v14895_v18 = vpop.f32.mrf.mxu0 }
 0x40a   : > { %7096 = vst.msk [vmem:[#allocation3 + $0x18] sm:$0xff] %vm347_vm4, %v7064_v32  ;;  %v7063_v56 = vadd.f32 %v6912_v30, %v6797_v36  ;;  %6764 = vst.msk [vmem:[#allocation3 + $0x30] sm:$0xff] %vm347_vm4, %v6732_v12  ;;  %v6735_v34 = vadd.f32 %v14842_v27, %v6379_v52  ;;  %v6389_v12 = vld [vmem:[#allocation3 + $0x98] sm:$0xff] }
 0x40b   : > { %v6800_v31 = vld [vmem:[#allocation3 + $0x28] sm:$0xff]  ;;  %v6607_v47 = vpop.f32.mrf.mxu1  ;;  %v6932_v29 = vpop.f32.mrf.mxu0 }
 0x40c   : > { %7095 = vst.msk [vmem:[#allocation3 + $0x10] sm:$0xff] %vm347_vm4, %v7063_v56  ;;  %v7066_v62 = vadd.f32 %v14892_v15, %v6800_v31  ;;  %6767 = vst.msk [vmem:[#allocation3 + $0x48] sm:$0xff] %vm347_vm4, %v6735_v34  ;;  %v6734_v2 = vadd.f32 %v6607_v47, %v6378_v61  ;;  %v6388_v56 = vld [vmem:[#allocation3 + $0x90] sm:$0xff] }
 0x40d   : > { %v6799_v54 = vld [vmem:[#allocation3 + $0x20] sm:$0xff]  ;;  %v14845_v45 = vpop.f32.mrf.mxu1  ;;  %v14898_v25 = vpop.f32.mrf.mxu0 }
 0x40e   : > { %7098 = vst.msk [vmem:[#allocation3 + $0x28] sm:$0xff] %vm347_vm4, %v7066_v62  ;;  %v7065_v39 = vadd.f32 %v6922_v44, %v6799_v54  ;;  %6766 = vst.msk [vmem:[#allocation3 + $0x40] sm:$0xff] %vm347_vm4, %v6734_v2  ;;  %v6737_v22 = vadd.f32 %v14845_v45, %v6381_v1  ;;  %v6391_v62 = vld [vmem:[#allocation3 + $0xa8] sm:$0xff] }
 0x40f   : > { %v6802_v49 = vld [vmem:[#allocation3 + $0x38] sm:$0xff]  ;;  %v6617_v5 = vpop.f32.mrf.mxu1  ;;  %v6942_v40 = vpop.f32.mrf.mxu0 }
 0x410   : > { %7097 = vst.msk [vmem:[#allocation3 + $0x20] sm:$0xff] %vm347_vm4, %v7065_v39  ;;  %v7068_v57 = vadd.f32 %v14895_v18, %v6802_v49  ;;  %6769 = vst.msk [vmem:[#allocation3 + $0x58] sm:$0xff] %vm347_vm4, %v6737_v22  ;;  %v6736_v13 = vadd.f32 %v6617_v5, %v6380_v46  ;;  %v6390_v39 = vld [vmem:[#allocation3 + $0xa0] sm:$0xff] }
 0x411   : > { %v6801_v11 = vld [vmem:[#allocation3 + $0x30] sm:$0xff]  ;;  %v14848_v14 = vpop.f32.mrf.mxu1  ;;  %v14901_v16 = vpop.f32.mrf.mxu0 }
 0x412   : > { %7100 = vst.msk [vmem:[#allocation3 + $0x38] sm:$0xff] %vm347_vm4, %v7068_v57  ;;  %v7067_v41 = vadd.f32 %v6932_v29, %v6801_v11  ;;  %6768 = vst.msk [vmem:[#allocation3 + $0x50] sm:$0xff] %vm347_vm4, %v6736_v13  ;;  %v6739_v63 = vadd.f32 %v14848_v14, %v6383_v48  ;;  %v6393_v57 = vld [vmem:[#allocation3 + $0xb8] sm:$0xff] }
 0x413   : > { %v6804_v23 = vld [vmem:[#allocation3 + $0x48] sm:$0xff]  ;;  %v6627_v55 = vpop.f32.mrf.mxu1  ;;  %v6952_v19 = vpop.f32.mrf.mxu0 }
 0x414   : > { %7099 = vst.msk [vmem:[#allocation3 + $0x30] sm:$0xff] %vm347_vm4, %v7067_v41  ;;  %v7070_v28 = vadd.f32 %v14898_v25, %v6804_v23  ;;  %6771 = vst.msk [vmem:[#allocation3 + $0x68] sm:$0xff] %vm347_vm4, %v6739_v63  ;;  %v6738_v9 = vadd.f32 %v6627_v55, %v6382_v0  ;;  %v6392_v41 = vld [vmem:[#allocation3 + $0xb0] sm:$0xff] }
 0x415   : > { %v6803_v58 = vld [vmem:[#allocation3 + $0x40] sm:$0xff]  ;;  %v14851_v20 = vpop.f32.mrf.mxu1  ;;  %v14904_v53 = vpop.f32.mrf.mxu0 }
 0x416   : > { %7102 = vst.msk [vmem:[#allocation3 + $0x48] sm:$0xff] %vm347_vm4, %v7070_v28  ;;  %v7069_v17 = vadd.f32 %v6942_v40, %v6803_v58  ;;  %6770 = vst.msk [vmem:[#allocation3 + $0x60] sm:$0xff] %vm347_vm4, %v6738_v9  ;;  %v6741_v35 = vadd.f32 %v14851_v20, %v6385_v3  ;;  %v6395_v28 = vld [vmem:[#allocation3 + $0xc8] sm:$0xff] }
 0x417   : > { %v6806_v59 = vld [vmem:[#allocation3 + $0x58] sm:$0xff]  ;;  %v6637_v30 = vpop.f32.mrf.mxu1  ;;  %v6962_v8 = vpop.f32.mrf.mxu0 }
 0x418   : > { %7101 = vst.msk [vmem:[#allocation3 + $0x40] sm:$0xff] %vm347_vm4, %v7069_v17  ;;  %v7072_v21 = vadd.f32 %v14901_v16, %v6806_v59  ;;  %6773 = vst.msk [vmem:[#allocation3 + $0x78] sm:$0xff] %vm347_vm4, %v6741_v35  ;;  %v6740_v26 = vadd.f32 %v6637_v30, %v6384_v38  ;;  %v6394_v17 = vld [vmem:[#allocation3 + $0xc0] sm:$0xff] }
 0x419   : > { %v6805_v43 = vld [vmem:[#allocation3 + $0x50] sm:$0xff]  ;;  %v14854_v15 = vpop.f32.mrf.mxu1  ;;  %v14907_v24 = vpop.f32.mrf.mxu0 }
 0x41a   : > { %7104 = vst.msk [vmem:[#allocation3 + $0x58] sm:$0xff] %vm347_vm4, %v7072_v21  ;;  %v7071_v42 = vadd.f32 %v6952_v19, %v6805_v43  ;;  %6772 = vst.msk [vmem:[#allocation3 + $0x70] sm:$0xff] %vm347_vm4, %v6740_v26  ;;  %v6743_v7 = vadd.f32 %v14854_v15, %v6387_v60  ;;  %v6397_v21 = vld [vmem:[#allocation3 + $0xd8] sm:$0xff] }
 0x41b   : > { %v6808_v37 = vld [vmem:[#allocation3 + $0x68] sm:$0xff]  ;;  %v6647_v50 = vpop.f32.mrf.mxu1  ;;  %v6972_v51 = vpop.f32.mrf.mxu0 }
 0x41c   : > { %7103 = vst.msk [vmem:[#allocation3 + $0x50] sm:$0xff] %vm347_vm4, %v7071_v42  ;;  %v7074_v44 = vadd.f32 %v14904_v53, %v6808_v37  ;;  %6775 = vst.msk [vmem:[#allocation3 + $0x88] sm:$0xff] %vm347_vm4, %v6743_v7  ;;  %v6742_v33 = vadd.f32 %v6647_v50, %v6386_v6  ;;  %v6396_v42 = vld [vmem:[#allocation3 + $0xd0] sm:$0xff] }
 0x41d   : > { %v6807_v32 = vld [vmem:[#allocation3 + $0x60] sm:$0xff]  ;;  %v14857_v10 = vpop.f32.mrf.mxu1  ;;  %v14910_v36 = vpop.f32.mrf.mxu0 }
 0x41e   : > { %7106 = vst.msk [vmem:[#allocation3 + $0x68] sm:$0xff] %vm347_vm4, %v7074_v44  ;;  %v7073_v52 = vadd.f32 %v6962_v8, %v6807_v32  ;;  %6774 = vst.msk [vmem:[#allocation3 + $0x80] sm:$0xff] %vm347_vm4, %v6742_v33  ;;  %v6745_v27 = vadd.f32 %v14857_v10, %v6389_v12  ;;  %v6399_v44 = vld [vmem:[#allocation3 + $0xe8] sm:$0xff] }
 0x41f   : > { %v6810_v18 = vld [vmem:[#allocation3 + $0x78] sm:$0xff]  ;;  %v6657_v34 = vpop.f32.mrf.mxu1  ;;  %v6982_v31 = vpop.f32.mrf.mxu0 }
 0x420   : > { %7105 = vst.msk [vmem:[#allocation3 + $0x60] sm:$0xff] %vm347_vm4, %v7073_v52  ;;  %v7076_v61 = vadd.f32 %v14907_v24, %v6810_v18  ;;  %6777 = vst.msk [vmem:[#allocation3 + $0x98] sm:$0xff] %vm347_vm4, %v6745_v27  ;;  %v6744_v47 = vadd.f32 %v6657_v34, %v6388_v56  ;;  %v6398_v52 = vld [vmem:[#allocation3 + $0xe0] sm:$0xff] }
 0x421   : > { %v6809_v29 = vld [vmem:[#allocation3 + $0x70] sm:$0xff]  ;;  %v14860_v2 = vpop.f32.mrf.mxu1  ;;  %v14913_v54 = vpop.f32.mrf.mxu0 }
 0x422   : > { %7108 = vst.msk [vmem:[#allocation3 + $0x78] sm:$0xff] %vm347_vm4, %v7076_v61  ;;  %v7075_v1 = vadd.f32 %v6972_v51, %v6809_v29  ;;  %6776 = vst.msk [vmem:[#allocation3 + $0x90] sm:$0xff] %vm347_vm4, %v6744_v47  ;;  %v6747_v45 = vadd.f32 %v14860_v2, %v6391_v62  ;;  %v6401_v61 = vld [vmem:[#allocation3 + $0xf8] sm:$0xff] }
 0x423   : > { %v6812_v25 = vld [vmem:[#allocation3 + $0x88] sm:$0xff]  ;;  %v6667_v22 = vpop.f32.mrf.mxu1  ;;  %v6992_v49 = vpop.f32.mrf.mxu0 }
 0x424   : > { %7107 = vst.msk [vmem:[#allocation3 + $0x70] sm:$0xff] %vm347_vm4, %v7075_v1  ;;  %v7078_v46 = vadd.f32 %v14910_v36, %v6812_v25  ;;  %6779 = vst.msk [vmem:[#allocation3 + $0xa8] sm:$0xff] %vm347_vm4, %v6747_v45  ;;  %v6746_v5 = vadd.f32 %v6667_v22, %v6390_v39  ;;  %v6400_v1 = vld [vmem:[#allocation3 + $0xf0] sm:$0xff] }
 0x425   : > { %v6811_v40 = vld [vmem:[#allocation3 + $0x80] sm:$0xff]  ;;  %v14863_v13 = vpop.f32.mrf.mxu1  ;;  %v14916_v11 = vpop.f32.mrf.mxu0 }
 0x426   : > { %7110 = vst.msk [vmem:[#allocation3 + $0x88] sm:$0xff] %vm347_vm4, %v7078_v46  ;;  %v7077_v48 = vadd.f32 %v6982_v31, %v6811_v40  ;;  %6778 = vst.msk [vmem:[#allocation3 + $0xa0] sm:$0xff] %vm347_vm4, %v6746_v5  ;;  %v6749_v14 = vadd.f32 %v14863_v13, %v6393_v57  ;;  %v7131_v46 = vld [vmem:[#allocation3 + $0x8] sm:$0xff] }
 0x427   : > { %v6814_v16 = vld [vmem:[#allocation3 + $0x98] sm:$0xff]  ;;  %v6677_v63 = vpop.f32.mrf.mxu1  ;;  %v7002_v23 = vpop.f32.mrf.mxu0 }
 0x428   : > { %7109 = vst.msk [vmem:[#allocation3 + $0x80] sm:$0xff] %vm347_vm4, %v7077_v48  ;;  %v7080_v0 = vadd.f32 %v14913_v54, %v6814_v16  ;;  %6781 = vst.msk [vmem:[#allocation3 + $0xb8] sm:$0xff] %vm347_vm4, %v6749_v14  ;;  %v6748_v55 = vadd.f32 %v6677_v63, %v6392_v41  ;;  %v7754_v14 = vld [vmem:[#allocation2] sm:$0xff]  ;;  %v7755_v63 = vld [vmem:[#allocation2 + $0x8] sm:$0xff] }
 0x429   : > { %v6813_v19 = vld [vmem:[#allocation3 + $0x90] sm:$0xff]  ;;  %v14866_v9 = vpop.f32.mrf.mxu1  ;;  %v14919_v58 = vpop.f32.mrf.mxu0  ;;  %14996 = vmatprep.mubr.msk.f32.mxu0 %vm225_vm1, %v7754_v14 }
 0x42a   : > { %7112 = vst.msk [vmem:[#allocation3 + $0x98] sm:$0xff] %vm347_vm4, %v7080_v0  ;;  %v7079_v3 = vadd.f32 %v6992_v49, %v6813_v19  ;;  %6780 = vst.msk [vmem:[#allocation3 + $0xb0] sm:$0xff] %vm347_vm4, %v6748_v55  ;;  %v6751_v20 = vadd.f32 %v14866_v9, %v6395_v28  ;;  %v7133_v55 = vld [vmem:[#allocation3 + $0x18] sm:$0xff]  ;;  %14997 = vmatmul.mubr.msk.f32.vlgmr.msra.gmra.mxu0 %vm225_vm1, %v7755_v63 }
 0x42b   : > { %v6816_v53 = vld [vmem:[#allocation3 + $0xa8] sm:$0xff]  ;;  %v6687_v35 = vpop.f32.mrf.mxu1  ;;  %v7012_v59 = vpop.f32.mrf.mxu0 }
 0x42c   : > { %7111 = vst.msk [vmem:[#allocation3 + $0x90] sm:$0xff] %vm347_vm4, %v7079_v3  ;;  %v7082_v38 = vadd.f32 %v14916_v11, %v6816_v53  ;;  %6783 = vst.msk [vmem:[#allocation3 + $0xc8] sm:$0xff] %vm347_vm4, %v6751_v20  ;;  %v6750_v30 = vadd.f32 %v6687_v35, %v6394_v17  ;;  %v7130_v11 = vld [vmem:[#allocation3] sm:$0xff]  ;;  %v7132_v3 = vld [vmem:[#allocation3 + $0x10] sm:$0xff] }
 0x42d   : > { %v6815_v8 = vld [vmem:[#allocation3 + $0xa0] sm:$0xff]  ;;  %v14869_v26 = vpop.f32.mrf.mxu1  ;;  %v14922_v43 = vpop.f32.mrf.mxu0 }
 0x42e   : > { %7114 = vst.msk [vmem:[#allocation3 + $0xa8] sm:$0xff] %vm347_vm4, %v7082_v38  ;;  %v7081_v60 = vadd.f32 %v7002_v23, %v6815_v8  ;;  %6782 = vst.msk [vmem:[#allocation3 + $0xc0] sm:$0xff] %vm347_vm4, %v6750_v30  ;;  %v6753_v15 = vadd.f32 %v14869_v26, %v6397_v21  ;;  %v12639_v53 = vld [vmem:[%s19997_s1 + $0x2b0] sm:$0xff]  ;;  %v7135_v8 = vld [vmem:[#allocation3 + $0x28] sm:$0xff] }
 0x42f   : > { %v6818_v24 = vld [vmem:[#allocation3 + $0xb8] sm:$0xff]  ;;  %v6697_v7 = vpop.f32.mrf.mxu1  ;;  %v7022_v37 = vpop.f32.mrf.mxu0  ;;  %15046 = vmatprep.subr.mxu1 %v12639_v53  ;;  %v12677_v26 = vld [vmem:[%s19997_s1 + $0x318] sm:$0xf] }
 0x430   : > { %7113 = vst.msk [vmem:[#allocation3 + $0xa0] sm:$0xff] %vm347_vm4, %v7081_v60  ;;  %v7084_v6 = vadd.f32 %v14919_v58, %v6818_v24  ;;  %6785 = vst.msk [vmem:[#allocation3 + $0xd8] sm:$0xff] %vm347_vm4, %v6753_v15  ;;  %v6752_v50 = vadd.f32 %v6697_v7, %v6396_v42  ;;  %15047 = vmatpush3.msra.mxu1 %v12639_v53  ;;  %15100 = vmatprep.subr.msk.mxu0 %vm548_vm0, %v12677_v26  ;;  %v12638_v15 = vld [vmem:[%s19997_s1 + $0x2a8] sm:$0xff]  ;;  %v7134_v24 = vld [vmem:[#allocation3 + $0x20] sm:$0xff] }
 0x431   : > { %v6817_v51 = vld [vmem:[#allocation3 + $0xb0] sm:$0xff]  ;;  %v14872_v33 = vpop.f32.mrf.mxu1  ;;  %v14925_v32 = vpop.f32.mrf.mxu0  ;;  %15048 = vmatprep.subr.mxu1 %v12638_v15  ;;  %15101 = vmatpush3.msk.msra.mxu0 %vm548_vm0, %v12677_v26 }
 0x432   : > { %7116 = vst.msk [vmem:[#allocation3 + $0xb8] sm:$0xff] %vm347_vm4, %v7084_v6  ;;  %v7083_v12 = vadd.f32 %v7012_v59, %v6817_v51  ;;  %6784 = vst.msk [vmem:[#allocation3 + $0xd0] sm:$0xff] %vm347_vm4, %v6752_v50  ;;  %v6755_v10 = vadd.f32 %v14872_v33, %v6399_v44  ;;  %v18371_v59 = vld [vmem:[%s19998_s2 + $0x1] ss:$0 sm:$0xff]  ;;  %15049 = vmatpush3.msra.mxu1 %v12638_v15  ;;  %v7137_v51 = vld [vmem:[#allocation3 + $0x38] sm:$0xff] }
 0x433   : > { %v6820_v36 = vld [vmem:[#allocation3 + $0xc8] sm:$0xff]  ;;  %v6707_v27 = vpop.f32.mrf.mxu1  ;;  %v7032_v18 = vpop.f32.mrf.mxu0  ;;  %v7144_v15 = vld [vmem:[#allocation3 + $0x70] sm:$0xff] }
 0x434   : > { %7115 = vst.msk [vmem:[#allocation3 + $0xb0] sm:$0xff] %vm347_vm4, %v7083_v12  ;;  %v7086_v56 = vadd.f32 %v14922_v43, %v6820_v36  ;;  %6787 = vst.msk [vmem:[#allocation3 + $0xe8] sm:$0xff] %vm347_vm4, %v6755_v10  ;;  %v6754_v34 = vadd.f32 %v6707_v27, %v6398_v52  ;;  %v7136_v36 = vld [vmem:[#allocation3 + $0x30] sm:$0xff] }
 0x435   : > { %v6819_v31 = vld [vmem:[#allocation3 + $0xc0] sm:$0xff]  ;;  %v14875_v47 = vpop.f32.mrf.mxu1  ;;  %v14928_v29 = vpop.f32.mrf.mxu0 }
 0x436   : > { %7118 = vst.msk [vmem:[#allocation3 + $0xc8] sm:$0xff] %vm347_vm4, %v7086_v56  ;;  %v7085_v62 = vadd.f32 %v7022_v37, %v6819_v31  ;;  %6786 = vst.msk [vmem:[#allocation3 + $0xe0] sm:$0xff] %vm347_vm4, %v6754_v34  ;;  %v6757_v2 = vadd.f32 %v14875_v47, %v6401_v61  ;;  %v12637_v37 = vld [vmem:[%s19997_s1 + $0x2a0] sm:$0xff]  ;;  %v7139_v31 = vld [vmem:[#allocation3 + $0x48] sm:$0xff] }
 0x437   : > { %v6822_v54 = vld [vmem:[#allocation3 + $0xd8] sm:$0xff]  ;;  %v6717_v45 = vpop.f32.mrf.mxu1  ;;  %v7042_v49 = vpop.f32.mrf.mxu0  ;;  %15050 = vmatprep.subr.mxu1 %v12637_v37 }
 0x438   : > { %7117 = vst.msk [vmem:[#allocation3 + $0xc0] sm:$0xff] %vm347_vm4, %v7085_v62  ;;  %v7088_v25 = vadd.f32 %v14925_v32, %v6822_v54  ;;  %6789 = vst.msk [vmem:[#allocation3 + $0xf8] sm:$0xff] %vm347_vm4, %v6757_v2  ;;  %v6756_v39 = vadd.f32 %v6717_v45, %v6400_v1  ;;  %15051 = vmatpush3.msra.mxu1 %v12637_v37  ;;  %v7138_v54 = vld [vmem:[#allocation3 + $0x40] sm:$0xff] }
 0x439   : > { %v6821_v22 = vld [vmem:[#allocation3 + $0xd0] sm:$0xff]  ;;  %v14942_v5 = vpop.f32.mrf.mxu1  ;;  %v14931_v0 = vpop.f32.mrf.mxu0 }
 0x43a   : > { %7120 = vst.msk [vmem:[#allocation3 + $0xd8] sm:$0xff] %vm347_vm4, %v7088_v25  ;;  %v7087_v40 = vadd.f32 %v7032_v18, %v6821_v22  ;;  %6788 = vst.msk [vmem:[#allocation3 + $0xf0] sm:$0xff] %vm347_vm4, %v6756_v39  ;;  %v7397_v57 = vadd.f32 %v14942_v5, %v7131_v46 }
 0x43b   : > { %v6824_v13 = vld [vmem:[#allocation3 + $0xe8] sm:$0xff]  ;;  %v7237_v48 = vpop.f32.mrf.mxu1  ;;  %v7052_v30 = vpop.f32.mrf.mxu0 }
 0x43c   : > { %7119 = vst.msk [vmem:[#allocation3 + $0xd0] sm:$0xff] %vm347_vm4, %v7087_v40  ;;  %v7090_v16 = vadd.f32 %v14928_v29, %v6824_v13  ;;  %7429 = vst.msk [vmem:[#allocation3 + $0x8] sm:$0xff] %vm347_vm4, %v7397_v57  ;;  %v7396_v41 = vadd.f32 %v7237_v48, %v7130_v11  ;;  %v7140_v11 = vld [vmem:[#allocation3 + $0x50] sm:$0xff] }
 0x43d   : > { %v6823_v23 = vld [vmem:[#allocation3 + $0xe0] sm:$0xff]  ;;  %v14945_v19 = vpop.f32.mrf.mxu1 }
 0x43e   : > { %7122 = vst.msk [vmem:[#allocation3 + $0xe8] sm:$0xff] %vm347_vm4, %v7090_v16  ;;  %v7089_v28 = vadd.f32 %v7042_v49, %v6823_v23  ;;  %7428 = vst.msk [vmem:[#allocation3] sm:$0xff] %vm347_vm4, %v7396_v41  ;;  %v7399_v9 = vadd.f32 %v14945_v19, %v7133_v55  ;;  %v7141_v49 = vld [vmem:[#allocation3 + $0x58] sm:$0xff]  ;;  %v7143_v23 = vld [vmem:[#allocation3 + $0x68] sm:$0xff] }
 0x43f   : > { %v6826_v58 = vld [vmem:[#allocation3 + $0xf8] sm:$0xff]  ;;  %v7247_v20 = vpop.f32.mrf.mxu1  ;;  %v12676_v19 = vld [vmem:[%s19997_s1 + $0x310] sm:$0xff] }
 0x440   : > { %7121 = vst.msk [vmem:[#allocation3 + $0xe0] sm:$0xff] %vm347_vm4, %v7089_v28  ;;  %v7092_v17 = vadd.f32 %v14931_v0, %v6826_v58  ;;  %7431 = vst.msk [vmem:[#allocation3 + $0x18] sm:$0xff] %vm347_vm4, %v7399_v9  ;;  %v7398_v35 = vadd.f32 %v7247_v20, %v7132_v3  ;;  %15102 = vmatprep.subr.mxu0 %v12676_v19  ;;  %v7142_v3 = vld [vmem:[#allocation3 + $0x60] sm:$0xff] }
 0x441   : > { %v6825_v38 = vld [vmem:[#allocation3 + $0xf0] sm:$0xff]  ;;  %v14948_v21 = vpop.f32.mrf.mxu1  ;;  %15103 = vmatpush3.msra.mxu0 %v12676_v19 }
 0x442   : > { %7124 = vst.msk [vmem:[#allocation3 + $0xf8] sm:$0xff] %vm347_vm4, %v7092_v17  ;;  %v7091_v43 = vadd.f32 %v7052_v30, %v6825_v38  ;;  %7430 = vst.msk [vmem:[#allocation3 + $0x10] sm:$0xff] %vm347_vm4, %v7398_v35  ;;  %v7401_v60 = vadd.f32 %v14948_v21, %v7135_v8  ;;  %v7145_v30 = vld [vmem:[#allocation3 + $0x78] sm:$0xff] }
 0x443   : > { %v7257_v42 = vpop.f32.mrf.mxu1  ;;  %v7461_v7 = vld [vmem:[#allocation3 + $0x8] sm:$0xff] }
 0x444   : > { %7123 = vst.msk [vmem:[#allocation3 + $0xf0] sm:$0xff] %vm347_vm4, %v7091_v43  ;;  %7433 = vst.msk [vmem:[#allocation3 + $0x28] sm:$0xff] %vm347_vm4, %v7401_v60  ;;  %v7400_v6 = vadd.f32 %v7257_v42, %v7134_v24  ;;  %v7498_v50 = vadd.f32 %v18371_v59, %v7461_v7 }
 0x445   : > { %7723 = vst.msk [vmem:[#allocation3 + $0x8] sm:$0xff] %vm347_vm4, %v15568_v4  ;;  %v14951_v44 = vpop.f32.mrf.mxu1  ;;  %v7460_v33 = vld [vmem:[#allocation3] sm:$0xff] }
 0x446   : > { %7432 = vst.msk [vmem:[#allocation3 + $0x20] sm:$0xff] %vm347_vm4, %v7400_v6  ;;  %v7403_v32 = vadd.f32 %v14951_v44, %v7137_v51  ;;  %v7530_v12 = vmax.f32 %v7498_v50, 0.0  ;;  %v7497_v10 = vadd.f32 %v18371_v59, %v7460_v33  ;;  %7722 = vst.msk [vmem:[#allocation3] sm:$0xff] %vm347_vm4, %v15568_v4  ;;  %v7147_v50 = vld [vmem:[#allocation3 + $0x88] sm:$0xff] }
 0x447   : > { %v7267_v52 = vpop.f32.mrf.mxu1  ;;  %v7463_v27 = vld [vmem:[#allocation3 + $0x18] sm:$0xff] }
 0x448   : > { %7435 = vst.msk [vmem:[#allocation3 + $0x38] sm:$0xff] %vm347_vm4, %v7403_v32  ;;  %v7402_v18 = vadd.f32 %v7267_v52, %v7136_v36  ;;  %7595 = vrot.lane.b32.xlu1 %v7530_v12, %s15570_s22  ;;  %v7529_v56 = vmax.f32 %v7497_v10, 0.0  ;;  %v7500_v34 = vadd.f32 %v18371_v59, %v7463_v27  ;;  %7725 = vst.msk [vmem:[#allocation3 + $0x18] sm:$0xff] %vm347_vm4, %v15568_v4  ;;  %v7146_v10 = vld [vmem:[#allocation3 + $0x80] sm:$0xff] }
 0x449   : > { %v14954_v61 = vpop.f32.mrf.mxu1  ;;  %v7462_v47 = vld [vmem:[#allocation3 + $0x10] sm:$0xff] }
 0x44a   : > { %7434 = vst.msk [vmem:[#allocation3 + $0x30] sm:$0xff] %vm347_vm4, %v7402_v18  ;;  %v7405_v29 = vadd.f32 %v14954_v61, %v7139_v31  ;;  %7593 = vrot.lane.b32.xlu0 %v7529_v56, %s15570_s22  ;;  %v7532_v62 = vmax.f32 %v7500_v34, 0.0  ;;  %v7499_v2 = vadd.f32 %v18371_v59, %v7462_v47  ;;  %7724 = vst.msk [vmem:[#allocation3 + $0x10] sm:$0xff] %vm347_vm4, %v15568_v4  ;;  %v7149_v34 = vld [vmem:[#allocation3 + $0x98] sm:$0xff] }
 0x44b   : > { %v7277_v1 = vpop.f32.mrf.mxu1  ;;  %v7465_v45 = vld [vmem:[#allocation3 + $0x28] sm:$0xff] }
 0x44c   : > { %7437 = vst.msk [vmem:[#allocation3 + $0x48] sm:$0xff] %vm347_vm4, %v7405_v29  ;;  %v7404_v25 = vadd.f32 %v7277_v1, %v7138_v54  ;;  %7599 = vrot.lane.b32.xlu1 %v7532_v62, %s15570_s22  ;;  %v7531_v39 = vmax.f32 %v7499_v2, 0.0  ;;  %v7502_v22 = vadd.f32 %v18371_v59, %v7465_v45  ;;  %7727 = vst.msk [vmem:[#allocation3 + $0x28] sm:$0xff] %vm347_vm4, %v15568_v4  ;;  %v7148_v2 = vld [vmem:[#allocation3 + $0x90] sm:$0xff] }
 0x44d   : > { %v14957_v46 = vpop.f32.mrf.mxu1  ;;  %v7464_v5 = vld [vmem:[#allocation3 + $0x20] sm:$0xff] }
 0x44e   : > { %7436 = vst.msk [vmem:[#allocation3 + $0x40] sm:$0xff] %vm347_vm4, %v7404_v25  ;;  %v7407_v40 = vadd.f32 %v14957_v46, %v7141_v49  ;;  %7597 = vrot.lane.b32.xlu0 %v7531_v39, %s15570_s22  ;;  %v7534_v57 = vmax.f32 %v7502_v22, 0.0  ;;  %v7501_v13 = vadd.f32 %v18371_v59, %v7464_v5  ;;  %7726 = vst.msk [vmem:[#allocation3 + $0x20] sm:$0xff] %vm347_vm4, %v15568_v4  ;;  %v7151_v22 = vld [vmem:[#allocation3 + $0xa8] sm:$0xff]  ;;  %v12675_v5 = vld [vmem:[%s19997_s1 + $0x308] sm:$0xff] }
 0x44f   : > { %v7287_v48 = vpop.f32.mrf.mxu1  ;;  %v7467_v14 = vld [vmem:[#allocation3 + $0x38] sm:$0xff]  ;;  %15104 = vmatprep.subr.mxu0 %v12675_v5 }
 0x450   : > { %7439 = vst.msk [vmem:[#allocation3 + $0x58] sm:$0xff] %vm347_vm4, %v7407_v40  ;;  %v7406_v16 = vadd.f32 %v7287_v48, %v7140_v11  ;;  %7603 = vrot.lane.b32.xlu1 %v7534_v57, %s15570_s22  ;;  %v7533_v41 = vmax.f32 %v7501_v13, 0.0  ;;  %v7504_v63 = vadd.f32 %v18371_v59, %v7467_v14  ;;  %7729 = vst.msk [vmem:[#allocation3 + $0x38] sm:$0xff] %vm347_vm4, %v15568_v4  ;;  %v7150_v11 = vld [vmem:[#allocation3 + $0xa0] sm:$0xff]  ;;  %15105 = vmatpush3.msra.mxu0 %v12675_v5 }
 0x451   : > { %v14960_v0 = vpop.f32.mrf.mxu1  ;;  %v7466_v55 = vld [vmem:[#allocation3 + $0x30] sm:$0xff] }
 0x452   : > { %7438 = vst.msk [vmem:[#allocation3 + $0x50] sm:$0xff] %vm347_vm4, %v7406_v16  ;;  %v7409_v28 = vadd.f32 %v14960_v0, %v7143_v23  ;;  %7601 = vrot.lane.b32.xlu0 %v7533_v41, %s15570_s22  ;;  %v7536_v9 = vmax.f32 %v7504_v63, 0.0  ;;  %v7503_v58 = vadd.f32 %v18371_v59, %v7466_v55  ;;  %7728 = vst.msk [vmem:[#allocation3 + $0x30] sm:$0xff] %vm347_vm4, %v15568_v4  ;;  %v7153_v23 = vld [vmem:[#allocation3 + $0xb8] sm:$0xff] }
 0x453   : > { %v7297_v20 = vpop.f32.mrf.mxu1  ;;  %v7469_v53 = vld [vmem:[#allocation3 + $0x48] sm:$0xff] }
 0x454   : > { %7441 = vst.msk [vmem:[#allocation3 + $0x68] sm:$0xff] %vm347_vm4, %v7409_v28  ;;  %v7408_v17 = vadd.f32 %v7297_v20, %v7142_v3  ;;  %7607 = vrot.lane.b32.xlu1 %v7536_v9, %s15570_s22  ;;  %v7535_v35 = vmax.f32 %v7503_v58, 0.0  ;;  %v7506_v38 = vadd.f32 %v18371_v59, %v7469_v53  ;;  %7731 = vst.msk [vmem:[#allocation3 + $0x48] sm:$0xff] %vm347_vm4, %v15568_v4  ;;  %v7152_v58 = vld [vmem:[#allocation3 + $0xb0] sm:$0xff] }
 0x455   : > { %v14963_v8 = vpop.f32.mrf.mxu1  ;;  %v7468_v21 = vld [vmem:[#allocation3 + $0x40] sm:$0xff] }
 0x456   : > { %7440 = vst.msk [vmem:[#allocation3 + $0x60] sm:$0xff] %vm347_vm4, %v7408_v17  ;;  %v7411_v26 = vadd.f32 %v14963_v8, %v7145_v30  ;;  %7605 = vrot.lane.b32.xlu0 %v7535_v35, %s15570_s22  ;;  %v7538_v43 = vmax.f32 %v7506_v38, 0.0  ;;  %v7505_v60 = vadd.f32 %v18371_v59, %v7468_v21  ;;  %7730 = vst.msk [vmem:[#allocation3 + $0x40] sm:$0xff] %vm347_vm4, %v15568_v4  ;;  %v7155_v38 = vld [vmem:[#allocation3 + $0xc8] sm:$0xff] }
 0x457   : > { %v7307_v24 = vpop.f32.mrf.mxu1  ;;  %v7471_v42 = vld [vmem:[#allocation3 + $0x58] sm:$0xff] }
 0x458   : > { %7443 = vst.msk [vmem:[#allocation3 + $0x78] sm:$0xff] %vm347_vm4, %v7411_v26  ;;  %v7410_v7 = vadd.f32 %v7307_v24, %v7144_v15  ;;  %7611 = vrot.lane.b32.xlu1 %v7538_v43, %s15570_s22  ;;  %v7537_v37 = vmax.f32 %v7505_v60, 0.0  ;;  %v7508_v6 = vadd.f32 %v18371_v59, %v7471_v42  ;;  %7733 = vst.msk [vmem:[#allocation3 + $0x58] sm:$0xff] %vm347_vm4, %v15568_v4  ;;  %v7154_v60 = vld [vmem:[#allocation3 + $0xc0] sm:$0xff] }
 0x459   : > { %v14966_v51 = vpop.f32.mrf.mxu1  ;;  %v7470_v44 = vld [vmem:[#allocation3 + $0x50] sm:$0xff] }
 0x45a   : > { %7442 = vst.msk [vmem:[#allocation3 + $0x70] sm:$0xff] %vm347_vm4, %v7410_v7  ;;  %v7413_v33 = vadd.f32 %v14966_v51, %v7147_v50  ;;  %7609 = vrot.lane.b32.xlu0 %v7537_v37, %s15570_s22  ;;  %v7540_v32 = vmax.f32 %v7508_v6, 0.0  ;;  %v7507_v12 = vadd.f32 %v18371_v59, %v7470_v44  ;;  %7732 = vst.msk [vmem:[#allocation3 + $0x50] sm:$0xff] %vm347_vm4, %v15568_v4  ;;  %v7157_v6 = vld [vmem:[#allocation3 + $0xd8] sm:$0xff] }
 0x45b   : > { %v7317_v36 = vpop.f32.mrf.mxu1  ;;  %v7473_v52 = vld [vmem:[#allocation3 + $0x68] sm:$0xff] }
 0x45c   : > { %7445 = vst.msk [vmem:[#allocation3 + $0x88] sm:$0xff] %vm347_vm4, %v7413_v33  ;;  %v7412_v27 = vadd.f32 %v7317_v36, %v7146_v10  ;;  %7615 = vrot.lane.b32.xlu1 %v7540_v32, %s15570_s22  ;;  %v7539_v18 = vmax.f32 %v7507_v12, 0.0  ;;  %v7510_v56 = vadd.f32 %v18371_v59, %v7473_v52  ;;  %7735 = vst.msk [vmem:[#allocation3 + $0x68] sm:$0xff] %vm347_vm4, %v15568_v4  ;;  %v7156_v12 = vld [vmem:[#allocation3 + $0xd0] sm:$0xff] }
 0x45d   : > { %v14969_v31 = vpop.f32.mrf.mxu1  ;;  %v7472_v61 = vld [vmem:[#allocation3 + $0x60] sm:$0xff] }
 0x45e   : > { %7444 = vst.msk [vmem:[#allocation3 + $0x80] sm:$0xff] %vm347_vm4, %v7412_v27  ;;  %v7415_v47 = vadd.f32 %v14969_v31, %v7149_v34  ;;  %7613 = vrot.lane.b32.xlu0 %v7539_v18, %s15570_s22  ;;  %v7542_v29 = vmax.f32 %v7510_v56, 0.0  ;;  %v7509_v62 = vadd.f32 %v18371_v59, %v7472_v61  ;;  %7734 = vst.msk [vmem:[#allocation3 + $0x60] sm:$0xff] %vm347_vm4, %v15568_v4  ;;  %v7159_v56 = vld [vmem:[#allocation3 + $0xe8] sm:$0xff]  ;;  %v12674_v61 = vld [vmem:[%s19997_s1 + $0x300] sm:$0xff] }
 0x45f   : > { %v7327_v54 = vpop.f32.mrf.mxu1  ;;  %v7475_v1 = vld [vmem:[#allocation3 + $0x78] sm:$0xff]  ;;  %15106 = vmatprep.subr.mxu0 %v12674_v61 }
 0x460   : > { %7447 = vst.msk [vmem:[#allocation3 + $0x98] sm:$0xff] %vm347_vm4, %v7415_v47  ;;  %v7414_v45 = vadd.f32 %v7327_v54, %v7148_v2  ;;  %7619 = vrot.lane.b32.xlu1 %v7542_v29, %s15570_s22  ;;  %v7541_v25 = vmax.f32 %v7509_v62, 0.0  ;;  %v7512_v39 = vadd.f32 %v18371_v59, %v7475_v1  ;;  %7737 = vst.msk [vmem:[#allocation3 + $0x78] sm:$0xff] %vm347_vm4, %v15568_v4  ;;  %v7158_v2 = vld [vmem:[#allocation3 + $0xe0] sm:$0xff]  ;;  %15107 = vmatpush3.msra.mxu0 %v12674_v61 }
 0x461   : > { %v14972_v49 = vpop.f32.mrf.mxu1  ;;  %v7474_v46 = vld [vmem:[#allocation3 + $0x70] sm:$0xff] }
 0x462   : > { %7446 = vst.msk [vmem:[#allocation3 + $0x90] sm:$0xff] %vm347_vm4, %v7414_v45  ;;  %v7417_v40 = vadd.f32 %v14972_v49, %v7151_v22  ;;  %7617 = vrot.lane.b32.xlu0 %v7541_v25, %s15570_s22  ;;  %v7544_v57 = vmax.f32 %v7512_v39, 0.0  ;;  %v7511_v13 = vadd.f32 %v18371_v59, %v7474_v46  ;;  %7736 = vst.msk [vmem:[#allocation3 + $0x70] sm:$0xff] %vm347_vm4, %v15568_v4  ;;  %v7161_v22 = vld [vmem:[#allocation3 + $0xf8] sm:$0xff] }
 0x463   : > { %v7337_v48 = vpop.f32.mrf.mxu1  ;;  %v7477_v14 = vld [vmem:[#allocation3 + $0x88] sm:$0xff] }
 0x464   : > { %7449 = vst.msk [vmem:[#allocation3 + $0xa8] sm:$0xff] %vm347_vm4, %v7417_v40  ;;  %v7416_v16 = vadd.f32 %v7337_v48, %v7150_v11  ;;  %7623 = vrot.lane.b32.xlu1 %v7544_v57, %s15570_s22  ;;  %v7543_v41 = vmax.f32 %v7511_v13, 0.0  ;;  %v7514_v63 = vadd.f32 %v18371_v59, %v7477_v14  ;;  %7739 = vst.msk [vmem:[#allocation3 + $0x88] sm:$0xff] %vm347_vm4, %v15568_v4  ;;  %v7160_v13 = vld [vmem:[#allocation3 + $0xf0] sm:$0xff]  ;;  %v12714_v14 = vld [vmem:[%s19997_s1 + $0x278] sm:$0xf] }
 0x465   : > { %v14975_v0 = vpop.f32.mrf.mxu1  ;;  %v7476_v55 = vld [vmem:[#allocation3 + $0x80] sm:$0xff]  ;;  %15156 = vmatprep.subr.msk.mxu1 %vm548_vm0, %v12714_v14 }
 0x466   : > { %7448 = vst.msk [vmem:[#allocation3 + $0xa0] sm:$0xff] %vm347_vm4, %v7416_v16  ;;  %v7419_v19 = vadd.f32 %v14975_v0, %v7153_v23  ;;  %7621 = vrot.lane.b32.xlu0 %v7543_v41, %s15570_s22  ;;  %v7546_v28 = vmax.f32 %v7514_v63, 0.0  ;;  %v7513_v9 = vadd.f32 %v18371_v59, %v7476_v55  ;;  %7738 = vst.msk [vmem:[#allocation3 + $0x80] sm:$0xff] %vm347_vm4, %v15568_v4 }
 0x467   : > { %v7347_v3 = vpop.f32.mrf.mxu1  ;;  %v7479_v20 = vld [vmem:[#allocation3 + $0x98] sm:$0xff] }
 0x468   : > { %7451 = vst.msk [vmem:[#allocation3 + $0xb8] sm:$0xff] %vm347_vm4, %v7419_v19  ;;  %v7418_v53 = vadd.f32 %v7347_v3, %v7152_v58  ;;  %7627 = vrot.lane.b32.xlu1 %v7546_v28, %s15570_s22  ;;  %v7545_v17 = vmax.f32 %v7513_v9, 0.0  ;;  %v7516_v35 = vadd.f32 %v18371_v59, %v7479_v20  ;;  %7741 = vst.msk [vmem:[#allocation3 + $0x98] sm:$0xff] %vm347_vm4, %v15568_v4 }
 0x469   : > { %v14978_v30 = vpop.f32.mrf.mxu1  ;;  %v7478_v8 = vld [vmem:[#allocation3 + $0x90] sm:$0xff] }
 0x46a   : > { %7450 = vst.msk [vmem:[#allocation3 + $0xb0] sm:$0xff] %vm347_vm4, %v7418_v53  ;;  %v7421_v21 = vadd.f32 %v14978_v30, %v7155_v38  ;;  %7625 = vrot.lane.b32.xlu0 %v7545_v17, %s15570_s22  ;;  %v7548_v26 = vmax.f32 %v7516_v35, 0.0  ;;  %v7515_v43 = vadd.f32 %v18371_v59, %v7478_v8  ;;  %7740 = vst.msk [vmem:[#allocation3 + $0x90] sm:$0xff] %vm347_vm4, %v15568_v4  ;;  %v18553_v30 = vld [vmem:[%s19997_s1 + $0x2d8] sm:$0xf] }
 0x46b   : > { %v7357_v15 = vpop.f32.mrf.mxu1  ;;  %v7481_v24 = vld [vmem:[#allocation3 + $0xa8] sm:$0xff]  ;;  %15212 = vmatprep.subr.msk.mxu0 %vm548_vm0, %v18553_v30 }
 0x46c   : > { %7453 = vst.msk [vmem:[#allocation3 + $0xc8] sm:$0xff] %vm347_vm4, %v7421_v21  ;;  %v7420_v42 = vadd.f32 %v7357_v15, %v7154_v60  ;;  %7631 = vrot.lane.b32.xlu1 %v7548_v26, %s15570_s22  ;;  %v7547_v7 = vmax.f32 %v7515_v43, 0.0  ;;  %v7518_v37 = vadd.f32 %v18371_v59, %v7481_v24  ;;  %7743 = vst.msk [vmem:[#allocation3 + $0xa8] sm:$0xff] %vm347_vm4, %v15568_v4 }
 0x46d   : > { %v14981_v50 = vpop.f32.mrf.mxu1  ;;  %v7480_v51 = vld [vmem:[#allocation3 + $0xa0] sm:$0xff] }
 0x46e   : > { %7452 = vst.msk [vmem:[#allocation3 + $0xc0] sm:$0xff] %vm347_vm4, %v7420_v42  ;;  %v7423_v44 = vadd.f32 %v14981_v50, %v7157_v6  ;;  %7629 = vrot.lane.b32.xlu0 %v7547_v7, %s15570_s22  ;;  %v7550_v33 = vmax.f32 %v7518_v37, 0.0  ;;  %v7517_v32 = vadd.f32 %v18371_v59, %v7480_v51  ;;  %7742 = vst.msk [vmem:[#allocation3 + $0xa0] sm:$0xff] %vm347_vm4, %v15568_v4  ;;  %v12713_v37 = vld [vmem:[%s19997_s1 + $0x270] sm:$0xff] }
 0x46f   : > { %v7367_v10 = vpop.f32.mrf.mxu1  ;;  %v7483_v36 = vld [vmem:[#allocation3 + $0xb8] sm:$0xff] }
 0x470   : > { %7455 = vst.msk [vmem:[#allocation3 + $0xd8] sm:$0xff] %vm347_vm4, %v7423_v44  ;;  %v7422_v52 = vadd.f32 %v7367_v10, %v7156_v12  ;;  %7635 = vrot.lane.b32.xlu1 %v7550_v33, %s15570_s22  ;;  %v7549_v27 = vmax.f32 %v7517_v32, 0.0  ;;  %v7520_v18 = vadd.f32 %v18371_v59, %v7483_v36  ;;  %7745 = vst.msk [vmem:[#allocation3 + $0xb8] sm:$0xff] %vm347_vm4, %v15568_v4  ;;  %v12712_v33 = vld [vmem:[%s19997_s1 + $0x268] sm:$0xff] }
 0x471   : > { %v14984_v34 = vpop.f32.mrf.mxu1  ;;  %v7482_v31 = vld [vmem:[#allocation3 + $0xb0] sm:$0xff] }
 0x472   : > { %7454 = vst.msk [vmem:[#allocation3 + $0xd0] sm:$0xff] %vm347_vm4, %v7422_v52  ;;  %v7425_v47 = vadd.f32 %v14984_v34, %v7159_v56  ;;  %7633 = vrot.lane.b32.xlu0 %v7549_v27, %s15570_s22  ;;  %v7552_v29 = vmax.f32 %v7520_v18, 0.0  ;;  %v7519_v62 = vadd.f32 %v18371_v59, %v7482_v31  ;;  %7744 = vst.msk [vmem:[#allocation3 + $0xb0] sm:$0xff] %vm347_vm4, %v15568_v4  ;;  %v12711_v52 = vld [vmem:[%s19997_s1 + $0x260] sm:$0xff]  ;;  %v18624_v31 = vld [vmem:[%s19997_s1 + $0x338] sm:$0xf] }
 0x473   : > { %v7377_v54 = vpop.f32.mrf.mxu1  ;;  %v7485_v1 = vld [vmem:[#allocation3 + $0xc8] sm:$0xff] }
 0x474   : > { %7457 = vst.msk [vmem:[#allocation3 + $0xe8] sm:$0xff] %vm347_vm4, %v7425_v47  ;;  %v7424_v45 = vadd.f32 %v7377_v54, %v7158_v2  ;;  %7639 = vrot.lane.b32.xlu1 %v7552_v29, %s15570_s22  ;;  %v7551_v25 = vmax.f32 %v7519_v62, 0.0  ;;  %v7522_v39 = vadd.f32 %v18371_v59, %v7485_v1  ;;  %7747 = vst.msk [vmem:[#allocation3 + $0xc8] sm:$0xff] %vm347_vm4, %v15568_v4 }
 0x475   : > { %v14987_v49 = vpop.f32.mrf.mxu1  ;;  %v7484_v46 = vld [vmem:[#allocation3 + $0xc0] sm:$0xff] }
 0x476   : > { %7456 = vst.msk [vmem:[#allocation3 + $0xe0] sm:$0xff] %vm347_vm4, %v7424_v45  ;;  %v7427_v5 = vadd.f32 %v14987_v49, %v7161_v22  ;;  %7637 = vrot.lane.b32.xlu0 %v7551_v25, %s15570_s22  ;;  %v7554_v40 = vmax.f32 %v7522_v39, 0.0  ;;  %v7521_v57 = vadd.f32 %v18371_v59, %v7484_v46  ;;  %7746 = vst.msk [vmem:[#allocation3 + $0xc0] sm:$0xff] %vm347_vm4, %v15568_v4 }
 0x477   : > { %v7387_v11 = vpop.f32.mrf.mxu1  ;;  %v7487_v48 = vld [vmem:[#allocation3 + $0xd8] sm:$0xff] }
 0x478   : > { %7459 = vst.msk [vmem:[#allocation3 + $0xf8] sm:$0xff] %vm347_vm4, %v7427_v5  ;;  %v7426_v16 = vadd.f32 %v7387_v11, %v7160_v13  ;;  %7643 = vrot.lane.b32.xlu1 %v7554_v40, %s15570_s22  ;;  %v7553_v41 = vmax.f32 %v7521_v57, 0.0  ;;  %v7524_v63 = vadd.f32 %v18371_v59, %v7487_v48  ;;  %7749 = vst.msk [vmem:[#allocation3 + $0xd8] sm:$0xff] %vm347_vm4, %v15568_v4 }
 0x479   : > { %v7486_v23 = vld [vmem:[#allocation3 + $0xd0] sm:$0xff] }
 0x47a   : > { %7458 = vst.msk [vmem:[#allocation3 + $0xf0] sm:$0xff] %vm347_vm4, %v7426_v16  ;;  %7641 = vrot.lane.b32.xlu0 %v7553_v41, %s15570_s22  ;;  %v7556_v0 = vmax.f32 %v7524_v63, 0.0  ;;  %v7523_v55 = vadd.f32 %v18371_v59, %v7486_v23  ;;  %7748 = vst.msk [vmem:[#allocation3 + $0xd0] sm:$0xff] %vm347_vm4, %v15568_v4 }
 0x47b   : > { %v7489_v19 = vld [vmem:[#allocation3 + $0xe8] sm:$0xff] }
 0x47c   : > { %7647 = vrot.lane.b32.xlu1 %v7556_v0, %s15570_s22  ;;  %v7555_v28 = vmax.f32 %v7523_v55, 0.0  ;;  %v7526_v9 = vadd.f32 %v18371_v59, %v7489_v19  ;;  %7751 = vst.msk [vmem:[#allocation3 + $0xe8] sm:$0xff] %vm347_vm4, %v15568_v4 }
 0x47d   : > { %v7488_v58 = vld [vmem:[#allocation3 + $0xe0] sm:$0xff] }
 0x47e   : > { %7645 = vrot.lane.b32.xlu0 %v7555_v28, %s15570_s22  ;;  %v7558_v3 = vmax.f32 %v7526_v9, 0.0  ;;  %v7525_v20 = vadd.f32 %v18371_v59, %v7488_v58  ;;  %7750 = vst.msk [vmem:[#allocation3 + $0xe0] sm:$0xff] %vm347_vm4, %v15568_v4 }
 0x47f   : > { %v7491_v53 = vld [vmem:[#allocation3 + $0xf8] sm:$0xff] }
 0x480   : > { %7651 = vrot.lane.b32.xlu1 %v7558_v3, %s15570_s22  ;;  %v7557_v17 = vmax.f32 %v7525_v20, 0.0  ;;  %v7528_v35 = vadd.f32 %v18371_v59, %v7491_v53  ;;  %7753 = vst.msk [vmem:[#allocation3 + $0xf8] sm:$0xff] %vm347_vm4, %v15568_v4 }
 0x481   : > { %v7490_v38 = vld [vmem:[#allocation3 + $0xf0] sm:$0xff] }
 0x482   : > { %7649 = vrot.lane.b32.xlu0 %v7557_v17, %s15570_s22  ;;  %v7560_v8 = vmax.f32 %v7528_v35, 0.0  ;;  %v7527_v21 = vadd.f32 %v18371_v59, %v7490_v38  ;;  %7752 = vst.msk [vmem:[#allocation3 + $0xf0] sm:$0xff] %vm347_vm4, %v15568_v4 }
 0x484   : > { %7655 = vrot.lane.b32.xlu1 %v7560_v8, %s15570_s22  ;;  %v7559_v26 = vmax.f32 %v7527_v21, 0.0 }
 0x486   : > { %7653 = vrot.lane.b32.xlu0 %v7559_v26, %s15570_s22 }
 0x4ba   : > { %v7596_v43 = vpop.permute.xlu1 %7595 }
 0x4bb   : > { %7691 = vst.msk [vmem:[#allocation2 + $0x21] sm:$0xff] %vm7689_vm6, %v7596_v43 }
 0x4bc   : > { %v7594_v60 = vpop.permute.xlu0 %7593 }
 0x4bd   : > { %7690 = vst.msk [vmem:[#allocation2 + $0x19] sm:$0xff] %vm7689_vm6, %v7594_v60  ;;  %v7796_v60 = vld [vmem:[#allocation3 + $0x8] sm:$0xff] }
 0x4be   : > { %v7600_v15 = vpop.permute.xlu1 %7599 }
 0x4bf   : > { %7693 = vst.msk [vmem:[#allocation2 + $0x39] sm:$0xff] %vm7689_vm6, %v7600_v15 }
 0x4c0   : > { %v7598_v59 = vpop.permute.xlu0 %7597 }
 0x4c1   : > { %7692 = vst.msk [vmem:[#allocation2 + $0x31] sm:$0xff] %vm7689_vm6, %v7598_v59 }
 0x4c2   : > { %v7604_v4 = vpop.permute.xlu1 %7603 }
 0x4c3   : > { %7695 = vst.msk [vmem:[#allocation2 + $0x51] sm:$0xff] %vm7689_vm6, %v7604_v4 }
 0x4c4   : > { %v7602_v24 = vpop.permute.xlu0 %7601  ;;  %v7756_v42 = vld [vmem:[#allocation2 + $0x18] sm:$0xff]  ;;  %v7757_v7 = vld [vmem:[#allocation2 + $0x20] sm:$0xff] }
 0x4c5   : > { %7694 = vst.msk [vmem:[#allocation2 + $0x49] sm:$0xff] %vm7689_vm6, %v7602_v24  ;;  %14999 = vmatprep.mubr.msk.f32.mxu0 %vm225_vm1, %v7756_v42  ;;  %15052 = vmatprep.mubr.msk.f32.mxu1 %vm225_vm1, %v7756_v42  ;;  %v7795_v24 = vld [vmem:[#allocation3] sm:$0xff] }
 0x4c6   : > { %15000 = vmatmul.mubr.msk.f32.gmra.mxu0 %vm225_vm1, %v7757_v7  ;;  %15053 = vmatmul.mubr.msk.f32.vlgmr.msra.gmra.mxu1 %vm225_vm1, %v7757_v7  ;;  %v7608_v6 = vpop.permute.xlu1 %7607 }
 0x4c7   : > { %7697 = vst.msk [vmem:[#allocation2 + $0x69] sm:$0xff] %vm7689_vm6, %v7608_v6  ;;  %15157 = vmatpush3.msk.msra.mxu1 %vm548_vm0, %v12714_v14 }
 0x4c8   : > { %v7606_v50 = vpop.permute.xlu0 %7605  ;;  %v18578_v51 = vld [vmem:[#allocation2 + $0x30] sm:$0xff]  ;;  %v18580_v44 = vld [vmem:[#allocation2 + $0x38] sm:$0xff]  ;;  %15158 = vmatprep.subr.mxu1 %v12713_v37 }
 0x4c9   : > { %7696 = vst.msk [vmem:[#allocation2 + $0x61] sm:$0xff] %vm7689_vm6, %v7606_v50  ;;  %15002 = vmatprep.mubr.msk.f32.mxu0 %vm225_vm1, %v18578_v51  ;;  %15055 = vmatprep.mubr.msk.f32.mxu1 %vm225_vm1, %v18578_v51 }
 0x4ca   : > { %15003 = vmatmul.mubr.msk.f32.gmra.mxu0 %vm225_vm1, %v18580_v44  ;;  %15056 = vmatmul.mubr.msk.f32.gmra.mxu1 %vm225_vm1, %v18580_v44  ;;  %v7612_v32 = vpop.permute.xlu1 %7611 }
 0x4cb   : > { %7699 = vst.msk [vmem:[#allocation2 + $0x81] sm:$0xff] %vm7689_vm6, %v7612_v32  ;;  %15159 = vmatpush3.msra.mxu1 %v12713_v37  ;;  %v12750_v32 = vld [vmem:[%s19997_s1 + $0x2d0] sm:$0xff] }
 0x4cc   : > { %v7610_v12 = vpop.permute.xlu0 %7609  ;;  %v18595_v10 = vld [vmem:[#allocation2 + $0x48] sm:$0xff]  ;;  %v18597_v36 = vld [vmem:[#allocation2 + $0x50] sm:$0xff]  ;;  %15160 = vmatprep.subr.mxu1 %v12712_v33 }
 0x4cd   : > { %7698 = vst.msk [vmem:[#allocation2 + $0x79] sm:$0xff] %vm7689_vm6, %v7610_v12  ;;  %15005 = vmatprep.mubr.msk.f32.mxu0 %vm225_vm1, %v18595_v10  ;;  %15058 = vmatprep.mubr.msk.f32.mxu1 %vm225_vm1, %v18595_v10  ;;  %v12749_v12 = vld [vmem:[%s19997_s1 + $0x2c8] sm:$0xff] }
 0x4ce   : > { %15006 = vmatmul.mubr.msk.f32.gmra.mxu0 %vm225_vm1, %v18597_v36  ;;  %15059 = vmatmul.mubr.msk.f32.gmra.mxu1 %vm225_vm1, %v18597_v36  ;;  %v7616_v27 = vpop.permute.xlu1 %7615 }
 0x4cf   : > { %7701 = vst.msk [vmem:[#allocation2 + $0x99] sm:$0xff] %vm7689_vm6, %v7616_v27  ;;  %15161 = vmatpush3.msra.mxu1 %v12712_v33  ;;  %v8885_v33 = vld [vmem:[#allocation2 + $0x1] sm:$0xff] }
 0x4d0   : > { %v7614_v18 = vpop.permute.xlu0 %7613  ;;  %v18612_v56 = vld [vmem:[#allocation2 + $0x60] sm:$0xff]  ;;  %v18614_v34 = vld [vmem:[#allocation2 + $0x68] sm:$0xff]  ;;  %15162 = vmatprep.subr.mxu1 %v12711_v52 }
 0x4d1   : > { %7700 = vst.msk [vmem:[#allocation2 + $0x91] sm:$0xff] %vm7689_vm6, %v7614_v18  ;;  %15008 = vmatprep.mubr.msk.f32.mxu0 %vm225_vm1, %v18612_v56  ;;  %15061 = vmatprep.mubr.msk.f32.mxu1 %vm225_vm1, %v18612_v56  ;;  %v12786_v27 = vld [vmem:[%s19997_s1 + $0x328] sm:$0xff]  ;;  %v18841_v18 = vld [vmem:[#allocation2 + $0x39] sm:$0xff] }
 0x4d2   : > { %15009 = vmatmul.mubr.msk.f32.gmra.mxu0 %vm225_vm1, %v18614_v34  ;;  %15062 = vmatmul.mubr.msk.f32.gmra.mxu1 %vm225_vm1, %v18614_v34  ;;  %v7620_v61 = vpop.permute.xlu1 %7619 }
 0x4d3   : > { %7703 = vst.msk [vmem:[#allocation2 + $0xb1] sm:$0xff] %vm7689_vm6, %v7620_v61  ;;  %15163 = vmatpush3.msra.mxu1 %v12711_v52  ;;  %v18832_v52 = vld [vmem:[#allocation2 + $0x31] sm:$0xff] }
 0x4d4   : > { %v7618_v47 = vpop.permute.xlu0 %7617  ;;  %v18631_v29 = vld [vmem:[#allocation2 + $0x78] sm:$0xff]  ;;  %v18633_v62 = vld [vmem:[#allocation2 + $0x80] sm:$0xff]  ;;  %15268 = vmatprep.subr.msk.mxu1 %vm548_vm0, %v18624_v31 }
 0x4d5   : > { %7702 = vst.msk [vmem:[#allocation2 + $0xa9] sm:$0xff] %vm7689_vm6, %v7618_v47  ;;  %15011 = vmatprep.mubr.msk.f32.mxu0 %vm225_vm1, %v18631_v29  ;;  %15064 = vmatprep.mubr.msk.f32.mxu1 %vm225_vm1, %v18631_v29  ;;  %v18863_v61 = vld [vmem:[#allocation2 + $0x51] sm:$0xff]  ;;  %v18869_v47 = vld [vmem:[#allocation2 + $0x61] sm:$0xff] }
 0x4d6   : > { %15012 = vmatmul.mubr.msk.f32.gmra.mxu0 %vm225_vm1, %v18633_v62  ;;  %15065 = vmatmul.mubr.msk.f32.gmra.mxu1 %vm225_vm1, %v18633_v62  ;;  %v7624_v2 = vpop.permute.xlu1 %7623 }
 0x4d7   : > { %7705 = vst.msk [vmem:[#allocation2 + $0xc9] sm:$0xff] %vm7689_vm6, %v7624_v2  ;;  %v18888_v2 = vld [vmem:[#allocation2 + $0x79] sm:$0xff] }
 0x4d8   : > { %v7622_v54 = vpop.permute.xlu0 %7621  ;;  %v18647_v1 = vld [vmem:[#allocation2 + $0x90] sm:$0xff]  ;;  %v18649_v45 = vld [vmem:[#allocation2 + $0x98] sm:$0xff] }
 0x4d9   : > { %7704 = vst.msk [vmem:[#allocation2 + $0xc1] sm:$0xff] %vm7689_vm6, %v7622_v54  ;;  %15014 = vmatprep.mubr.msk.f32.mxu0 %vm225_vm1, %v18647_v1  ;;  %15067 = vmatprep.mubr.msk.f32.mxu1 %vm225_vm1, %v18647_v1  ;;  %v18894_v54 = vld [vmem:[#allocation2 + $0x81] sm:$0xff] }
 0x4da   : > { %15015 = vmatmul.mubr.msk.f32.gmra.mxu0 %vm225_vm1, %v18649_v45  ;;  %15068 = vmatmul.mubr.msk.f32.gmra.mxu1 %vm225_vm1, %v18649_v45  ;;  %v7628_v25 = vpop.permute.xlu1 %7627 }
 0x4db   : > { %7707 = vst.msk [vmem:[#allocation2 + $0xe1] sm:$0xff] %vm7689_vm6, %v7628_v25 }
 0x4dc   : > { %v7626_v39 = vpop.permute.xlu0 %7625  ;;  %v18661_v22 = vld [vmem:[#allocation2 + $0xa8] sm:$0xff]  ;;  %v18663_v49 = vld [vmem:[#allocation2 + $0xb0] sm:$0xff] }
 0x4dd   : > { %7706 = vst.msk [vmem:[#allocation2 + $0xd9] sm:$0xff] %vm7689_vm6, %v7626_v39  ;;  %15017 = vmatprep.mubr.msk.f32.mxu0 %vm225_vm1, %v18661_v22  ;;  %15070 = vmatprep.mubr.msk.f32.mxu1 %vm225_vm1, %v18661_v22  ;;  %v18912_v25 = vld [vmem:[#allocation2 + $0xa9] sm:$0xff]  ;;  %v18918_v39 = vld [vmem:[#allocation2 + $0xb1] sm:$0xff] }
 0x4de   : > { %15018 = vmatmul.mubr.msk.f32.gmra.mxu0 %vm225_vm1, %v18663_v49  ;;  %15071 = vmatmul.mubr.msk.f32.gmra.mxu1 %vm225_vm1, %v18663_v49  ;;  %v7632_v46 = vpop.permute.xlu1 %7631 }
 0x4df   : > { %7709 = vst.msk [vmem:[#allocation2 + $0xf9] sm:$0xff] %vm7689_vm6, %v7632_v46 }
 0x4e0   : > { %v7630_v5 = vpop.permute.xlu0 %7629  ;;  %v18675_v40 = vld [vmem:[#allocation2 + $0xc0] sm:$0xff]  ;;  %v18677_v57 = vld [vmem:[#allocation2 + $0xc8] sm:$0xff] }
 0x4e1   : > { %7708 = vst.msk [vmem:[#allocation2 + $0xf1] sm:$0xff] %vm7689_vm6, %v7630_v5  ;;  %15020 = vmatprep.mubr.msk.f32.mxu0 %vm225_vm1, %v18675_v40  ;;  %15073 = vmatprep.mubr.msk.f32.mxu1 %vm225_vm1, %v18675_v40 }
 0x4e2   : > { %15021 = vmatmul.mubr.msk.f32.gmra.mxu0 %vm225_vm1, %v18677_v57  ;;  %15074 = vmatmul.mubr.msk.f32.gmra.mxu1 %vm225_vm1, %v18677_v57  ;;  %v7636_v13 = vpop.permute.xlu1 %7635  ;;  %v18942_v5 = vld [vmem:[#allocation2 + $0xe1] sm:$0xff] }
 0x4e3   : > { %7711 = vst.msk [vmem:[#allocation2 + $0x111] sm:$0xff] %vm7689_vm6, %v7636_v13 }
 0x4e4   : > { %v7634_v11 = vpop.permute.xlu0 %7633  ;;  %v18689_v48 = vld [vmem:[#allocation2 + $0xd8] sm:$0xff]  ;;  %v18691_v14 = vld [vmem:[#allocation2 + $0xe0] sm:$0xff] }
 0x4e5   : > { %7710 = vst.msk [vmem:[#allocation2 + $0x109] sm:$0xff] %vm7689_vm6, %v7634_v11  ;;  %15023 = vmatprep.mubr.msk.f32.mxu0 %vm225_vm1, %v18689_v48  ;;  %15076 = vmatprep.mubr.msk.f32.mxu1 %vm225_vm1, %v18689_v48  ;;  %v18936_v46 = vld [vmem:[#allocation2 + $0xd9] sm:$0xff] }
 0x4e6   : > { %15024 = vmatmul.mubr.msk.f32.gmra.mxu0 %vm225_vm1, %v18691_v14  ;;  %15077 = vmatmul.mubr.msk.f32.gmra.mxu1 %vm225_vm1, %v18691_v14  ;;  %v7640_v16 = vpop.permute.xlu1 %7639 }
 0x4e7   : > { %7713 = vst.msk [vmem:[#allocation2 + $0x129] sm:$0xff] %vm7689_vm6, %v7640_v16 }
 0x4e8   : > { %v7638_v41 = vpop.permute.xlu0 %7637  ;;  %v18703_v63 = vld [vmem:[#allocation2 + $0xf0] sm:$0xff]  ;;  %v18705_v23 = vld [vmem:[#allocation2 + $0xf8] sm:$0xff] }
 0x4e9   : > { %7712 = vst.msk [vmem:[#allocation2 + $0x121] sm:$0xff] %vm7689_vm6, %v7638_v41  ;;  %15026 = vmatprep.mubr.msk.f32.mxu0 %vm225_vm1, %v18703_v63  ;;  %15079 = vmatprep.mubr.msk.f32.mxu1 %vm225_vm1, %v18703_v63  ;;  %v7788_v41 = vld [vmem:[#allocation2 + $0x198] sm:$0xff] }
 0x4ea   : > { %15027 = vmatmul.mubr.msk.f32.gmra.mxu0 %vm225_vm1, %v18705_v23  ;;  %15080 = vmatmul.mubr.msk.f32.gmra.mxu1 %vm225_vm1, %v18705_v23  ;;  %v7644_v0 = vpop.permute.xlu1 %7643  ;;  %v14998_v4 = vpop.f32.mrf.mxu0  ;;  %v18966_v11 = vld [vmem:[#allocation2 + $0x111] sm:$0xff] }
 0x4eb   : > { %7715 = vst.msk [vmem:[#allocation2 + $0x141] sm:$0xff] %vm7689_vm6, %v7644_v0  ;;  %v8152_v42 = vadd.f32 %v14998_v4, %v7796_v60  ;;  %v7789_v0 = vld [vmem:[#allocation2 + $0x1a0] sm:$0xff]  ;;  %v10017_v60 = vld [vmem:[#allocation2 + $0xa] sm:$0xff] }
 0x4ec   : > { %v7642_v55 = vpop.permute.xlu0 %7641  ;;  %v18717_v19 = vld [vmem:[#allocation2 + $0x108] sm:$0xff]  ;;  %v18719_v28 = vld [vmem:[#allocation2 + $0x110] sm:$0xff]  ;;  %v7992_v7 = vpop.f32.mrf.mxu0 }
 0x4ed   : > { %7714 = vst.msk [vmem:[#allocation2 + $0x139] sm:$0xff] %vm7689_vm6, %v7642_v55  ;;  %15029 = vmatprep.mubr.msk.f32.mxu0 %vm225_vm1, %v18717_v19  ;;  %15082 = vmatprep.mubr.msk.f32.mxu1 %vm225_vm1, %v18717_v19  ;;  %v8151_v50 = vadd.f32 %v7992_v7, %v7795_v24  ;;  %v18960_v13 = vld [vmem:[#allocation2 + $0x109] sm:$0xff] }
 0x4ee   : > { %15030 = vmatmul.mubr.msk.f32.gmra.mxu0 %vm225_vm1, %v18719_v28  ;;  %15083 = vmatmul.mubr.msk.f32.gmra.mxu1 %vm225_vm1, %v18719_v28  ;;  %v7648_v9 = vpop.permute.xlu1 %7647  ;;  %8184 = vst.msk [vmem:[#allocation3 + $0x8] sm:$0xff] %vm347_vm4, %v8152_v42  ;;  %v7798_v4 = vld [vmem:[#allocation3 + $0x18] sm:$0xff] }
 0x4ef   : > { %7717 = vst.msk [vmem:[#allocation2 + $0x159] sm:$0xff] %vm7689_vm6, %v7648_v9  ;;  %v12824_v9 = vld [vmem:[%s19997_s1 + $0x290] sm:$0xff]  ;;  %v10019_v42 = vld [vmem:[#allocation2 + $0x22] sm:$0xff] }
 0x4f0   : > { %v7646_v58 = vpop.permute.xlu0 %7645  ;;  %v18731_v3 = vld [vmem:[#allocation2 + $0x120] sm:$0xff]  ;;  %v18733_v20 = vld [vmem:[#allocation2 + $0x128] sm:$0xff]  ;;  %8183 = vst.msk [vmem:[#allocation3] sm:$0xff] %vm347_vm4, %v8151_v50  ;;  %v19179_v50 = vld [vmem:[#allocation2 + $0x32] sm:$0xff] }
 0x4f1   : > { %7716 = vst.msk [vmem:[#allocation2 + $0x151] sm:$0xff] %vm7689_vm6, %v7646_v58  ;;  %15032 = vmatprep.mubr.msk.f32.mxu0 %vm225_vm1, %v18731_v3  ;;  %15085 = vmatprep.mubr.msk.f32.mxu1 %vm225_vm1, %v18731_v3  ;;  %v12823_v58 = vld [vmem:[%s19997_s1 + $0x288] sm:$0xff] }
 0x4f2   : > { %15033 = vmatmul.mubr.msk.f32.gmra.mxu0 %vm225_vm1, %v18733_v20  ;;  %15086 = vmatmul.mubr.msk.f32.gmra.mxu1 %vm225_vm1, %v18733_v20  ;;  %v7652_v53 = vpop.permute.xlu1 %7651  ;;  %v12897_v7 = vld [vmem:[%s19997_s1 + $0x348] sm:$0xff] }
 0x4f3   : > { %7719 = vst.msk [vmem:[#allocation2 + $0x171] sm:$0xff] %vm7689_vm6, %v7652_v53  ;;  %v12860_v53 = vld [vmem:[%s19997_s1 + $0x2e8] sm:$0xff] }
 0x4f4   : > { %v7650_v17 = vpop.permute.xlu0 %7649  ;;  %v18745_v35 = vld [vmem:[#allocation2 + $0x138] sm:$0xff]  ;;  %v18747_v38 = vld [vmem:[#allocation2 + $0x140] sm:$0xff] }
 0x4f5   : > { %7718 = vst.msk [vmem:[#allocation2 + $0x169] sm:$0xff] %vm7689_vm6, %v7650_v17  ;;  %15035 = vmatprep.mubr.msk.f32.mxu0 %vm225_vm1, %v18745_v35  ;;  %15088 = vmatprep.mubr.msk.f32.mxu1 %vm225_vm1, %v18745_v35  ;;  %v18984_v16 = vld [vmem:[#allocation2 + $0x139] sm:$0xff] }
 0x4f6   : > { %15036 = vmatmul.mubr.msk.f32.gmra.mxu0 %vm225_vm1, %v18747_v38  ;;  %15089 = vmatmul.mubr.msk.f32.gmra.mxu1 %vm225_vm1, %v18747_v38  ;;  %v7656_v8 = vpop.permute.xlu1 %7655  ;;  %v19001_v55 = vld [vmem:[#allocation2 + $0x159] sm:$0xff] }
 0x4f7   : > { %7721 = vst.msk [vmem:[#allocation2 + $0x189] sm:$0xff] %vm7689_vm6, %v7656_v8  ;;  %v19060_v17 = vld [vmem:[%s19997_s1 + $0x358] sm:$0xf] }
 0x4f8   : > { %v7654_v21 = vpop.permute.xlu0 %7653  ;;  %v18759_v26 = vld [vmem:[#allocation2 + $0x150] sm:$0xff]  ;;  %v18761_v43 = vld [vmem:[#allocation2 + $0x158] sm:$0xff] }
 0x4f9   : > { %7720 = vst.msk [vmem:[#allocation2 + $0x181] sm:$0xff] %vm7689_vm6, %v7654_v21  ;;  %15038 = vmatprep.mubr.msk.f32.mxu0 %vm225_vm1, %v18759_v26  ;;  %15091 = vmatprep.mubr.msk.f32.mxu1 %vm225_vm1, %v18759_v26  ;;  %v8919_v8 = vld [vmem:[#allocation2 + $0x199] sm:$0xff]  ;;  %v10016_v21 = vld [vmem:[#allocation2 + $0x2] sm:$0xff] }
 0x4fa   : > { %15039 = vmatmul.mubr.msk.f32.gmra.mxu0 %vm225_vm1, %v18761_v43  ;;  %15092 = vmatmul.mubr.msk.f32.gmra.mxu1 %vm225_vm1, %v18761_v43  ;;  %v8221_v24 = vld [vmem:[#allocation3 + $0x8] sm:$0xff] }
 0x4fc   : > { %v18772_v15 = vld [vmem:[#allocation2 + $0x168] sm:$0xff]  ;;  %v18774_v59 = vld [vmem:[#allocation2 + $0x170] sm:$0xff] }
 0x4fd   : > { %15041 = vmatprep.mubr.msk.f32.mxu0 %vm225_vm1, %v18772_v15  ;;  %15094 = vmatprep.mubr.msk.f32.mxu1 %vm225_vm1, %v18772_v15 }
 0x4fe   : > { %15042 = vmatmul.mubr.msk.f32.gmra.mxu0 %vm225_vm1, %v18774_v59  ;;  %15095 = vmatmul.mubr.msk.f32.gmra.mxu1 %vm225_vm1, %v18774_v59 }
 0x4ff   : > { %15108 = vmatprep.mubr.msk.f32.mxu0 %vm225_vm1, %v18578_v51  ;;  %v8886_v51 = vld [vmem:[#allocation2 + $0x9] sm:$0xff] }
 0x500   : > { %v18786_v37 = vld [vmem:[#allocation2 + $0x180] sm:$0xff]  ;;  %v18788_v6 = vld [vmem:[#allocation2 + $0x188] sm:$0xff] }
 0x501   : > { %15097 = vmatprep.mubr.msk.f32.mxu1 %vm225_vm1, %v18786_v37 }
 0x502   : > { %15098 = vmatmul.mubr.msk.f32.gmra.mxu1 %vm225_vm1, %v18788_v6  ;;  %15109 = vmatmul.mubr.msk.f32.vlgmr.msra.gmra.mxu0 %vm225_vm1, %v18580_v44  ;;  %v18812_v44 = vld [vmem:[#allocation2 + $0x19] sm:$0xff] }
 0x503   : > { %15213 = vmatpush3.msk.msra.mxu0 %vm548_vm0, %v18553_v30  ;;  %15111 = vmatprep.mubr.msk.f32.mxu0 %vm225_vm1, %v18595_v10  ;;  %v12787_v30 = vld [vmem:[%s19997_s1 + $0x330] sm:$0xff]  ;;  %v18823_v10 = vld [vmem:[#allocation2 + $0x21] sm:$0xff] }
 0x504   : > { %15164 = vmatprep.mubr.msk.f32.mxu1 %vm225_vm1, %v8885_v33  ;;  %15214 = vmatprep.subr.mxu0 %v12750_v32  ;;  %v7797_v33 = vld [vmem:[#allocation3 + $0x10] sm:$0xff] }
 0x505   : > { %15215 = vmatpush3.msra.mxu0 %v12750_v32  ;;  %v8220_v32 = vld [vmem:[#allocation3] sm:$0xff] }
 0x506   : > { %15112 = vmatmul.mubr.msk.f32.gmra.mxu0 %vm225_vm1, %v18597_v36  ;;  %15165 = vmatmul.mubr.msk.f32.vlgmr.msra.gmra.mxu1 %vm225_vm1, %v8886_v51  ;;  %v12748_v36 = vld [vmem:[%s19997_s1 + $0x2c0] sm:$0xff] }
 0x507   : > { %15114 = vmatprep.mubr.msk.f32.mxu0 %vm225_vm1, %v18612_v56  ;;  %15167 = vmatprep.mubr.msk.f32.mxu1 %vm225_vm1, %v18812_v44  ;;  %v18846_v56 = vld [vmem:[%s19997_s1 + $0x298] sm:$0xf] }
 0x508   : > { %15216 = vmatprep.subr.mxu0 %v12749_v12  ;;  %15269 = vmatpush3.msk.msra.mxu1 %vm548_vm0, %v18624_v31  ;;  %v12785_v31 = vld [vmem:[%s19997_s1 + $0x320] sm:$0xff] }
 0x509   : > { %15217 = vmatpush3.msra.mxu0 %v12749_v12  ;;  %15270 = vmatprep.subr.mxu1 %v12787_v30 }
 0x50a   : > { %15115 = vmatmul.mubr.msk.f32.gmra.mxu0 %vm225_vm1, %v18614_v34  ;;  %15168 = vmatmul.mubr.msk.f32.gmra.mxu1 %vm225_vm1, %v18823_v10  ;;  %v18852_v34 = vld [vmem:[#allocation2 + $0x49] sm:$0xff] }
 0x50b   : > { %15117 = vmatprep.mubr.msk.f32.mxu0 %vm225_vm1, %v18631_v29  ;;  %15170 = vmatprep.mubr.msk.f32.mxu1 %vm225_vm1, %v18832_v52  ;;  %v18874_v29 = vld [vmem:[%s19997_s1 + $0x2f8] sm:$0xf] }
 0x50c   : > { %15218 = vmatprep.subr.mxu0 %v12748_v36  ;;  %15271 = vmatpush3.msra.mxu1 %v12787_v30 }
 0x50d   : > { %15219 = vmatpush3.msra.mxu0 %v12748_v36  ;;  %15272 = vmatprep.subr.mxu1 %v12786_v27 }
 0x50e   : > { %15118 = vmatmul.mubr.msk.f32.gmra.mxu0 %vm225_vm1, %v18633_v62  ;;  %15171 = vmatmul.mubr.msk.f32.gmra.mxu1 %vm225_vm1, %v18841_v18  ;;  %v18880_v62 = vld [vmem:[#allocation2 + $0x69] sm:$0xff] }
 0x50f   : > { %15120 = vmatprep.mubr.msk.f32.mxu0 %vm225_vm1, %v18647_v1  ;;  %15173 = vmatprep.mubr.msk.f32.mxu1 %vm225_vm1, %v18852_v34  ;;  %v18900_v1 = vld [vmem:[#allocation2 + $0x91] sm:$0xff] }
 0x510   : > { %15324 = vmatprep.subr.msk.mxu0 %vm548_vm0, %v18846_v56  ;;  %15273 = vmatpush3.msra.mxu1 %v12786_v27  ;;  %v19187_v27 = vld [vmem:[#allocation2 + $0x3a] sm:$0xff] }
 0x511   : > { %15274 = vmatprep.subr.mxu1 %v12785_v31 }
 0x512   : > { %15121 = vmatmul.mubr.msk.f32.gmra.mxu0 %vm225_vm1, %v18649_v45  ;;  %15174 = vmatmul.mubr.msk.f32.gmra.mxu1 %vm225_vm1, %v18863_v61  ;;  %v18906_v45 = vld [vmem:[#allocation2 + $0x99] sm:$0xff] }
 0x513   : > { %15123 = vmatprep.mubr.msk.f32.mxu0 %vm225_vm1, %v18661_v22  ;;  %15176 = vmatprep.mubr.msk.f32.mxu1 %vm225_vm1, %v18869_v47  ;;  %v18924_v22 = vld [vmem:[#allocation2 + $0xc1] sm:$0xff] }
 0x514   : > { %15275 = vmatpush3.msra.mxu1 %v12785_v31  ;;  %v19196_v31 = vld [vmem:[#allocation2 + $0x4a] sm:$0xff] }
 0x515   : > { %15380 = vmatprep.subr.msk.mxu1 %vm548_vm0, %v18874_v29 }
 0x516   : > { %15124 = vmatmul.mubr.msk.f32.gmra.mxu0 %vm225_vm1, %v18663_v49  ;;  %15177 = vmatmul.mubr.msk.f32.gmra.mxu1 %vm225_vm1, %v18880_v62  ;;  %v18930_v49 = vld [vmem:[#allocation2 + $0xc9] sm:$0xff] }
 0x517   : > { %15126 = vmatprep.mubr.msk.f32.mxu0 %vm225_vm1, %v18675_v40  ;;  %15179 = vmatprep.mubr.msk.f32.mxu1 %vm225_vm1, %v18888_v2  ;;  %v18948_v40 = vld [vmem:[#allocation2 + $0xf1] sm:$0xff] }
 0x51a   : > { %15127 = vmatmul.mubr.msk.f32.gmra.mxu0 %vm225_vm1, %v18677_v57  ;;  %15180 = vmatmul.mubr.msk.f32.gmra.mxu1 %vm225_vm1, %v18894_v54  ;;  %v18954_v57 = vld [vmem:[#allocation2 + $0xf9] sm:$0xff] }
 0x51b   : > { %15129 = vmatprep.mubr.msk.f32.mxu0 %vm225_vm1, %v18689_v48  ;;  %15182 = vmatprep.mubr.msk.f32.mxu1 %vm225_vm1, %v18900_v1  ;;  %v18972_v48 = vld [vmem:[#allocation2 + $0x121] sm:$0xff] }
 0x51e   : > { %15130 = vmatmul.mubr.msk.f32.gmra.mxu0 %vm225_vm1, %v18691_v14  ;;  %15183 = vmatmul.mubr.msk.f32.gmra.mxu1 %vm225_vm1, %v18906_v45  ;;  %v18978_v14 = vld [vmem:[#allocation2 + $0x129] sm:$0xff] }
 0x51f   : > { %15132 = vmatprep.mubr.msk.f32.mxu0 %vm225_vm1, %v18703_v63  ;;  %15185 = vmatprep.mubr.msk.f32.mxu1 %vm225_vm1, %v18912_v25  ;;  %v18990_v63 = vld [vmem:[#allocation2 + $0x141] sm:$0xff] }
 0x522   : > { %15133 = vmatmul.mubr.msk.f32.gmra.mxu0 %vm225_vm1, %v18705_v23  ;;  %15186 = vmatmul.mubr.msk.f32.gmra.mxu1 %vm225_vm1, %v18918_v39  ;;  %v18996_v23 = vld [vmem:[#allocation2 + $0x151] sm:$0xff] }
 0x523   : > { %15135 = vmatprep.mubr.msk.f32.mxu0 %vm225_vm1, %v18717_v19  ;;  %15188 = vmatprep.mubr.msk.f32.mxu1 %vm225_vm1, %v18924_v22  ;;  %v19006_v19 = vld [vmem:[#allocation2 + $0x169] sm:$0xff] }
 0x526   : > { %15136 = vmatmul.mubr.msk.f32.gmra.mxu0 %vm225_vm1, %v18719_v28  ;;  %15189 = vmatmul.mubr.msk.f32.gmra.mxu1 %vm225_vm1, %v18930_v49  ;;  %v19012_v28 = vld [vmem:[#allocation2 + $0x171] sm:$0xff] }
 0x527   : > { %15138 = vmatprep.mubr.msk.f32.mxu0 %vm225_vm1, %v18731_v3  ;;  %15191 = vmatprep.mubr.msk.f32.mxu1 %vm225_vm1, %v18936_v46  ;;  %v12861_v3 = vld [vmem:[%s19997_s1 + $0x2f0] sm:$0xff] }
 0x52a   : > { %15139 = vmatmul.mubr.msk.f32.gmra.mxu0 %vm225_vm1, %v18733_v20  ;;  %15192 = vmatmul.mubr.msk.f32.gmra.mxu1 %vm225_vm1, %v18942_v5  ;;  %v12822_v20 = vld [vmem:[%s19997_s1 + $0x280] sm:$0xff] }
 0x52b   : > { %15141 = vmatprep.mubr.msk.f32.mxu0 %vm225_vm1, %v18745_v35  ;;  %15194 = vmatprep.mubr.msk.f32.mxu1 %vm225_vm1, %v18948_v40  ;;  %v12859_v35 = vld [vmem:[%s19997_s1 + $0x2e0] sm:$0xff] }
 0x52e   : > { %15142 = vmatmul.mubr.msk.f32.gmra.mxu0 %vm225_vm1, %v18747_v38  ;;  %15195 = vmatmul.mubr.msk.f32.gmra.mxu1 %vm225_vm1, %v18954_v57  ;;  %v8917_v38 = vld [vmem:[#allocation2 + $0x181] sm:$0xff] }
 0x52f   : > { %15144 = vmatprep.mubr.msk.f32.mxu0 %vm225_vm1, %v18759_v26  ;;  %15197 = vmatprep.mubr.msk.f32.mxu1 %vm225_vm1, %v18960_v13  ;;  %v8918_v26 = vld [vmem:[#allocation2 + $0x189] sm:$0xff] }
 0x532   : > { %15145 = vmatmul.mubr.msk.f32.gmra.mxu0 %vm225_vm1, %v18761_v43  ;;  %15198 = vmatmul.mubr.msk.f32.gmra.mxu1 %vm225_vm1, %v18966_v11  ;;  %v8920_v43 = vld [vmem:[#allocation2 + $0x1a1] sm:$0xff] }
 0x533   : > { %15147 = vmatprep.mubr.msk.f32.mxu0 %vm225_vm1, %v18772_v15  ;;  %15200 = vmatprep.mubr.msk.f32.mxu1 %vm225_vm1, %v18972_v48  ;;  %v12898_v15 = vld [vmem:[%s19997_s1 + $0x350] sm:$0xff] }
 0x536   : > { %15148 = vmatmul.mubr.msk.f32.gmra.mxu0 %vm225_vm1, %v18774_v59  ;;  %15201 = vmatmul.mubr.msk.f32.gmra.mxu1 %vm225_vm1, %v18978_v14  ;;  %v10018_v59 = vld [vmem:[#allocation2 + $0x1a] sm:$0xff] }
 0x537   : > { %15150 = vmatprep.mubr.msk.f32.mxu0 %vm225_vm1, %v18786_v37  ;;  %15203 = vmatprep.mubr.msk.f32.mxu1 %vm225_vm1, %v18984_v16 }
 0x53a   : > { %15151 = vmatmul.mubr.msk.f32.gmra.mxu0 %vm225_vm1, %v18788_v6  ;;  %15204 = vmatmul.mubr.msk.f32.gmra.mxu1 %vm225_vm1, %v18990_v63 }
 0x53b   : > { %15206 = vmatprep.mubr.msk.f32.mxu1 %vm225_vm1, %v18996_v23  ;;  %15153 = vmatprep.mubr.msk.f32.mxu0 %vm225_vm1, %v7788_v41 }
 0x53e   : > { %15154 = vmatmul.mubr.msk.f32.gmra.mxu0 %vm225_vm1, %v7789_v0  ;;  %15207 = vmatmul.mubr.msk.f32.gmra.mxu1 %vm225_vm1, %v19001_v55 }
 0x53f   : > { %15209 = vmatprep.mubr.msk.f32.mxu1 %vm225_vm1, %v19006_v19  ;;  %15220 = vmatprep.mubr.msk.f32.mxu0 %vm225_vm1, %v18812_v44 }
 0x542   : > { %15210 = vmatmul.mubr.msk.f32.gmra.mxu1 %vm225_vm1, %v19012_v28  ;;  %15221 = vmatmul.mubr.msk.f32.vlgmr.msra.gmra.mxu0 %vm225_vm1, %v18823_v10  ;;  %v7800_v10 = vld [vmem:[#allocation3 + $0x28] sm:$0xff] }
 0x543   : > { %15325 = vmatpush3.msk.msra.mxu0 %vm548_vm0, %v18846_v56  ;;  %15223 = vmatprep.mubr.msk.f32.mxu0 %vm225_vm1, %v18832_v52 }
 0x544   : > { %15276 = vmatprep.mubr.msk.f32.mxu1 %vm225_vm1, %v18832_v52  ;;  %15326 = vmatprep.subr.mxu0 %v12824_v9 }
 0x545   : > { %15327 = vmatpush3.msra.mxu0 %v12824_v9 }
 0x546   : > { %15224 = vmatmul.mubr.msk.f32.gmra.mxu0 %vm225_vm1, %v18841_v18  ;;  %15277 = vmatmul.mubr.msk.f32.vlgmr.msra.gmra.mxu1 %vm225_vm1, %v18841_v18  ;;  %v12896_v18 = vld [vmem:[%s19997_s1 + $0x340] sm:$0xff] }
 0x547   : > { %15226 = vmatprep.mubr.msk.f32.mxu0 %vm225_vm1, %v18852_v34  ;;  %15279 = vmatprep.mubr.msk.f32.mxu1 %vm225_vm1, %v18852_v34 }
 0x548   : > { %15328 = vmatprep.subr.mxu0 %v12823_v58  ;;  %15381 = vmatpush3.msk.msra.mxu1 %vm548_vm0, %v18874_v29 }
 0x549   : > { %15329 = vmatpush3.msra.mxu0 %v12823_v58  ;;  %15382 = vmatprep.subr.mxu1 %v12861_v3  ;;  %v7806_v58 = vld [vmem:[#allocation3 + $0x58] sm:$0xff] }
 0x54a   : > { %15227 = vmatmul.mubr.msk.f32.gmra.mxu0 %vm225_vm1, %v18863_v61  ;;  %15280 = vmatmul.mubr.msk.f32.gmra.mxu1 %vm225_vm1, %v18863_v61  ;;  %v7799_v61 = vld [vmem:[#allocation3 + $0x20] sm:$0xff] }
 0x54b   : > { %15229 = vmatprep.mubr.msk.f32.mxu0 %vm225_vm1, %v18869_v47  ;;  %15282 = vmatprep.mubr.msk.f32.mxu1 %vm225_vm1, %v18869_v47 }
 0x54c   : > { %15330 = vmatprep.subr.mxu0 %v12822_v20  ;;  %15383 = vmatpush3.msra.mxu1 %v12861_v3 }
 0x54d   : > { %15331 = vmatpush3.msra.mxu0 %v12822_v20  ;;  %15384 = vmatprep.subr.mxu1 %v12860_v53 }
 0x54e   : > { %15230 = vmatmul.mubr.msk.f32.gmra.mxu0 %vm225_vm1, %v18880_v62  ;;  %15283 = vmatmul.mubr.msk.f32.gmra.mxu1 %vm225_vm1, %v18880_v62 }
 0x54f   : > { %15232 = vmatprep.mubr.msk.f32.mxu0 %vm225_vm1, %v18888_v2  ;;  %15285 = vmatprep.mubr.msk.f32.mxu1 %vm225_vm1, %v18888_v2  ;;  %v7802_v2 = vld [vmem:[#allocation3 + $0x38] sm:$0xff] }
 0x550   : > { %15436 = vmatprep.subr.msk.mxu0 %vm548_vm0, %v19060_v17  ;;  %15385 = vmatpush3.msra.mxu1 %v12860_v53  ;;  %v19235_v53 = vld [vmem:[#allocation2 + $0x82] sm:$0xff] }
 0x551   : > { %15386 = vmatprep.subr.mxu1 %v12859_v35 }
 0x552   : > { %15233 = vmatmul.mubr.msk.f32.gmra.mxu0 %vm225_vm1, %v18894_v54  ;;  %15286 = vmatmul.mubr.msk.f32.gmra.mxu1 %vm225_vm1, %v18894_v54 }
 0x553   : > { %15235 = vmatprep.mubr.msk.f32.mxu0 %vm225_vm1, %v18900_v1  ;;  %15288 = vmatprep.mubr.msk.f32.mxu1 %vm225_vm1, %v18900_v1  ;;  %v19205_v1 = vld [vmem:[#allocation2 + $0x52] sm:$0xff] }
 0x554   : > { %15387 = vmatpush3.msra.mxu1 %v12859_v35 }
 0x556   : > { %15236 = vmatmul.mubr.msk.f32.gmra.mxu0 %vm225_vm1, %v18906_v45  ;;  %15289 = vmatmul.mubr.msk.f32.gmra.mxu1 %vm225_vm1, %v18906_v45 }
 0x557   : > { %15238 = vmatprep.mubr.msk.f32.mxu0 %vm225_vm1, %v18912_v25  ;;  %15291 = vmatprep.mubr.msk.f32.mxu1 %vm225_vm1, %v18912_v25 }
 0x55a   : > { %15239 = vmatmul.mubr.msk.f32.gmra.mxu0 %vm225_vm1, %v18918_v39  ;;  %15292 = vmatmul.mubr.msk.f32.gmra.mxu1 %vm225_vm1, %v18918_v39  ;;  %v19211_v39 = vld [vmem:[#allocation2 + $0x62] sm:$0xff] }
 0x55b   : > { %15241 = vmatprep.mubr.msk.f32.mxu0 %vm225_vm1, %v18924_v22  ;;  %15294 = vmatprep.mubr.msk.f32.mxu1 %vm225_vm1, %v18924_v22  ;;  %v7801_v22 = vld [vmem:[#allocation3 + $0x30] sm:$0xff] }
 0x55e   : > { %15242 = vmatmul.mubr.msk.f32.gmra.mxu0 %vm225_vm1, %v18930_v49  ;;  %15295 = vmatmul.mubr.msk.f32.gmra.mxu1 %vm225_vm1, %v18930_v49 }
 0x55f   : > { %15244 = vmatprep.mubr.msk.f32.mxu0 %vm225_vm1, %v18936_v46  ;;  %15297 = vmatprep.mubr.msk.f32.mxu1 %vm225_vm1, %v18936_v46 }
 0x562   : > { %15245 = vmatmul.mubr.msk.f32.gmra.mxu0 %vm225_vm1, %v18942_v5  ;;  %15298 = vmatmul.mubr.msk.f32.gmra.mxu1 %vm225_vm1, %v18942_v5 }
 0x563   : > { %15247 = vmatprep.mubr.msk.f32.mxu0 %vm225_vm1, %v18948_v40  ;;  %15300 = vmatprep.mubr.msk.f32.mxu1 %vm225_vm1, %v18948_v40 }
 0x566   : > { %15248 = vmatmul.mubr.msk.f32.gmra.mxu0 %vm225_vm1, %v18954_v57  ;;  %15301 = vmatmul.mubr.msk.f32.gmra.mxu1 %vm225_vm1, %v18954_v57  ;;  %v7804_v57 = vld [vmem:[#allocation3 + $0x48] sm:$0xff] }
 0x567   : > { %15250 = vmatprep.mubr.msk.f32.mxu0 %vm225_vm1, %v18960_v13  ;;  %15303 = vmatprep.mubr.msk.f32.mxu1 %vm225_vm1, %v18960_v13 }
 0x56a   : > { %15251 = vmatmul.mubr.msk.f32.gmra.mxu0 %vm225_vm1, %v18966_v11  ;;  %15304 = vmatmul.mubr.msk.f32.gmra.mxu1 %vm225_vm1, %v18966_v11 }
 0x56b   : > { %15253 = vmatprep.mubr.msk.f32.mxu0 %vm225_vm1, %v18972_v48  ;;  %15306 = vmatprep.mubr.msk.f32.mxu1 %vm225_vm1, %v18972_v48  ;;  %v19219_v48 = vld [vmem:[#allocation2 + $0x6a] sm:$0xff] }
 0x56e   : > { %15254 = vmatmul.mubr.msk.f32.gmra.mxu0 %vm225_vm1, %v18978_v14  ;;  %15307 = vmatmul.mubr.msk.f32.gmra.mxu1 %vm225_vm1, %v18978_v14 }
 0x56f   : > { %15256 = vmatprep.mubr.msk.f32.mxu0 %vm225_vm1, %v18984_v16  ;;  %15309 = vmatprep.mubr.msk.f32.mxu1 %vm225_vm1, %v18984_v16 }
 0x572   : > { %15257 = vmatmul.mubr.msk.f32.gmra.mxu0 %vm225_vm1, %v18990_v63  ;;  %15310 = vmatmul.mubr.msk.f32.gmra.mxu1 %vm225_vm1, %v18990_v63  ;;  %v19225_v63 = vld [vmem:[#allocation2 + $0x7a] sm:$0xff] }
 0x573   : > { %15259 = vmatprep.mubr.msk.f32.mxu0 %vm225_vm1, %v18996_v23  ;;  %15312 = vmatprep.mubr.msk.f32.mxu1 %vm225_vm1, %v18996_v23  ;;  %v7803_v23 = vld [vmem:[#allocation3 + $0x40] sm:$0xff] }
 0x576   : > { %15260 = vmatmul.mubr.msk.f32.gmra.mxu0 %vm225_vm1, %v19001_v55  ;;  %15313 = vmatmul.mubr.msk.f32.gmra.mxu1 %vm225_vm1, %v19001_v55 }
 0x577   : > { %15262 = vmatprep.mubr.msk.f32.mxu0 %vm225_vm1, %v19006_v19  ;;  %15315 = vmatprep.mubr.msk.f32.mxu1 %vm225_vm1, %v19006_v19 }
 0x57a   : > { %15263 = vmatmul.mubr.msk.f32.gmra.mxu0 %vm225_vm1, %v19012_v28  ;;  %15316 = vmatmul.mubr.msk.f32.gmra.mxu1 %vm225_vm1, %v19012_v28 }
 0x57b   : > { %15265 = vmatprep.mubr.msk.f32.mxu0 %vm225_vm1, %v8917_v38  ;;  %15318 = vmatprep.mubr.msk.f32.mxu1 %vm225_vm1, %v8917_v38 }
 0x57e   : > { %15266 = vmatmul.mubr.msk.f32.gmra.mxu0 %vm225_vm1, %v8918_v26  ;;  %15319 = vmatmul.mubr.msk.f32.gmra.mxu1 %vm225_vm1, %v8918_v26 }
 0x57f   : > { %15321 = vmatprep.mubr.msk.f32.mxu1 %vm225_vm1, %v8919_v8  ;;  %15332 = vmatprep.mubr.msk.f32.mxu0 %vm225_vm1, %v10016_v21  ;;  %v19241_v8 = vld [vmem:[#allocation2 + $0x92] sm:$0xff]  ;;  %v7805_v21 = vld [vmem:[#allocation3 + $0x50] sm:$0xff] }
 0x582   : > { %15322 = vmatmul.mubr.msk.f32.gmra.mxu1 %vm225_vm1, %v8920_v43  ;;  %15333 = vmatmul.mubr.msk.f32.vlgmr.msra.gmra.mxu0 %vm225_vm1, %v10017_v60 }
 0x583   : > { %15437 = vmatpush3.msk.msra.mxu0 %vm548_vm0, %v19060_v17  ;;  %15335 = vmatprep.mubr.msk.f32.mxu0 %vm225_vm1, %v10018_v59 }
 0x584   : > { %15388 = vmatprep.mubr.msk.f32.mxu1 %vm225_vm1, %v10018_v59  ;;  %15438 = vmatprep.subr.mxu0 %v12898_v15 }
 0x585   : > { %15439 = vmatpush3.msra.mxu0 %v12898_v15 }
 0x586   : > { %v15001_v37 = vpop.f32.mrf.mxu0  ;;  %v15054_v6 = vpop.f32.mrf.mxu1  ;;  %15336 = vmatmul.mubr.msk.f32.gmra.mxu0 %vm225_vm1, %v10019_v42  ;;  %15389 = vmatmul.mubr.msk.f32.vlgmr.msra.gmra.mxu1 %vm225_vm1, %v10019_v42 }
 0x587   : > { %v8154_v51 = vadd.f32 %v15001_v37, %v7798_v4  ;;  %v8487_v12 = vadd.f32 %v15054_v6, %v8221_v24  ;;  %15338 = vmatprep.mubr.msk.f32.mxu0 %vm225_vm1, %v19179_v50  ;;  %15391 = vmatprep.mubr.msk.f32.mxu1 %vm225_vm1, %v19179_v50  ;;  %v7808_v4 = vld [vmem:[#allocation3 + $0x68] sm:$0xff] }
 0x588   : > { %v8002_v44 = vpop.f32.mrf.mxu0  ;;  %v8327_v30 = vpop.f32.mrf.mxu1  ;;  %15440 = vmatprep.subr.mxu0 %v12897_v7 }
 0x589   : > { %8186 = vst.msk [vmem:[#allocation3 + $0x18] sm:$0xff] %vm347_vm4, %v8154_v51  ;;  %8519 = vst.msk [vmem:[#allocation3 + $0x8] sm:$0xff] %vm347_vm4, %v8487_v12  ;;  %v8153_v36 = vadd.f32 %v8002_v44, %v7797_v33  ;;  %v8486_v52 = vadd.f32 %v8327_v30, %v8220_v32  ;;  %15441 = vmatpush3.msra.mxu0 %v12897_v7  ;;  %v19251_v7 = vld [vmem:[#allocation2 + $0x9a] sm:$0xff]  ;;  %v19257_v32 = vld [vmem:[#allocation2 + $0xaa] sm:$0xff] }
 0x58a   : > { %v15004_v56 = vpop.f32.mrf.mxu0  ;;  %v15057_v34 = vpop.f32.mrf.mxu1  ;;  %15339 = vmatmul.mubr.msk.f32.gmra.mxu0 %vm225_vm1, %v19187_v27  ;;  %15392 = vmatmul.mubr.msk.f32.gmra.mxu1 %vm225_vm1, %v19187_v27  ;;  %v7807_v51 = vld [vmem:[#allocation3 + $0x60] sm:$0xff] }
 0x58b   : > { %8185 = vst.msk [vmem:[#allocation3 + $0x10] sm:$0xff] %vm347_vm4, %v8153_v36  ;;  %8518 = vst.msk [vmem:[#allocation3] sm:$0xff] %vm347_vm4, %v8486_v52  ;;  %v8156_v47 = vadd.f32 %v15004_v56, %v7800_v10  ;;  %15341 = vmatprep.mubr.msk.f32.mxu0 %vm225_vm1, %v19196_v31  ;;  %15394 = vmatprep.mubr.msk.f32.mxu1 %vm225_vm1, %v19196_v31  ;;  %v7810_v52 = vld [vmem:[#allocation3 + $0x78] sm:$0xff] }
 0x58c   : > { %v8012_v29 = vpop.f32.mrf.mxu0  ;;  %v8337_v62 = vpop.f32.mrf.mxu1  ;;  %15442 = vmatprep.subr.mxu0 %v12896_v18 }
 0x58d   : > { %8188 = vst.msk [vmem:[#allocation3 + $0x28] sm:$0xff] %vm347_vm4, %v8156_v47  ;;  %v8155_v54 = vadd.f32 %v8012_v29, %v7799_v61  ;;  %15443 = vmatpush3.msra.mxu0 %v12896_v18 }
 0x58e   : > { %v15007_v45 = vpop.f32.mrf.mxu0  ;;  %v15060_v25 = vpop.f32.mrf.mxu1  ;;  %15342 = vmatmul.mubr.msk.f32.gmra.mxu0 %vm225_vm1, %v19205_v1  ;;  %15395 = vmatmul.mubr.msk.f32.gmra.mxu1 %vm225_vm1, %v19205_v1 }
 0x58f   : > { %8187 = vst.msk [vmem:[#allocation3 + $0x20] sm:$0xff] %vm347_vm4, %v8155_v54  ;;  %v8158_v49 = vadd.f32 %v15007_v45, %v7802_v2  ;;  %15344 = vmatprep.mubr.msk.f32.mxu0 %vm225_vm1, %v19211_v39  ;;  %15397 = vmatprep.mubr.msk.f32.mxu1 %vm225_vm1, %v19211_v39  ;;  %v7809_v2 = vld [vmem:[#allocation3 + $0x70] sm:$0xff] }
 0x590   : > { %v8223_v46 = vld [vmem:[#allocation3 + $0x18] sm:$0xff]  ;;  %v8022_v5 = vpop.f32.mrf.mxu0  ;;  %v8347_v40 = vpop.f32.mrf.mxu1 }
 0x591   : > { %v8489_v13 = vadd.f32 %v15057_v34, %v8223_v46  ;;  %8190 = vst.msk [vmem:[#allocation3 + $0x38] sm:$0xff] %vm347_vm4, %v8158_v49  ;;  %v8157_v11 = vadd.f32 %v8022_v5, %v7801_v22  ;;  %v19267_v34 = vld [vmem:[#allocation2 + $0xb2] sm:$0xff] }
 0x592   : > { %v8222_v14 = vld [vmem:[#allocation3 + $0x10] sm:$0xff]  ;;  %v15010_v16 = vpop.f32.mrf.mxu0  ;;  %v15063_v41 = vpop.f32.mrf.mxu1  ;;  %15345 = vmatmul.mubr.msk.f32.gmra.mxu0 %vm225_vm1, %v19219_v48  ;;  %15398 = vmatmul.mubr.msk.f32.gmra.mxu1 %vm225_vm1, %v19219_v48  ;;  %v7812_v46 = vld [vmem:[#allocation3 + $0x88] sm:$0xff] }
 0x593   : > { %8521 = vst.msk [vmem:[#allocation3 + $0x18] sm:$0xff] %vm347_vm4, %v8489_v13  ;;  %v8488_v0 = vadd.f32 %v8337_v62, %v8222_v14  ;;  %8189 = vst.msk [vmem:[#allocation3 + $0x30] sm:$0xff] %vm347_vm4, %v8157_v11  ;;  %v8160_v55 = vadd.f32 %v15010_v16, %v7804_v57  ;;  %15347 = vmatprep.mubr.msk.f32.mxu0 %vm225_vm1, %v19225_v63  ;;  %15400 = vmatprep.mubr.msk.f32.mxu1 %vm225_vm1, %v19225_v63  ;;  %v19273_v62 = vld [vmem:[#allocation2 + $0xc2] sm:$0xff]  ;;  %v19283_v57 = vld [vmem:[#allocation2 + $0xca] sm:$0xff] }
 0x594   : > { %v8225_v19 = vld [vmem:[#allocation3 + $0x28] sm:$0xff]  ;;  %v8032_v28 = vpop.f32.mrf.mxu0  ;;  %v8357_v9 = vpop.f32.mrf.mxu1 }
 0x595   : > { %8520 = vst.msk [vmem:[#allocation3 + $0x10] sm:$0xff] %vm347_vm4, %v8488_v0  ;;  %v8491_v3 = vadd.f32 %v15060_v25, %v8225_v19  ;;  %8192 = vst.msk [vmem:[#allocation3 + $0x48] sm:$0xff] %vm347_vm4, %v8160_v55  ;;  %v8159_v20 = vadd.f32 %v8032_v28, %v7803_v23  ;;  %v19289_v16 = vld [vmem:[#allocation2 + $0xda] sm:$0xff] }
 0x596   : > { %v8224_v17 = vld [vmem:[#allocation3 + $0x20] sm:$0xff]  ;;  %v15013_v35 = vpop.f32.mrf.mxu0  ;;  %v15066_v38 = vpop.f32.mrf.mxu1  ;;  %15348 = vmatmul.mubr.msk.f32.gmra.mxu0 %vm225_vm1, %v19235_v53  ;;  %15401 = vmatmul.mubr.msk.f32.gmra.mxu1 %vm225_vm1, %v19235_v53 }
 0x597   : > { %8523 = vst.msk [vmem:[#allocation3 + $0x28] sm:$0xff] %vm347_vm4, %v8491_v3  ;;  %v8490_v26 = vadd.f32 %v8347_v40, %v8224_v17  ;;  %8191 = vst.msk [vmem:[#allocation3 + $0x40] sm:$0xff] %vm347_vm4, %v8159_v20  ;;  %v8162_v43 = vadd.f32 %v15013_v35, %v7806_v58  ;;  %15350 = vmatprep.mubr.msk.f32.mxu0 %vm225_vm1, %v19241_v8  ;;  %15403 = vmatprep.mubr.msk.f32.mxu1 %vm225_vm1, %v19241_v8  ;;  %v19299_v20 = vld [vmem:[#allocation2 + $0xe2] sm:$0xff] }
 0x598   : > { %v8227_v60 = vld [vmem:[#allocation3 + $0x38] sm:$0xff]  ;;  %v8042_v15 = vpop.f32.mrf.mxu0  ;;  %v8367_v59 = vpop.f32.mrf.mxu1 }
 0x599   : > { %8522 = vst.msk [vmem:[#allocation3 + $0x20] sm:$0xff] %vm347_vm4, %v8490_v26  ;;  %v8493_v24 = vadd.f32 %v15063_v41, %v8227_v60  ;;  %8194 = vst.msk [vmem:[#allocation3 + $0x58] sm:$0xff] %vm347_vm4, %v8162_v43  ;;  %v8161_v42 = vadd.f32 %v8042_v15, %v7805_v21  ;;  %v7811_v41 = vld [vmem:[#allocation3 + $0x80] sm:$0xff]  ;;  %v7813_v26 = vld [vmem:[#allocation3 + $0x90] sm:$0xff] }
 0x59a   : > { %v8226_v37 = vld [vmem:[#allocation3 + $0x30] sm:$0xff]  ;;  %v15016_v6 = vpop.f32.mrf.mxu0  ;;  %v15069_v33 = vpop.f32.mrf.mxu1  ;;  %15351 = vmatmul.mubr.msk.f32.gmra.mxu0 %vm225_vm1, %v19251_v7  ;;  %15404 = vmatmul.mubr.msk.f32.gmra.mxu1 %vm225_vm1, %v19251_v7  ;;  %v19305_v21 = vld [vmem:[#allocation2 + $0xf2] sm:$0xff] }
 0x59b   : > { %8525 = vst.msk [vmem:[#allocation3 + $0x38] sm:$0xff] %vm347_vm4, %v8493_v24  ;;  %v8492_v12 = vadd.f32 %v8357_v9, %v8226_v37  ;;  %8193 = vst.msk [vmem:[#allocation3 + $0x50] sm:$0xff] %vm347_vm4, %v8161_v42  ;;  %v8164_v44 = vadd.f32 %v15016_v6, %v7808_v4  ;;  %15353 = vmatprep.mubr.msk.f32.mxu0 %vm225_vm1, %v19257_v32  ;;  %15406 = vmatprep.mubr.msk.f32.mxu1 %vm225_vm1, %v19257_v32  ;;  %v7814_v9 = vld [vmem:[#allocation3 + $0x98] sm:$0xff]  ;;  %v7816_v24 = vld [vmem:[#allocation3 + $0xa8] sm:$0xff] }
 0x59c   : > { %v8229_v30 = vld [vmem:[#allocation3 + $0x48] sm:$0xff]  ;;  %v8052_v10 = vpop.f32.mrf.mxu0  ;;  %v8377_v36 = vpop.f32.mrf.mxu1 }
 0x59d   : > { %8524 = vst.msk [vmem:[#allocation3 + $0x30] sm:$0xff] %vm347_vm4, %v8492_v12  ;;  %v8495_v18 = vadd.f32 %v15066_v38, %v8229_v30  ;;  %8196 = vst.msk [vmem:[#allocation3 + $0x68] sm:$0xff] %vm347_vm4, %v8164_v44  ;;  %v8163_v56 = vadd.f32 %v8052_v10, %v7807_v51  ;;  %v19315_v6 = vld [vmem:[#allocation2 + $0xfa] sm:$0xff]  ;;  %v19321_v44 = vld [vmem:[#allocation2 + $0x10a] sm:$0xff] }
 0x59e   : > { %v8228_v61 = vld [vmem:[#allocation3 + $0x40] sm:$0xff]  ;;  %v15019_v47 = vpop.f32.mrf.mxu0  ;;  %v15072_v29 = vpop.f32.mrf.mxu1  ;;  %15354 = vmatmul.mubr.msk.f32.gmra.mxu0 %vm225_vm1, %v19267_v34  ;;  %15407 = vmatmul.mubr.msk.f32.gmra.mxu1 %vm225_vm1, %v19267_v34 }
 0x59f   : > { %8527 = vst.msk [vmem:[#allocation3 + $0x48] sm:$0xff] %vm347_vm4, %v8495_v18  ;;  %v8494_v54 = vadd.f32 %v8367_v59, %v8228_v61  ;;  %8195 = vst.msk [vmem:[#allocation3 + $0x60] sm:$0xff] %vm347_vm4, %v8163_v56  ;;  %v8166_v45 = vadd.f32 %v15019_v47, %v7810_v52  ;;  %15356 = vmatprep.mubr.msk.f32.mxu0 %vm225_vm1, %v19273_v62  ;;  %15409 = vmatprep.mubr.msk.f32.mxu1 %vm225_vm1, %v19273_v62  ;;  %v7815_v30 = vld [vmem:[#allocation3 + $0xa0] sm:$0xff]  ;;  %v7818_v61 = vld [vmem:[#allocation3 + $0xb8] sm:$0xff] }
 0x5a0   : > { %v8231_v25 = vld [vmem:[#allocation3 + $0x58] sm:$0xff]  ;;  %v8062_v22 = vpop.f32.mrf.mxu0  ;;  %v8387_v49 = vpop.f32.mrf.mxu1 }
 0x5a1   : > { %8526 = vst.msk [vmem:[#allocation3 + $0x40] sm:$0xff] %vm347_vm4, %v8494_v54  ;;  %v8497_v5 = vadd.f32 %v15069_v33, %v8231_v25  ;;  %8198 = vst.msk [vmem:[#allocation3 + $0x78] sm:$0xff] %vm347_vm4, %v8166_v45  ;;  %v8165_v40 = vadd.f32 %v8062_v22, %v7809_v2  ;;  %v19331_v2 = vld [vmem:[#allocation2 + $0x112] sm:$0xff]  ;;  %v19337_v22 = vld [vmem:[#allocation2 + $0x122] sm:$0xff] }
 0x5a2   : > { %v8230_v13 = vld [vmem:[#allocation3 + $0x50] sm:$0xff]  ;;  %v15022_v11 = vpop.f32.mrf.mxu0  ;;  %v15075_v14 = vpop.f32.mrf.mxu1  ;;  %15357 = vmatmul.mubr.msk.f32.gmra.mxu0 %vm225_vm1, %v19283_v57  ;;  %15410 = vmatmul.mubr.msk.f32.gmra.mxu1 %vm225_vm1, %v19283_v57 }
 0x5a3   : > { %8529 = vst.msk [vmem:[#allocation3 + $0x58] sm:$0xff] %vm347_vm4, %v8497_v5  ;;  %v8496_v23 = vadd.f32 %v8377_v36, %v8230_v13  ;;  %8197 = vst.msk [vmem:[#allocation3 + $0x70] sm:$0xff] %vm347_vm4, %v8165_v40  ;;  %v8168_v0 = vadd.f32 %v15022_v11, %v7812_v46  ;;  %15359 = vmatprep.mubr.msk.f32.mxu0 %vm225_vm1, %v19289_v16  ;;  %15412 = vmatprep.mubr.msk.f32.mxu1 %vm225_vm1, %v19289_v16 }
 0x5a4   : > { %v8233_v55 = vld [vmem:[#allocation3 + $0x68] sm:$0xff]  ;;  %v8072_v19 = vpop.f32.mrf.mxu0  ;;  %v8397_v28 = vpop.f32.mrf.mxu1 }
 0x5a5   : > { %8528 = vst.msk [vmem:[#allocation3 + $0x50] sm:$0xff] %vm347_vm4, %v8496_v23  ;;  %v8499_v58 = vadd.f32 %v15072_v29, %v8233_v55  ;;  %8200 = vst.msk [vmem:[#allocation3 + $0x88] sm:$0xff] %vm347_vm4, %v8168_v0  ;;  %v8167_v3 = vadd.f32 %v8072_v19, %v7811_v41  ;;  %v19347_v0 = vld [vmem:[#allocation2 + $0x12a] sm:$0xff] }
 0x5a6   : > { %v8232_v17 = vld [vmem:[#allocation3 + $0x60] sm:$0xff]  ;;  %v15025_v35 = vpop.f32.mrf.mxu0  ;;  %v15078_v38 = vpop.f32.mrf.mxu1  ;;  %15360 = vmatmul.mubr.msk.f32.gmra.mxu0 %vm225_vm1, %v19299_v20  ;;  %15413 = vmatmul.mubr.msk.f32.gmra.mxu1 %vm225_vm1, %v19299_v20 }
 0x5a7   : > { %8531 = vst.msk [vmem:[#allocation3 + $0x68] sm:$0xff] %vm347_vm4, %v8499_v58  ;;  %v8498_v43 = vadd.f32 %v8387_v49, %v8232_v17  ;;  %8199 = vst.msk [vmem:[#allocation3 + $0x80] sm:$0xff] %vm347_vm4, %v8167_v3  ;;  %v8170_v60 = vadd.f32 %v15025_v35, %v7814_v9  ;;  %15362 = vmatprep.mubr.msk.f32.mxu0 %vm225_vm1, %v19305_v21  ;;  %15415 = vmatprep.mubr.msk.f32.mxu1 %vm225_vm1, %v19305_v21  ;;  %v7817_v49 = vld [vmem:[#allocation3 + $0xb0] sm:$0xff]  ;;  %v7819_v58 = vld [vmem:[#allocation3 + $0xc0] sm:$0xff] }
 0x5a8   : > { %v8235_v15 = vld [vmem:[#allocation3 + $0x78] sm:$0xff]  ;;  %v8082_v59 = vpop.f32.mrf.mxu0  ;;  %v8407_v4 = vpop.f32.mrf.mxu1  ;;  %v19353_v9 = vld [vmem:[#allocation2 + $0x13a] sm:$0xff] }
 0x5a9   : > { %8530 = vst.msk [vmem:[#allocation3 + $0x60] sm:$0xff] %vm347_vm4, %v8498_v43  ;;  %v8501_v42 = vadd.f32 %v15075_v14, %v8235_v15  ;;  %8202 = vst.msk [vmem:[#allocation3 + $0x98] sm:$0xff] %vm347_vm4, %v8170_v60  ;;  %v8169_v37 = vadd.f32 %v8082_v59, %v7813_v26  ;;  %v7820_v14 = vld [vmem:[#allocation3 + $0xc8] sm:$0xff]  ;;  %v7822_v43 = vld [vmem:[#allocation3 + $0xd8] sm:$0xff] }
 0x5aa   : > { %v8234_v33 = vld [vmem:[#allocation3 + $0x70] sm:$0xff]  ;;  %v15028_v51 = vpop.f32.mrf.mxu0  ;;  %v15081_v12 = vpop.f32.mrf.mxu1  ;;  %15363 = vmatmul.mubr.msk.f32.gmra.mxu0 %vm225_vm1, %v19315_v6  ;;  %15416 = vmatmul.mubr.msk.f32.gmra.mxu1 %vm225_vm1, %v19315_v6 }
 0x5ab   : > { %8533 = vst.msk [vmem:[#allocation3 + $0x78] sm:$0xff] %vm347_vm4, %v8501_v42  ;;  %v8500_v10 = vadd.f32 %v8397_v28, %v8234_v33  ;;  %8201 = vst.msk [vmem:[#allocation3 + $0x90] sm:$0xff] %vm347_vm4, %v8169_v37  ;;  %v8172_v36 = vadd.f32 %v15028_v51, %v7816_v24  ;;  %15365 = vmatprep.mubr.msk.f32.mxu0 %vm225_vm1, %v19321_v44  ;;  %15418 = vmatprep.mubr.msk.f32.mxu1 %vm225_vm1, %v19321_v44  ;;  %v19363_v59 = vld [vmem:[#allocation2 + $0x142] sm:$0xff]  ;;  %v19369_v37 = vld [vmem:[#allocation2 + $0x152] sm:$0xff] }
 0x5ac   : > { %v8237_v52 = vld [vmem:[#allocation3 + $0x88] sm:$0xff]  ;;  %v8092_v18 = vpop.f32.mrf.mxu0  ;;  %v8417_v56 = vpop.f32.mrf.mxu1  ;;  %v7821_v33 = vld [vmem:[#allocation3 + $0xd0] sm:$0xff] }
 0x5ad   : > { %8532 = vst.msk [vmem:[#allocation3 + $0x70] sm:$0xff] %vm347_vm4, %v8500_v10  ;;  %v8503_v47 = vadd.f32 %v15078_v38, %v8237_v52  ;;  %8204 = vst.msk [vmem:[#allocation3 + $0xa8] sm:$0xff] %vm347_vm4, %v8172_v36  ;;  %v8171_v29 = vadd.f32 %v8092_v18, %v7815_v30  ;;  %v7824_v52 = vld [vmem:[#allocation3 + $0xe8] sm:$0xff] }
 0x5ae   : > { %v8236_v54 = vld [vmem:[#allocation3 + $0x80] sm:$0xff]  ;;  %v15031_v45 = vpop.f32.mrf.mxu0  ;;  %v15084_v25 = vpop.f32.mrf.mxu1  ;;  %15366 = vmatmul.mubr.msk.f32.gmra.mxu0 %vm225_vm1, %v19331_v2  ;;  %15419 = vmatmul.mubr.msk.f32.gmra.mxu1 %vm225_vm1, %v19331_v2 }
 0x5af   : > { %8535 = vst.msk [vmem:[#allocation3 + $0x88] sm:$0xff] %vm347_vm4, %v8503_v47  ;;  %v8502_v46 = vadd.f32 %v8407_v4, %v8236_v54  ;;  %8203 = vst.msk [vmem:[#allocation3 + $0xa0] sm:$0xff] %vm347_vm4, %v8171_v29  ;;  %v8174_v5 = vadd.f32 %v15031_v45, %v7818_v61  ;;  %15368 = vmatprep.mubr.msk.f32.mxu0 %vm225_vm1, %v19337_v22  ;;  %15421 = vmatprep.mubr.msk.f32.mxu1 %vm225_vm1, %v19337_v22  ;;  %v19379_v61 = vld [vmem:[#allocation2 + $0x15a] sm:$0xff]  ;;  %v19385_v45 = vld [vmem:[#allocation2 + $0x16a] sm:$0xff] }
 0x5b0   : > { %v8239_v40 = vld [vmem:[#allocation3 + $0x98] sm:$0xff]  ;;  %v8102_v13 = vpop.f32.mrf.mxu0  ;;  %v8427_v11 = vpop.f32.mrf.mxu1 }
 0x5b1   : > { %8534 = vst.msk [vmem:[#allocation3 + $0x80] sm:$0xff] %vm347_vm4, %v8502_v46  ;;  %v8505_v41 = vadd.f32 %v15081_v12, %v8239_v40  ;;  %8206 = vst.msk [vmem:[#allocation3 + $0xb8] sm:$0xff] %vm347_vm4, %v8174_v5  ;;  %v8173_v23 = vadd.f32 %v8102_v13, %v7817_v49 }
 0x5b2   : > { %v8238_v55 = vld [vmem:[#allocation3 + $0x90] sm:$0xff]  ;;  %v15034_v19 = vpop.f32.mrf.mxu0  ;;  %v15087_v28 = vpop.f32.mrf.mxu1  ;;  %15369 = vmatmul.mubr.msk.f32.gmra.mxu0 %vm225_vm1, %v19347_v0  ;;  %15422 = vmatmul.mubr.msk.f32.gmra.mxu1 %vm225_vm1, %v19347_v0 }
 0x5b3   : > { %8537 = vst.msk [vmem:[#allocation3 + $0x98] sm:$0xff] %vm347_vm4, %v8505_v41  ;;  %v8504_v3 = vadd.f32 %v8417_v56, %v8238_v55  ;;  %8205 = vst.msk [vmem:[#allocation3 + $0xb0] sm:$0xff] %vm347_vm4, %v8173_v23  ;;  %v8176_v17 = vadd.f32 %v15034_v19, %v7820_v14  ;;  %15371 = vmatprep.mubr.msk.f32.mxu0 %vm225_vm1, %v19353_v9  ;;  %15424 = vmatprep.mubr.msk.f32.mxu1 %vm225_vm1, %v19353_v9  ;;  %v19395_v23 = vld [vmem:[#allocation2 + $0x172] sm:$0xff] }
 0x5b4   : > { %v8241_v35 = vld [vmem:[#allocation3 + $0xa8] sm:$0xff]  ;;  %v8112_v38 = vpop.f32.mrf.mxu0  ;;  %v8437_v26 = vpop.f32.mrf.mxu1 }
 0x5b5   : > { %8536 = vst.msk [vmem:[#allocation3 + $0x90] sm:$0xff] %vm347_vm4, %v8504_v3  ;;  %v8507_v60 = vadd.f32 %v15084_v25, %v8241_v35  ;;  %8208 = vst.msk [vmem:[#allocation3 + $0xc8] sm:$0xff] %vm347_vm4, %v8176_v17  ;;  %v8175_v15 = vadd.f32 %v8112_v38, %v7819_v58  ;;  %v7823_v25 = vld [vmem:[#allocation3 + $0xe0] sm:$0xff]  ;;  %v19401_v58 = vld [vmem:[#allocation2 + $0x182] sm:$0xff] }
 0x5b6   : > { %v8240_v4 = vld [vmem:[#allocation3 + $0xa0] sm:$0xff]  ;;  %v15037_v24 = vpop.f32.mrf.mxu0  ;;  %v15090_v42 = vpop.f32.mrf.mxu1  ;;  %15372 = vmatmul.mubr.msk.f32.gmra.mxu0 %vm225_vm1, %v19363_v59  ;;  %15425 = vmatmul.mubr.msk.f32.gmra.mxu1 %vm225_vm1, %v19363_v59  ;;  %v7825_v3 = vld [vmem:[#allocation3 + $0xf0] sm:$0xff] }
 0x5b7   : > { %8539 = vst.msk [vmem:[#allocation3 + $0xa8] sm:$0xff] %vm347_vm4, %v8507_v60  ;;  %v8506_v51 = vadd.f32 %v8427_v11, %v8240_v4  ;;  %8207 = vst.msk [vmem:[#allocation3 + $0xc0] sm:$0xff] %vm347_vm4, %v8175_v15  ;;  %v8178_v12 = vadd.f32 %v15037_v24, %v7822_v43  ;;  %15374 = vmatprep.mubr.msk.f32.mxu0 %vm225_vm1, %v19369_v37  ;;  %15427 = vmatprep.mubr.msk.f32.mxu1 %vm225_vm1, %v19369_v37  ;;  %v7826_v11 = vld [vmem:[#allocation3 + $0xf8] sm:$0xff] }
 0x5b8   : > { %v8243_v30 = vld [vmem:[#allocation3 + $0xb8] sm:$0xff]  ;;  %v8122_v10 = vpop.f32.mrf.mxu0  ;;  %v8447_v36 = vpop.f32.mrf.mxu1 }
 0x5b9   : > { %8538 = vst.msk [vmem:[#allocation3 + $0xa0] sm:$0xff] %vm347_vm4, %v8506_v51  ;;  %v8509_v18 = vadd.f32 %v15087_v28, %v8243_v30  ;;  %8210 = vst.msk [vmem:[#allocation3 + $0xd8] sm:$0xff] %vm347_vm4, %v8178_v12  ;;  %v8177_v56 = vadd.f32 %v8122_v10, %v7821_v33  ;;  %v19411_v4 = vld [vmem:[#allocation2 + $0x18a] sm:$0xff]  ;;  %v8556_v33 = vld [vmem:[#allocation3 + $0x8] sm:$0xff] }
 0x5ba   : > { %v8242_v47 = vld [vmem:[#allocation3 + $0xb0] sm:$0xff]  ;;  %v15040_v29 = vpop.f32.mrf.mxu0  ;;  %v15093_v54 = vpop.f32.mrf.mxu1  ;;  %15375 = vmatmul.mubr.msk.f32.gmra.mxu0 %vm225_vm1, %v19379_v61  ;;  %15428 = vmatmul.mubr.msk.f32.gmra.mxu1 %vm225_vm1, %v19379_v61 }
 0x5bb   : > { %8541 = vst.msk [vmem:[#allocation3 + $0xb8] sm:$0xff] %vm347_vm4, %v8509_v18  ;;  %v8508_v49 = vadd.f32 %v8437_v26, %v8242_v47  ;;  %8209 = vst.msk [vmem:[#allocation3 + $0xd0] sm:$0xff] %vm347_vm4, %v8177_v56  ;;  %v8180_v46 = vadd.f32 %v15040_v29, %v7824_v52  ;;  %15377 = vmatprep.mubr.msk.f32.mxu0 %vm225_vm1, %v19385_v45  ;;  %15430 = vmatprep.mubr.msk.f32.mxu1 %vm225_vm1, %v19385_v45  ;;  %v8558_v47 = vld [vmem:[#allocation3 + $0x18] sm:$0xff] }
 0x5bc   : > { %v8245_v5 = vld [vmem:[#allocation3 + $0xc8] sm:$0xff]  ;;  %v8132_v40 = vpop.f32.mrf.mxu0  ;;  %v8457_v13 = vpop.f32.mrf.mxu1 }
 0x5bd   : > { %8540 = vst.msk [vmem:[#allocation3 + $0xb0] sm:$0xff] %vm347_vm4, %v8508_v49  ;;  %v8511_v14 = vadd.f32 %v15090_v42, %v8245_v5  ;;  %8212 = vst.msk [vmem:[#allocation3 + $0xe8] sm:$0xff] %vm347_vm4, %v8180_v46  ;;  %v8179_v41 = vadd.f32 %v8132_v40, %v7823_v25  ;;  %v8557_v46 = vld [vmem:[#allocation3 + $0x10] sm:$0xff] }
 0x5be   : > { %v8244_v55 = vld [vmem:[#allocation3 + $0xc0] sm:$0xff]  ;;  %v15043_v19 = vpop.f32.mrf.mxu0  ;;  %v15096_v28 = vpop.f32.mrf.mxu1  ;;  %15378 = vmatmul.mubr.msk.f32.gmra.mxu0 %vm225_vm1, %v19395_v23  ;;  %15431 = vmatmul.mubr.msk.f32.gmra.mxu1 %vm225_vm1, %v19395_v23 }
 0x5bf   : > { %8543 = vst.msk [vmem:[#allocation3 + $0xc8] sm:$0xff] %vm347_vm4, %v8511_v14  ;;  %v8510_v17 = vadd.f32 %v8447_v36, %v8244_v55  ;;  %8211 = vst.msk [vmem:[#allocation3 + $0xe0] sm:$0xff] %vm347_vm4, %v8179_v41  ;;  %v8182_v35 = vadd.f32 %v15043_v19, %v7826_v11  ;;  %15433 = vmatprep.mubr.msk.f32.mxu1 %vm225_vm1, %v19401_v58  ;;  %15444 = vmatprep.mubr.msk.f32.mxu0 %vm225_vm1, %v19179_v50  ;;  %v8555_v36 = vld [vmem:[#allocation3] sm:$0xff]  ;;  %v8560_v14 = vld [vmem:[#allocation3 + $0x28] sm:$0xff] }
 0x5c0   : > { %v8247_v38 = vld [vmem:[#allocation3 + $0xd8] sm:$0xff]  ;;  %v8142_v26 = vpop.f32.mrf.mxu0  ;;  %v8467_v43 = vpop.f32.mrf.mxu1 }
 0x5c1   : > { %8542 = vst.msk [vmem:[#allocation3 + $0xc0] sm:$0xff] %vm347_vm4, %v8510_v17  ;;  %v8513_v60 = vadd.f32 %v15093_v54, %v8247_v38  ;;  %8214 = vst.msk [vmem:[#allocation3 + $0xf8] sm:$0xff] %vm347_vm4, %v8182_v35  ;;  %v8181_v15 = vadd.f32 %v8142_v26, %v7825_v3  ;;  %v8559_v3 = vld [vmem:[#allocation3 + $0x20] sm:$0xff] }
 0x5c2   : > { %v8246_v24 = vld [vmem:[#allocation3 + $0xd0] sm:$0xff]  ;;  %v15099_v42 = vpop.f32.mrf.mxu1  ;;  %v15110_v51 = vpop.f32.mrf.mxu0  ;;  %15434 = vmatmul.mubr.msk.f32.gmra.mxu1 %vm225_vm1, %v19411_v4  ;;  %15445 = vmatmul.mubr.msk.f32.vlgmr.msra.gmra.mxu0 %vm225_vm1, %v19187_v27 }
 0x5c3   : > { %8545 = vst.msk [vmem:[#allocation3 + $0xd8] sm:$0xff] %vm347_vm4, %v8513_v60  ;;  %v8512_v50 = vadd.f32 %v8457_v13, %v8246_v24  ;;  %8213 = vst.msk [vmem:[#allocation3 + $0xf0] sm:$0xff] %vm347_vm4, %v8181_v15  ;;  %v8822_v12 = vadd.f32 %v15110_v51, %v8556_v33  ;;  %15447 = vmatprep.mubr.msk.f32.mxu0 %vm225_vm1, %v19196_v31  ;;  %v8561_v33 = vld [vmem:[#allocation3 + $0x30] sm:$0xff] }
 0x5c4   : > { %v8249_v30 = vld [vmem:[#allocation3 + $0xe8] sm:$0xff]  ;;  %v8477_v10 = vpop.f32.mrf.mxu1  ;;  %v8662_v52 = vpop.f32.mrf.mxu0 }
 0x5c5   : > { %8544 = vst.msk [vmem:[#allocation3 + $0xd0] sm:$0xff] %vm347_vm4, %v8512_v50  ;;  %v8515_v18 = vadd.f32 %v15096_v28, %v8249_v30  ;;  %8854 = vst.msk [vmem:[#allocation3 + $0x8] sm:$0xff] %vm347_vm4, %v8822_v12  ;;  %v8821_v56 = vadd.f32 %v8662_v52, %v8555_v36 }
 0x5c6   : > { %v8248_v27 = vld [vmem:[#allocation3 + $0xe0] sm:$0xff]  ;;  %v15113_v29 = vpop.f32.mrf.mxu0  ;;  %v15166_v54 = vpop.f32.mrf.mxu1  ;;  %15448 = vmatmul.mubr.msk.f32.gmra.mxu0 %vm225_vm1, %v19205_v1 }
 0x5c7   : > { %8547 = vst.msk [vmem:[#allocation3 + $0xe8] sm:$0xff] %vm347_vm4, %v8515_v18  ;;  %v8514_v31 = vadd.f32 %v8467_v43, %v8248_v27  ;;  %8853 = vst.msk [vmem:[#allocation3] sm:$0xff] %vm347_vm4, %v8821_v56  ;;  %v8824_v25 = vadd.f32 %v15113_v29, %v8558_v47  ;;  %15450 = vmatprep.mubr.msk.f32.mxu0 %vm225_vm1, %v19211_v39  ;;  %v8562_v43 = vld [vmem:[#allocation3 + $0x38] sm:$0xff]  ;;  %v8563_v27 = vld [vmem:[#allocation3 + $0x40] sm:$0xff] }
 0x5c8   : > { %v8251_v49 = vld [vmem:[#allocation3 + $0xf8] sm:$0xff]  ;;  %v8672_v5 = vpop.f32.mrf.mxu0  ;;  %v9123_v40 = vpop.f32.mrf.mxu1 }
 0x5c9   : > { %8546 = vst.msk [vmem:[#allocation3 + $0xe0] sm:$0xff] %vm347_vm4, %v8514_v31  ;;  %v8517_v13 = vadd.f32 %v15099_v42, %v8251_v49  ;;  %8856 = vst.msk [vmem:[#allocation3 + $0x18] sm:$0xff] %vm347_vm4, %v8824_v25  ;;  %v8823_v11 = vadd.f32 %v8672_v5, %v8557_v46  ;;  %v8566_v25 = vld [vmem:[#allocation3 + $0x58] sm:$0xff] }
 0x5ca   : > { %v8250_v1 = vld [vmem:[#allocation3 + $0xf0] sm:$0xff]  ;;  %v15116_v41 = vpop.f32.mrf.mxu0  ;;  %v15169_v55 = vpop.f32.mrf.mxu1  ;;  %15451 = vmatmul.mubr.msk.f32.gmra.mxu0 %vm225_vm1, %v19219_v48 }
 0x5cb   : > { %8549 = vst.msk [vmem:[#allocation3 + $0xf8] sm:$0xff] %vm347_vm4, %v8517_v13  ;;  %v8516_v39 = vadd.f32 %v8477_v10, %v8250_v1  ;;  %8855 = vst.msk [vmem:[#allocation3 + $0x10] sm:$0xff] %vm347_vm4, %v8823_v11  ;;  %v8826_v19 = vadd.f32 %v15116_v41, %v8560_v14  ;;  %15453 = vmatprep.mubr.msk.f32.mxu0 %vm225_vm1, %v19225_v63  ;;  %v8564_v10 = vld [vmem:[#allocation3 + $0x48] sm:$0xff]  ;;  %v8565_v13 = vld [vmem:[#allocation3 + $0x50] sm:$0xff] }
 0x5cc   : > { %v8927_v28 = vld [vmem:[#allocation3 + $0x8] sm:$0xff]  ;;  %v8682_v17 = vpop.f32.mrf.mxu0  ;;  %v9133_v35 = vpop.f32.mrf.mxu1 }
 0x5cd   : > { %8548 = vst.msk [vmem:[#allocation3 + $0xf0] sm:$0xff] %vm347_vm4, %v8516_v39  ;;  %v9283_v38 = vadd.f32 %v15166_v54, %v8927_v28  ;;  %8858 = vst.msk [vmem:[#allocation3 + $0x28] sm:$0xff] %vm347_vm4, %v8826_v19  ;;  %v8825_v26 = vadd.f32 %v8682_v17, %v8559_v3  ;;  %v8567_v17 = vld [vmem:[#allocation3 + $0x60] sm:$0xff] }
 0x5ce   : > { %v8926_v48 = vld [vmem:[#allocation3] sm:$0xff]  ;;  %v15119_v60 = vpop.f32.mrf.mxu0  ;;  %v15172_v15 = vpop.f32.mrf.mxu1  ;;  %15454 = vmatmul.mubr.msk.f32.gmra.mxu0 %vm225_vm1, %v19235_v53 }
 0x5cf   : > { %9315 = vst.msk [vmem:[#allocation3 + $0x8] sm:$0xff] %vm347_vm4, %v9283_v38  ;;  %v9282_v63 = vadd.f32 %v9123_v40, %v8926_v48  ;;  %8857 = vst.msk [vmem:[#allocation3 + $0x20] sm:$0xff] %vm347_vm4, %v8825_v26  ;;  %v8828_v24 = vadd.f32 %v15119_v60, %v8562_v43  ;;  %15456 = vmatprep.mubr.msk.f32.mxu0 %vm225_vm1, %v19241_v8  ;;  %v8570_v43 = vld [vmem:[#allocation3 + $0x78] sm:$0xff] }
 0x5d0   : > { %v8929_v42 = vld [vmem:[#allocation3 + $0x18] sm:$0xff]  ;;  %v8692_v51 = vpop.f32.mrf.mxu0  ;;  %v9143_v50 = vpop.f32.mrf.mxu1 }
 0x5d1   : > { %9314 = vst.msk [vmem:[#allocation3] sm:$0xff] %vm347_vm4, %v9282_v63  ;;  %v9285_v12 = vadd.f32 %v15169_v55, %v8929_v42  ;;  %8860 = vst.msk [vmem:[#allocation3 + $0x38] sm:$0xff] %vm347_vm4, %v8828_v24  ;;  %v8827_v30 = vadd.f32 %v8692_v51, %v8561_v33  ;;  %v8568_v55 = vld [vmem:[#allocation3 + $0x68] sm:$0xff]  ;;  %v8569_v42 = vld [vmem:[#allocation3 + $0x70] sm:$0xff] }
 0x5d2   : > { %v8928_v53 = vld [vmem:[#allocation3 + $0x10] sm:$0xff]  ;;  %v15122_v36 = vpop.f32.mrf.mxu0  ;;  %v15175_v52 = vpop.f32.mrf.mxu1  ;;  %15457 = vmatmul.mubr.msk.f32.gmra.mxu0 %vm225_vm1, %v19251_v7 }
 0x5d3   : > { %9317 = vst.msk [vmem:[#allocation3 + $0x18] sm:$0xff] %vm347_vm4, %v9285_v12  ;;  %v9284_v8 = vadd.f32 %v9133_v35, %v8928_v53  ;;  %8859 = vst.msk [vmem:[#allocation3 + $0x30] sm:$0xff] %vm347_vm4, %v8827_v30  ;;  %v8830_v18 = vadd.f32 %v15122_v36, %v8564_v10  ;;  %15459 = vmatprep.mubr.msk.f32.mxu0 %vm225_vm1, %v19257_v32  ;;  %v8572_v30 = vld [vmem:[#allocation3 + $0x88] sm:$0xff] }
 0x5d4   : > { %v8931_v56 = vld [vmem:[#allocation3 + $0x28] sm:$0xff]  ;;  %v8702_v47 = vpop.f32.mrf.mxu0  ;;  %v9153_v29 = vpop.f32.mrf.mxu1 }
 0x5d5   : > { %9316 = vst.msk [vmem:[#allocation3 + $0x10] sm:$0xff] %vm347_vm4, %v9284_v8  ;;  %v9287_v54 = vadd.f32 %v15172_v15, %v8931_v56  ;;  %8862 = vst.msk [vmem:[#allocation3 + $0x48] sm:$0xff] %vm347_vm4, %v8830_v18  ;;  %v8829_v31 = vadd.f32 %v8702_v47, %v8563_v27  ;;  %v8571_v8 = vld [vmem:[#allocation3 + $0x80] sm:$0xff] }
 0x5d6   : > { %v8930_v7 = vld [vmem:[#allocation3 + $0x20] sm:$0xff]  ;;  %v15125_v49 = vpop.f32.mrf.mxu0  ;;  %v15178_v46 = vpop.f32.mrf.mxu1  ;;  %15460 = vmatmul.mubr.msk.f32.gmra.mxu0 %vm225_vm1, %v19267_v34 }
 0x5d7   : > { %9319 = vst.msk [vmem:[#allocation3 + $0x28] sm:$0xff] %vm347_vm4, %v9287_v54  ;;  %v9286_v32 = vadd.f32 %v9143_v50, %v8930_v7  ;;  %8861 = vst.msk [vmem:[#allocation3 + $0x40] sm:$0xff] %vm347_vm4, %v8829_v31  ;;  %v8832_v5 = vadd.f32 %v15125_v49, %v8566_v25  ;;  %15462 = vmatprep.mubr.msk.f32.mxu0 %vm225_vm1, %v19273_v62  ;;  %v8573_v49 = vld [vmem:[#allocation3 + $0x90] sm:$0xff] }
 0x5d8   : > { %v8933_v40 = vld [vmem:[#allocation3 + $0x38] sm:$0xff]  ;;  %v8712_v11 = vpop.f32.mrf.mxu0  ;;  %v9163_v1 = vpop.f32.mrf.mxu1 }
 0x5d9   : > { %9318 = vst.msk [vmem:[#allocation3 + $0x20] sm:$0xff] %vm347_vm4, %v9286_v32  ;;  %v9289_v14 = vadd.f32 %v15175_v52, %v8933_v40  ;;  %8864 = vst.msk [vmem:[#allocation3 + $0x58] sm:$0xff] %vm347_vm4, %v8832_v5  ;;  %v8831_v41 = vadd.f32 %v8712_v11, %v8565_v13  ;;  %v8576_v13 = vld [vmem:[#allocation3 + $0xa8] sm:$0xff] }
 0x5da   : > { %v8932_v34 = vld [vmem:[#allocation3 + $0x30] sm:$0xff]  ;;  %v15128_v39 = vpop.f32.mrf.mxu0  ;;  %v15181_v19 = vpop.f32.mrf.mxu1  ;;  %15463 = vmatmul.mubr.msk.f32.gmra.mxu0 %vm225_vm1, %v19283_v57 }
 0x5db   : > { %9321 = vst.msk [vmem:[#allocation3 + $0x38] sm:$0xff] %vm347_vm4, %v9289_v14  ;;  %v9288_v62 = vadd.f32 %v9153_v29, %v8932_v34  ;;  %8863 = vst.msk [vmem:[#allocation3 + $0x50] sm:$0xff] %vm347_vm4, %v8831_v41  ;;  %v8834_v28 = vadd.f32 %v15128_v39, %v8568_v55  ;;  %15465 = vmatprep.mubr.msk.f32.mxu0 %vm225_vm1, %v19289_v16  ;;  %v8574_v29 = vld [vmem:[#allocation3 + $0x98] sm:$0xff]  ;;  %v8575_v34 = vld [vmem:[#allocation3 + $0xa0] sm:$0xff] }
 0x5dc   : > { %v8935_v3 = vld [vmem:[#allocation3 + $0x48] sm:$0xff]  ;;  %v8722_v35 = vpop.f32.mrf.mxu0  ;;  %v9173_v38 = vpop.f32.mrf.mxu1 }
 0x5dd   : > { %9320 = vst.msk [vmem:[#allocation3 + $0x30] sm:$0xff] %vm347_vm4, %v9288_v62  ;;  %v9291_v26 = vadd.f32 %v15178_v46, %v8935_v3  ;;  %8866 = vst.msk [vmem:[#allocation3 + $0x68] sm:$0xff] %vm347_vm4, %v8834_v28  ;;  %v8833_v48 = vadd.f32 %v8722_v35, %v8567_v17  ;;  %v8578_v28 = vld [vmem:[#allocation3 + $0xb8] sm:$0xff] }
 0x5de   : > { %v8934_v57 = vld [vmem:[#allocation3 + $0x40] sm:$0xff]  ;;  %v15131_v60 = vpop.f32.mrf.mxu0  ;;  %v15184_v15 = vpop.f32.mrf.mxu1  ;;  %15466 = vmatmul.mubr.msk.f32.gmra.mxu0 %vm225_vm1, %v19299_v20 }
 0x5df   : > { %9323 = vst.msk [vmem:[#allocation3 + $0x48] sm:$0xff] %vm347_vm4, %v9291_v26  ;;  %v9290_v16 = vadd.f32 %v9163_v1, %v8934_v57  ;;  %8865 = vst.msk [vmem:[#allocation3 + $0x60] sm:$0xff] %vm347_vm4, %v8833_v48  ;;  %v8836_v63 = vadd.f32 %v15131_v60, %v8570_v43  ;;  %15468 = vmatprep.mubr.msk.f32.mxu0 %vm225_vm1, %v19305_v21  ;;  %v8577_v26 = vld [vmem:[#allocation3 + $0xb0] sm:$0xff] }
 0x5e0   : > { %v8937_v24 = vld [vmem:[#allocation3 + $0x58] sm:$0xff]  ;;  %v8732_v33 = vpop.f32.mrf.mxu0  ;;  %v9183_v51 = vpop.f32.mrf.mxu1 }
 0x5e1   : > { %9322 = vst.msk [vmem:[#allocation3 + $0x40] sm:$0xff] %vm347_vm4, %v9290_v16  ;;  %v9293_v50 = vadd.f32 %v15181_v19, %v8937_v24  ;;  %8868 = vst.msk [vmem:[#allocation3 + $0x78] sm:$0xff] %vm347_vm4, %v8836_v63  ;;  %v8835_v12 = vadd.f32 %v8732_v33, %v8569_v42  ;;  %v8579_v33 = vld [vmem:[#allocation3 + $0xc0] sm:$0xff] }
 0x5e2   : > { %v8936_v20 = vld [vmem:[#allocation3 + $0x50] sm:$0xff]  ;;  %v15134_v53 = vpop.f32.mrf.mxu0  ;;  %v15187_v10 = vpop.f32.mrf.mxu1  ;;  %15469 = vmatmul.mubr.msk.f32.gmra.mxu0 %vm225_vm1, %v19315_v6 }
 0x5e3   : > { %9325 = vst.msk [vmem:[#allocation3 + $0x58] sm:$0xff] %vm347_vm4, %v9293_v50  ;;  %v9292_v21 = vadd.f32 %v9173_v38, %v8936_v20  ;;  %8867 = vst.msk [vmem:[#allocation3 + $0x70] sm:$0xff] %vm347_vm4, %v8835_v12  ;;  %v8838_v36 = vadd.f32 %v15134_v53, %v8572_v30  ;;  %15471 = vmatprep.mubr.msk.f32.mxu0 %vm225_vm1, %v19321_v44  ;;  %v8582_v30 = vld [vmem:[#allocation3 + $0xd8] sm:$0xff] }
 0x5e4   : > { %v8939_v52 = vld [vmem:[#allocation3 + $0x68] sm:$0xff]  ;;  %v8742_v18 = vpop.f32.mrf.mxu0  ;;  %v9193_v56 = vpop.f32.mrf.mxu1 }
 0x5e5   : > { %9324 = vst.msk [vmem:[#allocation3 + $0x50] sm:$0xff] %vm347_vm4, %v9292_v21  ;;  %v9295_v27 = vadd.f32 %v15184_v15, %v8939_v52  ;;  %8870 = vst.msk [vmem:[#allocation3 + $0x88] sm:$0xff] %vm347_vm4, %v8838_v36  ;;  %v8837_v47 = vadd.f32 %v8742_v18, %v8571_v8  ;;  %v8580_v15 = vld [vmem:[#allocation3 + $0xc8] sm:$0xff]  ;;  %v8581_v52 = vld [vmem:[#allocation3 + $0xd0] sm:$0xff] }
 0x5e6   : > { %v8938_v6 = vld [vmem:[#allocation3 + $0x60] sm:$0xff]  ;;  %v15137_v54 = vpop.f32.mrf.mxu0  ;;  %v15190_v31 = vpop.f32.mrf.mxu1  ;;  %15472 = vmatmul.mubr.msk.f32.gmra.mxu0 %vm225_vm1, %v19331_v2 }
 0x5e7   : > { %9327 = vst.msk [vmem:[#allocation3 + $0x68] sm:$0xff] %vm347_vm4, %v9295_v27  ;;  %v9294_v44 = vadd.f32 %v9183_v51, %v8938_v6  ;;  %8869 = vst.msk [vmem:[#allocation3 + $0x80] sm:$0xff] %vm347_vm4, %v8837_v47  ;;  %v8840_v7 = vadd.f32 %v15137_v54, %v8574_v29  ;;  %15474 = vmatprep.mubr.msk.f32.mxu0 %vm225_vm1, %v19337_v22  ;;  %v8584_v6 = vld [vmem:[#allocation3 + $0xe8] sm:$0xff] }
 0x5e8   : > { %v8941_v25 = vld [vmem:[#allocation3 + $0x78] sm:$0xff]  ;;  %v8752_v46 = vpop.f32.mrf.mxu0  ;;  %v9203_v32 = vpop.f32.mrf.mxu1 }
 0x5e9   : > { %9326 = vst.msk [vmem:[#allocation3 + $0x60] sm:$0xff] %vm347_vm4, %v9294_v44  ;;  %v9297_v5 = vadd.f32 %v15187_v10, %v8941_v25  ;;  %8872 = vst.msk [vmem:[#allocation3 + $0x98] sm:$0xff] %vm347_vm4, %v8840_v7  ;;  %v8839_v40 = vadd.f32 %v8752_v46, %v8573_v49  ;;  %v10051_v44 = vld [vmem:[#allocation2 + $0x1a2] sm:$0xff]  ;;  %v8583_v25 = vld [vmem:[#allocation3 + $0xe0] sm:$0xff] }
 0x5ea   : > { %v8940_v2 = vld [vmem:[#allocation3 + $0x70] sm:$0xff]  ;;  %v15140_v11 = vpop.f32.mrf.mxu0  ;;  %v15193_v1 = vpop.f32.mrf.mxu1  ;;  %15475 = vmatmul.mubr.msk.f32.gmra.mxu0 %vm225_vm1, %v19347_v0 }
 0x5eb   : > { %9329 = vst.msk [vmem:[#allocation3 + $0x78] sm:$0xff] %vm347_vm4, %v9297_v5  ;;  %v9296_v22 = vadd.f32 %v9193_v56, %v8940_v2  ;;  %8871 = vst.msk [vmem:[#allocation3 + $0x90] sm:$0xff] %vm347_vm4, %v8839_v40  ;;  %v8842_v14 = vadd.f32 %v15140_v11, %v8576_v13  ;;  %15477 = vmatprep.mubr.msk.f32.mxu0 %vm225_vm1, %v19353_v9  ;;  %v10050_v56 = vld [vmem:[#allocation2 + $0x19a] sm:$0xff]  ;;  %v8586_v40 = vld [vmem:[#allocation3 + $0xf8] sm:$0xff] }
 0x5ec   : > { %v8943_v41 = vld [vmem:[#allocation3 + $0x88] sm:$0xff]  ;;  %v8762_v55 = vpop.f32.mrf.mxu0  ;;  %v9213_v39 = vpop.f32.mrf.mxu1 }
 0x5ed   : > { %9328 = vst.msk [vmem:[#allocation3 + $0x70] sm:$0xff] %vm347_vm4, %v9296_v22  ;;  %v9299_v19 = vadd.f32 %v15190_v31, %v8943_v41  ;;  %8874 = vst.msk [vmem:[#allocation3 + $0xa8] sm:$0xff] %vm347_vm4, %v8842_v14  ;;  %v8841_v62 = vadd.f32 %v8762_v55, %v8575_v34  ;;  %v8585_v14 = vld [vmem:[#allocation3 + $0xf0] sm:$0xff] }
 0x5ee   : > { %v8942_v0 = vld [vmem:[#allocation3 + $0x80] sm:$0xff]  ;;  %v15143_v3 = vpop.f32.mrf.mxu0  ;;  %v15196_v17 = vpop.f32.mrf.mxu1  ;;  %15478 = vmatmul.mubr.msk.f32.gmra.mxu0 %vm225_vm1, %v19363_v59 }
 0x5ef   : > { %9331 = vst.msk [vmem:[#allocation3 + $0x88] sm:$0xff] %vm347_vm4, %v9299_v19  ;;  %v9298_v9 = vadd.f32 %v9203_v32, %v8942_v0  ;;  %8873 = vst.msk [vmem:[#allocation3 + $0xa0] sm:$0xff] %vm347_vm4, %v8841_v62  ;;  %v8844_v35 = vadd.f32 %v15143_v3, %v8578_v28  ;;  %15480 = vmatprep.mubr.msk.f32.mxu0 %vm225_vm1, %v19369_v37  ;;  %v9352_v0 = vld [vmem:[#allocation3 + $0x8] sm:$0xff] }
 0x5f0   : > { %v8945_v38 = vld [vmem:[#allocation3 + $0x98] sm:$0xff]  ;;  %v8772_v48 = vpop.f32.mrf.mxu0  ;;  %v9223_v57 = vpop.f32.mrf.mxu1 }
 0x5f1   : > { %9330 = vst.msk [vmem:[#allocation3 + $0x80] sm:$0xff] %vm347_vm4, %v9298_v9  ;;  %v9301_v43 = vadd.f32 %v15193_v1, %v8945_v38  ;;  %8876 = vst.msk [vmem:[#allocation3 + $0xb8] sm:$0xff] %vm347_vm4, %v8844_v35  ;;  %v8843_v60 = vadd.f32 %v8772_v48, %v8577_v26  ;;  %v9351_v38 = vld [vmem:[#allocation3] sm:$0xff] }
 0x5f2   : > { %v8944_v59 = vld [vmem:[#allocation3 + $0x90] sm:$0xff]  ;;  %v15146_v16 = vpop.f32.mrf.mxu0  ;;  %v15199_v63 = vpop.f32.mrf.mxu1  ;;  %15481 = vmatmul.mubr.msk.f32.gmra.mxu0 %vm225_vm1, %v19379_v61 }
 0x5f3   : > { %9333 = vst.msk [vmem:[#allocation3 + $0x98] sm:$0xff] %vm347_vm4, %v9301_v43  ;;  %v9300_v37 = vadd.f32 %v9213_v39, %v8944_v59  ;;  %8875 = vst.msk [vmem:[#allocation3 + $0xb0] sm:$0xff] %vm347_vm4, %v8843_v60  ;;  %v8846_v24 = vadd.f32 %v15146_v16, %v8580_v15  ;;  %15483 = vmatprep.mubr.msk.f32.mxu0 %vm225_vm1, %v19385_v45  ;;  %v9354_v60 = vld [vmem:[#allocation3 + $0x18] sm:$0xff] }
 0x5f4   : > { %v8947_v42 = vld [vmem:[#allocation3 + $0xa8] sm:$0xff]  ;;  %v8782_v51 = vpop.f32.mrf.mxu0  ;;  %v9233_v50 = vpop.f32.mrf.mxu1 }
 0x5f5   : > { %9332 = vst.msk [vmem:[#allocation3 + $0x90] sm:$0xff] %vm347_vm4, %v9300_v37  ;;  %v9303_v12 = vadd.f32 %v15196_v17, %v8947_v42  ;;  %8878 = vst.msk [vmem:[#allocation3 + $0xc8] sm:$0xff] %vm347_vm4, %v8846_v24  ;;  %v8845_v20 = vadd.f32 %v8782_v51, %v8579_v33  ;;  %v9353_v24 = vld [vmem:[#allocation3 + $0x10] sm:$0xff] }
 0x5f6   : > { %v8946_v61 = vld [vmem:[#allocation3 + $0xa0] sm:$0xff]  ;;  %v15149_v53 = vpop.f32.mrf.mxu0  ;;  %v15202_v10 = vpop.f32.mrf.mxu1  ;;  %15484 = vmatmul.mubr.msk.f32.gmra.mxu0 %vm225_vm1, %v19395_v23 }
 0x5f7   : > { %9335 = vst.msk [vmem:[#allocation3 + $0xa8] sm:$0xff] %vm347_vm4, %v9303_v12  ;;  %v9302_v45 = vadd.f32 %v9223_v57, %v8946_v61  ;;  %8877 = vst.msk [vmem:[#allocation3 + $0xc0] sm:$0xff] %vm347_vm4, %v8845_v20  ;;  %v8848_v21 = vadd.f32 %v15149_v53, %v8582_v30  ;;  %15486 = vmatprep.mubr.msk.f32.mxu0 %vm225_vm1, %v19401_v58  ;;  %v9356_v20 = vld [vmem:[#allocation3 + $0x28] sm:$0xff] }
 0x5f8   : > { %v8949_v36 = vld [vmem:[#allocation3 + $0xb8] sm:$0xff]  ;;  %v8792_v8 = vpop.f32.mrf.mxu0  ;;  %v9243_v18 = vpop.f32.mrf.mxu1 }
 0x5f9   : > { %9334 = vst.msk [vmem:[#allocation3 + $0xa0] sm:$0xff] %vm347_vm4, %v9302_v45  ;;  %v9305_v27 = vadd.f32 %v15199_v63, %v8949_v36  ;;  %8880 = vst.msk [vmem:[#allocation3 + $0xd8] sm:$0xff] %vm347_vm4, %v8848_v21  ;;  %v8847_v23 = vadd.f32 %v8792_v8, %v8581_v52  ;;  %v9355_v21 = vld [vmem:[#allocation3 + $0x20] sm:$0xff] }
 0x5fa   : > { %v8948_v47 = vld [vmem:[#allocation3 + $0xb0] sm:$0xff]  ;;  %v15152_v29 = vpop.f32.mrf.mxu0  ;;  %v15205_v54 = vpop.f32.mrf.mxu1  ;;  %15487 = vmatmul.mubr.msk.f32.gmra.mxu0 %vm225_vm1, %v19411_v4 }
 0x5fb   : > { %9337 = vst.msk [vmem:[#allocation3 + $0xb8] sm:$0xff] %vm347_vm4, %v9305_v27  ;;  %v9304_v58 = vadd.f32 %v9233_v50, %v8948_v47  ;;  %8879 = vst.msk [vmem:[#allocation3 + $0xd0] sm:$0xff] %vm347_vm4, %v8847_v23  ;;  %v8850_v31 = vadd.f32 %v15152_v29, %v8584_v6  ;;  %15489 = vmatprep.mubr.msk.f32.mxu0 %vm225_vm1, %v10050_v56  ;;  %v9358_v27 = vld [vmem:[#allocation3 + $0x38] sm:$0xff] }
 0x5fc   : > { %v8951_v7 = vld [vmem:[#allocation3 + $0xc8] sm:$0xff]  ;;  %v8802_v49 = vpop.f32.mrf.mxu0  ;;  %v9253_v46 = vpop.f32.mrf.mxu1 }
 0x5fd   : > { %9336 = vst.msk [vmem:[#allocation3 + $0xb0] sm:$0xff] %vm347_vm4, %v9304_v58  ;;  %v9307_v32 = vadd.f32 %v15202_v10, %v8951_v7  ;;  %8882 = vst.msk [vmem:[#allocation3 + $0xe8] sm:$0xff] %vm347_vm4, %v8850_v31  ;;  %v8849_v5 = vadd.f32 %v8802_v49, %v8583_v25  ;;  %v9357_v58 = vld [vmem:[#allocation3 + $0x30] sm:$0xff] }
 0x5fe   : > { %v8950_v4 = vld [vmem:[#allocation3 + $0xc0] sm:$0xff]  ;;  %v15155_v2 = vpop.f32.mrf.mxu0  ;;  %v15208_v13 = vpop.f32.mrf.mxu1  ;;  %15490 = vmatmul.mubr.msk.f32.gmra.mxu0 %vm225_vm1, %v10051_v44 }
 0x5ff   : > { %9339 = vst.msk [vmem:[#allocation3 + $0xc8] sm:$0xff] %vm347_vm4, %v9307_v32  ;;  %v9306_v11 = vadd.f32 %v9243_v18, %v8950_v4  ;;  %8881 = vst.msk [vmem:[#allocation3 + $0xe0] sm:$0xff] %vm347_vm4, %v8849_v5  ;;  %v8852_v1 = vadd.f32 %v15155_v2, %v8586_v40 }
 0x600   : > { %v8953_v22 = vld [vmem:[#allocation3 + $0xd8] sm:$0xff]  ;;  %v8812_v41 = vpop.f32.mrf.mxu0  ;;  %v9263_v34 = vpop.f32.mrf.mxu1 }
 0x601   : > { %9338 = vst.msk [vmem:[#allocation3 + $0xc0] sm:$0xff] %vm347_vm4, %v9306_v11  ;;  %v9309_v55 = vadd.f32 %v15205_v54, %v8953_v22  ;;  %8884 = vst.msk [vmem:[#allocation3 + $0xf8] sm:$0xff] %vm347_vm4, %v8852_v1  ;;  %v8851_v39 = vadd.f32 %v8812_v41, %v8585_v14 }
 0x602   : > { %v8952_v19 = vld [vmem:[#allocation3 + $0xd0] sm:$0xff]  ;;  %v15211_v62 = vpop.f32.mrf.mxu1  ;;  %v15222_v28 = vpop.f32.mrf.mxu0 }
 0x603   : > { %9341 = vst.msk [vmem:[#allocation3 + $0xd8] sm:$0xff] %vm347_vm4, %v9309_v55  ;;  %v9308_v3 = vadd.f32 %v9253_v46, %v8952_v19  ;;  %8883 = vst.msk [vmem:[#allocation3 + $0xf0] sm:$0xff] %vm347_vm4, %v8851_v39  ;;  %v9618_v17 = vadd.f32 %v15222_v28, %v9352_v0  ;;  %v9360_v46 = vld [vmem:[#allocation3 + $0x48] sm:$0xff]  ;;  %v9361_v28 = vld [vmem:[#allocation3 + $0x50] sm:$0xff] }
 0x604   : > { %v8955_v9 = vld [vmem:[#allocation3 + $0xe8] sm:$0xff]  ;;  %v9273_v35 = vpop.f32.mrf.mxu1  ;;  %v9458_v26 = vpop.f32.mrf.mxu0 }
 0x605   : > { %9340 = vst.msk [vmem:[#allocation3 + $0xd0] sm:$0xff] %vm347_vm4, %v9308_v3  ;;  %v9311_v48 = vadd.f32 %v15208_v13, %v8955_v9  ;;  %9650 = vst.msk [vmem:[#allocation3 + $0x8] sm:$0xff] %vm347_vm4, %v9618_v17  ;;  %v9617_v57 = vadd.f32 %v9458_v26, %v9351_v38  ;;  %v9359_v13 = vld [vmem:[#allocation3 + $0x40] sm:$0xff]  ;;  %v9364_v26 = vld [vmem:[#allocation3 + $0x68] sm:$0xff] }
 0x606   : > { %v8954_v43 = vld [vmem:[#allocation3 + $0xe0] sm:$0xff]  ;;  %v15225_v59 = vpop.f32.mrf.mxu0  ;;  %v15278_v15 = vpop.f32.mrf.mxu1 }
 0x607   : > { %9343 = vst.msk [vmem:[#allocation3 + $0xe8] sm:$0xff] %vm347_vm4, %v9311_v48  ;;  %v9310_v16 = vadd.f32 %v9263_v34, %v8954_v43  ;;  %9649 = vst.msk [vmem:[#allocation3] sm:$0xff] %vm347_vm4, %v9617_v57  ;;  %v9620_v63 = vadd.f32 %v15225_v59, %v9354_v60  ;;  %v9362_v34 = vld [vmem:[#allocation3 + $0x58] sm:$0xff] }
 0x608   : > { %v8957_v37 = vld [vmem:[#allocation3 + $0xf8] sm:$0xff]  ;;  %v9468_v42 = vpop.f32.mrf.mxu0  ;;  %v9793_v33 = vpop.f32.mrf.mxu1 }
 0x609   : > { %9342 = vst.msk [vmem:[#allocation3 + $0xe0] sm:$0xff] %vm347_vm4, %v9310_v16  ;;  %v9313_v51 = vadd.f32 %v15211_v62, %v8957_v37  ;;  %9652 = vst.msk [vmem:[#allocation3 + $0x18] sm:$0xff] %vm347_vm4, %v9620_v63  ;;  %v9619_v50 = vadd.f32 %v9468_v42, %v9353_v24 }
 0x60a   : > { %v8956_v12 = vld [vmem:[#allocation3 + $0xf0] sm:$0xff]  ;;  %v15228_v61 = vpop.f32.mrf.mxu0  ;;  %v15281_v30 = vpop.f32.mrf.mxu1 }
 0x60b   : > { %9345 = vst.msk [vmem:[#allocation3 + $0xf8] sm:$0xff] %vm347_vm4, %v9313_v51  ;;  %v9312_v53 = vadd.f32 %v9273_v35, %v8956_v12  ;;  %9651 = vst.msk [vmem:[#allocation3 + $0x10] sm:$0xff] %vm347_vm4, %v9619_v50  ;;  %v9622_v10 = vadd.f32 %v15228_v61, %v9356_v20 }
 0x60c   : > { %v9687_v45 = vld [vmem:[#allocation3 + $0x8] sm:$0xff]  ;;  %v9478_v36 = vpop.f32.mrf.mxu0  ;;  %v9803_v52 = vpop.f32.mrf.mxu1 }
 0x60d   : > { %9344 = vst.msk [vmem:[#allocation3 + $0xf0] sm:$0xff] %vm347_vm4, %v9312_v53  ;;  %v9953_v8 = vadd.f32 %v15278_v15, %v9687_v45  ;;  %9654 = vst.msk [vmem:[#allocation3 + $0x28] sm:$0xff] %vm347_vm4, %v9622_v10  ;;  %v9621_v18 = vadd.f32 %v9478_v36, %v9355_v21  ;;  %v9363_v15 = vld [vmem:[#allocation3 + $0x60] sm:$0xff] }
 0x60e   : > { %v9686_v56 = vld [vmem:[#allocation3] sm:$0xff]  ;;  %v15231_v23 = vpop.f32.mrf.mxu0  ;;  %v15284_v47 = vpop.f32.mrf.mxu1 }
 0x60f   : > { %9985 = vst.msk [vmem:[#allocation3 + $0x8] sm:$0xff] %vm347_vm4, %v9953_v8  ;;  %v9952_v6 = vadd.f32 %v9793_v33, %v9686_v56  ;;  %9653 = vst.msk [vmem:[#allocation3 + $0x20] sm:$0xff] %vm347_vm4, %v9621_v18  ;;  %v9624_v29 = vadd.f32 %v15231_v23, %v9358_v27  ;;  %v9366_v33 = vld [vmem:[#allocation3 + $0x78] sm:$0xff] }
 0x610   : > { %v9689_v54 = vld [vmem:[#allocation3 + $0x18] sm:$0xff]  ;;  %v9488_v31 = vpop.f32.mrf.mxu0  ;;  %v9813_v44 = vpop.f32.mrf.mxu1 }
 0x611   : > { %9984 = vst.msk [vmem:[#allocation3] sm:$0xff] %vm347_vm4, %v9952_v6  ;;  %v9955_v7 = vadd.f32 %v15281_v30, %v9689_v54  ;;  %9656 = vst.msk [vmem:[#allocation3 + $0x38] sm:$0xff] %vm347_vm4, %v9624_v29  ;;  %v9623_v25 = vadd.f32 %v9488_v31, %v9357_v58  ;;  %v9365_v30 = vld [vmem:[#allocation3 + $0x70] sm:$0xff] }
 0x612   : > { %v9688_v49 = vld [vmem:[#allocation3 + $0x10] sm:$0xff]  ;;  %v15234_v32 = vpop.f32.mrf.mxu0  ;;  %v15287_v5 = vpop.f32.mrf.mxu1 }
 0x613   : > { %9987 = vst.msk [vmem:[#allocation3 + $0x18] sm:$0xff] %vm347_vm4, %v9955_v7  ;;  %v9954_v4 = vadd.f32 %v9803_v52, %v9688_v49  ;;  %9655 = vst.msk [vmem:[#allocation3 + $0x30] sm:$0xff] %vm347_vm4, %v9623_v25  ;;  %v9626_v40 = vadd.f32 %v15234_v32, %v9360_v46  ;;  %v9368_v52 = vld [vmem:[#allocation3 + $0x88] sm:$0xff] }
 0x614   : > { %v9691_v2 = vld [vmem:[#allocation3 + $0x28] sm:$0xff]  ;;  %v9498_v11 = vpop.f32.mrf.mxu0  ;;  %v9823_v1 = vpop.f32.mrf.mxu1 }
 0x615   : > { %9986 = vst.msk [vmem:[#allocation3 + $0x10] sm:$0xff] %vm347_vm4, %v9954_v4  ;;  %v9957_v22 = vadd.f32 %v15284_v47, %v9691_v2  ;;  %9658 = vst.msk [vmem:[#allocation3 + $0x48] sm:$0xff] %vm347_vm4, %v9626_v40  ;;  %v9625_v14 = vadd.f32 %v9498_v11, %v9359_v13  ;;  %v9367_v47 = vld [vmem:[#allocation3 + $0x80] sm:$0xff] }
 0x616   : > { %v9690_v41 = vld [vmem:[#allocation3 + $0x20] sm:$0xff]  ;;  %v15237_v55 = vpop.f32.mrf.mxu0  ;;  %v15290_v39 = vpop.f32.mrf.mxu1 }
 0x617   : > { %9989 = vst.msk [vmem:[#allocation3 + $0x28] sm:$0xff] %vm347_vm4, %v9957_v22  ;;  %v9956_v19 = vadd.f32 %v9813_v44, %v9690_v41  ;;  %9657 = vst.msk [vmem:[#allocation3 + $0x40] sm:$0xff] %vm347_vm4, %v9625_v14  ;;  %v9628_v62 = vadd.f32 %v15237_v55, %v9362_v34  ;;  %v9370_v44 = vld [vmem:[#allocation3 + $0x98] sm:$0xff] }
 0x618   : > { %v9693_v0 = vld [vmem:[#allocation3 + $0x38] sm:$0xff]  ;;  %v9508_v3 = vpop.f32.mrf.mxu0  ;;  %v9833_v17 = vpop.f32.mrf.mxu1 }
 0x619   : > { %9988 = vst.msk [vmem:[#allocation3 + $0x20] sm:$0xff] %vm347_vm4, %v9956_v19  ;;  %v9959_v9 = vadd.f32 %v15287_v5, %v9693_v0  ;;  %9660 = vst.msk [vmem:[#allocation3 + $0x58] sm:$0xff] %vm347_vm4, %v9628_v62  ;;  %v9627_v35 = vadd.f32 %v9508_v3, %v9361_v28  ;;  %v9369_v5 = vld [vmem:[#allocation3 + $0x90] sm:$0xff] }
 0x61a   : > { %v9692_v38 = vld [vmem:[#allocation3 + $0x30] sm:$0xff]  ;;  %v15240_v48 = vpop.f32.mrf.mxu0  ;;  %v15293_v57 = vpop.f32.mrf.mxu1 }
 0x61b   : > { %9991 = vst.msk [vmem:[#allocation3 + $0x38] sm:$0xff] %vm347_vm4, %v9959_v9  ;;  %v9958_v43 = vadd.f32 %v9823_v1, %v9692_v38  ;;  %9659 = vst.msk [vmem:[#allocation3 + $0x50] sm:$0xff] %vm347_vm4, %v9627_v35  ;;  %v9630_v60 = vadd.f32 %v15240_v48, %v9364_v26  ;;  %v9372_v1 = vld [vmem:[#allocation3 + $0xa8] sm:$0xff] }
 0x61c   : > { %v9695_v59 = vld [vmem:[#allocation3 + $0x48] sm:$0xff]  ;;  %v9518_v16 = vpop.f32.mrf.mxu0  ;;  %v9843_v63 = vpop.f32.mrf.mxu1 }
 0x61d   : > { %9990 = vst.msk [vmem:[#allocation3 + $0x30] sm:$0xff] %vm347_vm4, %v9958_v43  ;;  %v9961_v37 = vadd.f32 %v15290_v39, %v9695_v59  ;;  %9662 = vst.msk [vmem:[#allocation3 + $0x68] sm:$0xff] %vm347_vm4, %v9630_v60  ;;  %v9629_v24 = vadd.f32 %v9518_v16, %v9363_v15  ;;  %v9371_v39 = vld [vmem:[#allocation3 + $0xa0] sm:$0xff] }
 0x61e   : > { %v9694_v42 = vld [vmem:[#allocation3 + $0x40] sm:$0xff]  ;;  %v15243_v51 = vpop.f32.mrf.mxu0  ;;  %v15296_v50 = vpop.f32.mrf.mxu1 }
 0x61f   : > { %9993 = vst.msk [vmem:[#allocation3 + $0x48] sm:$0xff] %vm347_vm4, %v9961_v37  ;;  %v9960_v12 = vadd.f32 %v9833_v17, %v9694_v42  ;;  %9661 = vst.msk [vmem:[#allocation3 + $0x60] sm:$0xff] %vm347_vm4, %v9629_v24  ;;  %v9632_v20 = vadd.f32 %v15243_v51, %v9366_v33  ;;  %v9374_v17 = vld [vmem:[#allocation3 + $0xb8] sm:$0xff] }
 0x620   : > { %v9697_v61 = vld [vmem:[#allocation3 + $0x58] sm:$0xff]  ;;  %v9528_v53 = vpop.f32.mrf.mxu0  ;;  %v9853_v10 = vpop.f32.mrf.mxu1 }
 0x621   : > { %9992 = vst.msk [vmem:[#allocation3 + $0x40] sm:$0xff] %vm347_vm4, %v9960_v12  ;;  %v9963_v45 = vadd.f32 %v15293_v57, %v9697_v61  ;;  %9664 = vst.msk [vmem:[#allocation3 + $0x78] sm:$0xff] %vm347_vm4, %v9632_v20  ;;  %v9631_v21 = vadd.f32 %v9528_v53, %v9365_v30  ;;  %v9373_v57 = vld [vmem:[#allocation3 + $0xb0] sm:$0xff] }
 0x622   : > { %v9696_v36 = vld [vmem:[#allocation3 + $0x50] sm:$0xff]  ;;  %v15246_v8 = vpop.f32.mrf.mxu0  ;;  %v15299_v18 = vpop.f32.mrf.mxu1 }
 0x623   : > { %9995 = vst.msk [vmem:[#allocation3 + $0x58] sm:$0xff] %vm347_vm4, %v9963_v45  ;;  %v9962_v56 = vadd.f32 %v9843_v63, %v9696_v36  ;;  %9663 = vst.msk [vmem:[#allocation3 + $0x70] sm:$0xff] %vm347_vm4, %v9631_v21  ;;  %v9634_v27 = vadd.f32 %v15246_v8, %v9368_v52  ;;  %v9376_v63 = vld [vmem:[#allocation3 + $0xc8] sm:$0xff] }
 0x624   : > { %v9699_v23 = vld [vmem:[#allocation3 + $0x68] sm:$0xff]  ;;  %v9538_v6 = vpop.f32.mrf.mxu0  ;;  %v9863_v29 = vpop.f32.mrf.mxu1 }
 0x625   : > { %9994 = vst.msk [vmem:[#allocation3 + $0x50] sm:$0xff] %vm347_vm4, %v9962_v56  ;;  %v9965_v54 = vadd.f32 %v15296_v50, %v9699_v23  ;;  %9666 = vst.msk [vmem:[#allocation3 + $0x88] sm:$0xff] %vm347_vm4, %v9634_v27  ;;  %v9633_v58 = vadd.f32 %v9538_v6, %v9367_v47  ;;  %v9375_v50 = vld [vmem:[#allocation3 + $0xc0] sm:$0xff] }
 0x626   : > { %v9698_v31 = vld [vmem:[#allocation3 + $0x60] sm:$0xff]  ;;  %v15249_v7 = vpop.f32.mrf.mxu0  ;;  %v15302_v25 = vpop.f32.mrf.mxu1 }
 0x627   : > { %9997 = vst.msk [vmem:[#allocation3 + $0x68] sm:$0xff] %vm347_vm4, %v9965_v54  ;;  %v9964_v49 = vadd.f32 %v9853_v10, %v9698_v31  ;;  %9665 = vst.msk [vmem:[#allocation3 + $0x80] sm:$0xff] %vm347_vm4, %v9633_v58  ;;  %v9636_v46 = vadd.f32 %v15249_v7, %v9370_v44  ;;  %v9378_v10 = vld [vmem:[#allocation3 + $0xd8] sm:$0xff] }
 0x628   : > { %v9701_v32 = vld [vmem:[#allocation3 + $0x78] sm:$0xff]  ;;  %v9548_v4 = vpop.f32.mrf.mxu0  ;;  %v9873_v40 = vpop.f32.mrf.mxu1 }
 0x629   : > { %9996 = vst.msk [vmem:[#allocation3 + $0x60] sm:$0xff] %vm347_vm4, %v9964_v49  ;;  %v9967_v2 = vadd.f32 %v15299_v18, %v9701_v32  ;;  %9668 = vst.msk [vmem:[#allocation3 + $0x98] sm:$0xff] %vm347_vm4, %v9636_v46  ;;  %v9635_v13 = vadd.f32 %v9548_v4, %v9369_v5  ;;  %v9377_v18 = vld [vmem:[#allocation3 + $0xd0] sm:$0xff] }
 0x62a   : > { %v9700_v11 = vld [vmem:[#allocation3 + $0x70] sm:$0xff]  ;;  %v15252_v22 = vpop.f32.mrf.mxu0  ;;  %v15305_v14 = vpop.f32.mrf.mxu1 }
 0x62b   : > { %9999 = vst.msk [vmem:[#allocation3 + $0x78] sm:$0xff] %vm347_vm4, %v9967_v2  ;;  %v9966_v41 = vadd.f32 %v9863_v29, %v9700_v11  ;;  %9667 = vst.msk [vmem:[#allocation3 + $0x90] sm:$0xff] %vm347_vm4, %v9635_v13  ;;  %v9638_v34 = vadd.f32 %v15252_v22, %v9372_v1  ;;  %v9380_v29 = vld [vmem:[#allocation3 + $0xe8] sm:$0xff] }
 0x62c   : > { %v9703_v55 = vld [vmem:[#allocation3 + $0x88] sm:$0xff]  ;;  %v9558_v19 = vpop.f32.mrf.mxu0  ;;  %v9883_v62 = vpop.f32.mrf.mxu1 }
 0x62d   : > { %9998 = vst.msk [vmem:[#allocation3 + $0x70] sm:$0xff] %vm347_vm4, %v9966_v41  ;;  %v9969_v0 = vadd.f32 %v15302_v25, %v9703_v55  ;;  %9670 = vst.msk [vmem:[#allocation3 + $0xa8] sm:$0xff] %vm347_vm4, %v9638_v34  ;;  %v9637_v28 = vadd.f32 %v9558_v19, %v9371_v39  ;;  %v9379_v25 = vld [vmem:[#allocation3 + $0xe0] sm:$0xff] }
 0x62e   : > { %v9702_v3 = vld [vmem:[#allocation3 + $0x80] sm:$0xff]  ;;  %v15255_v9 = vpop.f32.mrf.mxu0  ;;  %v15308_v35 = vpop.f32.mrf.mxu1 }
 0x62f   : > { %10001 = vst.msk [vmem:[#allocation3 + $0x88] sm:$0xff] %vm347_vm4, %v9969_v0  ;;  %v9968_v38 = vadd.f32 %v9873_v40, %v9702_v3  ;;  %9669 = vst.msk [vmem:[#allocation3 + $0xa0] sm:$0xff] %vm347_vm4, %v9637_v28  ;;  %v9640_v26 = vadd.f32 %v15255_v9, %v9374_v17  ;;  %v9382_v40 = vld [vmem:[#allocation3 + $0xf8] sm:$0xff]  ;;  %v10058_v0 = vld [vmem:[#allocation3 + $0x8] sm:$0xff] }
 0x630   : > { %v9705_v48 = vld [vmem:[#allocation3 + $0x98] sm:$0xff]  ;;  %v9568_v43 = vpop.f32.mrf.mxu0  ;;  %v9893_v60 = vpop.f32.mrf.mxu1 }
 0x631   : > { %10000 = vst.msk [vmem:[#allocation3 + $0x80] sm:$0xff] %vm347_vm4, %v9968_v38  ;;  %v9971_v59 = vadd.f32 %v15305_v14, %v9705_v48  ;;  %9672 = vst.msk [vmem:[#allocation3 + $0xb8] sm:$0xff] %vm347_vm4, %v9640_v26  ;;  %v9639_v15 = vadd.f32 %v9568_v43, %v9373_v57  ;;  %v9381_v14 = vld [vmem:[#allocation3 + $0xf0] sm:$0xff]  ;;  %v10057_v38 = vld [vmem:[#allocation3] sm:$0xff] }
 0x632   : > { %v9704_v16 = vld [vmem:[#allocation3 + $0x90] sm:$0xff]  ;;  %v15258_v37 = vpop.f32.mrf.mxu0  ;;  %v15311_v24 = vpop.f32.mrf.mxu1 }
 0x633   : > { %10003 = vst.msk [vmem:[#allocation3 + $0x98] sm:$0xff] %vm347_vm4, %v9971_v59  ;;  %v9970_v42 = vadd.f32 %v9883_v62, %v9704_v16  ;;  %9671 = vst.msk [vmem:[#allocation3 + $0xb0] sm:$0xff] %vm347_vm4, %v9639_v15  ;;  %v9642_v33 = vadd.f32 %v15258_v37, %v9376_v63 }
 0x634   : > { %v9707_v51 = vld [vmem:[#allocation3 + $0xa8] sm:$0xff]  ;;  %v9578_v12 = vpop.f32.mrf.mxu0  ;;  %v9903_v20 = vpop.f32.mrf.mxu1 }
 0x635   : > { %10002 = vst.msk [vmem:[#allocation3 + $0x90] sm:$0xff] %vm347_vm4, %v9970_v42  ;;  %v9973_v61 = vadd.f32 %v15308_v35, %v9707_v51  ;;  %9674 = vst.msk [vmem:[#allocation3 + $0xc8] sm:$0xff] %vm347_vm4, %v9642_v33  ;;  %v9641_v30 = vadd.f32 %v9578_v12, %v9375_v50 }
 0x636   : > { %v9706_v53 = vld [vmem:[#allocation3 + $0xa0] sm:$0xff]  ;;  %v15261_v45 = vpop.f32.mrf.mxu0  ;;  %v15314_v21 = vpop.f32.mrf.mxu1 }
 0x637   : > { %10005 = vst.msk [vmem:[#allocation3 + $0xa8] sm:$0xff] %vm347_vm4, %v9973_v61  ;;  %v9972_v36 = vadd.f32 %v9893_v60, %v9706_v53  ;;  %9673 = vst.msk [vmem:[#allocation3 + $0xc0] sm:$0xff] %vm347_vm4, %v9641_v30  ;;  %v9644_v52 = vadd.f32 %v15261_v45, %v9378_v10  ;;  %v10060_v60 = vld [vmem:[#allocation3 + $0x18] sm:$0xff] }
 0x638   : > { %v9709_v8 = vld [vmem:[#allocation3 + $0xb8] sm:$0xff]  ;;  %v9588_v56 = vpop.f32.mrf.mxu0  ;;  %v9913_v27 = vpop.f32.mrf.mxu1 }
 0x639   : > { %10004 = vst.msk [vmem:[#allocation3 + $0xa0] sm:$0xff] %vm347_vm4, %v9972_v36  ;;  %v9975_v23 = vadd.f32 %v15311_v24, %v9709_v8  ;;  %9676 = vst.msk [vmem:[#allocation3 + $0xd8] sm:$0xff] %vm347_vm4, %v9644_v52  ;;  %v9643_v47 = vadd.f32 %v9588_v56, %v9377_v18  ;;  %v10059_v24 = vld [vmem:[#allocation3 + $0x10] sm:$0xff]  ;;  %v11444_v56 = vld [vmem:[%s19999_s3 + $0x18] sm:$0xf] }
 0x63a   : > { %v9708_v6 = vld [vmem:[#allocation3 + $0xb0] sm:$0xff]  ;;  %v15264_v54 = vpop.f32.mrf.mxu0  ;;  %v15317_v58 = vpop.f32.mrf.mxu1  ;;  %15492 = vmatprep.subr.msk.mxu1 %vm548_vm0, %v11444_v56 }
 0x63b   : > { %10007 = vst.msk [vmem:[#allocation3 + $0xb8] sm:$0xff] %vm347_vm4, %v9975_v23  ;;  %v9974_v31 = vadd.f32 %v9903_v20, %v9708_v6  ;;  %9675 = vst.msk [vmem:[#allocation3 + $0xd0] sm:$0xff] %vm347_vm4, %v9643_v47  ;;  %v9646_v44 = vadd.f32 %v15264_v54, %v9380_v29  ;;  %v10062_v20 = vld [vmem:[#allocation3 + $0x28] sm:$0xff]  ;;  %v10064_v23 = vld [vmem:[#allocation3 + $0x38] sm:$0xff]  ;;  %15493 = vmatpush3.msk.msra.mxu1 %vm548_vm0, %v11444_v56 }
 0x63c   : > { %v9711_v7 = vld [vmem:[#allocation3 + $0xc8] sm:$0xff]  ;;  %v9598_v49 = vpop.f32.mrf.mxu0  ;;  %v9923_v46 = vpop.f32.mrf.mxu1 }
 0x63d   : > { %10006 = vst.msk [vmem:[#allocation3 + $0xb0] sm:$0xff] %vm347_vm4, %v9974_v31  ;;  %v9977_v32 = vadd.f32 %v15314_v21, %v9711_v7  ;;  %9678 = vst.msk [vmem:[#allocation3 + $0xe8] sm:$0xff] %vm347_vm4, %v9646_v44  ;;  %v9645_v5 = vadd.f32 %v9598_v49, %v9379_v25  ;;  %v10061_v21 = vld [vmem:[#allocation3 + $0x20] sm:$0xff]  ;;  %v11442_v31 = vld [vmem:[%s19999_s3 + $0x8] sm:$0xff] }
 0x63e   : > { %v9710_v4 = vld [vmem:[#allocation3 + $0xc0] sm:$0xff]  ;;  %v15267_v2 = vpop.f32.mrf.mxu0  ;;  %v15320_v13 = vpop.f32.mrf.mxu1  ;;  %v10063_v7 = vld [vmem:[#allocation3 + $0x30] sm:$0xff] }
 0x63f   : > { %10009 = vst.msk [vmem:[#allocation3 + $0xc8] sm:$0xff] %vm347_vm4, %v9977_v32  ;;  %v9976_v11 = vadd.f32 %v9913_v27, %v9710_v4  ;;  %9677 = vst.msk [vmem:[#allocation3 + $0xe0] sm:$0xff] %vm347_vm4, %v9645_v5  ;;  %v9648_v1 = vadd.f32 %v15267_v2, %v9382_v40  ;;  %v11441_v5 = vld [vmem:[%s19999_s3] sm:$0xff]  ;;  %v10066_v40 = vld [vmem:[#allocation3 + $0x48] sm:$0xff] }
 0x640   : > { %v9713_v22 = vld [vmem:[#allocation3 + $0xd8] sm:$0xff]  ;;  %v9608_v41 = vpop.f32.mrf.mxu0  ;;  %v9933_v34 = vpop.f32.mrf.mxu1 }
 0x641   : > { %10008 = vst.msk [vmem:[#allocation3 + $0xc0] sm:$0xff] %vm347_vm4, %v9976_v11  ;;  %v9979_v55 = vadd.f32 %v15317_v58, %v9713_v22  ;;  %9680 = vst.msk [vmem:[#allocation3 + $0xf8] sm:$0xff] %vm347_vm4, %v9648_v1  ;;  %v9647_v39 = vadd.f32 %v9608_v41, %v9381_v14  ;;  %v11443_v58 = vld [vmem:[%s19999_s3 + $0x10] sm:$0xff] }
 0x642   : > { %v9712_v19 = vld [vmem:[#allocation3 + $0xd0] sm:$0xff]  ;;  %v15323_v62 = vpop.f32.mrf.mxu1  ;;  %v15334_v28 = vpop.f32.mrf.mxu0  ;;  %15494 = vmatprep.subr.mxu1 %v11443_v58  ;;  %v10065_v14 = vld [vmem:[#allocation3 + $0x40] sm:$0xff] }
 0x643   : > { %10011 = vst.msk [vmem:[#allocation3 + $0xd8] sm:$0xff] %vm347_vm4, %v9979_v55  ;;  %v9978_v3 = vadd.f32 %v9923_v46, %v9712_v19  ;;  %9679 = vst.msk [vmem:[#allocation3 + $0xf0] sm:$0xff] %vm347_vm4, %v9647_v39  ;;  %v10414_v17 = vadd.f32 %v15334_v28, %v10058_v0  ;;  %15495 = vmatpush3.msra.mxu1 %v11443_v58  ;;  %v10073_v58 = vld [vmem:[#allocation3 + $0x80] sm:$0xff] }
 0x644   : > { %v9715_v9 = vld [vmem:[#allocation3 + $0xe8] sm:$0xff]  ;;  %v9943_v35 = vpop.f32.mrf.mxu1  ;;  %v10254_v26 = vpop.f32.mrf.mxu0  ;;  %15496 = vmatprep.subr.mxu1 %v11442_v31 }
 0x645   : > { %10010 = vst.msk [vmem:[#allocation3 + $0xd0] sm:$0xff] %vm347_vm4, %v9978_v3  ;;  %v9981_v48 = vadd.f32 %v15320_v13, %v9715_v9  ;;  %10446 = vst.msk [vmem:[#allocation3 + $0x8] sm:$0xff] %vm347_vm4, %v10414_v17  ;;  %v10413_v57 = vadd.f32 %v10254_v26, %v10057_v38  ;;  %15497 = vmatpush3.msra.mxu1 %v11442_v31 }
 0x646   : > { %v9714_v43 = vld [vmem:[#allocation3 + $0xe0] sm:$0xff]  ;;  %v15337_v59 = vpop.f32.mrf.mxu0  ;;  %v15390_v15 = vpop.f32.mrf.mxu1  ;;  %15498 = vmatprep.subr.mxu1 %v11441_v5 }
 0x647   : > { %10013 = vst.msk [vmem:[#allocation3 + $0xe8] sm:$0xff] %vm347_vm4, %v9981_v48  ;;  %v9980_v16 = vadd.f32 %v9933_v34, %v9714_v43  ;;  %10445 = vst.msk [vmem:[#allocation3] sm:$0xff] %vm347_vm4, %v10413_v57  ;;  %v10416_v63 = vadd.f32 %v15337_v59, %v10060_v60  ;;  %15499 = vmatpush3.msra.mxu1 %v11441_v5  ;;  %v10070_v60 = vld [vmem:[#allocation3 + $0x68] sm:$0xff] }
 0x648   : > { %v9717_v37 = vld [vmem:[#allocation3 + $0xf8] sm:$0xff]  ;;  %v10264_v42 = vpop.f32.mrf.mxu0  ;;  %v10589_v33 = vpop.f32.mrf.mxu1 }
 0x649   : > { %10012 = vst.msk [vmem:[#allocation3 + $0xe0] sm:$0xff] %vm347_vm4, %v9980_v16  ;;  %v9983_v51 = vadd.f32 %v15323_v62, %v9717_v37  ;;  %10448 = vst.msk [vmem:[#allocation3 + $0x18] sm:$0xff] %vm347_vm4, %v10416_v63  ;;  %v10415_v50 = vadd.f32 %v10264_v42, %v10059_v24  ;;  %v10068_v62 = vld [vmem:[#allocation3 + $0x58] sm:$0xff]  ;;  %v10069_v24 = vld [vmem:[#allocation3 + $0x60] sm:$0xff] }
 0x64a   : > { %v9716_v12 = vld [vmem:[#allocation3 + $0xf0] sm:$0xff]  ;;  %v15340_v61 = vpop.f32.mrf.mxu0  ;;  %v15393_v30 = vpop.f32.mrf.mxu1 }
 0x64b   : > { %10015 = vst.msk [vmem:[#allocation3 + $0xf8] sm:$0xff] %vm347_vm4, %v9983_v51  ;;  %v9982_v53 = vadd.f32 %v9943_v35, %v9716_v12  ;;  %10447 = vst.msk [vmem:[#allocation3 + $0x10] sm:$0xff] %vm347_vm4, %v10415_v50  ;;  %v10418_v10 = vadd.f32 %v15340_v61, %v10062_v20  ;;  %v10067_v35 = vld [vmem:[#allocation3 + $0x50] sm:$0xff]  ;;  %v10072_v20 = vld [vmem:[#allocation3 + $0x78] sm:$0xff] }
 0x64c   : > { %v10483_v45 = vld [vmem:[#allocation3 + $0x8] sm:$0xff]  ;;  %v10274_v36 = vpop.f32.mrf.mxu0  ;;  %v10599_v52 = vpop.f32.mrf.mxu1 }
 0x64d   : > { %10014 = vst.msk [vmem:[#allocation3 + $0xf0] sm:$0xff] %vm347_vm4, %v9982_v53  ;;  %v10749_v8 = vadd.f32 %v15390_v15, %v10483_v45  ;;  %10450 = vst.msk [vmem:[#allocation3 + $0x28] sm:$0xff] %vm347_vm4, %v10418_v10  ;;  %v10417_v18 = vadd.f32 %v10274_v36, %v10061_v21  ;;  %v10071_v21 = vld [vmem:[#allocation3 + $0x70] sm:$0xff] }
 0x64e   : > { %v10482_v27 = vld [vmem:[#allocation3] sm:$0xff]  ;;  %v15343_v47 = vpop.f32.mrf.mxu0  ;;  %v15396_v6 = vpop.f32.mrf.mxu1 }
 0x64f   : > { %10781 = vst.msk [vmem:[#allocation3 + $0x8] sm:$0xff] %vm347_vm4, %v10749_v8  ;;  %v10748_v29 = vadd.f32 %v10589_v33, %v10482_v27  ;;  %10449 = vst.msk [vmem:[#allocation3 + $0x20] sm:$0xff] %vm347_vm4, %v10417_v18  ;;  %v10420_v54 = vadd.f32 %v15343_v47, %v10064_v23  ;;  %v10074_v27 = vld [vmem:[#allocation3 + $0x88] sm:$0xff] }
 0x650   : > { %v10485_v44 = vld [vmem:[#allocation3 + $0x18] sm:$0xff]  ;;  %v10284_v25 = vpop.f32.mrf.mxu0  ;;  %v10609_v49 = vpop.f32.mrf.mxu1 }
 0x651   : > { %10780 = vst.msk [vmem:[#allocation3] sm:$0xff] %vm347_vm4, %v10748_v29  ;;  %v10751_v46 = vadd.f32 %v15393_v30, %v10485_v44  ;;  %10452 = vst.msk [vmem:[#allocation3 + $0x38] sm:$0xff] %vm347_vm4, %v10420_v54  ;;  %v10419_v32 = vadd.f32 %v10284_v25, %v10063_v7 }
 0x652   : > { %v10484_v4 = vld [vmem:[#allocation3 + $0x10] sm:$0xff]  ;;  %v15346_v2 = vpop.f32.mrf.mxu0  ;;  %v15399_v13 = vpop.f32.mrf.mxu1 }
 0x653   : > { %10783 = vst.msk [vmem:[#allocation3 + $0x18] sm:$0xff] %vm347_vm4, %v10751_v46  ;;  %v10750_v11 = vadd.f32 %v10599_v52, %v10484_v4  ;;  %10451 = vst.msk [vmem:[#allocation3 + $0x30] sm:$0xff] %vm347_vm4, %v10419_v32  ;;  %v10422_v1 = vadd.f32 %v15346_v2, %v10066_v40  ;;  %v10076_v46 = vld [vmem:[#allocation3 + $0x98] sm:$0xff] }
 0x654   : > { %v10487_v22 = vld [vmem:[#allocation3 + $0x28] sm:$0xff]  ;;  %v10294_v41 = vpop.f32.mrf.mxu0  ;;  %v10619_v34 = vpop.f32.mrf.mxu1 }
 0x655   : > { %10782 = vst.msk [vmem:[#allocation3 + $0x10] sm:$0xff] %vm347_vm4, %v10750_v11  ;;  %v10753_v55 = vadd.f32 %v15396_v6, %v10487_v22  ;;  %10454 = vst.msk [vmem:[#allocation3 + $0x48] sm:$0xff] %vm347_vm4, %v10422_v1  ;;  %v10421_v39 = vadd.f32 %v10294_v41, %v10065_v14 }
 0x656   : > { %v10486_v19 = vld [vmem:[#allocation3 + $0x20] sm:$0xff]  ;;  %v15349_v0 = vpop.f32.mrf.mxu0  ;;  %v15402_v28 = vpop.f32.mrf.mxu1 }
 0x657   : > { %10785 = vst.msk [vmem:[#allocation3 + $0x28] sm:$0xff] %vm347_vm4, %v10753_v55  ;;  %v10752_v3 = vadd.f32 %v10609_v49, %v10486_v19  ;;  %10453 = vst.msk [vmem:[#allocation3 + $0x40] sm:$0xff] %vm347_vm4, %v10421_v39  ;;  %v10424_v17 = vadd.f32 %v15349_v0, %v10068_v62 }
 0x658   : > { %v10489_v9 = vld [vmem:[#allocation3 + $0x38] sm:$0xff]  ;;  %v10304_v38 = vpop.f32.mrf.mxu0  ;;  %v10629_v26 = vpop.f32.mrf.mxu1 }
 0x659   : > { %10784 = vst.msk [vmem:[#allocation3 + $0x20] sm:$0xff] %vm347_vm4, %v10752_v3  ;;  %v10755_v48 = vadd.f32 %v15399_v13, %v10489_v9  ;;  %10456 = vst.msk [vmem:[#allocation3 + $0x58] sm:$0xff] %vm347_vm4, %v10424_v17  ;;  %v10423_v57 = vadd.f32 %v10304_v38, %v10067_v35  ;;  %v10075_v13 = vld [vmem:[#allocation3 + $0x90] sm:$0xff] }
 0x65a   : > { %v10488_v43 = vld [vmem:[#allocation3 + $0x30] sm:$0xff]  ;;  %v15352_v59 = vpop.f32.mrf.mxu0  ;;  %v15405_v15 = vpop.f32.mrf.mxu1 }
 0x65b   : > { %10787 = vst.msk [vmem:[#allocation3 + $0x38] sm:$0xff] %vm347_vm4, %v10755_v48  ;;  %v10754_v16 = vadd.f32 %v10619_v34, %v10488_v43  ;;  %10455 = vst.msk [vmem:[#allocation3 + $0x50] sm:$0xff] %vm347_vm4, %v10423_v57  ;;  %v10426_v63 = vadd.f32 %v15352_v59, %v10070_v60  ;;  %v10078_v34 = vld [vmem:[#allocation3 + $0xa8] sm:$0xff] }
 0x65c   : > { %v10491_v37 = vld [vmem:[#allocation3 + $0x48] sm:$0xff]  ;;  %v10314_v42 = vpop.f32.mrf.mxu0  ;;  %v10639_v33 = vpop.f32.mrf.mxu1 }
 0x65d   : > { %10786 = vst.msk [vmem:[#allocation3 + $0x30] sm:$0xff] %vm347_vm4, %v10754_v16  ;;  %v10757_v51 = vadd.f32 %v15402_v28, %v10491_v37  ;;  %10458 = vst.msk [vmem:[#allocation3 + $0x68] sm:$0xff] %vm347_vm4, %v10426_v63  ;;  %v10425_v50 = vadd.f32 %v10314_v42, %v10069_v24  ;;  %v10077_v28 = vld [vmem:[#allocation3 + $0xa0] sm:$0xff] }
 0x65e   : > { %v10490_v12 = vld [vmem:[#allocation3 + $0x40] sm:$0xff]  ;;  %v15355_v61 = vpop.f32.mrf.mxu0  ;;  %v15408_v30 = vpop.f32.mrf.mxu1 }
 0x65f   : > { %10789 = vst.msk [vmem:[#allocation3 + $0x48] sm:$0xff] %vm347_vm4, %v10757_v51  ;;  %v10756_v53 = vadd.f32 %v10629_v26, %v10490_v12  ;;  %10457 = vst.msk [vmem:[#allocation3 + $0x60] sm:$0xff] %vm347_vm4, %v10425_v50  ;;  %v10428_v10 = vadd.f32 %v15355_v61, %v10072_v20  ;;  %v10080_v26 = vld [vmem:[#allocation3 + $0xb8] sm:$0xff] }
 0x660   : > { %v10493_v45 = vld [vmem:[#allocation3 + $0x58] sm:$0xff]  ;;  %v10324_v36 = vpop.f32.mrf.mxu0  ;;  %v10649_v52 = vpop.f32.mrf.mxu1 }
 0x661   : > { %10788 = vst.msk [vmem:[#allocation3 + $0x40] sm:$0xff] %vm347_vm4, %v10756_v53  ;;  %v10759_v8 = vadd.f32 %v15405_v15, %v10493_v45  ;;  %10460 = vst.msk [vmem:[#allocation3 + $0x78] sm:$0xff] %vm347_vm4, %v10428_v10  ;;  %v10427_v18 = vadd.f32 %v10324_v36, %v10071_v21  ;;  %v10079_v15 = vld [vmem:[#allocation3 + $0xb0] sm:$0xff] }
 0x662   : > { %v10492_v56 = vld [vmem:[#allocation3 + $0x50] sm:$0xff]  ;;  %v15358_v23 = vpop.f32.mrf.mxu0  ;;  %v15411_v47 = vpop.f32.mrf.mxu1 }
 0x663   : > { %10791 = vst.msk [vmem:[#allocation3 + $0x58] sm:$0xff] %vm347_vm4, %v10759_v8  ;;  %v10758_v6 = vadd.f32 %v10639_v33, %v10492_v56  ;;  %10459 = vst.msk [vmem:[#allocation3 + $0x70] sm:$0xff] %vm347_vm4, %v10427_v18  ;;  %v10430_v29 = vadd.f32 %v15358_v23, %v10074_v27  ;;  %v10082_v33 = vld [vmem:[#allocation3 + $0xc8] sm:$0xff] }
 0x664   : > { %v10495_v54 = vld [vmem:[#allocation3 + $0x68] sm:$0xff]  ;;  %v10334_v31 = vpop.f32.mrf.mxu0  ;;  %v10659_v44 = vpop.f32.mrf.mxu1 }
 0x665   : > { %10790 = vst.msk [vmem:[#allocation3 + $0x50] sm:$0xff] %vm347_vm4, %v10758_v6  ;;  %v10761_v7 = vadd.f32 %v15408_v30, %v10495_v54  ;;  %10462 = vst.msk [vmem:[#allocation3 + $0x88] sm:$0xff] %vm347_vm4, %v10430_v29  ;;  %v10429_v25 = vadd.f32 %v10334_v31, %v10073_v58  ;;  %v10081_v30 = vld [vmem:[#allocation3 + $0xc0] sm:$0xff] }
 0x666   : > { %v10494_v49 = vld [vmem:[#allocation3 + $0x60] sm:$0xff]  ;;  %v15361_v32 = vpop.f32.mrf.mxu0  ;;  %v15414_v5 = vpop.f32.mrf.mxu1 }
 0x667   : > { %10793 = vst.msk [vmem:[#allocation3 + $0x68] sm:$0xff] %vm347_vm4, %v10761_v7  ;;  %v10760_v4 = vadd.f32 %v10649_v52, %v10494_v49  ;;  %10461 = vst.msk [vmem:[#allocation3 + $0x80] sm:$0xff] %vm347_vm4, %v10429_v25  ;;  %v10432_v40 = vadd.f32 %v15361_v32, %v10076_v46  ;;  %v10084_v52 = vld [vmem:[#allocation3 + $0xd8] sm:$0xff] }
 0x668   : > { %v10497_v2 = vld [vmem:[#allocation3 + $0x78] sm:$0xff]  ;;  %v10344_v11 = vpop.f32.mrf.mxu0  ;;  %v10669_v1 = vpop.f32.mrf.mxu1 }
 0x669   : > { %10792 = vst.msk [vmem:[#allocation3 + $0x60] sm:$0xff] %vm347_vm4, %v10760_v4  ;;  %v10763_v22 = vadd.f32 %v15411_v47, %v10497_v2  ;;  %10464 = vst.msk [vmem:[#allocation3 + $0x98] sm:$0xff] %vm347_vm4, %v10432_v40  ;;  %v10431_v14 = vadd.f32 %v10344_v11, %v10075_v13  ;;  %v10083_v47 = vld [vmem:[#allocation3 + $0xd0] sm:$0xff] }
 0x66a   : > { %v10496_v41 = vld [vmem:[#allocation3 + $0x70] sm:$0xff]  ;;  %v15364_v55 = vpop.f32.mrf.mxu0  ;;  %v15417_v39 = vpop.f32.mrf.mxu1 }
 0x66b   : > { %10795 = vst.msk [vmem:[#allocation3 + $0x78] sm:$0xff] %vm347_vm4, %v10763_v22  ;;  %v10762_v19 = vadd.f32 %v10659_v44, %v10496_v41  ;;  %10463 = vst.msk [vmem:[#allocation3 + $0x90] sm:$0xff] %vm347_vm4, %v10431_v14  ;;  %v10434_v62 = vadd.f32 %v15364_v55, %v10078_v34  ;;  %v10086_v44 = vld [vmem:[#allocation3 + $0xe8] sm:$0xff] }
 0x66c   : > { %v10499_v0 = vld [vmem:[#allocation3 + $0x88] sm:$0xff]  ;;  %v10354_v3 = vpop.f32.mrf.mxu0  ;;  %v10679_v17 = vpop.f32.mrf.mxu1 }
 0x66d   : > { %10794 = vst.msk [vmem:[#allocation3 + $0x70] sm:$0xff] %vm347_vm4, %v10762_v19  ;;  %v10765_v9 = vadd.f32 %v15414_v5, %v10499_v0  ;;  %10466 = vst.msk [vmem:[#allocation3 + $0xa8] sm:$0xff] %vm347_vm4, %v10434_v62  ;;  %v10433_v35 = vadd.f32 %v10354_v3, %v10077_v28  ;;  %v10085_v5 = vld [vmem:[#allocation3 + $0xe0] sm:$0xff] }
 0x66e   : > { %v10498_v38 = vld [vmem:[#allocation3 + $0x80] sm:$0xff]  ;;  %v15367_v48 = vpop.f32.mrf.mxu0  ;;  %v15420_v57 = vpop.f32.mrf.mxu1 }
 0x66f   : > { %10797 = vst.msk [vmem:[#allocation3 + $0x88] sm:$0xff] %vm347_vm4, %v10765_v9  ;;  %v10764_v43 = vadd.f32 %v10669_v1, %v10498_v38  ;;  %10465 = vst.msk [vmem:[#allocation3 + $0xa0] sm:$0xff] %vm347_vm4, %v10433_v35  ;;  %v10436_v60 = vadd.f32 %v15367_v48, %v10080_v26  ;;  %v10088_v1 = vld [vmem:[#allocation3 + $0xf8] sm:$0xff]  ;;  %v10817_v48 = vld [vmem:[#allocation3] sm:$0xff] }
 0x670   : > { %v10501_v59 = vld [vmem:[#allocation3 + $0x98] sm:$0xff]  ;;  %v10364_v16 = vpop.f32.mrf.mxu0  ;;  %v10689_v63 = vpop.f32.mrf.mxu1 }
 0x671   : > { %10796 = vst.msk [vmem:[#allocation3 + $0x80] sm:$0xff] %vm347_vm4, %v10764_v43  ;;  %v10767_v37 = vadd.f32 %v15417_v39, %v10501_v59  ;;  %10468 = vst.msk [vmem:[#allocation3 + $0xb8] sm:$0xff] %vm347_vm4, %v10436_v60  ;;  %v10435_v24 = vadd.f32 %v10364_v16, %v10079_v15  ;;  %v10087_v39 = vld [vmem:[#allocation3 + $0xf0] sm:$0xff]  ;;  %v10820_v16 = vld [vmem:[#allocation3 + $0x18] sm:$0xff] }
 0x672   : > { %v10500_v42 = vld [vmem:[#allocation3 + $0x90] sm:$0xff]  ;;  %v15370_v51 = vpop.f32.mrf.mxu0  ;;  %v15423_v50 = vpop.f32.mrf.mxu1 }
 0x673   : > { %10799 = vst.msk [vmem:[#allocation3 + $0x98] sm:$0xff] %vm347_vm4, %v10767_v37  ;;  %v10766_v12 = vadd.f32 %v10679_v17, %v10500_v42  ;;  %10467 = vst.msk [vmem:[#allocation3 + $0xb0] sm:$0xff] %vm347_vm4, %v10435_v24  ;;  %v10438_v20 = vadd.f32 %v15370_v51, %v10082_v33  ;;  %v10818_v17 = vld [vmem:[#allocation3 + $0x8] sm:$0xff]  ;;  %v10819_v33 = vld [vmem:[#allocation3 + $0x10] sm:$0xff] }
 0x674   : > { %v10503_v61 = vld [vmem:[#allocation3 + $0xa8] sm:$0xff]  ;;  %v10374_v53 = vpop.f32.mrf.mxu0  ;;  %v10699_v10 = vpop.f32.mrf.mxu1 }
 0x675   : > { %10798 = vst.msk [vmem:[#allocation3 + $0x90] sm:$0xff] %vm347_vm4, %v10766_v12  ;;  %v10769_v45 = vadd.f32 %v15420_v57, %v10503_v61  ;;  %10470 = vst.msk [vmem:[#allocation3 + $0xc8] sm:$0xff] %vm347_vm4, %v10438_v20  ;;  %v10437_v21 = vadd.f32 %v10374_v53, %v10081_v30  ;;  %v10822_v30 = vld [vmem:[#allocation3 + $0x28] sm:$0xff] }
 0x676   : > { %v10502_v36 = vld [vmem:[#allocation3 + $0xa0] sm:$0xff]  ;;  %v15373_v8 = vpop.f32.mrf.mxu0  ;;  %v15426_v18 = vpop.f32.mrf.mxu1 }
 0x677   : > { %10801 = vst.msk [vmem:[#allocation3 + $0xa8] sm:$0xff] %vm347_vm4, %v10769_v45  ;;  %v10768_v56 = vadd.f32 %v10689_v63, %v10502_v36  ;;  %10469 = vst.msk [vmem:[#allocation3 + $0xc0] sm:$0xff] %vm347_vm4, %v10437_v21  ;;  %v10440_v27 = vadd.f32 %v15373_v8, %v10084_v52  ;;  %v10821_v36 = vld [vmem:[#allocation3 + $0x20] sm:$0xff] }
 0x678   : > { %v10505_v23 = vld [vmem:[#allocation3 + $0xb8] sm:$0xff]  ;;  %v10384_v6 = vpop.f32.mrf.mxu0  ;;  %v10709_v29 = vpop.f32.mrf.mxu1 }
 0x679   : > { %10800 = vst.msk [vmem:[#allocation3 + $0xa0] sm:$0xff] %vm347_vm4, %v10768_v56  ;;  %v10771_v54 = vadd.f32 %v15423_v50, %v10505_v23  ;;  %10472 = vst.msk [vmem:[#allocation3 + $0xd8] sm:$0xff] %vm347_vm4, %v10440_v27  ;;  %v10439_v58 = vadd.f32 %v10384_v6, %v10083_v47  ;;  %v10824_v27 = vld [vmem:[#allocation3 + $0x38] sm:$0xff] }
 0x67a   : > { %v10504_v31 = vld [vmem:[#allocation3 + $0xb0] sm:$0xff]  ;;  %v15376_v7 = vpop.f32.mrf.mxu0  ;;  %v15429_v25 = vpop.f32.mrf.mxu1 }
 0x67b   : > { %10803 = vst.msk [vmem:[#allocation3 + $0xb8] sm:$0xff] %vm347_vm4, %v10771_v54  ;;  %v10770_v49 = vadd.f32 %v10699_v10, %v10504_v31  ;;  %10471 = vst.msk [vmem:[#allocation3 + $0xd0] sm:$0xff] %vm347_vm4, %v10439_v58  ;;  %v10442_v46 = vadd.f32 %v15376_v7, %v10086_v44  ;;  %v19692_v10 = vld [vmem:[%s19998_s2 + $0x2] ss:$0 sm:$0xff] }
 0x67c   : > { %v10507_v32 = vld [vmem:[#allocation3 + $0xc8] sm:$0xff]  ;;  %v10394_v4 = vpop.f32.mrf.mxu0  ;;  %v10719_v40 = vpop.f32.mrf.mxu1  ;;  %v10823_v58 = vld [vmem:[#allocation3 + $0x30] sm:$0xff] }
 0x67d   : > { %10802 = vst.msk [vmem:[#allocation3 + $0xb0] sm:$0xff] %vm347_vm4, %v10770_v49  ;;  %v10773_v2 = vadd.f32 %v15426_v18, %v10507_v32  ;;  %10474 = vst.msk [vmem:[#allocation3 + $0xe8] sm:$0xff] %vm347_vm4, %v10442_v46  ;;  %v10441_v13 = vadd.f32 %v10394_v4, %v10085_v5  ;;  %v10826_v46 = vld [vmem:[#allocation3 + $0x48] sm:$0xff] }
 0x67e   : > { %v10506_v11 = vld [vmem:[#allocation3 + $0xc0] sm:$0xff]  ;;  %v15379_v22 = vpop.f32.mrf.mxu0  ;;  %v15432_v14 = vpop.f32.mrf.mxu1 }
 0x67f   : > { %10805 = vst.msk [vmem:[#allocation3 + $0xc8] sm:$0xff] %vm347_vm4, %v10773_v2  ;;  %v10772_v41 = vadd.f32 %v10709_v29, %v10506_v11  ;;  %10473 = vst.msk [vmem:[#allocation3 + $0xe0] sm:$0xff] %vm347_vm4, %v10441_v13  ;;  %v10444_v34 = vadd.f32 %v15379_v22, %v10088_v1  ;;  %v10825_v13 = vld [vmem:[#allocation3 + $0x40] sm:$0xff] }
 0x680   : > { %v10509_v55 = vld [vmem:[#allocation3 + $0xd8] sm:$0xff]  ;;  %v10404_v19 = vpop.f32.mrf.mxu0  ;;  %v10729_v3 = vpop.f32.mrf.mxu1 }
 0x681   : > { %10804 = vst.msk [vmem:[#allocation3 + $0xc0] sm:$0xff] %vm347_vm4, %v10772_v41  ;;  %v10775_v62 = vadd.f32 %v15429_v25, %v10509_v55  ;;  %10476 = vst.msk [vmem:[#allocation3 + $0xf8] sm:$0xff] %vm347_vm4, %v10444_v34  ;;  %v10443_v0 = vadd.f32 %v10404_v19, %v10087_v39  ;;  %v10828_v34 = vld [vmem:[#allocation3 + $0x58] sm:$0xff] }
 0x682   : > { %v10508_v28 = vld [vmem:[#allocation3 + $0xd0] sm:$0xff]  ;;  %v15446_v9 = vpop.f32.mrf.mxu0  ;;  %v15435_v15 = vpop.f32.mrf.mxu1 }
 0x683   : > { %10807 = vst.msk [vmem:[#allocation3 + $0xd8] sm:$0xff] %vm347_vm4, %v10775_v62  ;;  %v10774_v35 = vadd.f32 %v10719_v40, %v10508_v28  ;;  %10475 = vst.msk [vmem:[#allocation3 + $0xf0] sm:$0xff] %vm347_vm4, %v10443_v0  ;;  %v11084_v38 = vadd.f32 %v15446_v9, %v10818_v17  ;;  %v10827_v28 = vld [vmem:[#allocation3 + $0x50] sm:$0xff] }
 0x684   : > { %v10511_v26 = vld [vmem:[#allocation3 + $0xe8] sm:$0xff]  ;;  %v10924_v57 = vpop.f32.mrf.mxu0  ;;  %v10739_v61 = vpop.f32.mrf.mxu1 }
 0x685   : > { %10806 = vst.msk [vmem:[#allocation3 + $0xd0] sm:$0xff] %vm347_vm4, %v10774_v35  ;;  %v10777_v43 = vadd.f32 %v15432_v14, %v10511_v26  ;;  %11116 = vst.msk [vmem:[#allocation3 + $0x8] sm:$0xff] %vm347_vm4, %v11084_v38  ;;  %v11083_v60 = vadd.f32 %v10924_v57, %v10817_v48  ;;  %v10830_v26 = vld [vmem:[#allocation3 + $0x68] sm:$0xff] }
 0x686   : > { %v10510_v59 = vld [vmem:[#allocation3 + $0xe0] sm:$0xff]  ;;  %v15449_v63 = vpop.f32.mrf.mxu0 }
 0x687   : > { %10809 = vst.msk [vmem:[#allocation3 + $0xe8] sm:$0xff] %vm347_vm4, %v10777_v43  ;;  %v10776_v37 = vadd.f32 %v10729_v3, %v10510_v59  ;;  %11115 = vst.msk [vmem:[#allocation3] sm:$0xff] %vm347_vm4, %v11083_v60  ;;  %v11086_v24 = vadd.f32 %v15449_v63, %v10820_v16 }
 0x688   : > { %v10513_v42 = vld [vmem:[#allocation3 + $0xf8] sm:$0xff]  ;;  %v10934_v51 = vpop.f32.mrf.mxu0 }
 0x689   : > { %10808 = vst.msk [vmem:[#allocation3 + $0xe0] sm:$0xff] %vm347_vm4, %v10776_v37  ;;  %v10779_v50 = vadd.f32 %v15435_v15, %v10513_v42  ;;  %11118 = vst.msk [vmem:[#allocation3 + $0x18] sm:$0xff] %vm347_vm4, %v11086_v24  ;;  %v11085_v12 = vadd.f32 %v10934_v51, %v10819_v33  ;;  %v10829_v15 = vld [vmem:[#allocation3 + $0x60] sm:$0xff]  ;;  %v10832_v33 = vld [vmem:[#allocation3 + $0x78] sm:$0xff] }
 0x68a   : > { %v10512_v20 = vld [vmem:[#allocation3 + $0xf0] sm:$0xff]  ;;  %v15452_v53 = vpop.f32.mrf.mxu0 }
 0x68b   : > { %10811 = vst.msk [vmem:[#allocation3 + $0xf8] sm:$0xff] %vm347_vm4, %v10779_v50  ;;  %v10778_v45 = vadd.f32 %v10739_v61, %v10512_v20  ;;  %11117 = vst.msk [vmem:[#allocation3 + $0x10] sm:$0xff] %vm347_vm4, %v11085_v12  ;;  %v11088_v21 = vadd.f32 %v15452_v53, %v10822_v30  ;;  %v10831_v30 = vld [vmem:[#allocation3 + $0x70] sm:$0xff] }
 0x68c   : > { %v10944_v52 = vpop.f32.mrf.mxu0  ;;  %v11148_v8 = vld [vmem:[#allocation3 + $0x8] sm:$0xff] }
 0x68d   : > { %10810 = vst.msk [vmem:[#allocation3 + $0xf0] sm:$0xff] %vm347_vm4, %v10778_v45  ;;  %11120 = vst.msk [vmem:[#allocation3 + $0x28] sm:$0xff] %vm347_vm4, %v11088_v21  ;;  %v11087_v18 = vadd.f32 %v10944_v52, %v10821_v36  ;;  %v11185_v56 = vadd.f32 %v19692_v10, %v11148_v8  ;;  %v10834_v8 = vld [vmem:[#allocation3 + $0x88] sm:$0xff] }
 0x68e   : > { %v15455_v23 = vpop.f32.mrf.mxu0  ;;  %v11147_v47 = vld [vmem:[#allocation3] sm:$0xff] }
 0x68f   : > { %11119 = vst.msk [vmem:[#allocation3 + $0x20] sm:$0xff] %vm347_vm4, %v11087_v18  ;;  %v11090_v6 = vadd.f32 %v15455_v23, %v10824_v27  ;;  %v11217_v29 = vmax.f32 %v11185_v56, 0.0  ;;  %v11184_v54 = vadd.f32 %v19692_v10, %v11147_v47 }
 0x690   : > { %v10954_v31 = vpop.f32.mrf.mxu0  ;;  %v11150_v44 = vld [vmem:[#allocation3 + $0x18] sm:$0xff] }
 0x691   : > { %11122 = vst.msk [vmem:[#allocation3 + $0x38] sm:$0xff] %vm347_vm4, %v11090_v6  ;;  %v11089_v7 = vadd.f32 %v10954_v31, %v10823_v58  ;;  %11282 = vrot.lane.b32.xlu1 %v11217_v29, %s15571_s24  ;;  %v11216_v25 = vmax.f32 %v11184_v54, 0.0  ;;  %v11187_v49 = vadd.f32 %v19692_v10, %v11150_v44  ;;  %v10833_v6 = vld [vmem:[#allocation3 + $0x80] sm:$0xff] }
 0x692   : > { %v15458_v32 = vpop.f32.mrf.mxu0  ;;  %v11149_v5 = vld [vmem:[#allocation3 + $0x10] sm:$0xff] }
 0x693   : > { %11121 = vst.msk [vmem:[#allocation3 + $0x30] sm:$0xff] %vm347_vm4, %v11089_v7  ;;  %v11092_v4 = vadd.f32 %v15458_v32, %v10826_v46  ;;  %11280 = vrot.lane.b32.xlu0 %v11216_v25, %s15571_s24  ;;  %v11219_v40 = vmax.f32 %v11187_v49, 0.0  ;;  %v11186_v2 = vadd.f32 %v19692_v10, %v11149_v5  ;;  %v10836_v7 = vld [vmem:[#allocation3 + $0x98] sm:$0xff] }
 0x694   : > { %v10964_v11 = vpop.f32.mrf.mxu0  ;;  %v11152_v1 = vld [vmem:[#allocation3 + $0x28] sm:$0xff] }
 0x695   : > { %11124 = vst.msk [vmem:[#allocation3 + $0x48] sm:$0xff] %vm347_vm4, %v11092_v4  ;;  %v11091_v22 = vadd.f32 %v10964_v11, %v10825_v13  ;;  %11286 = vrot.lane.b32.xlu1 %v11219_v40, %s15571_s24  ;;  %v11218_v14 = vmax.f32 %v11186_v2, 0.0  ;;  %v11189_v41 = vadd.f32 %v19692_v10, %v11152_v1  ;;  %v10835_v4 = vld [vmem:[#allocation3 + $0x90] sm:$0xff] }
 0x696   : > { %v15461_v55 = vpop.f32.mrf.mxu0  ;;  %v11151_v39 = vld [vmem:[#allocation3 + $0x20] sm:$0xff] }
 0x697   : > { %11123 = vst.msk [vmem:[#allocation3 + $0x40] sm:$0xff] %vm347_vm4, %v11091_v22  ;;  %v11094_v19 = vadd.f32 %v15461_v55, %v10828_v34  ;;  %11284 = vrot.lane.b32.xlu0 %v11218_v14, %s15571_s24  ;;  %v11221_v62 = vmax.f32 %v11189_v41, 0.0  ;;  %v11188_v0 = vadd.f32 %v19692_v10, %v11151_v39  ;;  %v10838_v22 = vld [vmem:[#allocation3 + $0xa8] sm:$0xff] }
 0x698   : > { %v10974_v3 = vpop.f32.mrf.mxu0  ;;  %v11154_v17 = vld [vmem:[#allocation3 + $0x38] sm:$0xff] }
 0x699   : > { %11126 = vst.msk [vmem:[#allocation3 + $0x58] sm:$0xff] %vm347_vm4, %v11094_v19  ;;  %v11093_v9 = vadd.f32 %v10974_v3, %v10827_v28  ;;  %11290 = vrot.lane.b32.xlu1 %v11221_v62, %s15571_s24  ;;  %v11220_v35 = vmax.f32 %v11188_v0, 0.0  ;;  %v11191_v38 = vadd.f32 %v19692_v10, %v11154_v17  ;;  %v10837_v19 = vld [vmem:[#allocation3 + $0xa0] sm:$0xff] }
 0x69a   : > { %v15464_v48 = vpop.f32.mrf.mxu0  ;;  %v11153_v57 = vld [vmem:[#allocation3 + $0x30] sm:$0xff] }
 0x69b   : > { %11125 = vst.msk [vmem:[#allocation3 + $0x50] sm:$0xff] %vm347_vm4, %v11093_v9  ;;  %v11096_v43 = vadd.f32 %v15464_v48, %v10830_v26  ;;  %11288 = vrot.lane.b32.xlu0 %v11220_v35, %s15571_s24  ;;  %v11223_v60 = vmax.f32 %v11191_v38, 0.0  ;;  %v11190_v59 = vadd.f32 %v19692_v10, %v11153_v57  ;;  %v10840_v9 = vld [vmem:[#allocation3 + $0xb8] sm:$0xff] }
 0x69c   : > { %v10984_v16 = vpop.f32.mrf.mxu0  ;;  %v11156_v63 = vld [vmem:[#allocation3 + $0x48] sm:$0xff] }
 0x69d   : > { %11128 = vst.msk [vmem:[#allocation3 + $0x68] sm:$0xff] %vm347_vm4, %v11096_v43  ;;  %v11095_v37 = vadd.f32 %v10984_v16, %v10829_v15  ;;  %11294 = vrot.lane.b32.xlu1 %v11223_v60, %s15571_s24  ;;  %v11222_v24 = vmax.f32 %v11190_v59, 0.0  ;;  %v11193_v42 = vadd.f32 %v19692_v10, %v11156_v63  ;;  %v10839_v43 = vld [vmem:[#allocation3 + $0xb0] sm:$0xff] }
 0x69e   : > { %v15467_v51 = vpop.f32.mrf.mxu0  ;;  %v11155_v50 = vld [vmem:[#allocation3 + $0x40] sm:$0xff] }
 0x69f   : > { %11127 = vst.msk [vmem:[#allocation3 + $0x60] sm:$0xff] %vm347_vm4, %v11095_v37  ;;  %v11098_v12 = vadd.f32 %v15467_v51, %v10832_v33  ;;  %11292 = vrot.lane.b32.xlu0 %v11222_v24, %s15571_s24  ;;  %v11225_v20 = vmax.f32 %v11193_v42, 0.0  ;;  %v11192_v61 = vadd.f32 %v19692_v10, %v11155_v50  ;;  %v10842_v37 = vld [vmem:[#allocation3 + $0xc8] sm:$0xff] }
 0x6a0   : > { %v10994_v53 = vpop.f32.mrf.mxu0  ;;  %v11158_v45 = vld [vmem:[#allocation3 + $0x58] sm:$0xff] }
 0x6a1   : > { %11130 = vst.msk [vmem:[#allocation3 + $0x78] sm:$0xff] %vm347_vm4, %v11098_v12  ;;  %v11097_v21 = vadd.f32 %v10994_v53, %v10831_v30  ;;  %11298 = vrot.lane.b32.xlu1 %v11225_v20, %s15571_s24  ;;  %v11224_v36 = vmax.f32 %v11192_v61, 0.0  ;;  %v11195_v52 = vadd.f32 %v19692_v10, %v11158_v45  ;;  %v10841_v12 = vld [vmem:[#allocation3 + $0xc0] sm:$0xff] }
 0x6a2   : > { %v15470_v18 = vpop.f32.mrf.mxu0  ;;  %v11157_v56 = vld [vmem:[#allocation3 + $0x50] sm:$0xff] }
 0x6a3   : > { %11129 = vst.msk [vmem:[#allocation3 + $0x70] sm:$0xff] %vm347_vm4, %v11097_v21  ;;  %v11100_v27 = vadd.f32 %v15470_v18, %v10834_v8  ;;  %11296 = vrot.lane.b32.xlu0 %v11224_v36, %s15571_s24  ;;  %v11227_v23 = vmax.f32 %v11195_v52, 0.0  ;;  %v11194_v47 = vadd.f32 %v19692_v10, %v11157_v56  ;;  %v10844_v21 = vld [vmem:[#allocation3 + $0xd8] sm:$0xff] }
 0x6a4   : > { %v11004_v29 = vpop.f32.mrf.mxu0  ;;  %v11160_v54 = vld [vmem:[#allocation3 + $0x68] sm:$0xff] }
 0x6a5   : > { %11132 = vst.msk [vmem:[#allocation3 + $0x88] sm:$0xff] %vm347_vm4, %v11100_v27  ;;  %v11099_v58 = vadd.f32 %v11004_v29, %v10833_v6  ;;  %11302 = vrot.lane.b32.xlu1 %v11227_v23, %s15571_s24  ;;  %v11226_v31 = vmax.f32 %v11194_v47, 0.0  ;;  %v11197_v44 = vadd.f32 %v19692_v10, %v11160_v54  ;;  %v10843_v27 = vld [vmem:[#allocation3 + $0xd0] sm:$0xff] }
 0x6a6   : > { %v15473_v25 = vpop.f32.mrf.mxu0  ;;  %v11159_v49 = vld [vmem:[#allocation3 + $0x60] sm:$0xff] }
 0x6a7   : > { %11131 = vst.msk [vmem:[#allocation3 + $0x80] sm:$0xff] %vm347_vm4, %v11099_v58  ;;  %v11102_v46 = vadd.f32 %v15473_v25, %v10836_v7  ;;  %11300 = vrot.lane.b32.xlu0 %v11226_v31, %s15571_s24  ;;  %v11229_v32 = vmax.f32 %v11197_v44, 0.0  ;;  %v11196_v5 = vadd.f32 %v19692_v10, %v11159_v49  ;;  %v10846_v58 = vld [vmem:[#allocation3 + $0xe8] sm:$0xff] }
 0x6a8   : > { %v11014_v40 = vpop.f32.mrf.mxu0  ;;  %v11162_v2 = vld [vmem:[#allocation3 + $0x78] sm:$0xff] }
 0x6a9   : > { %11134 = vst.msk [vmem:[#allocation3 + $0x98] sm:$0xff] %vm347_vm4, %v11102_v46  ;;  %v11101_v13 = vadd.f32 %v11014_v40, %v10835_v4  ;;  %11306 = vrot.lane.b32.xlu1 %v11229_v32, %s15571_s24  ;;  %v11228_v11 = vmax.f32 %v11196_v5, 0.0  ;;  %v11199_v1 = vadd.f32 %v19692_v10, %v11162_v2  ;;  %v10845_v46 = vld [vmem:[#allocation3 + $0xe0] sm:$0xff] }
 0x6aa   : > { %v15476_v14 = vpop.f32.mrf.mxu0  ;;  %v11161_v41 = vld [vmem:[#allocation3 + $0x70] sm:$0xff] }
 0x6ab   : > { %11133 = vst.msk [vmem:[#allocation3 + $0x90] sm:$0xff] %vm347_vm4, %v11101_v13  ;;  %v11104_v34 = vadd.f32 %v15476_v14, %v10838_v22  ;;  %11304 = vrot.lane.b32.xlu0 %v11228_v11, %s15571_s24  ;;  %v11231_v55 = vmax.f32 %v11199_v1, 0.0  ;;  %v11198_v39 = vadd.f32 %v19692_v10, %v11161_v41  ;;  %v10848_v13 = vld [vmem:[#allocation3 + $0xf8] sm:$0xff] }
 0x6ac   : > { %v11024_v62 = vpop.f32.mrf.mxu0  ;;  %v11164_v0 = vld [vmem:[#allocation3 + $0x88] sm:$0xff] }
 0x6ad   : > { %11136 = vst.msk [vmem:[#allocation3 + $0xa8] sm:$0xff] %vm347_vm4, %v11104_v34  ;;  %v11103_v28 = vadd.f32 %v11024_v62, %v10837_v19  ;;  %11310 = vrot.lane.b32.xlu1 %v11231_v55, %s15571_s24  ;;  %v11230_v3 = vmax.f32 %v11198_v39, 0.0  ;;  %v11201_v17 = vadd.f32 %v19692_v10, %v11164_v0  ;;  %v10847_v34 = vld [vmem:[#allocation3 + $0xf0] sm:$0xff] }
 0x6ae   : > { %v15479_v35 = vpop.f32.mrf.mxu0  ;;  %v11163_v38 = vld [vmem:[#allocation3 + $0x80] sm:$0xff] }
 0x6af   : > { %11135 = vst.msk [vmem:[#allocation3 + $0xa0] sm:$0xff] %vm347_vm4, %v11103_v28  ;;  %v11106_v26 = vadd.f32 %v15479_v35, %v10840_v9  ;;  %11308 = vrot.lane.b32.xlu0 %v11230_v3, %s15571_s24  ;;  %v11233_v48 = vmax.f32 %v11201_v17, 0.0  ;;  %v11200_v57 = vadd.f32 %v19692_v10, %v11163_v38 }
 0x6b0   : > { %v11034_v60 = vpop.f32.mrf.mxu0  ;;  %v11166_v59 = vld [vmem:[#allocation3 + $0x98] sm:$0xff] }
 0x6b1   : > { %11138 = vst.msk [vmem:[#allocation3 + $0xb8] sm:$0xff] %vm347_vm4, %v11106_v26  ;;  %v11105_v15 = vadd.f32 %v11034_v60, %v10839_v43  ;;  %11314 = vrot.lane.b32.xlu1 %v11233_v48, %s15571_s24  ;;  %v11232_v16 = vmax.f32 %v11200_v57, 0.0  ;;  %v11203_v63 = vadd.f32 %v19692_v10, %v11166_v59 }
 0x6b2   : > { %v15482_v24 = vpop.f32.mrf.mxu0  ;;  %v11165_v42 = vld [vmem:[#allocation3 + $0x90] sm:$0xff] }
 0x6b3   : > { %11137 = vst.msk [vmem:[#allocation3 + $0xb0] sm:$0xff] %vm347_vm4, %v11105_v15  ;;  %v11108_v33 = vadd.f32 %v15482_v24, %v10842_v37  ;;  %11312 = vrot.lane.b32.xlu0 %v11232_v16, %s15571_s24  ;;  %v11235_v51 = vmax.f32 %v11203_v63, 0.0  ;;  %v11202_v50 = vadd.f32 %v19692_v10, %v11165_v42 }
 0x6b4   : > { %v11044_v20 = vpop.f32.mrf.mxu0  ;;  %v11168_v61 = vld [vmem:[#allocation3 + $0xa8] sm:$0xff] }
 0x6b5   : > { %11140 = vst.msk [vmem:[#allocation3 + $0xc8] sm:$0xff] %vm347_vm4, %v11108_v33  ;;  %v11107_v30 = vadd.f32 %v11044_v20, %v10841_v12  ;;  %11318 = vrot.lane.b32.xlu1 %v11235_v51, %s15571_s24  ;;  %v11234_v53 = vmax.f32 %v11202_v50, 0.0  ;;  %v11205_v45 = vadd.f32 %v19692_v10, %v11168_v61 }
 0x6b6   : > { %v15485_v36 = vpop.f32.mrf.mxu0  ;;  %v11167_v52 = vld [vmem:[#allocation3 + $0xa0] sm:$0xff] }
 0x6b7   : > { %11139 = vst.msk [vmem:[#allocation3 + $0xc0] sm:$0xff] %vm347_vm4, %v11107_v30  ;;  %v11110_v8 = vadd.f32 %v15485_v36, %v10844_v21  ;;  %11316 = vrot.lane.b32.xlu0 %v11234_v53, %s15571_s24  ;;  %v11237_v18 = vmax.f32 %v11205_v45, 0.0  ;;  %v11204_v56 = vadd.f32 %v19692_v10, %v11167_v52 }
 0x6b8   : > { %v11054_v23 = vpop.f32.mrf.mxu0  ;;  %v11170_v47 = vld [vmem:[#allocation3 + $0xb8] sm:$0xff] }
 0x6b9   : > { %11142 = vst.msk [vmem:[#allocation3 + $0xd8] sm:$0xff] %vm347_vm4, %v11110_v8  ;;  %v11109_v6 = vadd.f32 %v11054_v23, %v10843_v27  ;;  %11322 = vrot.lane.b32.xlu1 %v11237_v18, %s15571_s24  ;;  %v11236_v29 = vmax.f32 %v11204_v56, 0.0  ;;  %v11207_v54 = vadd.f32 %v19692_v10, %v11170_v47 }
 0x6ba   : > { %v15488_v31 = vpop.f32.mrf.mxu0  ;;  %v11169_v44 = vld [vmem:[#allocation3 + $0xb0] sm:$0xff] }
 0x6bb   : > { %11141 = vst.msk [vmem:[#allocation3 + $0xd0] sm:$0xff] %vm347_vm4, %v11109_v6  ;;  %v11112_v7 = vadd.f32 %v15488_v31, %v10846_v58  ;;  %11320 = vrot.lane.b32.xlu0 %v11236_v29, %s15571_s24  ;;  %v11239_v25 = vmax.f32 %v11207_v54, 0.0  ;;  %v11206_v49 = vadd.f32 %v19692_v10, %v11169_v44 }
 0x6bc   : > { %v11064_v32 = vpop.f32.mrf.mxu0  ;;  %v11172_v5 = vld [vmem:[#allocation3 + $0xc8] sm:$0xff] }
 0x6bd   : > { %11144 = vst.msk [vmem:[#allocation3 + $0xe8] sm:$0xff] %vm347_vm4, %v11112_v7  ;;  %v11111_v4 = vadd.f32 %v11064_v32, %v10845_v46  ;;  %11326 = vrot.lane.b32.xlu1 %v11239_v25, %s15571_s24  ;;  %v11238_v40 = vmax.f32 %v11206_v49, 0.0  ;;  %v11209_v2 = vadd.f32 %v19692_v10, %v11172_v5 }
 0x6be   : > { %v15491_v11 = vpop.f32.mrf.mxu0  ;;  %v11171_v1 = vld [vmem:[#allocation3 + $0xc0] sm:$0xff] }
 0x6bf   : > { %11143 = vst.msk [vmem:[#allocation3 + $0xe0] sm:$0xff] %vm347_vm4, %v11111_v4  ;;  %v11114_v22 = vadd.f32 %v15491_v11, %v10848_v13  ;;  %11324 = vrot.lane.b32.xlu0 %v11238_v40, %s15571_s24  ;;  %v11241_v14 = vmax.f32 %v11209_v2, 0.0  ;;  %v11208_v41 = vadd.f32 %v19692_v10, %v11171_v1 }
 0x6c0   : > { %v11074_v55 = vpop.f32.mrf.mxu0  ;;  %v11174_v39 = vld [vmem:[#allocation3 + $0xd8] sm:$0xff] }
 0x6c1   : > { %11146 = vst.msk [vmem:[#allocation3 + $0xf8] sm:$0xff] %vm347_vm4, %v11114_v22  ;;  %v11113_v19 = vadd.f32 %v11074_v55, %v10847_v34  ;;  %11330 = vrot.lane.b32.xlu1 %v11241_v14, %s15571_s24  ;;  %v11240_v62 = vmax.f32 %v11208_v41, 0.0  ;;  %v11211_v0 = vadd.f32 %v19692_v10, %v11174_v39 }
 0x6c2   : > { %v11173_v28 = vld [vmem:[#allocation3 + $0xd0] sm:$0xff] }
 0x6c3   : > { %11145 = vst.msk [vmem:[#allocation3 + $0xf0] sm:$0xff] %vm347_vm4, %v11113_v19  ;;  %11328 = vrot.lane.b32.xlu0 %v11240_v62, %s15571_s24  ;;  %v11243_v3 = vmax.f32 %v11211_v0, 0.0  ;;  %v11210_v17 = vadd.f32 %v19692_v10, %v11173_v28 }
 0x6c4   : > { %v11176_v9 = vld [vmem:[#allocation3 + $0xe8] sm:$0xff] }
 0x6c5   : > { %11334 = vrot.lane.b32.xlu1 %v11243_v3, %s15571_s24  ;;  %v11242_v35 = vmax.f32 %v11210_v17, 0.0  ;;  %v11213_v38 = vadd.f32 %v19692_v10, %v11176_v9 }
 0x6c6   : > { %v11175_v26 = vld [vmem:[#allocation3 + $0xe0] sm:$0xff] }
 0x6c7   : > { %11332 = vrot.lane.b32.xlu0 %v11242_v35, %s15571_s24  ;;  %v11245_v48 = vmax.f32 %v11213_v38, 0.0  ;;  %v11212_v57 = vadd.f32 %v19692_v10, %v11175_v26 }
 0x6c8   : > { %v11178_v43 = vld [vmem:[#allocation3 + $0xf8] sm:$0xff] }
 0x6c9   : > { %11338 = vrot.lane.b32.xlu1 %v11245_v48, %s15571_s24  ;;  %v11244_v60 = vmax.f32 %v11212_v57, 0.0  ;;  %v11215_v59 = vadd.f32 %v19692_v10, %v11178_v43 }
 0x6ca   : > { %v11177_v15 = vld [vmem:[#allocation3 + $0xf0] sm:$0xff] }
 0x6cb   : > { %11336 = vrot.lane.b32.xlu0 %v11244_v60, %s15571_s24  ;;  %v11247_v16 = vmax.f32 %v11215_v59, 0.0  ;;  %v11214_v63 = vadd.f32 %v19692_v10, %v11177_v15 }
 0x6cd   : > { %11342 = vrot.lane.b32.xlu1 %v11247_v16, %s15571_s24  ;;  %v11246_v37 = vmax.f32 %v11214_v63, 0.0 }
 0x6cf   : > { %11340 = vrot.lane.b32.xlu0 %v11246_v37, %s15571_s24 }
 0x703   : > { %v11283_v24 = vpop.permute.xlu1 %11282 }
 0x704   : > { %11378 = vst.msk [vmem:[#allocation2 + $0x21] sm:$0xff] %vm11376_vm7, %v11283_v24  ;;  %v19856_v24 = vld [vmem:[%s20000_s4] ss:$0 sm:$0xff] }
 0x705   : > { %v11281_v42 = vpop.permute.xlu0 %11280 }
 0x706   : > { %11377 = vst.msk [vmem:[#allocation2 + $0x19] sm:$0xff] %vm11376_vm7, %v11281_v42 }
 0x707   : > { %v11287_v33 = vpop.permute.xlu1 %11286 }
 0x708   : > { %11380 = vst.msk [vmem:[#allocation2 + $0x39] sm:$0xff] %vm11376_vm7, %v11287_v33  ;;  %v11777_v33 = vld [vmem:[%s15775_s17 + $0x8] sm:$0xff] }
 0x709   : > { %v11285_v51 = vpop.permute.xlu0 %11284 }
 0x70a   : > { %11379 = vst.msk [vmem:[#allocation2 + $0x31] sm:$0xff] %vm11376_vm7, %v11285_v51 }
 0x70b   : > { %v11291_v50 = vpop.permute.xlu1 %11290  ;;  %v11410_v20 = vld [vmem:[#allocation2 + $0x21] sm:$0xff] }
 0x70c   : > { %11382 = vst.msk [vmem:[#allocation2 + $0x51] sm:$0xff] %vm11376_vm7, %v11291_v50 }
 0x70d   : > { %v11289_v10 = vpop.permute.xlu0 %11288  ;;  %v11409_v12 = vld [vmem:[#allocation2 + $0x19] sm:$0xff] }
 0x70e   : > { %11381 = vst.msk [vmem:[#allocation2 + $0x49] sm:$0xff] %vm11376_vm7, %v11289_v10  ;;  %15500 = vmatprep.mubr.msk.f32.mxu1 %vm225_vm1, %v11409_v12  ;;  %v11776_v10 = vld [vmem:[%s15775_s17] sm:$0xff] }
 0x70f   : > { %15501 = vmatmul.mubr.msk.f32.vlgmr.msra.gmra.mxu1 %vm225_vm1, %v11410_v20  ;;  %v11295_v61 = vpop.permute.xlu1 %11294  ;;  %v11412_v45 = vld [vmem:[#allocation2 + $0x39] sm:$0xff] }
 0x710   : > { %11384 = vst.msk [vmem:[#allocation2 + $0x69] sm:$0xff] %vm11376_vm7, %v11295_v61 }
 0x711   : > { %v11293_v30 = vpop.permute.xlu0 %11292  ;;  %v11411_v53 = vld [vmem:[#allocation2 + $0x31] sm:$0xff] }
 0x712   : > { %11383 = vst.msk [vmem:[#allocation2 + $0x61] sm:$0xff] %vm11376_vm7, %v11293_v30  ;;  %15503 = vmatprep.mubr.msk.f32.mxu1 %vm225_vm1, %v11411_v53  ;;  %v11779_v30 = vld [vmem:[%s15775_s17 + $0x18] sm:$0xff] }
 0x713   : > { %15504 = vmatmul.mubr.msk.f32.gmra.mxu1 %vm225_vm1, %v11412_v45  ;;  %v11299_v21 = vpop.permute.xlu1 %11298  ;;  %v11414_v8 = vld [vmem:[#allocation2 + $0x51] sm:$0xff] }
 0x714   : > { %11386 = vst.msk [vmem:[#allocation2 + $0x81] sm:$0xff] %vm11376_vm7, %v11299_v21 }
 0x715   : > { %v11297_v36 = vpop.permute.xlu0 %11296  ;;  %v11413_v52 = vld [vmem:[#allocation2 + $0x49] sm:$0xff] }
 0x716   : > { %11385 = vst.msk [vmem:[#allocation2 + $0x79] sm:$0xff] %vm11376_vm7, %v11297_v36  ;;  %15506 = vmatprep.mubr.msk.f32.mxu1 %vm225_vm1, %v11413_v52  ;;  %v11778_v36 = vld [vmem:[%s15775_s17 + $0x10] sm:$0xff] }
 0x717   : > { %15507 = vmatmul.mubr.msk.f32.gmra.mxu1 %vm225_vm1, %v11414_v8  ;;  %v11303_v18 = vpop.permute.xlu1 %11302  ;;  %v11416_v23 = vld [vmem:[#allocation2 + $0x69] sm:$0xff] }
 0x718   : > { %11388 = vst.msk [vmem:[#allocation2 + $0x99] sm:$0xff] %vm11376_vm7, %v11303_v18 }
 0x719   : > { %v11301_v56 = vpop.permute.xlu0 %11300  ;;  %v11415_v27 = vld [vmem:[#allocation2 + $0x61] sm:$0xff] }
 0x71a   : > { %11387 = vst.msk [vmem:[#allocation2 + $0x91] sm:$0xff] %vm11376_vm7, %v11301_v56  ;;  %15509 = vmatprep.mubr.msk.f32.mxu1 %vm225_vm1, %v11415_v27  ;;  %v11781_v56 = vld [vmem:[%s15775_s17 + $0x28] sm:$0xff] }
 0x71b   : > { %15510 = vmatmul.mubr.msk.f32.gmra.mxu1 %vm225_vm1, %v11416_v23  ;;  %v11307_v47 = vpop.permute.xlu1 %11306  ;;  %v11418_v54 = vld [vmem:[#allocation2 + $0x81] sm:$0xff] }
 0x71c   : > { %11390 = vst.msk [vmem:[#allocation2 + $0xb1] sm:$0xff] %vm11376_vm7, %v11307_v47 }
 0x71d   : > { %v11305_v6 = vpop.permute.xlu0 %11304  ;;  %v11417_v29 = vld [vmem:[#allocation2 + $0x79] sm:$0xff] }
 0x71e   : > { %11389 = vst.msk [vmem:[#allocation2 + $0xa9] sm:$0xff] %vm11376_vm7, %v11305_v6  ;;  %15512 = vmatprep.mubr.msk.f32.mxu1 %vm225_vm1, %v11417_v29  ;;  %v11780_v6 = vld [vmem:[%s15775_s17 + $0x20] sm:$0xff] }
 0x71f   : > { %15513 = vmatmul.mubr.msk.f32.gmra.mxu1 %vm225_vm1, %v11418_v54  ;;  %v11311_v58 = vpop.permute.xlu1 %11310  ;;  %v11420_v7 = vld [vmem:[#allocation2 + $0x99] sm:$0xff] }
 0x720   : > { %11392 = vst.msk [vmem:[#allocation2 + $0xc9] sm:$0xff] %vm11376_vm7, %v11311_v58 }
 0x721   : > { %v11309_v31 = vpop.permute.xlu0 %11308  ;;  %v11419_v44 = vld [vmem:[#allocation2 + $0x91] sm:$0xff] }
 0x722   : > { %11391 = vst.msk [vmem:[#allocation2 + $0xc1] sm:$0xff] %vm11376_vm7, %v11309_v31  ;;  %15515 = vmatprep.mubr.msk.f32.mxu1 %vm225_vm1, %v11419_v44  ;;  %v11783_v31 = vld [vmem:[%s15775_s17 + $0x38] sm:$0xff] }
 0x723   : > { %15516 = vmatmul.mubr.msk.f32.gmra.mxu1 %vm225_vm1, %v11420_v7  ;;  %v11315_v25 = vpop.permute.xlu1 %11314  ;;  %v11422_v32 = vld [vmem:[#allocation2 + $0xb1] sm:$0xff] }
 0x724   : > { %11394 = vst.msk [vmem:[#allocation2 + $0xe1] sm:$0xff] %vm11376_vm7, %v11315_v25 }
 0x725   : > { %v11313_v49 = vpop.permute.xlu0 %11312  ;;  %v11421_v46 = vld [vmem:[#allocation2 + $0xa9] sm:$0xff] }
 0x726   : > { %11393 = vst.msk [vmem:[#allocation2 + $0xd9] sm:$0xff] %vm11376_vm7, %v11313_v49  ;;  %15518 = vmatprep.mubr.msk.f32.mxu1 %vm225_vm1, %v11421_v46  ;;  %v11782_v49 = vld [vmem:[%s15775_s17 + $0x30] sm:$0xff] }
 0x727   : > { %15519 = vmatmul.mubr.msk.f32.gmra.mxu1 %vm225_vm1, %v11422_v32  ;;  %v11319_v5 = vpop.permute.xlu1 %11318  ;;  %v11424_v2 = vld [vmem:[#allocation2 + $0xc9] sm:$0xff] }
 0x728   : > { %11396 = vst.msk [vmem:[#allocation2 + $0xf9] sm:$0xff] %vm11376_vm7, %v11319_v5 }
 0x729   : > { %v11317_v4 = vpop.permute.xlu0 %11316  ;;  %v11423_v40 = vld [vmem:[#allocation2 + $0xc1] sm:$0xff] }
 0x72a   : > { %11395 = vst.msk [vmem:[#allocation2 + $0xf1] sm:$0xff] %vm11376_vm7, %v11317_v4  ;;  %15521 = vmatprep.mubr.msk.f32.mxu1 %vm225_vm1, %v11423_v40  ;;  %v11785_v4 = vld [vmem:[%s15775_s17 + $0x48] sm:$0xff] }
 0x72b   : > { %15522 = vmatmul.mubr.msk.f32.gmra.mxu1 %vm225_vm1, %v11424_v2  ;;  %v11323_v13 = vpop.permute.xlu1 %11322  ;;  %v11426_v22 = vld [vmem:[#allocation2 + $0xe1] sm:$0xff] }
 0x72c   : > { %11398 = vst.msk [vmem:[#allocation2 + $0x111] sm:$0xff] %vm11376_vm7, %v11323_v13 }
 0x72d   : > { %v11321_v11 = vpop.permute.xlu0 %11320  ;;  %v11425_v1 = vld [vmem:[#allocation2 + $0xd9] sm:$0xff] }
 0x72e   : > { %11397 = vst.msk [vmem:[#allocation2 + $0x109] sm:$0xff] %vm11376_vm7, %v11321_v11  ;;  %15524 = vmatprep.mubr.msk.f32.mxu1 %vm225_vm1, %v11425_v1  ;;  %v11784_v11 = vld [vmem:[%s15775_s17 + $0x40] sm:$0xff] }
 0x72f   : > { %15525 = vmatmul.mubr.msk.f32.gmra.mxu1 %vm225_vm1, %v11426_v22  ;;  %v11327_v14 = vpop.permute.xlu1 %11326  ;;  %v11428_v55 = vld [vmem:[#allocation2 + $0xf9] sm:$0xff] }
 0x730   : > { %11400 = vst.msk [vmem:[#allocation2 + $0x129] sm:$0xff] %vm11376_vm7, %v11327_v14 }
 0x731   : > { %v11325_v41 = vpop.permute.xlu0 %11324  ;;  %v11427_v34 = vld [vmem:[#allocation2 + $0xf1] sm:$0xff] }
 0x732   : > { %11399 = vst.msk [vmem:[#allocation2 + $0x121] sm:$0xff] %vm11376_vm7, %v11325_v41  ;;  %15527 = vmatprep.mubr.msk.f32.mxu1 %vm225_vm1, %v11427_v34  ;;  %v11787_v41 = vld [vmem:[%s15775_s17 + $0x58] sm:$0xff] }
 0x733   : > { %15528 = vmatmul.mubr.msk.f32.gmra.mxu1 %vm225_vm1, %v11428_v55  ;;  %v11331_v39 = vpop.permute.xlu1 %11330  ;;  %v11430_v0 = vld [vmem:[#allocation2 + $0x111] sm:$0xff] }
 0x734   : > { %11402 = vst.msk [vmem:[#allocation2 + $0x141] sm:$0xff] %vm11376_vm7, %v11331_v39 }
 0x735   : > { %v11329_v19 = vpop.permute.xlu0 %11328  ;;  %v11429_v62 = vld [vmem:[#allocation2 + $0x109] sm:$0xff] }
 0x736   : > { %11401 = vst.msk [vmem:[#allocation2 + $0x139] sm:$0xff] %vm11376_vm7, %v11329_v19  ;;  %15530 = vmatprep.mubr.msk.f32.mxu1 %vm225_vm1, %v11429_v62  ;;  %v11786_v19 = vld [vmem:[%s15775_s17 + $0x50] sm:$0xff] }
 0x737   : > { %15531 = vmatmul.mubr.msk.f32.gmra.mxu1 %vm225_vm1, %v11430_v0  ;;  %v11335_v28 = vpop.permute.xlu1 %11334  ;;  %v11432_v9 = vld [vmem:[#allocation2 + $0x129] sm:$0xff] }
 0x738   : > { %11404 = vst.msk [vmem:[#allocation2 + $0x159] sm:$0xff] %vm11376_vm7, %v11335_v28 }
 0x739   : > { %v11333_v3 = vpop.permute.xlu0 %11332  ;;  %v11431_v17 = vld [vmem:[#allocation2 + $0x121] sm:$0xff] }
 0x73a   : > { %11403 = vst.msk [vmem:[#allocation2 + $0x151] sm:$0xff] %vm11376_vm7, %v11333_v3  ;;  %15533 = vmatprep.mubr.msk.f32.mxu1 %vm225_vm1, %v11431_v17  ;;  %v11789_v3 = vld [vmem:[%s15775_s17 + $0x68] sm:$0xff] }
 0x73b   : > { %15534 = vmatmul.mubr.msk.f32.gmra.mxu1 %vm225_vm1, %v11432_v9  ;;  %v11339_v35 = vpop.permute.xlu1 %11338  ;;  %v11434_v48 = vld [vmem:[#allocation2 + $0x141] sm:$0xff] }
 0x73c   : > { %11406 = vst.msk [vmem:[#allocation2 + $0x171] sm:$0xff] %vm11376_vm7, %v11339_v35 }
 0x73d   : > { %v11337_v38 = vpop.permute.xlu0 %11336  ;;  %v11433_v26 = vld [vmem:[#allocation2 + $0x139] sm:$0xff] }
 0x73e   : > { %11405 = vst.msk [vmem:[#allocation2 + $0x169] sm:$0xff] %vm11376_vm7, %v11337_v38  ;;  %15536 = vmatprep.mubr.msk.f32.mxu1 %vm225_vm1, %v11433_v26  ;;  %v11788_v38 = vld [vmem:[%s15775_s17 + $0x60] sm:$0xff] }
 0x73f   : > { %15537 = vmatmul.mubr.msk.f32.gmra.mxu1 %vm225_vm1, %v11434_v48  ;;  %v11343_v57 = vpop.permute.xlu1 %11342  ;;  %v11436_v59 = vld [vmem:[#allocation2 + $0x159] sm:$0xff] }
 0x740   : > { %11408 = vst.msk [vmem:[#allocation2 + $0x189] sm:$0xff] %vm11376_vm7, %v11343_v57 }
 0x741   : > { %v11341_v43 = vpop.permute.xlu0 %11340  ;;  %v11435_v60 = vld [vmem:[#allocation2 + $0x151] sm:$0xff] }
 0x742   : > { %11407 = vst.msk [vmem:[#allocation2 + $0x181] sm:$0xff] %vm11376_vm7, %v11341_v43  ;;  %15539 = vmatprep.mubr.msk.f32.mxu1 %vm225_vm1, %v11435_v60  ;;  %v11791_v43 = vld [vmem:[%s15775_s17 + $0x78] sm:$0xff] }
 0x743   : > { %15540 = vmatmul.mubr.msk.f32.gmra.mxu1 %vm225_vm1, %v11436_v59  ;;  %v11438_v16 = vld [vmem:[#allocation2 + $0x171] sm:$0xff] }
 0x745   : > { %v11437_v15 = vld [vmem:[#allocation2 + $0x169] sm:$0xff] }
 0x746   : > { %15542 = vmatprep.mubr.msk.f32.mxu1 %vm225_vm1, %v11437_v15 }
 0x747   : > { %15543 = vmatmul.mubr.msk.f32.gmra.mxu1 %vm225_vm1, %v11438_v16  ;;  %v11440_v37 = vld [vmem:[#allocation2 + $0x189] sm:$0xff] }
 0x748   : > { %v11790_v16 = vld [vmem:[%s15775_s17 + $0x70] sm:$0xff] }
 0x749   : > { %v11439_v63 = vld [vmem:[#allocation2 + $0x181] sm:$0xff] }
 0x74a   : > { %15545 = vmatprep.mubr.msk.f32.mxu1 %vm225_vm1, %v11439_v63 }
 0x74b   : > { %15546 = vmatmul.mubr.msk.f32.gmra.mxu1 %vm225_vm1, %v11440_v37 }
 0x7cf   : > { %v15502_v42 = vpop.f32.mrf.mxu1 }
 0x7d0   : > { %v11623_v51 = vadd.f32 %v15502_v42, %v19856_v24 }
 0x7d1   : > { %v11617_v50 = vpop.f32.mrf.mxu1 }
 0x7d2   : > { %v11809_v12 = vadd.f32 %v11777_v33, %v11623_v51  ;;  %v11618_v20 = vadd.f32 %v19856_v24, %v11617_v50  ;;  %v11793_v33 = vld [vmem:[%s15775_s17 + $0x88] sm:$0xff] }
 0x7d3   : > { %v15505_v61 = vpop.f32.mrf.mxu1 }
 0x7d4   : > { %11841 = vst.msk [vmem:[%s19865_s29 + $0x8] sm:$0xff] %vm314_vm3, %v11809_v12  ;;  %v11808_v53 = vadd.f32 %v11776_v10, %v11618_v20  ;;  %v11633_v45 = vadd.f32 %v15505_v61, %v19856_v24  ;;  %v11792_v12 = vld [vmem:[%s15775_s17 + $0x80] sm:$0xff] }
 0x7d5   : > { %v11627_v21 = vpop.f32.mrf.mxu1 }
 0x7d6   : > { %11840 = vst.msk [vmem:[%s19865_s29] sm:$0xff] %vm314_vm3, %v11808_v53  ;;  %v11811_v52 = vadd.f32 %v11779_v30, %v11633_v45  ;;  %v11628_v8 = vadd.f32 %v19856_v24, %v11627_v21  ;;  %v11795_v53 = vld [vmem:[%s15775_s17 + $0x98] sm:$0xff] }
 0x7d7   : > { %v15508_v18 = vpop.f32.mrf.mxu1 }
 0x7d8   : > { %11843 = vst.msk [vmem:[%s19865_s29 + $0x18] sm:$0xff] %vm314_vm3, %v11811_v52  ;;  %v11810_v27 = vadd.f32 %v11778_v36, %v11628_v8  ;;  %v11643_v23 = vadd.f32 %v15508_v18, %v19856_v24  ;;  %v11794_v52 = vld [vmem:[%s15775_s17 + $0x90] sm:$0xff] }
 0x7d9   : > { %v11637_v47 = vpop.f32.mrf.mxu1 }
 0x7da   : > { %11842 = vst.msk [vmem:[%s19865_s29 + $0x10] sm:$0xff] %vm314_vm3, %v11810_v27  ;;  %v11813_v29 = vadd.f32 %v11781_v56, %v11643_v23  ;;  %v11638_v54 = vadd.f32 %v19856_v24, %v11637_v47  ;;  %v11797_v27 = vld [vmem:[%s15775_s17 + $0xa8] sm:$0xff] }
 0x7db   : > { %v15511_v58 = vpop.f32.mrf.mxu1 }
 0x7dc   : > { %11845 = vst.msk [vmem:[%s19865_s29 + $0x28] sm:$0xff] %vm314_vm3, %v11813_v29  ;;  %v11812_v44 = vadd.f32 %v11780_v6, %v11638_v54  ;;  %v11653_v7 = vadd.f32 %v15511_v58, %v19856_v24  ;;  %v11796_v29 = vld [vmem:[%s15775_s17 + $0xa0] sm:$0xff] }
 0x7dd   : > { %v11647_v25 = vpop.f32.mrf.mxu1 }
 0x7de   : > { %11844 = vst.msk [vmem:[%s19865_s29 + $0x20] sm:$0xff] %vm314_vm3, %v11812_v44  ;;  %v11815_v46 = vadd.f32 %v11783_v31, %v11653_v7  ;;  %v11648_v32 = vadd.f32 %v19856_v24, %v11647_v25  ;;  %v11799_v44 = vld [vmem:[%s15775_s17 + $0xb8] sm:$0xff] }
 0x7df   : > { %v15514_v5 = vpop.f32.mrf.mxu1 }
 0x7e0   : > { %11847 = vst.msk [vmem:[%s19865_s29 + $0x38] sm:$0xff] %vm314_vm3, %v11815_v46  ;;  %v11814_v40 = vadd.f32 %v11782_v49, %v11648_v32  ;;  %v11663_v2 = vadd.f32 %v15514_v5, %v19856_v24  ;;  %v11798_v46 = vld [vmem:[%s15775_s17 + $0xb0] sm:$0xff] }
 0x7e1   : > { %v11657_v13 = vpop.f32.mrf.mxu1 }
 0x7e2   : > { %11846 = vst.msk [vmem:[%s19865_s29 + $0x30] sm:$0xff] %vm314_vm3, %v11814_v40  ;;  %v11817_v1 = vadd.f32 %v11785_v4, %v11663_v2  ;;  %v11658_v22 = vadd.f32 %v19856_v24, %v11657_v13  ;;  %v11801_v40 = vld [vmem:[%s15775_s17 + $0xc8] sm:$0xff] }
 0x7e3   : > { %v15517_v14 = vpop.f32.mrf.mxu1 }
 0x7e4   : > { %11849 = vst.msk [vmem:[%s19865_s29 + $0x48] sm:$0xff] %vm314_vm3, %v11817_v1  ;;  %v11816_v34 = vadd.f32 %v11784_v11, %v11658_v22  ;;  %v11673_v55 = vadd.f32 %v15517_v14, %v19856_v24  ;;  %v11800_v1 = vld [vmem:[%s15775_s17 + $0xc0] sm:$0xff] }
 0x7e5   : > { %v11667_v39 = vpop.f32.mrf.mxu1 }
 0x7e6   : > { %11848 = vst.msk [vmem:[%s19865_s29 + $0x40] sm:$0xff] %vm314_vm3, %v11816_v34  ;;  %v11819_v62 = vadd.f32 %v11787_v41, %v11673_v55  ;;  %v11668_v0 = vadd.f32 %v19856_v24, %v11667_v39  ;;  %v11803_v34 = vld [vmem:[%s15775_s17 + $0xd8] sm:$0xff] }
 0x7e7   : > { %v15520_v28 = vpop.f32.mrf.mxu1 }
 0x7e8   : > { %11851 = vst.msk [vmem:[%s19865_s29 + $0x58] sm:$0xff] %vm314_vm3, %v11819_v62  ;;  %v11818_v17 = vadd.f32 %v11786_v19, %v11668_v0  ;;  %v11683_v9 = vadd.f32 %v15520_v28, %v19856_v24  ;;  %v11802_v62 = vld [vmem:[%s15775_s17 + $0xd0] sm:$0xff] }
 0x7e9   : > { %v11677_v35 = vpop.f32.mrf.mxu1 }
 0x7ea   : > { %11850 = vst.msk [vmem:[%s19865_s29 + $0x50] sm:$0xff] %vm314_vm3, %v11818_v17  ;;  %v11821_v26 = vadd.f32 %v11789_v3, %v11683_v9  ;;  %v11678_v48 = vadd.f32 %v19856_v24, %v11677_v35  ;;  %v11805_v17 = vld [vmem:[%s15775_s17 + $0xe8] sm:$0xff] }
 0x7eb   : > { %v15523_v57 = vpop.f32.mrf.mxu1 }
 0x7ec   : > { %11853 = vst.msk [vmem:[%s19865_s29 + $0x68] sm:$0xff] %vm314_vm3, %v11821_v26  ;;  %v11820_v60 = vadd.f32 %v11788_v38, %v11678_v48  ;;  %v11693_v59 = vadd.f32 %v15523_v57, %v19856_v24  ;;  %v11804_v26 = vld [vmem:[%s15775_s17 + $0xe0] sm:$0xff] }
 0x7ed   : > { %v11687_v15 = vpop.f32.mrf.mxu1 }
 0x7ee   : > { %11852 = vst.msk [vmem:[%s19865_s29 + $0x60] sm:$0xff] %vm314_vm3, %v11820_v60  ;;  %v11823_v63 = vadd.f32 %v11791_v43, %v11693_v59  ;;  %v11688_v37 = vadd.f32 %v19856_v24, %v11687_v15  ;;  %v11807_v60 = vld [vmem:[%s15775_s17 + $0xf8] sm:$0xff] }
 0x7ef   : > { %v15526_v42 = vpop.f32.mrf.mxu1 }
 0x7f0   : > { %11855 = vst.msk [vmem:[%s19865_s29 + $0x78] sm:$0xff] %vm314_vm3, %v11823_v63  ;;  %v11822_v51 = vadd.f32 %v11790_v16, %v11688_v37  ;;  %v11703_v50 = vadd.f32 %v15526_v42, %v19856_v24  ;;  %v11806_v63 = vld [vmem:[%s15775_s17 + $0xf0] sm:$0xff] }
 0x7f1   : > { %v11697_v10 = vpop.f32.mrf.mxu1 }
 0x7f2   : > { %11854 = vst.msk [vmem:[%s19865_s29 + $0x70] sm:$0xff] %vm314_vm3, %v11822_v51  ;;  %v11825_v20 = vadd.f32 %v11793_v33, %v11703_v50  ;;  %v11698_v61 = vadd.f32 %v19856_v24, %v11697_v10 }
 0x7f3   : > { %v15529_v30 = vpop.f32.mrf.mxu1 }
 0x7f4   : > { %11857 = vst.msk [vmem:[%s19865_s29 + $0x88] sm:$0xff] %vm314_vm3, %v11825_v20  ;;  %v11824_v45 = vadd.f32 %v11792_v12, %v11698_v61  ;;  %v11713_v21 = vadd.f32 %v15529_v30, %v19856_v24 }
 0x7f5   : > { %v11707_v36 = vpop.f32.mrf.mxu1 }
 0x7f6   : > { %11856 = vst.msk [vmem:[%s19865_s29 + $0x80] sm:$0xff] %vm314_vm3, %v11824_v45  ;;  %v11827_v8 = vadd.f32 %v11795_v53, %v11713_v21  ;;  %v11708_v18 = vadd.f32 %v19856_v24, %v11707_v36 }
 0x7f7   : > { %v15532_v56 = vpop.f32.mrf.mxu1 }
 0x7f8   : > { %11859 = vst.msk [vmem:[%s19865_s29 + $0x98] sm:$0xff] %vm314_vm3, %v11827_v8  ;;  %v11826_v23 = vadd.f32 %v11794_v52, %v11708_v18  ;;  %v11723_v47 = vadd.f32 %v15532_v56, %v19856_v24 }
 0x7f9   : > { %v11717_v6 = vpop.f32.mrf.mxu1 }
 0x7fa   : > { %11858 = vst.msk [vmem:[%s19865_s29 + $0x90] sm:$0xff] %vm314_vm3, %v11826_v23  ;;  %v11829_v54 = vadd.f32 %v11797_v27, %v11723_v47  ;;  %v11718_v58 = vadd.f32 %v19856_v24, %v11717_v6 }
 0x7fb   : > { %v15535_v31 = vpop.f32.mrf.mxu1 }
 0x7fc   : > { %11861 = vst.msk [vmem:[%s19865_s29 + $0xa8] sm:$0xff] %vm314_vm3, %v11829_v54  ;;  %v11828_v7 = vadd.f32 %v11796_v29, %v11718_v58  ;;  %v11733_v25 = vadd.f32 %v15535_v31, %v19856_v24 }
 0x7fd   : > { %v11727_v49 = vpop.f32.mrf.mxu1 }
 0x7fe   : > { %11860 = vst.msk [vmem:[%s19865_s29 + $0xa0] sm:$0xff] %vm314_vm3, %v11828_v7  ;;  %v11831_v32 = vadd.f32 %v11799_v44, %v11733_v25  ;;  %v11728_v5 = vadd.f32 %v19856_v24, %v11727_v49 }
 0x7ff   : > { %v15538_v4 = vpop.f32.mrf.mxu1 }
 0x800   : > { %11863 = vst.msk [vmem:[%s19865_s29 + $0xb8] sm:$0xff] %vm314_vm3, %v11831_v32  ;;  %v11830_v2 = vadd.f32 %v11798_v46, %v11728_v5  ;;  %v11743_v13 = vadd.f32 %v15538_v4, %v19856_v24 }
 0x801   : > { %v11737_v11 = vpop.f32.mrf.mxu1 }
 0x802   : > { %11862 = vst.msk [vmem:[%s19865_s29 + $0xb0] sm:$0xff] %vm314_vm3, %v11830_v2  ;;  %v11833_v22 = vadd.f32 %v11801_v40, %v11743_v13  ;;  %v11738_v14 = vadd.f32 %v19856_v24, %v11737_v11 }
 0x803   : > { %v15541_v41 = vpop.f32.mrf.mxu1 }
 0x804   : > { %11865 = vst.msk [vmem:[%s19865_s29 + $0xc8] sm:$0xff] %vm314_vm3, %v11833_v22  ;;  %v11832_v55 = vadd.f32 %v11800_v1, %v11738_v14  ;;  %v11753_v39 = vadd.f32 %v15541_v41, %v19856_v24 }
 0x805   : > { %v11747_v19 = vpop.f32.mrf.mxu1 }
 0x806   : > { %11864 = vst.msk [vmem:[%s19865_s29 + $0xc0] sm:$0xff] %vm314_vm3, %v11832_v55  ;;  %v11835_v0 = vadd.f32 %v11803_v34, %v11753_v39  ;;  %v11748_v28 = vadd.f32 %v19856_v24, %v11747_v19 }
 0x807   : > { %v15544_v3 = vpop.f32.mrf.mxu1 }
 0x808   : > { %11867 = vst.msk [vmem:[%s19865_s29 + $0xd8] sm:$0xff] %vm314_vm3, %v11835_v0  ;;  %v11834_v9 = vadd.f32 %v11802_v62, %v11748_v28  ;;  %v11763_v35 = vadd.f32 %v15544_v3, %v19856_v24 }
 0x809   : > { %v11757_v38 = vpop.f32.mrf.mxu1 }
 0x80a   : > { %11866 = vst.msk [vmem:[%s19865_s29 + $0xd0] sm:$0xff] %vm314_vm3, %v11834_v9  ;;  %v11837_v48 = vadd.f32 %v11805_v17, %v11763_v35  ;;  %v11758_v57 = vadd.f32 %v19856_v24, %v11757_v38 }
 0x80b   : > { %v15547_v43 = vpop.f32.mrf.mxu1 }
 0x80c   : > { %11869 = vst.msk [vmem:[%s19865_s29 + $0xe8] sm:$0xff] %vm314_vm3, %v11837_v48  ;;  %v11836_v59 = vadd.f32 %v11804_v26, %v11758_v57  ;;  %v11773_v15 = vadd.f32 %v15547_v43, %v19856_v24 }
 0x80d   : > { %v11767_v16 = vpop.f32.mrf.mxu1 }
 0x80e   : > { %11868 = vst.msk [vmem:[%s19865_s29 + $0xe0] sm:$0xff] %vm314_vm3, %v11836_v59  ;;  %v11839_v37 = vadd.f32 %v11807_v60, %v11773_v15  ;;  %v11768_v42 = vadd.f32 %v19856_v24, %v11767_v16 }
 0x810   : > { %11871 = vst.msk [vmem:[%s19865_s29 + $0xf8] sm:$0xff] %vm314_vm3, %v11839_v37  ;;  %v11838_v33 = vadd.f32 %v11806_v63, %v11768_v42 }
 0x812   : > { %11870 = vst.msk [vmem:[%s19865_s29 + $0xf0] sm:$0xff] %vm314_vm3, %v11838_v33 }
 0x813 PF: > { %s15_s18 = sadd.s32 1, %s15566_s18  }
 0x814   : > { %p12_p4 = scmp.ge.s32.totalorder %s15_s18, 4  }
 0x816   :  { %14 = sbr.rel (!%p12_p4) target bundleno = 1 (0x1), region = 97 }

</bundles_post_ra>
